<compile_context>
chip_gen: v7x
topology: tpu7x:2x2x1
jax: 0.10.0
libtpu: 0.0.40
codegen_flags: <defaults>
</compile_context>

<pallas_src>
import functools
import numpy as np
import jax
import jax.numpy as jnp
from jax.experimental import pallas as pl
from jax.experimental.pallas import tpu as pltpu


def _round_up(x, m):
    return ((x + m - 1) // m) * m


# --------------------------- tiled bf16 matmul ------------------------------

def _matmul_kernel(a_ref, b_ref, bias_ref, o_ref, acc_ref):
    @pl.when(pl.program_id(2) == 0)
    def _():
        acc_ref[...] = jnp.zeros_like(acc_ref)

    acc_ref[...] += jnp.dot(a_ref[...], b_ref[...],
                            preferred_element_type=jnp.float32)

    @pl.when(pl.program_id(2) == pl.num_programs(2) - 1)
    def _():
        o_ref[...] = (acc_ref[...] + bias_ref[...]).astype(o_ref.dtype)


def pallas_matmul(a, b, bias=None):
    """(M, K) @ (K, N) [+ bias] -> (M, N).  bf16 MXU operands, f32 accumulate."""
    M, K = a.shape
    K2, N = b.shape
    assert K == K2
    # Full dim when small (no padding / full-dim blocks), else fixed tiles.
    tm = M if M <= 256 else 256
    tk = K if K <= 512 else 512
    tn = N if N <= 256 else 256
    Mp, Kp, Np = _round_up(M, tm), _round_up(K, tk), _round_up(N, tn)

    a_p = a if (Mp, Kp) == (M, K) else jnp.pad(a, ((0, Mp - M), (0, Kp - K)))
    b_p = b if (Kp, Np) == (K, N) else jnp.pad(b, ((0, Kp - K), (0, Np - N)))
    if bias is None:
        bias_p = jnp.zeros((1, Np), jnp.float32)
    else:
        bias_p = bias.reshape(1, N).astype(jnp.float32)
        if Np != N:
            bias_p = jnp.pad(bias_p, ((0, 0), (0, Np - N)))

    out = pl.pallas_call(
        _matmul_kernel,
        out_shape=jax.ShapeDtypeStruct((Mp, Np), jnp.float32),
        grid=(Mp // tm, Np // tn, Kp // tk),
        in_specs=[pl.BlockSpec((tm, tk), lambda i, j, k: (i, k)),
                  pl.BlockSpec((tk, tn), lambda i, j, k: (k, j)),
                  pl.BlockSpec((1, tn), lambda i, j, k: (0, j))],
        out_specs=pl.BlockSpec((tm, tn), lambda i, j, k: (i, j)),
        scratch_shapes=[pltpu.VMEM((tm, tn), jnp.float32)],
        compiler_params=pltpu.CompilerParams(
            dimension_semantics=("parallel", "parallel", "arbitrary")),
    )(a_p.astype(jnp.bfloat16), b_p.astype(jnp.bfloat16), bias_p)
    if (Mp, Np) != (M, N):
        out = out[:M, :N]
    return out


# ------------------------------- LayerNorm ----------------------------------

def _layernorm_kernel(x_ref, g_ref, b_ref, o_ref):
    x = x_ref[...]
    mu = jnp.mean(x, axis=-1, keepdims=True)
    xc = x - mu
    var = jnp.mean(xc * xc, axis=-1, keepdims=True)
    o_ref[...] = xc * jax.lax.rsqrt(var + 1e-5) * g_ref[...] + b_ref[...]


def pallas_layernorm(x, gamma, beta):
    """LayerNorm over the last dim of a (T, C) token matrix (eps=1e-5)."""
    T, C = x.shape
    tr = min(256, _round_up(T, 8))
    Tp = _round_up(T, tr)
    xp = x if Tp == T else jnp.pad(x, ((0, Tp - T), (0, 0)))
    out = pl.pallas_call(
        _layernorm_kernel,
        out_shape=jax.ShapeDtypeStruct((Tp, C), jnp.float32),
        grid=(Tp // tr,),
        in_specs=[pl.BlockSpec((tr, C), lambda i: (i, 0)),
                  pl.BlockSpec((1, C), lambda i: (0, 0)),
                  pl.BlockSpec((1, C), lambda i: (0, 0))],
        out_specs=pl.BlockSpec((tr, C), lambda i: (i, 0)),
        compiler_params=pltpu.CompilerParams(
            dimension_semantics=("parallel",)),
    )(xp.astype(jnp.float32), gamma.reshape(1, C).astype(jnp.float32),
      beta.reshape(1, C).astype(jnp.float32))
    return out if Tp == T else out[:T]


# ----------------------- window (NLSA) attention kernel ---------------------

def _window_attn_kernel(qkv_ref, bias_ref, mask_ref, o_ref, *, heads, scale):
    qkv = qkv_ref[0]                       # (nW, N, 3C) f32, all windows of img
    nW, N, C3 = qkv.shape
    C = C3 // 3
    d = C // heads
    mask = mask_ref[...]                   # (nW, N, N)
    outs = []
    for h in range(heads):                 # static unroll over heads
        qh = qkv[:, :, h * d:(h + 1) * d] * scale
        kh = qkv[:, :, C + h * d:C + (h + 1) * d]
        vh = qkv[:, :, 2 * C + h * d:2 * C + (h + 1) * d]
        s = jnp.einsum('wnd,wmd->wnm',
                       qh.astype(jnp.bfloat16), kh.astype(jnp.bfloat16),
                       preferred_element_type=jnp.float32)
        s = s + bias_ref[h][None, :, :] + mask     # bias+mask added in-kernel
        s = s - jnp.max(s, axis=-1, keepdims=True)
        p = jnp.exp(s)
        p = p * pl.reciprocal(jnp.sum(p, axis=-1, keepdims=True), approx=True)
        outs.append(jnp.einsum('wnm,wmd->wnd',
                               p.astype(jnp.bfloat16), vh.astype(jnp.bfloat16),
                               preferred_element_type=jnp.float32))
    o_ref[0] = jnp.concatenate(outs, axis=-1)      # lane-dense (nW, N, C)


def pallas_window_attention(qkv, bias, mask, heads, scale):
    B, nW, N, C3 = qkv.shape
    C = C3 // 3
    return pl.pallas_call(
        functools.partial(_window_attn_kernel, heads=heads, scale=scale),
        out_shape=jax.ShapeDtypeStruct((B, nW, N, C), jnp.float32),
        grid=(B,),
        in_specs=[pl.BlockSpec((1, nW, N, C3), lambda b: (b, 0, 0, 0)),
                  pl.BlockSpec((heads, N, N), lambda b: (0, 0, 0)),
                  pl.BlockSpec((nW, N, N), lambda b: (0, 0, 0))],
        out_specs=pl.BlockSpec((1, nW, N, C), lambda b: (b, 0, 0, 0)),
        compiler_params=pltpu.CompilerParams(
            dimension_semantics=("parallel",)),
    )(qkv, bias, mask)


# ---------------------- global spectral attention kernel --------------------

def _gsa_kernel(qkv_ref, t_ref, o_ref, *, heads):
    qkv = qkv_ref[0]                       # (S, 3C) f32, channels-last tokens
    S, C3 = qkv.shape
    C = C3 // 3
    c = C // heads
    t = t_ref[...]                         # (heads, 1, 1)
    outs = []
    for h in range(heads):                 # static unroll over heads
        qt = qkv[:, h * c:(h + 1) * c].T                   # (c, S)
        kt = qkv[:, C + h * c:C + (h + 1) * c].T
        vt = qkv[:, 2 * C + h * c:2 * C + (h + 1) * c].T
        qn = qt * jnp.minimum(
            jax.lax.rsqrt(jnp.sum(qt * qt, axis=-1, keepdims=True)), 1e12)
        kn = kt * jnp.minimum(
            jax.lax.rsqrt(jnp.sum(kt * kt, axis=-1, keepdims=True)), 1e12)
        s = jax.lax.dot_general(qn.astype(jnp.bfloat16), kn.astype(jnp.bfloat16),
                                (((1,), (1,)), ((), ())),
                                preferred_element_type=jnp.float32)   # (c, c)
        s = s * t[h]
        s = s - jnp.max(s, axis=-1, keepdims=True)
        p = jnp.exp(s)
        p = p * pl.reciprocal(jnp.sum(p, axis=-1, keepdims=True), approx=True)
        oh = jnp.dot(p.astype(jnp.bfloat16), vt.astype(jnp.bfloat16),
                     preferred_element_type=jnp.float32)              # (c, S)
        outs.append(oh.T)                                             # (S, c)
    o_ref[0] = jnp.concatenate(outs, axis=-1)      # lane-dense (S, C)


def pallas_gsa_attention(qkv, temperature, heads):
    B, S, C3 = qkv.shape
    C = C3 // 3
    return pl.pallas_call(
        functools.partial(_gsa_kernel, heads=heads),
        out_shape=jax.ShapeDtypeStruct((B, S, C), jnp.float32),
        grid=(B,),
        in_specs=[pl.BlockSpec((1, S, C3), lambda b: (b, 0, 0)),
                  pl.BlockSpec((heads, 1, 1), lambda b: (0, 0, 0))],
        out_specs=pl.BlockSpec((1, S, C), lambda b: (b, 0, 0)),
        compiler_params=pltpu.CompilerParams(
            dimension_semantics=("parallel",)),
    )(qkv, temperature)


# ------------------------------ glue layers ---------------------------------

def linear(x, w_io, b=None):
    """x:(T,in) @ w:(in,out) [+ b] on the Pallas MXU matmul (weights pre-packed)."""
    return pallas_matmul(x, w_io, b)


def conv3x3_nhwc(x, w_packed, b=None):
    """3x3 / stride 1 / pad 1 conv, NHWC, via im2col + tiled Pallas matmul."""
    # TODO(synk): a fully fused halo-strip 3x3 conv kernel would avoid the 9x
    # im2col activation expansion; the streamed K-reduction matmul is used here.
    B, H, W, C = x.shape
    xp = jnp.pad(x, ((0, 0), (1, 1), (1, 1), (0, 0)))
    cols = [xp[:, dy:dy + H, dx:dx + W, :] for dy in range(3) for dx in range(3)]
    patches = jnp.concatenate(cols, axis=-1).reshape(B * H * W, 9 * C)
    y = pallas_matmul(patches, w_packed, b)
    return y.reshape(B, H, W, -1)


def window_partition(x, ws):
    B, H, W, C = x.shape
    x = x.reshape(B, H // ws, ws, W // ws, ws, C)
    return x.transpose(0, 1, 3, 2, 4, 5).reshape(-1, ws, ws, C)


def window_reverse(windows, ws, H, W):
    B = windows.shape[0] // (H * W // ws // ws)
    x = windows.reshape(B, H // ws, W // ws, ws, ws, -1)
    return x.transpose(0, 1, 3, 2, 4, 5).reshape(B, H, W, -1)


def relative_position_index(ws):
    coords = np.stack(np.meshgrid(np.arange(ws), np.arange(ws), indexing='ij'))
    flat = coords.reshape(2, -1)
    rel = flat[:, :, None] - flat[:, None, :]
    rel = rel.transpose(1, 2, 0).astype(np.int64).copy()
    rel[:, :, 0] += ws - 1
    rel[:, :, 1] += ws - 1
    rel[:, :, 0] *= 2 * ws - 1
    return rel.sum(-1)                                   # (N, N)


def calculate_mask(H, W, ws, shift):
    nW = (H // ws) * (W // ws)
    if shift == 0:
        # the reference mask reduces to all-zeros when shift == 0
        return np.zeros((nW, ws * ws, ws * ws), np.float32)
    img_mask = np.zeros((1, H, W, 1), np.float32)
    slices = (slice(0, -ws), slice(-ws, -shift), slice(-shift, None))
    cnt = 0
    for h in slices:
        for w in slices:
            img_mask[:, h, w, :] = cnt
            cnt += 1
    mw = window_partition(img_mask, ws).reshape(-1, ws * ws)
    am = mw[:, None, :] - mw[:, :, None]
    return np.where(am != 0, -100.0, 0.0).astype(np.float32)


# --------------------------- model forward pieces ---------------------------

def nlsa_forward(xw, p, heads, rel_index, mask):
    # xw: (B, nW, N, C) window tokens, channels-last
    B, nW, N, C = xw.shape
    d = C // heads
    scale = d ** -0.5
    qkv = linear(xw.reshape(B * nW * N, C), p['qkv_w'], p['qkv_b'])
    qkv = qkv.reshape(B, nW, N, 3 * C)
    bias = p['rel_tab'][rel_index.reshape(-1)].reshape(N, N, heads)
    bias = bias.transpose(2, 0, 1)                       # (heads, N, N)
    out = pallas_window_attention(qkv, bias, mask, heads, scale)
    out = linear(out.reshape(B * nW * N, C), p['proj_w'], p['proj_b'])
    return out.reshape(B, nW, N, C)


def gsa_forward(x, p, heads):
    # x: (B, H, W, C) channels-last; 1x1 convs == token matmuls
    B, H, W, C = x.shape
    qkv = linear(x.reshape(B * H * W, C), p['qkv_w'])            # bias=False
    out = pallas_gsa_attention(qkv.reshape(B, H * W, 3 * C),
                               p['temperature'], heads)
    out = linear(out.reshape(B * H * W, C), p['proj_w'])         # bias=False
    return out.reshape(B, H, W, C)


def ssma_forward(x, p, heads, ws, shift, rel_index, mask):
    B, H, W, C = x.shape
    tokens = x.reshape(B * H * W, C)
    shortcut = tokens
    xn = pallas_layernorm(tokens, p['norm1_g'], p['norm1_b']).reshape(B, H, W, C)
    if shift > 0:
        xn = jnp.roll(xn, (-shift, -shift), axis=(1, 2))
    nW = (H // ws) * (W // ws)
    xw = window_partition(xn, ws).reshape(B, nW, ws * ws, C)
    aw = nlsa_forward(xw, p['nlsa'], heads, rel_index, mask)
    aw = aw.reshape(B * nW, ws, ws, C)
    xr = window_reverse(aw, ws, H, W)
    if shift > 0:
        xr = jnp.roll(xr, (shift, shift), axis=(1, 2))
    xs = gsa_forward(xr, p['gsa'], heads)
    t = shortcut + xs.reshape(B * H * W, C)
    xn2 = pallas_layernorm(t, p['norm2_g'], p['norm2_b'])
    hdn = linear(xn2, p['mlp']['fc1_w'], p['mlp']['fc1_b'])
    hdn = jax.nn.gelu(hdn, approximate=False)            # exact erf GELU
    hdn = linear(hdn, p['mlp']['fc2_w'], p['mlp']['fc2_b'])
    t = t + hdn
    return t.reshape(B, H, W, C)


def sst_forward(params, inp, cfg):
    x = inp.transpose(0, 2, 3, 1)                        # NCHW -> NHWC once
    f1 = conv3x3_nhwc(x, params['conv_first_w'], params['conv_first_b'])
    x = f1
    for li, layer_p in enumerate(params['layers']):
        heads = cfg['num_heads'][li]
        out = x
        for bi, blk in enumerate(layer_p['blocks']):
            out = ssma_forward(out, blk, heads, cfg['window_size'],
                               cfg['shifts'][li][bi], cfg['rel_index'],
                               cfg['masks'][li][bi])
        out = conv3x3_nhwc(out, layer_p['conv_w'], layer_p['conv_b'])
        x = out + x
    x = conv3x3_nhwc(x + f1, params['output_w'], None)   # bias=False
    x = conv3x3_nhwc(x, params['delasta_w'], params['delasta_b'])
    return x.transpose(0, 3, 1, 2) + inp                 # back to NCHW


# ------------------------------ parameter init ------------------------------

def init_sst_params(key, inp_channels, dim, window_size, depths, num_heads,
                    mlp_ratio):
    """Parameters in PyTorch layout (Linear: (out,in); Conv3x3: (Cout,Cin,3,3))."""
    kit = iter(jax.random.split(key, 4096))

    def w(shape, std=0.02):
        return (std * jax.random.normal(next(kit), shape)).astype(jnp.float32)

    zeros = lambda s: jnp.zeros(s, jnp.float32)
    ones = lambda s: jnp.ones(s, jnp.float32)
    hidden = int(dim * mlp_ratio)

    params = {
        'conv_first_w': w((dim, inp_channels, 3, 3)),
        'conv_first_b': zeros((dim,)),
        'layers': [],
        'output_w': w((dim, dim, 3, 3)),                 # bias=False
        'delasta_w': w((inp_channels, dim, 3, 3)),
        'delasta_b': zeros((inp_channels,)),
    }
    for li, depth in enumerate(depths):
        heads = num_heads[li]
        blocks = []
        for _ in range(depth):
            blocks.append({
                'norm1_g': ones((dim,)), 'norm1_b': zeros((dim,)),
                'norm2_g': ones((dim,)), 'norm2_b': zeros((dim,)),
                'nlsa': {
                    'qkv_w': w((3 * dim, dim)), 'qkv_b': zeros((3 * dim,)),
                    'proj_w': w((dim, dim)), 'proj_b': zeros((dim,)),
                    'rel_tab': w(((2 * window_size - 1) ** 2, heads)),
                },
                'gsa': {
                    'qkv_w': w((3 * dim, dim)),          # 1x1 conv, bias=False
                    'proj_w': w((dim, dim)),             # 1x1 conv, bias=False
                    'temperature': ones((heads, 1, 1)),
                },
                'mlp': {
                    'fc1_w': w((hidden, dim)), 'fc1_b': zeros((hidden,)),
                    'fc2_w': w((dim, hidden)), 'fc2_b': zeros((dim,)),
                },
            })
        params['layers'].append({
            'blocks': blocks,
            'conv_w': w((dim, dim, 3, 3)),
            'conv_b': zeros((dim,)),
        })
    return params


def pack_params(p):
    """One-time weight pack: Linear (out,in)->(in,out); 3x3 conv -> (9*Cin,Cout)."""
    lin = lambda w: jnp.transpose(w, (1, 0))
    conv3 = lambda w: jnp.transpose(w, (2, 3, 1, 0)).reshape(9 * w.shape[1],
                                                             w.shape[0])
    out = {
        'conv_first_w': conv3(p['conv_first_w']),
        'conv_first_b': p['conv_first_b'],
        'output_w': conv3(p['output_w']),
        'delasta_w': conv3(p['delasta_w']),
        'delasta_b': p['delasta_b'],
        'layers': [],
    }
    for layer in p['layers']:
        blocks = []
        for b in layer['blocks']:
            blocks.append({
                'norm1_g': b['norm1_g'], 'norm1_b': b['norm1_b'],
                'norm2_g': b['norm2_g'], 'norm2_b': b['norm2_b'],
                'nlsa': {
                    'qkv_w': lin(b['nlsa']['qkv_w']), 'qkv_b': b['nlsa']['qkv_b'],
                    'proj_w': lin(b['nlsa']['proj_w']),
                    'proj_b': b['nlsa']['proj_b'],
                    'rel_tab': b['nlsa']['rel_tab'],
                },
                'gsa': {
                    'qkv_w': lin(b['gsa']['qkv_w']),
                    'proj_w': lin(b['gsa']['proj_w']),
                    'temperature': b['gsa']['temperature'],
                },
                'mlp': {
                    'fc1_w': lin(b['mlp']['fc1_w']), 'fc1_b': b['mlp']['fc1_b'],
                    'fc2_w': lin(b['mlp']['fc2_w']), 'fc2_b': b['mlp']['fc2_b'],
                },
            })
        out['layers'].append({'blocks': blocks,
                              'conv_w': conv3(layer['conv_w']),
                              'conv_b': layer['conv_b']})
    return out


# ----------------------------------- main -----------------------------------

if __name__ == "__main__":
    # small config consistent with the module structure
    inp_channels, dim, ws = 4, 16, 4
    depths, num_heads, mlp_ratio = [2, 2], [2, 2], 2
    B, H, W = 2, 16, 16

    key = jax.random.PRNGKey(0)
    pkey, xkey = jax.random.split(key)
    params = pack_params(init_sst_params(pkey, inp_channels, dim, ws, depths,
                                         num_heads, mlp_ratio))

    rel_index = relative_position_index(ws)
    shifts, masks = [], []
    for li, depth in enumerate(depths):
        s_row, m_row = [], []
        for bi in range(depth):
            s = 0 if bi % 2 == 0 else ws // 2
            s_row.append(s)
            m_row.append(jnp.asarray(calculate_mask(H, W, ws, s)))
        shifts.append(s_row)
        masks.append(m_row)
    cfg = dict(window_size=ws, num_heads=num_heads, shifts=shifts,
               masks=masks, rel_index=rel_index)

    x = jax.random.normal(xkey, (B, inp_channels, H, W), jnp.float32)

    fwd = jax.jit(lambda p, xx: sst_forward(p, xx, cfg))
    y = jax.block_until_ready(fwd(params, x))

    assert y.shape == (B, inp_channels, H, W)
    assert bool(jnp.all(jnp.isfinite(y)))
    print("KERNEL_OK")
</pallas_src>

<mosaic_0001>
module attributes {stable_mosaic.version = 11 : i64} {
  func.func @_matmul_kernel(%arg0: i32, %arg1: i32, %arg2: i32, %arg3: memref<256x36xbf16, #tpu.memory_space<vmem>>, %arg4: memref<36x16xbf16, #tpu.memory_space<vmem>>, %arg5: memref<1x16xf32, #tpu.memory_space<vmem>>, %arg6: memref<256x16xf32, #tpu.memory_space<vmem>>, %arg7: memref<256x16xf32, #tpu.memory_space<vmem>>) attributes {dimension_semantics = [#tpu.dimension_semantics<parallel>, #tpu.dimension_semantics<parallel>, #tpu.dimension_semantics<arbitrary>], iteration_bounds = array<i64: 2, 1, 1>, scalar_prefetch = 0 : i64, scratch_operands = 1 : i64, tpu.core_type = #tpu.core_type<tc>, window_params = [{transform_indices = @transform_0, window_bounds = array<i64: 256, 36>}, {transform_indices = @transform_1, window_bounds = array<i64: 36, 16>}, {transform_indices = @transform_2, window_bounds = array<i64: 1, 16>}, {transform_indices = @transform_3, window_bounds = array<i64: 256, 16>}]} {
    %c0_i32 = arith.constant 0 : i32
    %0 = arith.cmpi eq, %arg2, %c0_i32 : i32
    %1 = arith.extui %0 : i1 to i32
    %c0_i32_0 = arith.constant 0 : i32
    %2 = arith.cmpi ne, %1, %c0_i32_0 : i32
    scf.if %2 {
      %cst_10 = arith.constant 0.000000e+00 : f32
      %12 = vector.broadcast %cst_10 : f32 to vector<256x16xf32>
      %c0_11 = arith.constant 0 : index
      %c0_12 = arith.constant 0 : index
      %13 = vector.load %arg7[%c0_11, %c0_12] : memref<256x16xf32, #tpu.memory_space<vmem>>, vector<256x16xf32>
      tpu.vector_store %arg7[%c0_11, %c0_12], %12 {strides = array<i32>} : memref<256x16xf32, #tpu.memory_space<vmem>>, vector<256x16xf32>,
    } else {
    }
    %c0 = arith.constant 0 : index
    %c0_1 = arith.constant 0 : index
    %3 = vector.load %arg7[%c0, %c0_1] : memref<256x16xf32, #tpu.memory_space<vmem>>, vector<256x16xf32>
    %c0_2 = arith.constant 0 : index
    %c0_3 = arith.constant 0 : index
    %4 = vector.load %arg3[%c0_2, %c0_3] : memref<256x36xbf16, #tpu.memory_space<vmem>>, vector<256x36xbf16>
    %c0_4 = arith.constant 0 : index
    %c0_5 = arith.constant 0 : index
    %5 = vector.load %arg4[%c0_4, %c0_5] : memref<36x16xbf16, #tpu.memory_space<vmem>>, vector<36x16xbf16>
    %cst = arith.constant dense<0.000000e+00> : vector<256x16xf32>
    %6 = tpu.matmul %4, %5, %cst {dimension_numbers = #tpu.dot_dimension_numbers<[1], [0], [0], [1], [0, 0, 1, 1], [], []>} : vector<256x36xbf16>, vector<36x16xbf16>, vector<256x16xf32> -> vector<256x16xf32>
    %7 = arith.addf %3, %6 : vector<256x16xf32>
    %c0_6 = arith.constant 0 : index
    %c0_7 = arith.constant 0 : index
    %8 = vector.load %arg7[%c0_6, %c0_7] : memref<256x16xf32, #tpu.memory_space<vmem>>, vector<256x16xf32>
    tpu.vector_store %arg7[%c0_6, %c0_7], %7 {strides = array<i32>} : memref<256x16xf32, #tpu.memory_space<vmem>>, vector<256x16xf32>,
    %c0_i32_8 = arith.constant 0 : i32
    %9 = arith.cmpi eq, %arg2, %c0_i32_8 : i32
    %10 = arith.extui %9 : i1 to i32
    %c0_i32_9 = arith.constant 0 : i32
    %11 = arith.cmpi ne, %10, %c0_i32_9 : i32
    scf.if %11 {
      %c0_10 = arith.constant 0 : index
      %c0_11 = arith.constant 0 : index
      %12 = vector.load %arg7[%c0_10, %c0_11] : memref<256x16xf32, #tpu.memory_space<vmem>>, vector<256x16xf32>
      %c0_12 = arith.constant 0 : index
      %c0_13 = arith.constant 0 : index
      %13 = vector.load %arg5[%c0_12, %c0_13] : memref<1x16xf32, #tpu.memory_space<vmem>>, vector<1x16xf32>
      %14 = vector.broadcast %13 : vector<1x16xf32> to vector<256x16xf32>
      %15 = arith.addf %12, %14 : vector<256x16xf32>
      %c0_14 = arith.constant 0 : index
      %c0_15 = arith.constant 0 : index
      %16 = vector.load %arg6[%c0_14, %c0_15] : memref<256x16xf32, #tpu.memory_space<vmem>>, vector<256x16xf32>
      tpu.vector_store %arg6[%c0_14, %c0_15], %15 {strides = array<i32>} : memref<256x16xf32, #tpu.memory_space<vmem>>, vector<256x16xf32>,
    } else {
    }
    return
  }
  func.func @transform_0(%arg0: i32, %arg1: i32, %arg2: i32) -> (i32, i32) {
    %c0_i32 = arith.constant 0 : i32
    return %arg0, %arg2 : i32, i32
  }
  func.func @transform_1(%arg0: i32, %arg1: i32, %arg2: i32) -> (i32, i32) {
    %c0_i32 = arith.constant 0 : i32
    return %arg2, %arg1 : i32, i32
  }
  func.func @transform_2(%arg0: i32, %arg1: i32, %arg2: i32) -> (i32, i32) {
    %c0_i32 = arith.constant 0 : i32
    %c0_i32_0 = arith.constant 0 : i32
    return %c0_i32, %arg1 : i32, i32
  }
  func.func @transform_3(%arg0: i32, %arg1: i32, %arg2: i32) -> (i32, i32) {
    %c0_i32 = arith.constant 0 : i32
    return %arg0, %arg1 : i32, i32
  }
}

module attributes {stable_mosaic.version = 11 : i64} {
  func.func @_layernorm_kernel(%arg0: i32, %arg1: memref<256x16xf32, #tpu.memory_space<vmem>>, %arg2: memref<1x16xf32, #tpu.memory_space<vmem>>, %arg3: memref<1x16xf32, #tpu.memory_space<vmem>>, %arg4: memref<256x16xf32, #tpu.memory_space<vmem>>) attributes {dimension_semantics = [#tpu.dimension_semantics<parallel>], iteration_bounds = array<i64: 2>, scalar_prefetch = 0 : i64, scratch_operands = 0 : i64, tpu.core_type = #tpu.core_type<tc>, window_params = [{transform_indices = @transform_0, window_bounds = array<i64: 256, 16>}, {pipeline_mode = #tpu.pipeline_mode<synchronous>, transform_indices = @transform_1, window_bounds = array<i64: 1, 16>}, {pipeline_mode = #tpu.pipeline_mode<synchronous>, transform_indices = @transform_2, window_bounds = array<i64: 1, 16>}, {transform_indices = @transform_3, window_bounds = array<i64: 256, 16>}]} {
    %c0 = arith.constant 0 : index
    %c0_0 = arith.constant 0 : index
    %0 = vector.load %arg1[%c0, %c0_0] : memref<256x16xf32, #tpu.memory_space<vmem>>, vector<256x16xf32>
    %cst = arith.constant dense<0.000000e+00> : vector<256xf32>
    %1 = vector.multi_reduction <add>, %0, %cst [1] : vector<256x16xf32> to vector<256xf32>
    %2 = vector.shape_cast %1 : vector<256xf32> to vector<256x1xf32>
    %cst_1 = arith.constant 1.600000e+01 : f32
    %3 = vector.broadcast %cst_1 : f32 to vector<256x1xf32>
    %4 = arith.divf %2, %3 : vector<256x1xf32>
    %5 = vector.broadcast %4 : vector<256x1xf32> to vector<256x16xf32>
    %6 = arith.subf %0, %5 : vector<256x16xf32>
    %7 = arith.mulf %6, %6 : vector<256x16xf32>
    %cst_2 = arith.constant dense<0.000000e+00> : vector<256xf32>
    %8 = vector.multi_reduction <add>, %7, %cst_2 [1] : vector<256x16xf32> to vector<256xf32>
    %9 = vector.shape_cast %8 : vector<256xf32> to vector<256x1xf32>
    %cst_3 = arith.constant 1.600000e+01 : f32
    %10 = vector.broadcast %cst_3 : f32 to vector<256x1xf32>
    %11 = arith.divf %9, %10 : vector<256x1xf32>
    %cst_4 = arith.constant 9.99999974E-6 : f32
    %12 = vector.broadcast %cst_4 : f32 to vector<256x1xf32>
    %13 = arith.addf %11, %12 : vector<256x1xf32>
    %14 = math.rsqrt %13 : vector<256x1xf32>
    %15 = vector.broadcast %14 : vector<256x1xf32> to vector<256x16xf32>
    %16 = arith.mulf %6, %15 : vector<256x16xf32>
    %c0_5 = arith.constant 0 : index
    %c0_6 = arith.constant 0 : index
    %17 = vector.load %arg2[%c0_5, %c0_6] : memref<1x16xf32, #tpu.memory_space<vmem>>, vector<1x16xf32>
    %18 = vector.broadcast %17 : vector<1x16xf32> to vector<256x16xf32>
    %19 = arith.mulf %16, %18 : vector<256x16xf32>
    %c0_7 = arith.constant 0 : index
    %c0_8 = arith.constant 0 : index
    %20 = vector.load %arg3[%c0_7, %c0_8] : memref<1x16xf32, #tpu.memory_space<vmem>>, vector<1x16xf32>
    %21 = vector.broadcast %20 : vector<1x16xf32> to vector<256x16xf32>
    %22 = arith.addf %19, %21 : vector<256x16xf32>
    %c0_9 = arith.constant 0 : index
    %c0_10 = arith.constant 0 : index
    %23 = vector.load %arg4[%c0_9, %c0_10] : memref<256x16xf32, #tpu.memory_space<vmem>>, vector<256x16xf32>
    tpu.vector_store %arg4[%c0_9, %c0_10], %22 {strides = array<i32>} : memref<256x16xf32, #tpu.memory_space<vmem>>, vector<256x16xf32>,
    return
  }
  func.func @transform_0(%arg0: i32) -> (i32, i32) {
    %c0_i32 = arith.constant 0 : i32
    %c0_i32_0 = arith.constant 0 : i32
    return %arg0, %c0_i32 : i32, i32
  }
  func.func @transform_1(%arg0: i32) -> (i32, i32) {
    %c0_i32 = arith.constant 0 : i32
    %c0_i32_0 = arith.constant 0 : i32
    %c0_i32_1 = arith.constant 0 : i32
    return %c0_i32, %c0_i32_0 : i32, i32
  }
  func.func @transform_2(%arg0: i32) -> (i32, i32) {
    %c0_i32 = arith.constant 0 : i32
    %c0_i32_0 = arith.constant 0 : i32
    %c0_i32_1 = arith.constant 0 : i32
    return %c0_i32, %c0_i32_0 : i32, i32
  }
  func.func @transform_3(%arg0: i32) -> (i32, i32) {
    %c0_i32 = arith.constant 0 : i32
    %c0_i32_0 = arith.constant 0 : i32
    return %arg0, %c0_i32 : i32, i32
  }
}

module attributes {stable_mosaic.version = 11 : i64} {
  func.func @_matmul_kernel(%arg0: i32, %arg1: i32, %arg2: i32, %arg3: memref<256x16xbf16, #tpu.memory_space<vmem>>, %arg4: memref<16x48xbf16, #tpu.memory_space<vmem>>, %arg5: memref<1x48xf32, #tpu.memory_space<vmem>>, %arg6: memref<256x48xf32, #tpu.memory_space<vmem>>, %arg7: memref<256x48xf32, #tpu.memory_space<vmem>>) attributes {dimension_semantics = [#tpu.dimension_semantics<parallel>, #tpu.dimension_semantics<parallel>, #tpu.dimension_semantics<arbitrary>], iteration_bounds = array<i64: 2, 1, 1>, scalar_prefetch = 0 : i64, scratch_operands = 1 : i64, tpu.core_type = #tpu.core_type<tc>, window_params = [{transform_indices = @transform_0, window_bounds = array<i64: 256, 16>}, {transform_indices = @transform_1, window_bounds = array<i64: 16, 48>}, {transform_indices = @transform_2, window_bounds = array<i64: 1, 48>}, {transform_indices = @transform_3, window_bounds = array<i64: 256, 48>}]} {
    %c0_i32 = arith.constant 0 : i32
    %0 = arith.cmpi eq, %arg2, %c0_i32 : i32
    %1 = arith.extui %0 : i1 to i32
    %c0_i32_0 = arith.constant 0 : i32
    %2 = arith.cmpi ne, %1, %c0_i32_0 : i32
    scf.if %2 {
      %cst_10 = arith.constant 0.000000e+00 : f32
      %12 = vector.broadcast %cst_10 : f32 to vector<256x48xf32>
      %c0_11 = arith.constant 0 : index
      %c0_12 = arith.constant 0 : index
      %13 = vector.load %arg7[%c0_11, %c0_12] : memref<256x48xf32, #tpu.memory_space<vmem>>, vector<256x48xf32>
      tpu.vector_store %arg7[%c0_11, %c0_12], %12 {strides = array<i32>} : memref<256x48xf32, #tpu.memory_space<vmem>>, vector<256x48xf32>,
    } else {
    }
    %c0 = arith.constant 0 : index
    %c0_1 = arith.constant 0 : index
    %3 = vector.load %arg7[%c0, %c0_1] : memref<256x48xf32, #tpu.memory_space<vmem>>, vector<256x48xf32>
    %c0_2 = arith.constant 0 : index
    %c0_3 = arith.constant 0 : index
    %4 = vector.load %arg3[%c0_2, %c0_3] : memref<256x16xbf16, #tpu.memory_space<vmem>>, vector<256x16xbf16>
    %c0_4 = arith.constant 0 : index
    %c0_5 = arith.constant 0 : index
    %5 = vector.load %arg4[%c0_4, %c0_5] : memref<16x48xbf16, #tpu.memory_space<vmem>>, vector<16x48xbf16>
    %cst = arith.constant dense<0.000000e+00> : vector<256x48xf32>
    %6 = tpu.matmul %4, %5, %cst {dimension_numbers = #tpu.dot_dimension_numbers<[1], [0], [0], [1], [0, 0, 1, 1], [], []>} : vector<256x16xbf16>, vector<16x48xbf16>, vector<256x48xf32> -> vector<256x48xf32>
    %7 = arith.addf %3, %6 : vector<256x48xf32>
    %c0_6 = arith.constant 0 : index
    %c0_7 = arith.constant 0 : index
    %8 = vector.load %arg7[%c0_6, %c0_7] : memref<256x48xf32, #tpu.memory_space<vmem>>, vector<256x48xf32>
    tpu.vector_store %arg7[%c0_6, %c0_7], %7 {strides = array<i32>} : memref<256x48xf32, #tpu.memory_space<vmem>>, vector<256x48xf32>,
    %c0_i32_8 = arith.constant 0 : i32
    %9 = arith.cmpi eq, %arg2, %c0_i32_8 : i32
    %10 = arith.extui %9 : i1 to i32
    %c0_i32_9 = arith.constant 0 : i32
    %11 = arith.cmpi ne, %10, %c0_i32_9 : i32
    scf.if %11 {
      %c0_10 = arith.constant 0 : index
      %c0_11 = arith.constant 0 : index
      %12 = vector.load %arg7[%c0_10, %c0_11] : memref<256x48xf32, #tpu.memory_space<vmem>>, vector<256x48xf32>
      %c0_12 = arith.constant 0 : index
      %c0_13 = arith.constant 0 : index
      %13 = vector.load %arg5[%c0_12, %c0_13] : memref<1x48xf32, #tpu.memory_space<vmem>>, vector<1x48xf32>
      %14 = vector.broadcast %13 : vector<1x48xf32> to vector<256x48xf32>
      %15 = arith.addf %12, %14 : vector<256x48xf32>
      %c0_14 = arith.constant 0 : index
      %c0_15 = arith.constant 0 : index
      %16 = vector.load %arg6[%c0_14, %c0_15] : memref<256x48xf32, #tpu.memory_space<vmem>>, vector<256x48xf32>
      tpu.vector_store %arg6[%c0_14, %c0_15], %15 {strides = array<i32>} : memref<256x48xf32, #tpu.memory_space<vmem>>, vector<256x48xf32>,
    } else {
    }
    return
  }
  func.func @transform_0(%arg0: i32, %arg1: i32, %arg2: i32) -> (i32, i32) {
    %c0_i32 = arith.constant 0 : i32
    return %arg0, %arg2 : i32, i32
  }
  func.func @transform_1(%arg0: i32, %arg1: i32, %arg2: i32) -> (i32, i32) {
    %c0_i32 = arith.constant 0 : i32
    return %arg2, %arg1 : i32, i32
  }
  func.func @transform_2(%arg0: i32, %arg1: i32, %arg2: i32) -> (i32, i32) {
    %c0_i32 = arith.constant 0 : i32
    %c0_i32_0 = arith.constant 0 : i32
    return %c0_i32, %arg1 : i32, i32
  }
  func.func @transform_3(%arg0: i32, %arg1: i32, %arg2: i32) -> (i32, i32) {
    %c0_i32 = arith.constant 0 : i32
    return %arg0, %arg1 : i32, i32
  }
}

module attributes {stable_mosaic.version = 11 : i64} {
  func.func @_window_attn_kernel(%arg0: i32, %arg1: memref<1x16x16x48xf32, #tpu.memory_space<vmem>>, %arg2: memref<2x16x16xf32, #tpu.memory_space<vmem>>, %arg3: memref<16x16x16xf32, #tpu.memory_space<vmem>>, %arg4: memref<1x16x16x16xf32, #tpu.memory_space<vmem>>) attributes {dimension_semantics = [#tpu.dimension_semantics<parallel>], iteration_bounds = array<i64: 2>, scalar_prefetch = 0 : i64, scratch_operands = 0 : i64, tpu.core_type = #tpu.core_type<tc>, window_params = [{transform_indices = @transform_0, window_bounds = array<i64: 1, 16, 16, 48>}, {pipeline_mode = #tpu.pipeline_mode<synchronous>, transform_indices = @transform_1, window_bounds = array<i64: 2, 16, 16>}, {pipeline_mode = #tpu.pipeline_mode<synchronous>, transform_indices = @transform_2, window_bounds = array<i64: 16, 16, 16>}, {transform_indices = @transform_3, window_bounds = array<i64: 1, 16, 16, 16>}]} {
    %c0 = arith.constant 0 : index
    %c0_0 = arith.constant 0 : index
    %c0_1 = arith.constant 0 : index
    %c0_2 = arith.constant 0 : index
    %0 = vector.load %arg1[%c0, %c0_0, %c0_1, %c0_2] : memref<1x16x16x48xf32, #tpu.memory_space<vmem>>, vector<1x16x16x48xf32>
    %1 = vector.shape_cast %0 : vector<1x16x16x48xf32> to vector<16x16x48xf32>
    %c0_3 = arith.constant 0 : index
    %c0_4 = arith.constant 0 : index
    %c0_5 = arith.constant 0 : index
    %2 = vector.load %arg3[%c0_3, %c0_4, %c0_5] : memref<16x16x16xf32, #tpu.memory_space<vmem>>, vector<16x16x16xf32>
    %3 = vector.extract_strided_slice %1 {offsets = [0, 0, 0], sizes = [16, 16, 8], strides = [1, 1, 1]} : vector<16x16x48xf32> to vector<16x16x8xf32>
    %cst = arith.constant 0.353553385 : f32
    %4 = vector.broadcast %cst : f32 to vector<16x16x8xf32>
    %5 = arith.mulf %3, %4 : vector<16x16x8xf32>
    %6 = vector.extract_strided_slice %1 {offsets = [0, 0, 16], sizes = [16, 16, 8], strides = [1, 1, 1]} : vector<16x16x48xf32> to vector<16x16x8xf32>
    %7 = vector.extract_strided_slice %1 {offsets = [0, 0, 32], sizes = [16, 16, 8], strides = [1, 1, 1]} : vector<16x16x48xf32> to vector<16x16x8xf32>
    %8 = arith.truncf %5 : vector<16x16x8xf32> to vector<16x16x8xbf16>
    %9 = arith.truncf %6 : vector<16x16x8xf32> to vector<16x16x8xbf16>
    "tpu.trace_start"() <{level = 10 : i32, message = "wnd,wmd->wnm"}> : () -> ()
    %cst_6 = arith.constant dense<0.000000e+00> : vector<16x16x16xf32>
    %10 = tpu.matmul %8, %9, %cst_6 {dimension_numbers = #tpu.dot_dimension_numbers<[2], [2], [1], [1], [0, 0, 0, 1, 1, 1], [0], [0]>} : vector<16x16x8xbf16>, vector<16x16x8xbf16>, vector<16x16x16xf32> -> vector<16x16x16xf32>
    "tpu.trace_stop"() : () -> ()
    %c0_7 = arith.constant 0 : index
    %c0_8 = arith.constant 0 : index
    %c0_9 = arith.constant 0 : index
    %11 = vector.load %arg2[%c0_7, %c0_8, %c0_9] : memref<2x16x16xf32, #tpu.memory_space<vmem>>, vector<1x16x16xf32>
    %12 = vector.shape_cast %11 : vector<1x16x16xf32> to vector<16x16xf32>
    %13 = vector.shape_cast %12 : vector<16x16xf32> to vector<1x16x16xf32>
    %14 = vector.broadcast %13 : vector<1x16x16xf32> to vector<16x16x16xf32>
    %15 = arith.addf %10, %14 : vector<16x16x16xf32>
    %16 = arith.addf %15, %2 : vector<16x16x16xf32>
    %cst_10 = arith.constant dense<0xFF800000> : vector<16x16xf32>
    %17 = vector.multi_reduction <maximumf>, %16, %cst_10 [2] : vector<16x16x16xf32> to vector<16x16xf32>
    %18 = vector.shape_cast %17 : vector<16x16xf32> to vector<16x16x1xf32>
    %19 = vector.broadcast %18 : vector<16x16x1xf32> to vector<16x16x16xf32>
    %20 = arith.subf %16, %19 : vector<16x16x16xf32>
    %21 = math.exp %20 : vector<16x16x16xf32>
    %cst_11 = arith.constant dense<0.000000e+00> : vector<16x16xf32>
    %22 = vector.multi_reduction <add>, %21, %cst_11 [2] : vector<16x16x16xf32> to vector<16x16xf32>
    %23 = vector.shape_cast %22 : vector<16x16xf32> to vector<16x16x1xf32>
    %24 = tpu.reciprocal %23 {approx = true} : vector<16x16x1xf32> -> vector<16x16x1xf32>
    %25 = vector.broadcast %24 : vector<16x16x1xf32> to vector<16x16x16xf32>
    %26 = arith.mulf %21, %25 : vector<16x16x16xf32>
    %27 = arith.truncf %26 : vector<16x16x16xf32> to vector<16x16x16xbf16>
    %28 = arith.truncf %7 : vector<16x16x8xf32> to vector<16x16x8xbf16>
    "tpu.trace_start"() <{level = 10 : i32, message = "wnm,wmd->wnd"}> : () -> ()
    %cst_12 = arith.constant dense<0.000000e+00> : vector<16x16x8xf32>
    %29 = tpu.matmul %27, %28, %cst_12 {dimension_numbers = #tpu.dot_dimension_numbers<[2], [1], [1], [2], [0, 0, 0, 1, 1, 2], [0], [0]>} : vector<16x16x16xbf16>, vector<16x16x8xbf16>, vector<16x16x8xf32> -> vector<16x16x8xf32>
    "tpu.trace_stop"() : () -> ()
    %30 = vector.extract_strided_slice %1 {offsets = [0, 0, 8], sizes = [16, 16, 8], strides = [1, 1, 1]} : vector<16x16x48xf32> to vector<16x16x8xf32>
    %cst_13 = arith.constant 0.353553385 : f32
    %31 = vector.broadcast %cst_13 : f32 to vector<16x16x8xf32>
    %32 = arith.mulf %30, %31 : vector<16x16x8xf32>
    %33 = vector.extract_strided_slice %1 {offsets = [0, 0, 24], sizes = [16, 16, 8], strides = [1, 1, 1]} : vector<16x16x48xf32> to vector<16x16x8xf32>
    %34 = vector.extract_strided_slice %1 {offsets = [0, 0, 40], sizes = [16, 16, 8], strides = [1, 1, 1]} : vector<16x16x48xf32> to vector<16x16x8xf32>
    %35 = arith.truncf %32 : vector<16x16x8xf32> to vector<16x16x8xbf16>
    %36 = arith.truncf %33 : vector<16x16x8xf32> to vector<16x16x8xbf16>
    "tpu.trace_start"() <{level = 10 : i32, message = "wnd,wmd->wnm"}> : () -> ()
    %cst_14 = arith.constant dense<0.000000e+00> : vector<16x16x16xf32>
    %37 = tpu.matmul %35, %36, %cst_14 {dimension_numbers = #tpu.dot_dimension_numbers<[2], [2], [1], [1], [0, 0, 0, 1, 1, 1], [0], [0]>} : vector<16x16x8xbf16>, vector<16x16x8xbf16>, vector<16x16x16xf32> -> vector<16x16x16xf32>
    "tpu.trace_stop"() : () -> ()
    %c1 = arith.constant 1 : index
    %c0_15 = arith.constant 0 : index
    %c0_16 = arith.constant 0 : index
    %38 = vector.load %arg2[%c1, %c0_15, %c0_16] : memref<2x16x16xf32, #tpu.memory_space<vmem>>, vector<1x16x16xf32>
    %39 = vector.shape_cast %38 : vector<1x16x16xf32> to vector<16x16xf32>
    %40 = vector.shape_cast %39 : vector<16x16xf32> to vector<1x16x16xf32>
    %41 = vector.broadcast %40 : vector<1x16x16xf32> to vector<16x16x16xf32>
    %42 = arith.addf %37, %41 : vector<16x16x16xf32>
    %43 = arith.addf %42, %2 : vector<16x16x16xf32>
    %cst_17 = arith.constant dense<0xFF800000> : vector<16x16xf32>
    %44 = vector.multi_reduction <maximumf>, %43, %cst_17 [2] : vector<16x16x16xf32> to vector<16x16xf32>
    %45 = vector.shape_cast %44 : vector<16x16xf32> to vector<16x16x1xf32>
    %46 = vector.broadcast %45 : vector<16x16x1xf32> to vector<16x16x16xf32>
    %47 = arith.subf %43, %46 : vector<16x16x16xf32>
    %48 = math.exp %47 : vector<16x16x16xf32>
    %cst_18 = arith.constant dense<0.000000e+00> : vector<16x16xf32>
    %49 = vector.multi_reduction <add>, %48, %cst_18 [2] : vector<16x16x16xf32> to vector<16x16xf32>
    %50 = vector.shape_cast %49 : vector<16x16xf32> to vector<16x16x1xf32>
    %51 = tpu.reciprocal %50 {approx = true} : vector<16x16x1xf32> -> vector<16x16x1xf32>
    %52 = vector.broadcast %51 : vector<16x16x1xf32> to vector<16x16x16xf32>
    %53 = arith.mulf %48, %52 : vector<16x16x16xf32>
    %54 = arith.truncf %53 : vector<16x16x16xf32> to vector<16x16x16xbf16>
    %55 = arith.truncf %34 : vector<16x16x8xf32> to vector<16x16x8xbf16>
    "tpu.trace_start"() <{level = 10 : i32, message = "wnm,wmd->wnd"}> : () -> ()
    %cst_19 = arith.constant dense<0.000000e+00> : vector<16x16x8xf32>
    %56 = tpu.matmul %54, %55, %cst_19 {dimension_numbers = #tpu.dot_dimension_numbers<[2], [1], [1], [2], [0, 0, 0, 1, 1, 2], [0], [0]>} : vector<16x16x16xbf16>, vector<16x16x8xbf16>, vector<16x16x8xf32> -> vector<16x16x8xf32>
    "tpu.trace_stop"() : () -> ()
    %57 = tpu.concatenate %29, %56 in 2 : vector<16x16x8xf32>, vector<16x16x8xf32> -> vector<16x16x16xf32>
    %c0_20 = arith.constant 0 : index
    %c0_21 = arith.constant 0 : index
    %c0_22 = arith.constant 0 : index
    %c0_23 = arith.constant 0 : index
    %58 = vector.load %arg4[%c0_20, %c0_21, %c0_22, %c0_23] : memref<1x16x16x16xf32, #tpu.memory_space<vmem>>, vector<1x16x16x16xf32>
    %59 = vector.shape_cast %58 : vector<1x16x16x16xf32> to vector<16x16x16xf32>
    %60 = vector.shape_cast %57 : vector<16x16x16xf32> to vector<1x16x16x16xf32>
    tpu.vector_store %arg4[%c0_20, %c0_21, %c0_22, %c0_23], %60 {strides = array<i32>} : memref<1x16x16x16xf32, #tpu.memory_space<vmem>>, vector<1x16x16x16xf32>,
    return
  }
  func.func @transform_0(%arg0: i32) -> (i32, i32, i32, i32) {
    %c0_i32 = arith.constant 0 : i32
    %c0_i32_0 = arith.constant 0 : i32
    %c0_i32_1 = arith.constant 0 : i32
    %c0_i32_2 = arith.constant 0 : i32
    return %arg0, %c0_i32, %c0_i32_0, %c0_i32_1 : i32, i32, i32, i32
  }
  func.func @transform_1(%arg0: i32) -> (i32, i32, i32) {
    %c0_i32 = arith.constant 0 : i32
    %c0_i32_0 = arith.constant 0 : i32
    %c0_i32_1 = arith.constant 0 : i32
    %c0_i32_2 = arith.constant 0 : i32
    return %c0_i32, %c0_i32_0, %c0_i32_1 : i32, i32, i32
  }
  func.func @transform_2(%arg0: i32) -> (i32, i32, i32) {
    %c0_i32 = arith.constant 0 : i32
    %c0_i32_0 = arith.constant 0 : i32
    %c0_i32_1 = arith.constant 0 : i32
    %c0_i32_2 = arith.constant 0 : i32
    return %c0_i32, %c0_i32_0, %c0_i32_1 : i32, i32, i32
  }
  func.func @transform_3(%arg0: i32) -> (i32, i32, i32, i32) {
    %c0_i32 = arith.constant 0 : i32
    %c0_i32_0 = arith.constant 0 : i32
    %c0_i32_1 = arith.constant 0 : i32
    %c0_i32_2 = arith.constant 0 : i32
    return %arg0, %c0_i32, %c0_i32_0, %c0_i32_1 : i32, i32, i32, i32
  }
}

module attributes {stable_mosaic.version = 11 : i64} {
  func.func @_matmul_kernel(%arg0: i32, %arg1: i32, %arg2: i32, %arg3: memref<256x16xbf16, #tpu.memory_space<vmem>>, %arg4: memref<16x16xbf16, #tpu.memory_space<vmem>>, %arg5: memref<1x16xf32, #tpu.memory_space<vmem>>, %arg6: memref<256x16xf32, #tpu.memory_space<vmem>>, %arg7: memref<256x16xf32, #tpu.memory_space<vmem>>) attributes {dimension_semantics = [#tpu.dimension_semantics<parallel>, #tpu.dimension_semantics<parallel>, #tpu.dimension_semantics<arbitrary>], iteration_bounds = array<i64: 2, 1, 1>, scalar_prefetch = 0 : i64, scratch_operands = 1 : i64, tpu.core_type = #tpu.core_type<tc>, window_params = [{transform_indices = @transform_0, window_bounds = array<i64: 256, 16>}, {transform_indices = @transform_1, window_bounds = array<i64: 16, 16>}, {transform_indices = @transform_2, window_bounds = array<i64: 1, 16>}, {transform_indices = @transform_3, window_bounds = array<i64: 256, 16>}]} {
    %c0_i32 = arith.constant 0 : i32
    %0 = arith.cmpi eq, %arg2, %c0_i32 : i32
    %1 = arith.extui %0 : i1 to i32
    %c0_i32_0 = arith.constant 0 : i32
    %2 = arith.cmpi ne, %1, %c0_i32_0 : i32
    scf.if %2 {
      %cst_10 = arith.constant 0.000000e+00 : f32
      %12 = vector.broadcast %cst_10 : f32 to vector<256x16xf32>
      %c0_11 = arith.constant 0 : index
      %c0_12 = arith.constant 0 : index
      %13 = vector.load %arg7[%c0_11, %c0_12] : memref<256x16xf32, #tpu.memory_space<vmem>>, vector<256x16xf32>
      tpu.vector_store %arg7[%c0_11, %c0_12], %12 {strides = array<i32>} : memref<256x16xf32, #tpu.memory_space<vmem>>, vector<256x16xf32>,
    } else {
    }
    %c0 = arith.constant 0 : index
    %c0_1 = arith.constant 0 : index
    %3 = vector.load %arg7[%c0, %c0_1] : memref<256x16xf32, #tpu.memory_space<vmem>>, vector<256x16xf32>
    %c0_2 = arith.constant 0 : index
    %c0_3 = arith.constant 0 : index
    %4 = vector.load %arg3[%c0_2, %c0_3] : memref<256x16xbf16, #tpu.memory_space<vmem>>, vector<256x16xbf16>
    %c0_4 = arith.constant 0 : index
    %c0_5 = arith.constant 0 : index
    %5 = vector.load %arg4[%c0_4, %c0_5] : memref<16x16xbf16, #tpu.memory_space<vmem>>, vector<16x16xbf16>
    %cst = arith.constant dense<0.000000e+00> : vector<256x16xf32>
    %6 = tpu.matmul %4, %5, %cst {dimension_numbers = #tpu.dot_dimension_numbers<[1], [0], [0], [1], [0, 0, 1, 1], [], []>} : vector<256x16xbf16>, vector<16x16xbf16>, vector<256x16xf32> -> vector<256x16xf32>
    %7 = arith.addf %3, %6 : vector<256x16xf32>
    %c0_6 = arith.constant 0 : index
    %c0_7 = arith.constant 0 : index
    %8 = vector.load %arg7[%c0_6, %c0_7] : memref<256x16xf32, #tpu.memory_space<vmem>>, vector<256x16xf32>
    tpu.vector_store %arg7[%c0_6, %c0_7], %7 {strides = array<i32>} : memref<256x16xf32, #tpu.memory_space<vmem>>, vector<256x16xf32>,
    %c0_i32_8 = arith.constant 0 : i32
    %9 = arith.cmpi eq, %arg2, %c0_i32_8 : i32
    %10 = arith.extui %9 : i1 to i32
    %c0_i32_9 = arith.constant 0 : i32
    %11 = arith.cmpi ne, %10, %c0_i32_9 : i32
    scf.if %11 {
      %c0_10 = arith.constant 0 : index
      %c0_11 = arith.constant 0 : index
      %12 = vector.load %arg7[%c0_10, %c0_11] : memref<256x16xf32, #tpu.memory_space<vmem>>, vector<256x16xf32>
      %c0_12 = arith.constant 0 : index
      %c0_13 = arith.constant 0 : index
      %13 = vector.load %arg5[%c0_12, %c0_13] : memref<1x16xf32, #tpu.memory_space<vmem>>, vector<1x16xf32>
      %14 = vector.broadcast %13 : vector<1x16xf32> to vector<256x16xf32>
      %15 = arith.addf %12, %14 : vector<256x16xf32>
      %c0_14 = arith.constant 0 : index
      %c0_15 = arith.constant 0 : index
      %16 = vector.load %arg6[%c0_14, %c0_15] : memref<256x16xf32, #tpu.memory_space<vmem>>, vector<256x16xf32>
      tpu.vector_store %arg6[%c0_14, %c0_15], %15 {strides = array<i32>} : memref<256x16xf32, #tpu.memory_space<vmem>>, vector<256x16xf32>,
    } else {
    }
    return
  }
  func.func @transform_0(%arg0: i32, %arg1: i32, %arg2: i32) -> (i32, i32) {
    %c0_i32 = arith.constant 0 : i32
    return %arg0, %arg2 : i32, i32
  }
  func.func @transform_1(%arg0: i32, %arg1: i32, %arg2: i32) -> (i32, i32) {
    %c0_i32 = arith.constant 0 : i32
    return %arg2, %arg1 : i32, i32
  }
  func.func @transform_2(%arg0: i32, %arg1: i32, %arg2: i32) -> (i32, i32) {
    %c0_i32 = arith.constant 0 : i32
    %c0_i32_0 = arith.constant 0 : i32
    return %c0_i32, %arg1 : i32, i32
  }
  func.func @transform_3(%arg0: i32, %arg1: i32, %arg2: i32) -> (i32, i32) {
    %c0_i32 = arith.constant 0 : i32
    return %arg0, %arg1 : i32, i32
  }
}

module attributes {stable_mosaic.version = 11 : i64} {
  func.func @_gsa_kernel(%arg0: i32, %arg1: memref<1x256x48xf32, #tpu.memory_space<vmem>>, %arg2: memref<2x1x1xf32, #tpu.memory_space<vmem>>, %arg3: memref<1x256x16xf32, #tpu.memory_space<vmem>>) attributes {dimension_semantics = [#tpu.dimension_semantics<parallel>], iteration_bounds = array<i64: 2>, scalar_prefetch = 0 : i64, scratch_operands = 0 : i64, tpu.core_type = #tpu.core_type<tc>, window_params = [{transform_indices = @transform_0, window_bounds = array<i64: 1, 256, 48>}, {pipeline_mode = #tpu.pipeline_mode<synchronous>, transform_indices = @transform_1, window_bounds = array<i64: 2, 1, 1>}, {transform_indices = @transform_2, window_bounds = array<i64: 1, 256, 16>}]} {
    %c0 = arith.constant 0 : index
    %c0_0 = arith.constant 0 : index
    %c0_1 = arith.constant 0 : index
    %0 = vector.load %arg1[%c0, %c0_0, %c0_1] : memref<1x256x48xf32, #tpu.memory_space<vmem>>, vector<1x256x48xf32>
    %1 = vector.shape_cast %0 : vector<1x256x48xf32> to vector<256x48xf32>
    %c0_2 = arith.constant 0 : index
    %c0_3 = arith.constant 0 : index
    %c0_4 = arith.constant 0 : index
    %2 = vector.load %arg2[%c0_2, %c0_3, %c0_4] : memref<2x1x1xf32, #tpu.memory_space<vmem>>, vector<2x1x1xf32>
    %3 = vector.extract_strided_slice %1 {offsets = [0, 0], sizes = [256, 8], strides = [1, 1]} : vector<256x48xf32> to vector<256x8xf32>
    %4 = tpu.transpose %3, [1, 0] : vector<256x8xf32> -> vector<8x256xf32>
    %5 = vector.extract_strided_slice %1 {offsets = [0, 16], sizes = [256, 8], strides = [1, 1]} : vector<256x48xf32> to vector<256x8xf32>
    %6 = tpu.transpose %5, [1, 0] : vector<256x8xf32> -> vector<8x256xf32>
    %7 = vector.extract_strided_slice %1 {offsets = [0, 32], sizes = [256, 8], strides = [1, 1]} : vector<256x48xf32> to vector<256x8xf32>
    %8 = tpu.transpose %7, [1, 0] : vector<256x8xf32> -> vector<8x256xf32>
    %9 = arith.mulf %4, %4 : vector<8x256xf32>
    %cst = arith.constant dense<0.000000e+00> : vector<8xf32>
    %10 = vector.multi_reduction <add>, %9, %cst [1] : vector<8x256xf32> to vector<8xf32>
    %11 = vector.shape_cast %10 : vector<8xf32> to vector<8x1xf32>
    %12 = math.rsqrt %11 : vector<8x1xf32>
    %cst_5 = arith.constant 9.99999995E+11 : f32
    %13 = vector.broadcast %cst_5 : f32 to vector<8x1xf32>
    %14 = arith.minimumf %12, %13 : vector<8x1xf32>
    %15 = vector.broadcast %14 : vector<8x1xf32> to vector<8x256xf32>
    %16 = arith.mulf %4, %15 : vector<8x256xf32>
    %17 = arith.mulf %6, %6 : vector<8x256xf32>
    %cst_6 = arith.constant dense<0.000000e+00> : vector<8xf32>
    %18 = vector.multi_reduction <add>, %17, %cst_6 [1] : vector<8x256xf32> to vector<8xf32>
    %19 = vector.shape_cast %18 : vector<8xf32> to vector<8x1xf32>
    %20 = math.rsqrt %19 : vector<8x1xf32>
    %cst_7 = arith.constant 9.99999995E+11 : f32
    %21 = vector.broadcast %cst_7 : f32 to vector<8x1xf32>
    %22 = arith.minimumf %20, %21 : vector<8x1xf32>
    %23 = vector.broadcast %22 : vector<8x1xf32> to vector<8x256xf32>
    %24 = arith.mulf %6, %23 : vector<8x256xf32>
    %25 = arith.truncf %16 : vector<8x256xf32> to vector<8x256xbf16>
    %26 = arith.truncf %24 : vector<8x256xf32> to vector<8x256xbf16>
    %cst_8 = arith.constant dense<0.000000e+00> : vector<8x8xf32>
    %27 = tpu.matmul %25, %26, %cst_8 {dimension_numbers = #tpu.dot_dimension_numbers<[1], [1], [0], [0], [0, 0, 1, 0], [], []>} : vector<8x256xbf16>, vector<8x256xbf16>, vector<8x8xf32> -> vector<8x8xf32>
    %28 = vector.extract_strided_slice %2 {offsets = [0, 0, 0], sizes = [1, 1, 1], strides = [1, 1, 1]} : vector<2x1x1xf32> to vector<1x1x1xf32>
    %29 = vector.shape_cast %28 : vector<1x1x1xf32> to vector<1x1xf32>
    %30 = vector.broadcast %29 : vector<1x1xf32> to vector<8x8xf32>
    %31 = arith.mulf %27, %30 : vector<8x8xf32>
    %cst_9 = arith.constant dense<0xFF800000> : vector<8xf32>
    %32 = vector.multi_reduction <maximumf>, %31, %cst_9 [1] : vector<8x8xf32> to vector<8xf32>
    %33 = vector.shape_cast %32 : vector<8xf32> to vector<8x1xf32>
    %34 = vector.broadcast %33 : vector<8x1xf32> to vector<8x8xf32>
    %35 = arith.subf %31, %34 : vector<8x8xf32>
    %36 = math.exp %35 : vector<8x8xf32>
    %cst_10 = arith.constant dense<0.000000e+00> : vector<8xf32>
    %37 = vector.multi_reduction <add>, %36, %cst_10 [1] : vector<8x8xf32> to vector<8xf32>
    %38 = vector.shape_cast %37 : vector<8xf32> to vector<8x1xf32>
    %39 = tpu.reciprocal %38 {approx = true} : vector<8x1xf32> -> vector<8x1xf32>
    %40 = vector.broadcast %39 : vector<8x1xf32> to vector<8x8xf32>
    %41 = arith.mulf %36, %40 : vector<8x8xf32>
    %42 = arith.truncf %41 : vector<8x8xf32> to vector<8x8xbf16>
    %43 = arith.truncf %8 : vector<8x256xf32> to vector<8x256xbf16>
    %cst_11 = arith.constant dense<0.000000e+00> : vector<8x256xf32>
    %44 = tpu.matmul %42, %43, %cst_11 {dimension_numbers = #tpu.dot_dimension_numbers<[1], [0], [0], [1], [0, 0, 1, 1], [], []>} : vector<8x8xbf16>, vector<8x256xbf16>, vector<8x256xf32> -> vector<8x256xf32>
    %45 = tpu.transpose %44, [1, 0] : vector<8x256xf32> -> vector<256x8xf32>
    %46 = vector.extract_strided_slice %1 {offsets = [0, 8], sizes = [256, 8], strides = [1, 1]} : vector<256x48xf32> to vector<256x8xf32>
    %47 = tpu.transpose %46, [1, 0] : vector<256x8xf32> -> vector<8x256xf32>
    %48 = vector.extract_strided_slice %1 {offsets = [0, 24], sizes = [256, 8], strides = [1, 1]} : vector<256x48xf32> to vector<256x8xf32>
    %49 = tpu.transpose %48, [1, 0] : vector<256x8xf32> -> vector<8x256xf32>
    %50 = vector.extract_strided_slice %1 {offsets = [0, 40], sizes = [256, 8], strides = [1, 1]} : vector<256x48xf32> to vector<256x8xf32>
    %51 = tpu.transpose %50, [1, 0] : vector<256x8xf32> -> vector<8x256xf32>
    %52 = arith.mulf %47, %47 : vector<8x256xf32>
    %cst_12 = arith.constant dense<0.000000e+00> : vector<8xf32>
    %53 = vector.multi_reduction <add>, %52, %cst_12 [1] : vector<8x256xf32> to vector<8xf32>
    %54 = vector.shape_cast %53 : vector<8xf32> to vector<8x1xf32>
    %55 = math.rsqrt %54 : vector<8x1xf32>
    %cst_13 = arith.constant 9.99999995E+11 : f32
    %56 = vector.broadcast %cst_13 : f32 to vector<8x1xf32>
    %57 = arith.minimumf %55, %56 : vector<8x1xf32>
    %58 = vector.broadcast %57 : vector<8x1xf32> to vector<8x256xf32>
    %59 = arith.mulf %47, %58 : vector<8x256xf32>
    %60 = arith.mulf %49, %49 : vector<8x256xf32>
    %cst_14 = arith.constant dense<0.000000e+00> : vector<8xf32>
    %61 = vector.multi_reduction <add>, %60, %cst_14 [1] : vector<8x256xf32> to vector<8xf32>
    %62 = vector.shape_cast %61 : vector<8xf32> to vector<8x1xf32>
    %63 = math.rsqrt %62 : vector<8x1xf32>
    %cst_15 = arith.constant 9.99999995E+11 : f32
    %64 = vector.broadcast %cst_15 : f32 to vector<8x1xf32>
    %65 = arith.minimumf %63, %64 : vector<8x1xf32>
    %66 = vector.broadcast %65 : vector<8x1xf32> to vector<8x256xf32>
    %67 = arith.mulf %49, %66 : vector<8x256xf32>
    %68 = arith.truncf %59 : vector<8x256xf32> to vector<8x256xbf16>
    %69 = arith.truncf %67 : vector<8x256xf32> to vector<8x256xbf16>
    %cst_16 = arith.constant dense<0.000000e+00> : vector<8x8xf32>
    %70 = tpu.matmul %68, %69, %cst_16 {dimension_numbers = #tpu.dot_dimension_numbers<[1], [1], [0], [0], [0, 0, 1, 0], [], []>} : vector<8x256xbf16>, vector<8x256xbf16>, vector<8x8xf32> -> vector<8x8xf32>
    %71 = vector.extract_strided_slice %2 {offsets = [1, 0, 0], sizes = [1, 1, 1], strides = [1, 1, 1]} : vector<2x1x1xf32> to vector<1x1x1xf32>
    %72 = vector.shape_cast %71 : vector<1x1x1xf32> to vector<1x1xf32>
    %73 = vector.broadcast %72 : vector<1x1xf32> to vector<8x8xf32>
    %74 = arith.mulf %70, %73 : vector<8x8xf32>
    %cst_17 = arith.constant dense<0xFF800000> : vector<8xf32>
    %75 = vector.multi_reduction <maximumf>, %74, %cst_17 [1] : vector<8x8xf32> to vector<8xf32>
    %76 = vector.shape_cast %75 : vector<8xf32> to vector<8x1xf32>
    %77 = vector.broadcast %76 : vector<8x1xf32> to vector<8x8xf32>
    %78 = arith.subf %74, %77 : vector<8x8xf32>
    %79 = math.exp %78 : vector<8x8xf32>
    %cst_18 = arith.constant dense<0.000000e+00> : vector<8xf32>
    %80 = vector.multi_reduction <add>, %79, %cst_18 [1] : vector<8x8xf32> to vector<8xf32>
    %81 = vector.shape_cast %80 : vector<8xf32> to vector<8x1xf32>
    %82 = tpu.reciprocal %81 {approx = true} : vector<8x1xf32> -> vector<8x1xf32>
    %83 = vector.broadcast %82 : vector<8x1xf32> to vector<8x8xf32>
    %84 = arith.mulf %79, %83 : vector<8x8xf32>
    %85 = arith.truncf %84 : vector<8x8xf32> to vector<8x8xbf16>
    %86 = arith.truncf %51 : vector<8x256xf32> to vector<8x256xbf16>
    %cst_19 = arith.constant dense<0.000000e+00> : vector<8x256xf32>
    %87 = tpu.matmul %85, %86, %cst_19 {dimension_numbers = #tpu.dot_dimension_numbers<[1], [0], [0], [1], [0, 0, 1, 1], [], []>} : vector<8x8xbf16>, vector<8x256xbf16>, vector<8x256xf32> -> vector<8x256xf32>
    %88 = tpu.transpose %87, [1, 0] : vector<8x256xf32> -> vector<256x8xf32>
    %89 = tpu.concatenate %45, %88 in 1 : vector<256x8xf32>, vector<256x8xf32> -> vector<256x16xf32>
    %c0_20 = arith.constant 0 : index
    %c0_21 = arith.constant 0 : index
    %c0_22 = arith.constant 0 : index
    %90 = vector.load %arg3[%c0_20, %c0_21, %c0_22] : memref<1x256x16xf32, #tpu.memory_space<vmem>>, vector<1x256x16xf32>
    %91 = vector.shape_cast %90 : vector<1x256x16xf32> to vector<256x16xf32>
    %92 = vector.shape_cast %89 : vector<256x16xf32> to vector<1x256x16xf32>
    tpu.vector_store %arg3[%c0_20, %c0_21, %c0_22], %92 {strides = array<i32>} : memref<1x256x16xf32, #tpu.memory_space<vmem>>, vector<1x256x16xf32>,
    return
  }
  func.func @transform_0(%arg0: i32) -> (i32, i32, i32) {
    %c0_i32 = arith.constant 0 : i32
    %c0_i32_0 = arith.constant 0 : i32
    %c0_i32_1 = arith.constant 0 : i32
    return %arg0, %c0_i32, %c0_i32_0 : i32, i32, i32
  }
  func.func @transform_1(%arg0: i32) -> (i32, i32, i32) {
    %c0_i32 = arith.constant 0 : i32
    %c0_i32_0 = arith.constant 0 : i32
    %c0_i32_1 = arith.constant 0 : i32
    %c0_i32_2 = arith.constant 0 : i32
    return %c0_i32, %c0_i32_0, %c0_i32_1 : i32, i32, i32
  }
  func.func @transform_2(%arg0: i32) -> (i32, i32, i32) {
    %c0_i32 = arith.constant 0 : i32
    %c0_i32_0 = arith.constant 0 : i32
    %c0_i32_1 = arith.constant 0 : i32
    return %arg0, %c0_i32, %c0_i32_0 : i32, i32, i32
  }
}

module attributes {stable_mosaic.version = 11 : i64} {
  func.func @_matmul_kernel(%arg0: i32, %arg1: i32, %arg2: i32, %arg3: memref<256x16xbf16, #tpu.memory_space<vmem>>, %arg4: memref<16x32xbf16, #tpu.memory_space<vmem>>, %arg5: memref<1x32xf32, #tpu.memory_space<vmem>>, %arg6: memref<256x32xf32, #tpu.memory_space<vmem>>, %arg7: memref<256x32xf32, #tpu.memory_space<vmem>>) attributes {dimension_semantics = [#tpu.dimension_semantics<parallel>, #tpu.dimension_semantics<parallel>, #tpu.dimension_semantics<arbitrary>], iteration_bounds = array<i64: 2, 1, 1>, scalar_prefetch = 0 : i64, scratch_operands = 1 : i64, tpu.core_type = #tpu.core_type<tc>, window_params = [{transform_indices = @transform_0, window_bounds = array<i64: 256, 16>}, {transform_indices = @transform_1, window_bounds = array<i64: 16, 32>}, {transform_indices = @transform_2, window_bounds = array<i64: 1, 32>}, {transform_indices = @transform_3, window_bounds = array<i64: 256, 32>}]} {
    %c0_i32 = arith.constant 0 : i32
    %0 = arith.cmpi eq, %arg2, %c0_i32 : i32
    %1 = arith.extui %0 : i1 to i32
    %c0_i32_0 = arith.constant 0 : i32
    %2 = arith.cmpi ne, %1, %c0_i32_0 : i32
    scf.if %2 {
      %cst_10 = arith.constant 0.000000e+00 : f32
      %12 = vector.broadcast %cst_10 : f32 to vector<256x32xf32>
      %c0_11 = arith.constant 0 : index
      %c0_12 = arith.constant 0 : index
      %13 = vector.load %arg7[%c0_11, %c0_12] : memref<256x32xf32, #tpu.memory_space<vmem>>, vector<256x32xf32>
      tpu.vector_store %arg7[%c0_11, %c0_12], %12 {strides = array<i32>} : memref<256x32xf32, #tpu.memory_space<vmem>>, vector<256x32xf32>,
    } else {
    }
    %c0 = arith.constant 0 : index
    %c0_1 = arith.constant 0 : index
    %3 = vector.load %arg7[%c0, %c0_1] : memref<256x32xf32, #tpu.memory_space<vmem>>, vector<256x32xf32>
    %c0_2 = arith.constant 0 : index
    %c0_3 = arith.constant 0 : index
    %4 = vector.load %arg3[%c0_2, %c0_3] : memref<256x16xbf16, #tpu.memory_space<vmem>>, vector<256x16xbf16>
    %c0_4 = arith.constant 0 : index
    %c0_5 = arith.constant 0 : index
    %5 = vector.load %arg4[%c0_4, %c0_5] : memref<16x32xbf16, #tpu.memory_space<vmem>>, vector<16x32xbf16>
    %cst = arith.constant dense<0.000000e+00> : vector<256x32xf32>
    %6 = tpu.matmul %4, %5, %cst {dimension_numbers = #tpu.dot_dimension_numbers<[1], [0], [0], [1], [0, 0, 1, 1], [], []>} : vector<256x16xbf16>, vector<16x32xbf16>, vector<256x32xf32> -> vector<256x32xf32>
    %7 = arith.addf %3, %6 : vector<256x32xf32>
    %c0_6 = arith.constant 0 : index
    %c0_7 = arith.constant 0 : index
    %8 = vector.load %arg7[%c0_6, %c0_7] : memref<256x32xf32, #tpu.memory_space<vmem>>, vector<256x32xf32>
    tpu.vector_store %arg7[%c0_6, %c0_7], %7 {strides = array<i32>} : memref<256x32xf32, #tpu.memory_space<vmem>>, vector<256x32xf32>,
    %c0_i32_8 = arith.constant 0 : i32
    %9 = arith.cmpi eq, %arg2, %c0_i32_8 : i32
    %10 = arith.extui %9 : i1 to i32
    %c0_i32_9 = arith.constant 0 : i32
    %11 = arith.cmpi ne, %10, %c0_i32_9 : i32
    scf.if %11 {
      %c0_10 = arith.constant 0 : index
      %c0_11 = arith.constant 0 : index
      %12 = vector.load %arg7[%c0_10, %c0_11] : memref<256x32xf32, #tpu.memory_space<vmem>>, vector<256x32xf32>
      %c0_12 = arith.constant 0 : index
      %c0_13 = arith.constant 0 : index
      %13 = vector.load %arg5[%c0_12, %c0_13] : memref<1x32xf32, #tpu.memory_space<vmem>>, vector<1x32xf32>
      %14 = vector.broadcast %13 : vector<1x32xf32> to vector<256x32xf32>
      %15 = arith.addf %12, %14 : vector<256x32xf32>
      %c0_14 = arith.constant 0 : index
      %c0_15 = arith.constant 0 : index
      %16 = vector.load %arg6[%c0_14, %c0_15] : memref<256x32xf32, #tpu.memory_space<vmem>>, vector<256x32xf32>
      tpu.vector_store %arg6[%c0_14, %c0_15], %15 {strides = array<i32>} : memref<256x32xf32, #tpu.memory_space<vmem>>, vector<256x32xf32>,
    } else {
    }
    return
  }
  func.func @transform_0(%arg0: i32, %arg1: i32, %arg2: i32) -> (i32, i32) {
    %c0_i32 = arith.constant 0 : i32
    return %arg0, %arg2 : i32, i32
  }
  func.func @transform_1(%arg0: i32, %arg1: i32, %arg2: i32) -> (i32, i32) {
    %c0_i32 = arith.constant 0 : i32
    return %arg2, %arg1 : i32, i32
  }
  func.func @transform_2(%arg0: i32, %arg1: i32, %arg2: i32) -> (i32, i32) {
    %c0_i32 = arith.constant 0 : i32
    %c0_i32_0 = arith.constant 0 : i32
    return %c0_i32, %arg1 : i32, i32
  }
  func.func @transform_3(%arg0: i32, %arg1: i32, %arg2: i32) -> (i32, i32) {
    %c0_i32 = arith.constant 0 : i32
    return %arg0, %arg1 : i32, i32
  }
}

module attributes {stable_mosaic.version = 11 : i64} {
  func.func @_matmul_kernel(%arg0: i32, %arg1: i32, %arg2: i32, %arg3: memref<256x32xbf16, #tpu.memory_space<vmem>>, %arg4: memref<32x16xbf16, #tpu.memory_space<vmem>>, %arg5: memref<1x16xf32, #tpu.memory_space<vmem>>, %arg6: memref<256x16xf32, #tpu.memory_space<vmem>>, %arg7: memref<256x16xf32, #tpu.memory_space<vmem>>) attributes {dimension_semantics = [#tpu.dimension_semantics<parallel>, #tpu.dimension_semantics<parallel>, #tpu.dimension_semantics<arbitrary>], iteration_bounds = array<i64: 2, 1, 1>, scalar_prefetch = 0 : i64, scratch_operands = 1 : i64, tpu.core_type = #tpu.core_type<tc>, window_params = [{transform_indices = @transform_0, window_bounds = array<i64: 256, 32>}, {transform_indices = @transform_1, window_bounds = array<i64: 32, 16>}, {transform_indices = @transform_2, window_bounds = array<i64: 1, 16>}, {transform_indices = @transform_3, window_bounds = array<i64: 256, 16>}]} {
    %c0_i32 = arith.constant 0 : i32
    %0 = arith.cmpi eq, %arg2, %c0_i32 : i32
    %1 = arith.extui %0 : i1 to i32
    %c0_i32_0 = arith.constant 0 : i32
    %2 = arith.cmpi ne, %1, %c0_i32_0 : i32
    scf.if %2 {
      %cst_10 = arith.constant 0.000000e+00 : f32
      %12 = vector.broadcast %cst_10 : f32 to vector<256x16xf32>
      %c0_11 = arith.constant 0 : index
      %c0_12 = arith.constant 0 : index
      %13 = vector.load %arg7[%c0_11, %c0_12] : memref<256x16xf32, #tpu.memory_space<vmem>>, vector<256x16xf32>
      tpu.vector_store %arg7[%c0_11, %c0_12], %12 {strides = array<i32>} : memref<256x16xf32, #tpu.memory_space<vmem>>, vector<256x16xf32>,
    } else {
    }
    %c0 = arith.constant 0 : index
    %c0_1 = arith.constant 0 : index
    %3 = vector.load %arg7[%c0, %c0_1] : memref<256x16xf32, #tpu.memory_space<vmem>>, vector<256x16xf32>
    %c0_2 = arith.constant 0 : index
    %c0_3 = arith.constant 0 : index
    %4 = vector.load %arg3[%c0_2, %c0_3] : memref<256x32xbf16, #tpu.memory_space<vmem>>, vector<256x32xbf16>
    %c0_4 = arith.constant 0 : index
    %c0_5 = arith.constant 0 : index
    %5 = vector.load %arg4[%c0_4, %c0_5] : memref<32x16xbf16, #tpu.memory_space<vmem>>, vector<32x16xbf16>
    %cst = arith.constant dense<0.000000e+00> : vector<256x16xf32>
    %6 = tpu.matmul %4, %5, %cst {dimension_numbers = #tpu.dot_dimension_numbers<[1], [0], [0], [1], [0, 0, 1, 1], [], []>} : vector<256x32xbf16>, vector<32x16xbf16>, vector<256x16xf32> -> vector<256x16xf32>
    %7 = arith.addf %3, %6 : vector<256x16xf32>
    %c0_6 = arith.constant 0 : index
    %c0_7 = arith.constant 0 : index
    %8 = vector.load %arg7[%c0_6, %c0_7] : memref<256x16xf32, #tpu.memory_space<vmem>>, vector<256x16xf32>
    tpu.vector_store %arg7[%c0_6, %c0_7], %7 {strides = array<i32>} : memref<256x16xf32, #tpu.memory_space<vmem>>, vector<256x16xf32>,
    %c0_i32_8 = arith.constant 0 : i32
    %9 = arith.cmpi eq, %arg2, %c0_i32_8 : i32
    %10 = arith.extui %9 : i1 to i32
    %c0_i32_9 = arith.constant 0 : i32
    %11 = arith.cmpi ne, %10, %c0_i32_9 : i32
    scf.if %11 {
      %c0_10 = arith.constant 0 : index
      %c0_11 = arith.constant 0 : index
      %12 = vector.load %arg7[%c0_10, %c0_11] : memref<256x16xf32, #tpu.memory_space<vmem>>, vector<256x16xf32>
      %c0_12 = arith.constant 0 : index
      %c0_13 = arith.constant 0 : index
      %13 = vector.load %arg5[%c0_12, %c0_13] : memref<1x16xf32, #tpu.memory_space<vmem>>, vector<1x16xf32>
      %14 = vector.broadcast %13 : vector<1x16xf32> to vector<256x16xf32>
      %15 = arith.addf %12, %14 : vector<256x16xf32>
      %c0_14 = arith.constant 0 : index
      %c0_15 = arith.constant 0 : index
      %16 = vector.load %arg6[%c0_14, %c0_15] : memref<256x16xf32, #tpu.memory_space<vmem>>, vector<256x16xf32>
      tpu.vector_store %arg6[%c0_14, %c0_15], %15 {strides = array<i32>} : memref<256x16xf32, #tpu.memory_space<vmem>>, vector<256x16xf32>,
    } else {
    }
    return
  }
  func.func @transform_0(%arg0: i32, %arg1: i32, %arg2: i32) -> (i32, i32) {
    %c0_i32 = arith.constant 0 : i32
    return %arg0, %arg2 : i32, i32
  }
  func.func @transform_1(%arg0: i32, %arg1: i32, %arg2: i32) -> (i32, i32) {
    %c0_i32 = arith.constant 0 : i32
    return %arg2, %arg1 : i32, i32
  }
  func.func @transform_2(%arg0: i32, %arg1: i32, %arg2: i32) -> (i32, i32) {
    %c0_i32 = arith.constant 0 : i32
    %c0_i32_0 = arith.constant 0 : i32
    return %c0_i32, %arg1 : i32, i32
  }
  func.func @transform_3(%arg0: i32, %arg1: i32, %arg2: i32) -> (i32, i32) {
    %c0_i32 = arith.constant 0 : i32
    return %arg0, %arg1 : i32, i32
  }
}

module attributes {stable_mosaic.version = 11 : i64} {
  func.func @_matmul_kernel(%arg0: i32, %arg1: i32, %arg2: i32, %arg3: memref<256x144xbf16, #tpu.memory_space<vmem>>, %arg4: memref<144x16xbf16, #tpu.memory_space<vmem>>, %arg5: memref<1x16xf32, #tpu.memory_space<vmem>>, %arg6: memref<256x16xf32, #tpu.memory_space<vmem>>, %arg7: memref<256x16xf32, #tpu.memory_space<vmem>>) attributes {dimension_semantics = [#tpu.dimension_semantics<parallel>, #tpu.dimension_semantics<parallel>, #tpu.dimension_semantics<arbitrary>], iteration_bounds = array<i64: 2, 1, 1>, scalar_prefetch = 0 : i64, scratch_operands = 1 : i64, tpu.core_type = #tpu.core_type<tc>, window_params = [{transform_indices = @transform_0, window_bounds = array<i64: 256, 144>}, {transform_indices = @transform_1, window_bounds = array<i64: 144, 16>}, {transform_indices = @transform_2, window_bounds = array<i64: 1, 16>}, {transform_indices = @transform_3, window_bounds = array<i64: 256, 16>}]} {
    %c0_i32 = arith.constant 0 : i32
    %0 = arith.cmpi eq, %arg2, %c0_i32 : i32
    %1 = arith.extui %0 : i1 to i32
    %c0_i32_0 = arith.constant 0 : i32
    %2 = arith.cmpi ne, %1, %c0_i32_0 : i32
    scf.if %2 {
      %cst_10 = arith.constant 0.000000e+00 : f32
      %12 = vector.broadcast %cst_10 : f32 to vector<256x16xf32>
      %c0_11 = arith.constant 0 : index
      %c0_12 = arith.constant 0 : index
      %13 = vector.load %arg7[%c0_11, %c0_12] : memref<256x16xf32, #tpu.memory_space<vmem>>, vector<256x16xf32>
      tpu.vector_store %arg7[%c0_11, %c0_12], %12 {strides = array<i32>} : memref<256x16xf32, #tpu.memory_space<vmem>>, vector<256x16xf32>,
    } else {
    }
    %c0 = arith.constant 0 : index
    %c0_1 = arith.constant 0 : index
    %3 = vector.load %arg7[%c0, %c0_1] : memref<256x16xf32, #tpu.memory_space<vmem>>, vector<256x16xf32>
    %c0_2 = arith.constant 0 : index
    %c0_3 = arith.constant 0 : index
    %4 = vector.load %arg3[%c0_2, %c0_3] : memref<256x144xbf16, #tpu.memory_space<vmem>>, vector<256x144xbf16>
    %c0_4 = arith.constant 0 : index
    %c0_5 = arith.constant 0 : index
    %5 = vector.load %arg4[%c0_4, %c0_5] : memref<144x16xbf16, #tpu.memory_space<vmem>>, vector<144x16xbf16>
    %cst = arith.constant dense<0.000000e+00> : vector<256x16xf32>
    %6 = tpu.matmul %4, %5, %cst {dimension_numbers = #tpu.dot_dimension_numbers<[1], [0], [0], [1], [0, 0, 1, 1], [], []>} : vector<256x144xbf16>, vector<144x16xbf16>, vector<256x16xf32> -> vector<256x16xf32>
    %7 = arith.addf %3, %6 : vector<256x16xf32>
    %c0_6 = arith.constant 0 : index
    %c0_7 = arith.constant 0 : index
    %8 = vector.load %arg7[%c0_6, %c0_7] : memref<256x16xf32, #tpu.memory_space<vmem>>, vector<256x16xf32>
    tpu.vector_store %arg7[%c0_6, %c0_7], %7 {strides = array<i32>} : memref<256x16xf32, #tpu.memory_space<vmem>>, vector<256x16xf32>,
    %c0_i32_8 = arith.constant 0 : i32
    %9 = arith.cmpi eq, %arg2, %c0_i32_8 : i32
    %10 = arith.extui %9 : i1 to i32
    %c0_i32_9 = arith.constant 0 : i32
    %11 = arith.cmpi ne, %10, %c0_i32_9 : i32
    scf.if %11 {
      %c0_10 = arith.constant 0 : index
      %c0_11 = arith.constant 0 : index
      %12 = vector.load %arg7[%c0_10, %c0_11] : memref<256x16xf32, #tpu.memory_space<vmem>>, vector<256x16xf32>
      %c0_12 = arith.constant 0 : index
      %c0_13 = arith.constant 0 : index
      %13 = vector.load %arg5[%c0_12, %c0_13] : memref<1x16xf32, #tpu.memory_space<vmem>>, vector<1x16xf32>
      %14 = vector.broadcast %13 : vector<1x16xf32> to vector<256x16xf32>
      %15 = arith.addf %12, %14 : vector<256x16xf32>
      %c0_14 = arith.constant 0 : index
      %c0_15 = arith.constant 0 : index
      %16 = vector.load %arg6[%c0_14, %c0_15] : memref<256x16xf32, #tpu.memory_space<vmem>>, vector<256x16xf32>
      tpu.vector_store %arg6[%c0_14, %c0_15], %15 {strides = array<i32>} : memref<256x16xf32, #tpu.memory_space<vmem>>, vector<256x16xf32>,
    } else {
    }
    return
  }
  func.func @transform_0(%arg0: i32, %arg1: i32, %arg2: i32) -> (i32, i32) {
    %c0_i32 = arith.constant 0 : i32
    return %arg0, %arg2 : i32, i32
  }
  func.func @transform_1(%arg0: i32, %arg1: i32, %arg2: i32) -> (i32, i32) {
    %c0_i32 = arith.constant 0 : i32
    return %arg2, %arg1 : i32, i32
  }
  func.func @transform_2(%arg0: i32, %arg1: i32, %arg2: i32) -> (i32, i32) {
    %c0_i32 = arith.constant 0 : i32
    %c0_i32_0 = arith.constant 0 : i32
    return %c0_i32, %arg1 : i32, i32
  }
  func.func @transform_3(%arg0: i32, %arg1: i32, %arg2: i32) -> (i32, i32) {
    %c0_i32 = arith.constant 0 : i32
    return %arg0, %arg1 : i32, i32
  }
}

module attributes {stable_mosaic.version = 11 : i64} {
  func.func @_matmul_kernel(%arg0: i32, %arg1: i32, %arg2: i32, %arg3: memref<256x144xbf16, #tpu.memory_space<vmem>>, %arg4: memref<144x4xbf16, #tpu.memory_space<vmem>>, %arg5: memref<1x4xf32, #tpu.memory_space<vmem>>, %arg6: memref<256x4xf32, #tpu.memory_space<vmem>>, %arg7: memref<256x4xf32, #tpu.memory_space<vmem>>) attributes {dimension_semantics = [#tpu.dimension_semantics<parallel>, #tpu.dimension_semantics<parallel>, #tpu.dimension_semantics<arbitrary>], iteration_bounds = array<i64: 2, 1, 1>, scalar_prefetch = 0 : i64, scratch_operands = 1 : i64, tpu.core_type = #tpu.core_type<tc>, window_params = [{transform_indices = @transform_0, window_bounds = array<i64: 256, 144>}, {transform_indices = @transform_1, window_bounds = array<i64: 144, 4>}, {transform_indices = @transform_2, window_bounds = array<i64: 1, 4>}, {transform_indices = @transform_3, window_bounds = array<i64: 256, 4>}]} {
    %c0_i32 = arith.constant 0 : i32
    %0 = arith.cmpi eq, %arg2, %c0_i32 : i32
    %1 = arith.extui %0 : i1 to i32
    %c0_i32_0 = arith.constant 0 : i32
    %2 = arith.cmpi ne, %1, %c0_i32_0 : i32
    scf.if %2 {
      %cst_10 = arith.constant 0.000000e+00 : f32
      %12 = vector.broadcast %cst_10 : f32 to vector<256x4xf32>
      %c0_11 = arith.constant 0 : index
      %c0_12 = arith.constant 0 : index
      %13 = vector.load %arg7[%c0_11, %c0_12] : memref<256x4xf32, #tpu.memory_space<vmem>>, vector<256x4xf32>
      tpu.vector_store %arg7[%c0_11, %c0_12], %12 {strides = array<i32>} : memref<256x4xf32, #tpu.memory_space<vmem>>, vector<256x4xf32>,
    } else {
    }
    %c0 = arith.constant 0 : index
    %c0_1 = arith.constant 0 : index
    %3 = vector.load %arg7[%c0, %c0_1] : memref<256x4xf32, #tpu.memory_space<vmem>>, vector<256x4xf32>
    %c0_2 = arith.constant 0 : index
    %c0_3 = arith.constant 0 : index
    %4 = vector.load %arg3[%c0_2, %c0_3] : memref<256x144xbf16, #tpu.memory_space<vmem>>, vector<256x144xbf16>
    %c0_4 = arith.constant 0 : index
    %c0_5 = arith.constant 0 : index
    %5 = vector.load %arg4[%c0_4, %c0_5] : memref<144x4xbf16, #tpu.memory_space<vmem>>, vector<144x4xbf16>
    %cst = arith.constant dense<0.000000e+00> : vector<256x4xf32>
    %6 = tpu.matmul %4, %5, %cst {dimension_numbers = #tpu.dot_dimension_numbers<[1], [0], [0], [1], [0, 0, 1, 1], [], []>} : vector<256x144xbf16>, vector<144x4xbf16>, vector<256x4xf32> -> vector<256x4xf32>
    %7 = arith.addf %3, %6 : vector<256x4xf32>
    %c0_6 = arith.constant 0 : index
    %c0_7 = arith.constant 0 : index
    %8 = vector.load %arg7[%c0_6, %c0_7] : memref<256x4xf32, #tpu.memory_space<vmem>>, vector<256x4xf32>
    tpu.vector_store %arg7[%c0_6, %c0_7], %7 {strides = array<i32>} : memref<256x4xf32, #tpu.memory_space<vmem>>, vector<256x4xf32>,
    %c0_i32_8 = arith.constant 0 : i32
    %9 = arith.cmpi eq, %arg2, %c0_i32_8 : i32
    %10 = arith.extui %9 : i1 to i32
    %c0_i32_9 = arith.constant 0 : i32
    %11 = arith.cmpi ne, %10, %c0_i32_9 : i32
    scf.if %11 {
      %c0_10 = arith.constant 0 : index
      %c0_11 = arith.constant 0 : index
      %12 = vector.load %arg7[%c0_10, %c0_11] : memref<256x4xf32, #tpu.memory_space<vmem>>, vector<256x4xf32>
      %c0_12 = arith.constant 0 : index
      %c0_13 = arith.constant 0 : index
      %13 = vector.load %arg5[%c0_12, %c0_13] : memref<1x4xf32, #tpu.memory_space<vmem>>, vector<1x4xf32>
      %14 = vector.broadcast %13 : vector<1x4xf32> to vector<256x4xf32>
      %15 = arith.addf %12, %14 : vector<256x4xf32>
      %c0_14 = arith.constant 0 : index
      %c0_15 = arith.constant 0 : index
      %16 = vector.load %arg6[%c0_14, %c0_15] : memref<256x4xf32, #tpu.memory_space<vmem>>, vector<256x4xf32>
      tpu.vector_store %arg6[%c0_14, %c0_15], %15 {strides = array<i32>} : memref<256x4xf32, #tpu.memory_space<vmem>>, vector<256x4xf32>,
    } else {
    }
    return
  }
  func.func @transform_0(%arg0: i32, %arg1: i32, %arg2: i32) -> (i32, i32) {
    %c0_i32 = arith.constant 0 : i32
    return %arg0, %arg2 : i32, i32
  }
  func.func @transform_1(%arg0: i32, %arg1: i32, %arg2: i32) -> (i32, i32) {
    %c0_i32 = arith.constant 0 : i32
    return %arg2, %arg1 : i32, i32
  }
  func.func @transform_2(%arg0: i32, %arg1: i32, %arg2: i32) -> (i32, i32) {
    %c0_i32 = arith.constant 0 : i32
    %c0_i32_0 = arith.constant 0 : i32
    return %c0_i32, %arg1 : i32, i32
  }
  func.func @transform_3(%arg0: i32, %arg1: i32, %arg2: i32) -> (i32, i32) {
    %c0_i32 = arith.constant 0 : i32
    return %arg0, %arg1 : i32, i32
  }
}

</mosaic_0001>

<bundles_post_ra>
// kernel: _lambda_.45
= control target key start
LH: loop header
LB: loop body
LE: loop exit
PB: predicated region body
PF: predicated region fallthrough
CT: control target
= control target key end

     0   :  { %s1160_s12 = smov 0   ;;  %s1162_s13 = smov 0   ;;  %s1407_s0 = inlined_call_operand.vmem [shape: bf16[512,36], index: 0, kind: input, shape index: {}]   ;;  %s1408_s1 = inlined_call_operand.vmem [shape: bf16[36,16], index: 1, kind: input, shape index: {}]   ;;  %s1409_s2 = inlined_call_operand.vmem [shape: f32[1,16], index: 2, kind: input, shape index: {}]   ;;  %s1410_s3 = inlined_call_operand.vmem [shape: f32[512,16], index: 3, kind: output, shape index: {}]  }
   0x1   :  { %s1164_s14 = smov 0  }
   0x2 LB: > { %s32_s15 = sadd.s32 1, %s1133_s13  ;;  %p963_p0 = scmp.ge.s32.totalorder %s1137_s14, 1  ;;  %s1137_s14 = sphi %s1164_s14, %s13_s14   ;;  %s1133_s13 = sphi %s1162_s13, %s1412_s13   ;;  %s1129_s12 = sphi %s1160_s12, %s1411_s12  }
   0x3   : > { %p34_p1 = scmp.ge.s32.totalorder %s32_s15, 2  ;;  %p188_p2 = scmp.lt.s32.totalorder %s1137_s14, 3 }
   0x5   : > { %s1414_s15 = smov (%p34_p1, %s32_s15), 0  ;;  %p189_p3 = pnand %p963_p0, %p188_p2 }
   0x6   : > { %v1096_v0 = vld [vmem:[%s1408_s1] sm:$0xff] (!%p189_p3)   ;;  %v1097_v1 = vld [vmem:[%s1408_s1 + $0x8] sm:$0xff] (!%p189_p3)   ;;  %s964_s20 = sshll.u32 (!%p189_p3), %s1129_s12, 5  ;;  %vm264_vm0 = vcmask (!%p189_p3), 130048   ;;  %v1139_v3 = vmov (!%p189_p3), 0.0   ;;  %vm510_vm1 = vcmask (!%p189_p3), 1041408  }
   0x7   : > { %192 = sbr.rel (%p189_p3) target bundleno = 274 (0x112), region = 32  ;;  %1025 = vmatprep.subr.bf16.mxu0 (!%p189_p3), %v1096_v0  ;;  %1063 = vmatprep.subr.bf16.mxu1 (!%p189_p3), %v1096_v0  ;;  %p230_p4 = scmp.lt.s32.totalorder (!%p189_p3), %s964_s20, 63  ;;  %v1098_v2 = vld [vmem:[%s1408_s1 + $0x10] ss:$0 sps:$4 sm:$0x33] (!%p189_p3)   ;;  %267 = vst.msk [vmem:[#allocation2 + $0x10] sm:$0xff] (!%p189_p3), %vm264_vm0, %v1139_v3 }
   0x8   : > { %1026 = vmatpush3.bf16.msra.mxu0 (!%p189_p3), %v1096_v0  ;;  %1066 = vmatpush3.bf16.msra.mxu1 (!%p189_p3), %v1096_v0  ;;  %265 = vst.msk [vmem:[#allocation2] sm:$0xff] (!%p189_p3), %vm264_vm0, %v1139_v3  ;;  %266 = vst.msk [vmem:[#allocation2 + $0x8] sm:$0xff] (!%p189_p3), %vm264_vm0, %v1139_v3  ;;  %vm461_vm2 = vcmask (!%p189_p3), 293888   ;;  %v512_v4 = vsel (!%p189_p3), %vm510_vm1, %v1098_v2, 0  ;;  %v1271_v49 = vld [vmem:[%s1409_s2] ss:$0 sm:$0xff] (!%p189_p3) }
   0x9   : > { %1027 = vmatprep.subr.bf16.mxu0 (!%p189_p3), %v1097_v1  ;;  %1064 = vmatprep.subr.bf16.mxu1 (!%p189_p3), %v1097_v1  ;;  %268 = vst.msk [vmem:[#allocation2 + $0x18] sm:$0xff] (!%p189_p3), %vm264_vm0, %v1139_v3  ;;  %269 = vst.msk [vmem:[#allocation2 + $0x20] sm:$0xff] (!%p189_p3), %vm264_vm0, %v1139_v3 }
   0xa   : > { %270 = vst.msk [vmem:[#allocation2 + $0x28] sm:$0xff] (!%p189_p3), %vm264_vm0, %v1139_v3  ;;  %271 = vst.msk [vmem:[#allocation2 + $0x30] sm:$0xff] (!%p189_p3), %vm264_vm0, %v1139_v3 }
   0xb   : > { %272 = vst.msk [vmem:[#allocation2 + $0x38] sm:$0xff] (!%p189_p3), %vm264_vm0, %v1139_v3  ;;  %273 = vst.msk [vmem:[#allocation2 + $0x40] sm:$0xff] (!%p189_p3), %vm264_vm0, %v1139_v3 }
   0xc   : > { %274 = vst.msk [vmem:[#allocation2 + $0x48] sm:$0xff] (!%p189_p3), %vm264_vm0, %v1139_v3  ;;  %275 = vst.msk [vmem:[#allocation2 + $0x50] sm:$0xff] (!%p189_p3), %vm264_vm0, %v1139_v3  ;;  %1028 = vmatpush3.bf16.msra.mxu0 (!%p189_p3), %v1097_v1  ;;  %1067 = vmatpush3.bf16.msra.mxu1 (!%p189_p3), %v1097_v1 }
   0xd   : > { %276 = vst.msk [vmem:[#allocation2 + $0x58] sm:$0xff] (!%p189_p3), %vm264_vm0, %v1139_v3  ;;  %277 = vst.msk [vmem:[#allocation2 + $0x60] sm:$0xff] (!%p189_p3), %vm264_vm0, %v1139_v3  ;;  %1069 = vmatprep.subr.msk.bf16.mxu0 (!%p189_p3), %vm510_vm1, %v1098_v2  ;;  %1070 = vmatprep.subr.msk.bf16.mxu1 (!%p189_p3), %vm510_vm1, %v1098_v2 }
   0xe   : > { %s1416_s20 = smov (!%p230_p4, %s964_s20), 63  ;;  %278 = vst.msk [vmem:[#allocation2 + $0x68] sm:$0xff] %vm264_vm0, %v1139_v3  ;;  %279 = vst.msk [vmem:[#allocation2 + $0x70] sm:$0xff] %vm264_vm0, %v1139_v3  ;;  %v299_v21 = vld [vmem:[#allocation2 + $0x10] sm:$0xff] }
   0xf   : > { %280 = vst.msk [vmem:[#allocation2 + $0x78] sm:$0xff] %vm264_vm0, %v1139_v3  ;;  %281 = vst.msk [vmem:[#allocation2 + $0x80] sm:$0xff] %vm264_vm0, %v1139_v3  ;;  %s965_s23 = sshll.u32 %s1416_s20, 2  ;;  %v297_v23 = vld [vmem:[#allocation2] sm:$0xff]  ;;  %v298_v33 = vld [vmem:[#allocation2 + $0x8] sm:$0xff]  ;;  %s967_s27 = sshll.u32 %s1416_s20, 3 }
  0x10   : > { %282 = vst.msk [vmem:[#allocation2 + $0x88] sm:$0xff] %vm264_vm0, %v1139_v3  ;;  %283 = vst.msk [vmem:[#allocation2 + $0x90] sm:$0xff] %vm264_vm0, %v1139_v3  ;;  %s1225_s26 = scalar_lea.vmem %s1407_s0, %s965_s23  ;;  %1030 = vmatpush3.bf16.msra.mxu0 %v512_v4  ;;  %1068 = vmatpush3.bf16.msra.mxu1 %v512_v4  ;;  %v300_v27 = vld [vmem:[#allocation2 + $0x18] sm:$0xff]  ;;  %v301_v47 = vld [vmem:[#allocation2 + $0x20] sm:$0xff]  ;;  %s1276_s5 = scalar_lea.vmem %s1410_s3, %s967_s27 }
  0x11   : > { %284 = vst.msk [vmem:[#allocation2 + $0x98] sm:$0xff] %vm264_vm0, %v1139_v3  ;;  %285 = vst.msk [vmem:[#allocation2 + $0xa0] sm:$0xff] %vm264_vm0, %v1139_v3  ;;  %v1099_v5 = vld [vmem:[%s1225_s26] sm:$0xff]   ;;  %v1101_v7 = vld [vmem:[%s1225_s26 + $0x8] sm:$0xff]  }
  0x12   : > { %286 = vst.msk [vmem:[#allocation2 + $0xa8] sm:$0xff] %vm264_vm0, %v1139_v3  ;;  %287 = vst.msk [vmem:[#allocation2 + $0xb0] sm:$0xff] %vm264_vm0, %v1139_v3  ;;  %v1100_v6 = vld [vmem:[%s1225_s26 + $0x40] sm:$0xff]   ;;  %1031 = vmatprep.mubr.msk.bf16.mxu0 %vm461_vm2, %v1099_v5  ;;  %v1102_v8 = vld [vmem:[%s1225_s26 + $0x48] sm:$0xff]  }
  0x13   : > { %288 = vst.msk [vmem:[#allocation2 + $0xb8] sm:$0xff] %vm264_vm0, %v1139_v3  ;;  %289 = vst.msk [vmem:[#allocation2 + $0xc0] sm:$0xff] %vm264_vm0, %v1139_v3  ;;  %1047 = vmatprep.mubr.msk.bf16.mxu1 %vm461_vm2, %v1100_v6  ;;  %v1103_v9 = vld [vmem:[%s1225_s26 + $0x10] sm:$0xff]   ;;  %1032 = vmatmul.mubr.msk.bf16.vlgmr.msra.gmra.mrb[0].mxu0 %vm461_vm2, %v1101_v7  ;;  %v1105_v11 = vld [vmem:[%s1225_s26 + $0x18] sm:$0xff]  }
  0x14   : > { %290 = vst.msk [vmem:[#allocation2 + $0xc8] sm:$0xff] %vm264_vm0, %v1139_v3  ;;  %291 = vst.msk [vmem:[#allocation2 + $0xd0] sm:$0xff] %vm264_vm0, %v1139_v3  ;;  %v1104_v10 = vld [vmem:[%s1225_s26 + $0x50] sm:$0xff]   ;;  %1048 = vmatmul.mubr.msk.bf16.vlgmr.msra.gmra.mrb[0].mxu1 %vm461_vm2, %v1102_v8  ;;  %1035 = vmatprep.mubr.msk.bf16.mxu0 %vm461_vm2, %v1103_v9  ;;  %v1106_v12 = vld [vmem:[%s1225_s26 + $0x58] sm:$0xff]  }
  0x15   : > { %292 = vst.msk [vmem:[#allocation2 + $0xd8] sm:$0xff] %vm264_vm0, %v1139_v3  ;;  %293 = vst.msk [vmem:[#allocation2 + $0xe0] sm:$0xff] %vm264_vm0, %v1139_v3  ;;  %1051 = vmatprep.mubr.msk.bf16.mxu1 %vm461_vm2, %v1104_v10  ;;  %v1107_v13 = vld [vmem:[%s1225_s26 + $0x20] sm:$0xff]   ;;  %v1109_v15 = vld [vmem:[%s1225_s26 + $0x28] sm:$0xff]  }
  0x16   : > { %294 = vst.msk [vmem:[#allocation2 + $0xe8] sm:$0xff] %vm264_vm0, %v1139_v3  ;;  %295 = vst.msk [vmem:[#allocation2 + $0xf0] sm:$0xff] %vm264_vm0, %v1139_v3  ;;  %v1108_v14 = vld [vmem:[%s1225_s26 + $0x60] sm:$0xff]   ;;  %v1110_v16 = vld [vmem:[%s1225_s26 + $0x68] sm:$0xff]  }
  0x17   : > { %296 = vst.msk [vmem:[#allocation2 + $0xf8] sm:$0xff] %vm264_vm0, %v1139_v3  ;;  %v1111_v17 = vld [vmem:[%s1225_s26 + $0x30] sm:$0xff]   ;;  %v1113_v19 = vld [vmem:[%s1225_s26 + $0x38] sm:$0xff]   ;;  %v313_v24 = vld [vmem:[#allocation2 + $0x80] sm:$0xff] }
  0x18   : > { %v1112_v18 = vld [vmem:[%s1225_s26 + $0x70] sm:$0xff]   ;;  %v1114_v20 = vld [vmem:[%s1225_s26 + $0x78] sm:$0xff]   ;;  %v314_v34 = vld [vmem:[#allocation2 + $0x88] sm:$0xff] }
  0x19   : > { %v315_v22 = vld [vmem:[#allocation2 + $0x90] sm:$0xff]  ;;  %v316_v28 = vld [vmem:[#allocation2 + $0x98] sm:$0xff]  ;;  %v317_v48 = vld [vmem:[#allocation2 + $0xa0] sm:$0xff] }
  0x1a   : > { %v303_v45 = vld [vmem:[#allocation2 + $0x30] sm:$0xff]  ;;  %v304_v52 = vld [vmem:[#allocation2 + $0x38] sm:$0xff]  ;;  %v302_v58 = vld [vmem:[#allocation2 + $0x28] sm:$0xff] }
  0x1b   : > { %1036 = vmatmul.mubr.msk.bf16.gmra.mrb[4].mxu0 %vm461_vm2, %v1105_v11  ;;  %v319_v46 = vld [vmem:[#allocation2 + $0xb0] sm:$0xff]  ;;  %v320_v53 = vld [vmem:[#allocation2 + $0xb8] sm:$0xff]  ;;  %v318_v59 = vld [vmem:[#allocation2 + $0xa8] sm:$0xff] }
  0x1c   : > { %1052 = vmatmul.mubr.msk.bf16.gmra.mrb[4].mxu1 %vm461_vm2, %v1106_v12  ;;  %1039 = vmatprep.mubr.msk.bf16.mxu0 %vm461_vm2, %v1107_v13 }
  0x1d   : > { %1055 = vmatprep.mubr.msk.bf16.mxu1 %vm461_vm2, %v1108_v14 }
  0x23   : > { %1040 = vmatmul.mubr.msk.bf16.gmra.mrb[8].mxu0 %vm461_vm2, %v1109_v15 }
  0x24   : > { %1056 = vmatmul.mubr.msk.bf16.gmra.mrb[8].mxu1 %vm461_vm2, %v1110_v16  ;;  %1043 = vmatprep.mubr.msk.bf16.mxu0 %vm461_vm2, %v1111_v17 }
  0x25   : > { %1059 = vmatprep.mubr.msk.bf16.mxu1 %vm461_vm2, %v1112_v18 }
  0x2b   : > { %1044 = vmatmul.mubr.msk.bf16.gmra.mrb[12].mxu0 %vm461_vm2, %v1113_v19 }
  0x2c   : > { %1060 = vmatmul.mubr.msk.bf16.gmra.mrb[12].mxu1 %vm461_vm2, %v1114_v20 }
  0xe6   : > { %v1033_v25 = vpop.f32.mrb[0].mxu0 }
  0xe7   : > { %v1049_v26 = vpop.f32.mrb[0].mxu1  ;;  %v677_v29 = vadd.f32 %v1033_v25, %v299_v21  ;;  %v548_v31 = vpop.f32.mrb[1].mxu0  ;;  %v321_v25 = vld [vmem:[#allocation2 + $0xc0] sm:$0xff] }
  0xe8   : > { %v693_v30 = vadd.f32 %v1049_v26, %v315_v22  ;;  %v612_v32 = vpop.f32.mrb[1].mxu1  ;;  %v675_v35 = vadd.f32 %v548_v31, %v297_v23  ;;  %v1034_v37 = vpop.f32.mrb[2].mxu0  ;;  %v307_v22 = vld [vmem:[#allocation2 + $0x50] sm:$0xff] }
  0xe9   : > { %v691_v36 = vadd.f32 %v612_v32, %v313_v24  ;;  %v1050_v38 = vpop.f32.mrb[2].mxu1  ;;  %710 = vst.msk [vmem:[#allocation2 + $0x10] sm:$0xff] %vm264_vm0, %v677_v29  ;;  %v678_v39 = vadd.f32 %v1034_v37, %v300_v27  ;;  %v551_v41 = vpop.f32.mrb[3].mxu0  ;;  %v323_v23 = vld [vmem:[#allocation2 + $0xd0] sm:$0xff]  ;;  %v305_v24 = vld [vmem:[#allocation2 + $0x40] sm:$0xff]  ;;  %v324_v29 = vld [vmem:[#allocation2 + $0xd8] sm:$0xff] }
  0xea   : > { %726 = vst.msk [vmem:[#allocation2 + $0x90] sm:$0xff] %vm264_vm0, %v693_v30  ;;  %v694_v40 = vadd.f32 %v1050_v38, %v316_v28  ;;  %v615_v42 = vpop.f32.mrb[3].mxu1  ;;  %708 = vst.msk [vmem:[#allocation2] sm:$0xff] %vm264_vm0, %v675_v35  ;;  %v676_v43 = vadd.f32 %v551_v41, %v298_v33  ;;  %v308_v28 = vld [vmem:[#allocation2 + $0x58] sm:$0xff]  ;;  %v322_v35 = vld [vmem:[#allocation2 + $0xc8] sm:$0xff] }
  0xeb   : > { %724 = vst.msk [vmem:[#allocation2 + $0x80] sm:$0xff] %vm264_vm0, %v691_v36  ;;  %v692_v44 = vadd.f32 %v615_v42, %v314_v34  ;;  %711 = vst.msk [vmem:[#allocation2 + $0x18] sm:$0xff] %vm264_vm0, %v678_v39  ;;  %v306_v34 = vld [vmem:[#allocation2 + $0x48] sm:$0xff] }
  0xec   : > { %727 = vst.msk [vmem:[#allocation2 + $0x98] sm:$0xff] %vm264_vm0, %v694_v40  ;;  %709 = vst.msk [vmem:[#allocation2 + $0x8] sm:$0xff] %vm264_vm0, %v676_v43 }
  0xed   : > { %725 = vst.msk [vmem:[#allocation2 + $0x88] sm:$0xff] %vm264_vm0, %v692_v44 }
  0xee   : > { %v1037_v50 = vpop.f32.mrb[4].mxu0 }
  0xef   : > { %v1053_v51 = vpop.f32.mrb[4].mxu1  ;;  %v681_v54 = vadd.f32 %v1037_v50, %v303_v45  ;;  %v564_v56 = vpop.f32.mrb[5].mxu0 }
  0xf0   : > { %v697_v55 = vadd.f32 %v1053_v51, %v319_v46  ;;  %v628_v57 = vpop.f32.mrb[5].mxu1  ;;  %v745_v60 = vld [vmem:[#allocation2 + $0x10] sm:$0xff]  ;;  %v679_v62 = vadd.f32 %v564_v56, %v301_v47  ;;  %v1038_v0 = vpop.f32.mrb[6].mxu0 }
  0xf1   : > { %v761_v61 = vld [vmem:[#allocation2 + $0x90] sm:$0xff]  ;;  %v695_v63 = vadd.f32 %v628_v57, %v317_v48  ;;  %v1054_v1 = vpop.f32.mrb[6].mxu1  ;;  %v784_v2 = vadd.f32 %v1271_v49, %v745_v60  ;;  %v743_v4 = vld [vmem:[#allocation2] sm:$0xff]  ;;  %714 = vst.msk [vmem:[#allocation2 + $0x30] sm:$0xff] %vm264_vm0, %v681_v54  ;;  %v682_v6 = vadd.f32 %v1038_v0, %v304_v52  ;;  %v567_v8 = vpop.f32.mrb[7].mxu0 }
  0xf2   : > { %v800_v3 = vadd.f32 %v1271_v49, %v761_v61  ;;  %v759_v5 = vld [vmem:[#allocation2 + $0x80] sm:$0xff]  ;;  %730 = vst.msk [vmem:[#allocation2 + $0xb0] sm:$0xff] %vm264_vm0, %v697_v55  ;;  %v698_v7 = vadd.f32 %v1054_v1, %v320_v53  ;;  %v631_v9 = vpop.f32.mrb[7].mxu1  ;;  %v782_v10 = vadd.f32 %v1271_v49, %v743_v4  ;;  %v746_v12 = vld [vmem:[#allocation2 + $0x18] sm:$0xff]  ;;  %712 = vst.msk [vmem:[#allocation2 + $0x20] sm:$0xff] %vm264_vm0, %v679_v62 }
  0xf3   : > { %v798_v11 = vadd.f32 %v1271_v49, %v759_v5  ;;  %v762_v13 = vld [vmem:[#allocation2 + $0x98] sm:$0xff]  ;;  %728 = vst.msk [vmem:[#allocation2 + $0xa0] sm:$0xff] %vm264_vm0, %v695_v63  ;;  %v680_v14 = vadd.f32 %v567_v8, %v302_v58  ;;  %v696_v15 = vadd.f32 %v631_v9, %v318_v59  ;;  %816 = vst.msk [vmem:[%s1276_s5 + $0x10] sm:$0xff] %vm264_vm0, %v784_v2  ;;  %v744_v18 = vld [vmem:[#allocation2 + $0x8] sm:$0xff] }
  0xf4   : > { %832 = vst.msk [vmem:[%s1276_s5 + $0x90] sm:$0xff] %vm264_vm0, %v800_v3  ;;  %v785_v16 = vadd.f32 %v1271_v49, %v746_v12  ;;  %v801_v17 = vadd.f32 %v1271_v49, %v762_v13  ;;  %v760_v19 = vld [vmem:[#allocation2 + $0x88] sm:$0xff]  ;;  %715 = vst.msk [vmem:[#allocation2 + $0x38] sm:$0xff] %vm264_vm0, %v682_v6  ;;  %v783_v20 = vadd.f32 %v1271_v49, %v744_v18  ;;  %v311_v63 = vld [vmem:[#allocation2 + $0x70] sm:$0xff] }
  0xf5   : > { %731 = vst.msk [vmem:[#allocation2 + $0xb8] sm:$0xff] %vm264_vm0, %v698_v7  ;;  %814 = vst.msk [vmem:[%s1276_s5] sm:$0xff] %vm264_vm0, %v782_v10  ;;  %v799_v21 = vadd.f32 %v1271_v49, %v760_v19  ;;  %v327_v0 = vld [vmem:[#allocation2 + $0xf0] sm:$0xff]  ;;  %v309_v1 = vld [vmem:[#allocation2 + $0x60] sm:$0xff] }
  0xf6   : > { %830 = vst.msk [vmem:[%s1276_s5 + $0x80] sm:$0xff] %vm264_vm0, %v798_v11  ;;  %713 = vst.msk [vmem:[#allocation2 + $0x28] sm:$0xff] %vm264_vm0, %v680_v14  ;;  %v1041_v26 = vpop.f32.mrb[8].mxu0  ;;  %v325_v2 = vld [vmem:[#allocation2 + $0xe0] sm:$0xff]  ;;  %v312_v5 = vld [vmem:[#allocation2 + $0x78] sm:$0xff] }
  0xf7   : > { %729 = vst.msk [vmem:[#allocation2 + $0xa8] sm:$0xff] %vm264_vm0, %v696_v15  ;;  %817 = vst.msk [vmem:[%s1276_s5 + $0x18] sm:$0xff] %vm264_vm0, %v785_v16  ;;  %v1057_v27 = vpop.f32.mrb[8].mxu1  ;;  %v685_v30 = vadd.f32 %v1041_v26, %v307_v22  ;;  %v580_v32 = vpop.f32.mrb[9].mxu0  ;;  %v328_v6 = vld [vmem:[#allocation2 + $0xf8] sm:$0xff]  ;;  %v310_v11 = vld [vmem:[#allocation2 + $0x68] sm:$0xff] }
  0xf8   : > { %833 = vst.msk [vmem:[%s1276_s5 + $0x98] sm:$0xff] %vm264_vm0, %v801_v17  ;;  %815 = vst.msk [vmem:[%s1276_s5 + $0x8] sm:$0xff] %vm264_vm0, %v783_v20  ;;  %v701_v31 = vadd.f32 %v1057_v27, %v323_v23  ;;  %v644_v33 = vpop.f32.mrb[9].mxu1  ;;  %v749_v36 = vld [vmem:[#allocation2 + $0x30] sm:$0xff]  ;;  %v683_v38 = vadd.f32 %v580_v32, %v305_v24  ;;  %v1042_v40 = vpop.f32.mrb[10].mxu0  ;;  %v326_v12 = vld [vmem:[#allocation2 + $0xe8] sm:$0xff] }
  0xf9   : > { %831 = vst.msk [vmem:[%s1276_s5 + $0x88] sm:$0xff] %vm264_vm0, %v799_v21  ;;  %v765_v37 = vld [vmem:[#allocation2 + $0xb0] sm:$0xff]  ;;  %v699_v39 = vadd.f32 %v644_v33, %v321_v25  ;;  %v1058_v41 = vpop.f32.mrb[10].mxu1  ;;  %v788_v42 = vadd.f32 %v1271_v49, %v749_v36  ;;  %v747_v44 = vld [vmem:[#allocation2 + $0x20] sm:$0xff]  ;;  %718 = vst.msk [vmem:[#allocation2 + $0x50] sm:$0xff] %vm264_vm0, %v685_v30  ;;  %v686_v46 = vadd.f32 %v1042_v40, %v308_v28  ;;  %v583_v48 = vpop.f32.mrb[11].mxu0 }
  0xfa   : > { %v804_v43 = vadd.f32 %v1271_v49, %v765_v37  ;;  %v763_v45 = vld [vmem:[#allocation2 + $0xa0] sm:$0xff]  ;;  %734 = vst.msk [vmem:[#allocation2 + $0xd0] sm:$0xff] %vm264_vm0, %v701_v31  ;;  %v702_v47 = vadd.f32 %v1058_v41, %v324_v29  ;;  %v647_v50 = vpop.f32.mrb[11].mxu1  ;;  %v786_v51 = vadd.f32 %v1271_v49, %v747_v44  ;;  %716 = vst.msk [vmem:[#allocation2 + $0x40] sm:$0xff] %vm264_vm0, %v683_v38 }
  0xfb   : > { %v802_v52 = vadd.f32 %v1271_v49, %v763_v45  ;;  %v750_v53 = vld [vmem:[#allocation2 + $0x38] sm:$0xff]  ;;  %732 = vst.msk [vmem:[#allocation2 + $0xc0] sm:$0xff] %vm264_vm0, %v699_v39  ;;  %v684_v55 = vadd.f32 %v583_v48, %v306_v34  ;;  %v700_v56 = vadd.f32 %v647_v50, %v322_v35  ;;  %820 = vst.msk [vmem:[%s1276_s5 + $0x30] sm:$0xff] %vm264_vm0, %v788_v42 }
  0xfc   : > { %v766_v54 = vld [vmem:[#allocation2 + $0xb8] sm:$0xff]  ;;  %836 = vst.msk [vmem:[%s1276_s5 + $0xb0] sm:$0xff] %vm264_vm0, %v804_v43  ;;  %v789_v57 = vadd.f32 %v1271_v49, %v750_v53  ;;  %719 = vst.msk [vmem:[#allocation2 + $0x58] sm:$0xff] %vm264_vm0, %v686_v46 }
  0xfd   : > { %v805_v58 = vadd.f32 %v1271_v49, %v766_v54  ;;  %v748_v59 = vld [vmem:[#allocation2 + $0x28] sm:$0xff]  ;;  %735 = vst.msk [vmem:[#allocation2 + $0xd8] sm:$0xff] %vm264_vm0, %v702_v47  ;;  %818 = vst.msk [vmem:[%s1276_s5 + $0x20] sm:$0xff] %vm264_vm0, %v786_v51 }
  0xfe   : > { %v764_v60 = vld [vmem:[#allocation2 + $0xa8] sm:$0xff]  ;;  %834 = vst.msk [vmem:[%s1276_s5 + $0xa0] sm:$0xff] %vm264_vm0, %v802_v52  ;;  %v787_v61 = vadd.f32 %v1271_v49, %v748_v59  ;;  %717 = vst.msk [vmem:[#allocation2 + $0x48] sm:$0xff] %vm264_vm0, %v684_v55  ;;  %v1045_v3 = vpop.f32.mrb[12].mxu0 }
  0xff   : > { %v803_v62 = vadd.f32 %v1271_v49, %v764_v60  ;;  %733 = vst.msk [vmem:[#allocation2 + $0xc8] sm:$0xff] %vm264_vm0, %v700_v56  ;;  %821 = vst.msk [vmem:[%s1276_s5 + $0x38] sm:$0xff] %vm264_vm0, %v789_v57  ;;  %v1061_v4 = vpop.f32.mrb[12].mxu1  ;;  %v689_v7 = vadd.f32 %v1045_v3, %v311_v63  ;;  %v596_v9 = vpop.f32.mrb[13].mxu0 }
 0x100   : > { %837 = vst.msk [vmem:[%s1276_s5 + $0xb8] sm:$0xff] %vm264_vm0, %v805_v58  ;;  %819 = vst.msk [vmem:[%s1276_s5 + $0x28] sm:$0xff] %vm264_vm0, %v787_v61  ;;  %v705_v8 = vadd.f32 %v1061_v4, %v327_v0  ;;  %v660_v10 = vpop.f32.mrb[13].mxu1  ;;  %v753_v13 = vld [vmem:[#allocation2 + $0x50] sm:$0xff]  ;;  %v687_v15 = vadd.f32 %v596_v9, %v309_v1  ;;  %v1046_v17 = vpop.f32.mrb[14].mxu0 }
 0x101   : > { %835 = vst.msk [vmem:[%s1276_s5 + $0xa8] sm:$0xff] %vm264_vm0, %v803_v62  ;;  %v769_v14 = vld [vmem:[#allocation2 + $0xd0] sm:$0xff]  ;;  %v703_v16 = vadd.f32 %v660_v10, %v325_v2  ;;  %v1062_v18 = vpop.f32.mrb[14].mxu1  ;;  %v792_v19 = vadd.f32 %v1271_v49, %v753_v13  ;;  %v751_v21 = vld [vmem:[#allocation2 + $0x40] sm:$0xff]  ;;  %722 = vst.msk [vmem:[#allocation2 + $0x70] sm:$0xff] %vm264_vm0, %v689_v7  ;;  %v690_v23 = vadd.f32 %v1046_v17, %v312_v5  ;;  %v599_v25 = vpop.f32.mrb[15].mxu0 }
 0x102   : > { %v808_v20 = vadd.f32 %v1271_v49, %v769_v14  ;;  %v767_v22 = vld [vmem:[#allocation2 + $0xc0] sm:$0xff]  ;;  %738 = vst.msk [vmem:[#allocation2 + $0xf0] sm:$0xff] %vm264_vm0, %v705_v8  ;;  %v706_v24 = vadd.f32 %v1062_v18, %v328_v6  ;;  %v663_v26 = vpop.f32.mrb[15].mxu1  ;;  %v790_v27 = vadd.f32 %v1271_v49, %v751_v21  ;;  %720 = vst.msk [vmem:[#allocation2 + $0x60] sm:$0xff] %vm264_vm0, %v687_v15 }
 0x103   : > { %v806_v28 = vadd.f32 %v1271_v49, %v767_v22  ;;  %v754_v29 = vld [vmem:[#allocation2 + $0x58] sm:$0xff]  ;;  %736 = vst.msk [vmem:[#allocation2 + $0xe0] sm:$0xff] %vm264_vm0, %v703_v16  ;;  %v688_v31 = vadd.f32 %v599_v25, %v310_v11  ;;  %v704_v32 = vadd.f32 %v663_v26, %v326_v12  ;;  %824 = vst.msk [vmem:[%s1276_s5 + $0x50] sm:$0xff] %vm264_vm0, %v792_v19 }
 0x104   : > { %v770_v30 = vld [vmem:[#allocation2 + $0xd8] sm:$0xff]  ;;  %840 = vst.msk [vmem:[%s1276_s5 + $0xd0] sm:$0xff] %vm264_vm0, %v808_v20  ;;  %v793_v33 = vadd.f32 %v1271_v49, %v754_v29  ;;  %723 = vst.msk [vmem:[#allocation2 + $0x78] sm:$0xff] %vm264_vm0, %v690_v23 }
 0x105   : > { %v809_v34 = vadd.f32 %v1271_v49, %v770_v30  ;;  %v752_v35 = vld [vmem:[#allocation2 + $0x48] sm:$0xff]  ;;  %739 = vst.msk [vmem:[#allocation2 + $0xf8] sm:$0xff] %vm264_vm0, %v706_v24  ;;  %822 = vst.msk [vmem:[%s1276_s5 + $0x40] sm:$0xff] %vm264_vm0, %v790_v27 }
 0x106   : > { %v768_v36 = vld [vmem:[#allocation2 + $0xc8] sm:$0xff]  ;;  %838 = vst.msk [vmem:[%s1276_s5 + $0xc0] sm:$0xff] %vm264_vm0, %v806_v28  ;;  %v791_v37 = vadd.f32 %v1271_v49, %v752_v35  ;;  %721 = vst.msk [vmem:[#allocation2 + $0x68] sm:$0xff] %vm264_vm0, %v688_v31 }
 0x107   : > { %v807_v38 = vadd.f32 %v1271_v49, %v768_v36  ;;  %737 = vst.msk [vmem:[#allocation2 + $0xe8] sm:$0xff] %vm264_vm0, %v704_v32  ;;  %825 = vst.msk [vmem:[%s1276_s5 + $0x58] sm:$0xff] %vm264_vm0, %v793_v33 }
 0x108   : > { %841 = vst.msk [vmem:[%s1276_s5 + $0xd8] sm:$0xff] %vm264_vm0, %v809_v34  ;;  %823 = vst.msk [vmem:[%s1276_s5 + $0x48] sm:$0xff] %vm264_vm0, %v791_v37  ;;  %v757_v39 = vld [vmem:[#allocation2 + $0x70] sm:$0xff] }
 0x109   : > { %839 = vst.msk [vmem:[%s1276_s5 + $0xc8] sm:$0xff] %vm264_vm0, %v807_v38  ;;  %v773_v40 = vld [vmem:[#allocation2 + $0xf0] sm:$0xff]  ;;  %v796_v41 = vadd.f32 %v1271_v49, %v757_v39  ;;  %v755_v43 = vld [vmem:[#allocation2 + $0x60] sm:$0xff] }
 0x10a   : > { %v812_v42 = vadd.f32 %v1271_v49, %v773_v40  ;;  %v771_v44 = vld [vmem:[#allocation2 + $0xe0] sm:$0xff]  ;;  %v794_v45 = vadd.f32 %v1271_v49, %v755_v43 }
 0x10b   : > { %v810_v46 = vadd.f32 %v1271_v49, %v771_v44  ;;  %v758_v47 = vld [vmem:[#allocation2 + $0x78] sm:$0xff]  ;;  %828 = vst.msk [vmem:[%s1276_s5 + $0x70] sm:$0xff] %vm264_vm0, %v796_v41 }
 0x10c   : > { %v774_v48 = vld [vmem:[#allocation2 + $0xf8] sm:$0xff]  ;;  %844 = vst.msk [vmem:[%s1276_s5 + $0xf0] sm:$0xff] %vm264_vm0, %v812_v42  ;;  %v797_v50 = vadd.f32 %v1271_v49, %v758_v47  ;;  %826 = vst.msk [vmem:[%s1276_s5 + $0x60] sm:$0xff] %vm264_vm0, %v794_v45 }
 0x10d   : > { %v813_v51 = vadd.f32 %v1271_v49, %v774_v48  ;;  %v756_v52 = vld [vmem:[#allocation2 + $0x68] sm:$0xff]  ;;  %842 = vst.msk [vmem:[%s1276_s5 + $0xe0] sm:$0xff] %vm264_vm0, %v810_v46 }
 0x10e   : > { %v772_v53 = vld [vmem:[#allocation2 + $0xe8] sm:$0xff]  ;;  %v795_v54 = vadd.f32 %v1271_v49, %v756_v52  ;;  %829 = vst.msk [vmem:[%s1276_s5 + $0x78] sm:$0xff] %vm264_vm0, %v797_v50 }
 0x10f   : > { %v811_v55 = vadd.f32 %v1271_v49, %v772_v53  ;;  %845 = vst.msk [vmem:[%s1276_s5 + $0xf8] sm:$0xff] %vm264_vm0, %v813_v51 }
 0x110   : > { %827 = vst.msk [vmem:[%s1276_s5 + $0x68] sm:$0xff] %vm264_vm0, %v795_v54 }
 0x111   : > { %843 = vst.msk [vmem:[%s1276_s5 + $0xe8] sm:$0xff] %vm264_vm0, %v811_v55 }
 0x112 PF: > { %s13_s14 = sadd.s32 1, %s1137_s14   ;;  %s1411_s12 = smov %s1133_s13 }
 0x113   : > { %p10_p5 = scmp.ge.s32.totalorder %s13_s14, 4   ;;  %s1412_s13 = smov %s1414_s15 }
 0x115   :  { %12 = sbr.rel (!%p10_p5) target bundleno = 2 (0x2), region = 76 }

// kernel: _lambda_.46
= control target key start
LH: loop header
LB: loop body
LE: loop exit
PB: predicated region body
PF: predicated region fallthrough
CT: control target
= control target key end

     0   :  { %s903_s12 = smov 0   ;;  %s1453_s0 = inlined_call_operand.vmem [shape: f32[512,16], index: 0, kind: input, shape index: {}]   ;;  %s1454_s1 = inlined_call_operand.vmem [shape: f32[1,16], index: 1, kind: input, shape index: {}]   ;;  %s1455_s2 = inlined_call_operand.vmem [shape: f32[1,16], index: 2, kind: input, shape index: {}]   ;;  %s1456_s3 = inlined_call_operand.vmem [shape: f32[512,16], index: 3, kind: output, shape index: {}]  }
   0x1 LB: > { %s790_s13 = sadd.s32 4294967295, %s881_s12   ;;  %p794_p0 = scmp.ge.s32.totalorder %s881_s12, 1  ;;  %s881_s12 = sphi %s903_s12, %s13_s12  }
   0x2   : > { %p138_p1 = scmp.lt.s32.totalorder %s881_s12, 3 }
   0x4   : > { %p139_p2 = pnand %p794_p0, %p138_p1 }
   0x5   : > { %s795_s14 = sshll.u32 (!%p139_p2), %s790_s13, 5  ;;  %vm206_vm0 = vcmask (!%p139_p2), 130048  }
   0x6   : > { %142 = sbr.rel (%p139_p2) target bundleno = 395 (0x18b), region = 32  ;;  %p163_p3 = scmp.lt.s32.totalorder (!%p139_p2), %s795_s14, 63 }
   0xd   : > { %s1458_s14 = smov (!%p163_p3, %s795_s14), 63 }
   0xe   : > { %s796_s15 = sshll.u32 %s1458_s14, 3 }
   0xf   : > { %s919_s18 = scalar_lea.vmem %s1453_s0, %s796_s15  ;;  %s1290_s25 = scalar_lea.vmem %s1456_s3, %s796_s15 }
  0x10   : > { %v922_v0 = vld [vmem:[%s919_s18] sm:$0xff]  ;;  %v925_v1 = vld [vmem:[%s919_s18 + $0x10] sm:$0xff]  ;;  %v928_v2 = vld [vmem:[%s919_s18 + $0x8] sm:$0xff] }
  0x11   : > { %v207_v3 = vsel %vm206_vm0, %v922_v0, 0.0  ;;  %v213_v4 = vsel %vm206_vm0, %v925_v1, 0.0  ;;  %v935_v5 = vld [vmem:[%s919_s18 + $0x18] sm:$0xff]  ;;  %v210_v6 = vsel %vm206_vm0, %v928_v2, 0.0  ;;  %v942_v8 = vld [vmem:[%s919_s18 + $0x20] sm:$0xff]  ;;  %v945_v9 = vld [vmem:[%s919_s18 + $0x28] sm:$0xff] }
  0x12   : > { %208 = vadd.xlane.f32.xlu0 %v207_v3  ;;  %214 = vadd.xlane.f32.xlu1 %v213_v4  ;;  %v216_v7 = vsel %vm206_vm0, %v935_v5, 0.0  ;;  %v219_v10 = vsel %vm206_vm0, %v942_v8, 0.0  ;;  %v222_v11 = vsel %vm206_vm0, %v945_v9, 0.0  ;;  %v952_v12 = vld [vmem:[%s919_s18 + $0x30] sm:$0xff]  ;;  %v955_v13 = vld [vmem:[%s919_s18 + $0x38] sm:$0xff]  ;;  %v962_v16 = vld [vmem:[%s919_s18 + $0x40] sm:$0xff] }
  0x13   : > { %v225_v14 = vsel %vm206_vm0, %v952_v12, 0.0  ;;  %v228_v15 = vsel %vm206_vm0, %v955_v13, 0.0  ;;  %v965_v17 = vld [vmem:[%s919_s18 + $0x48] sm:$0xff]  ;;  %v231_v18 = vsel %vm206_vm0, %v962_v16, 0.0  ;;  %v972_v20 = vld [vmem:[%s919_s18 + $0x50] sm:$0xff]  ;;  %v975_v21 = vld [vmem:[%s919_s18 + $0x58] sm:$0xff] }
  0x14   : > { %v234_v19 = vsel %vm206_vm0, %v965_v17, 0.0  ;;  %v237_v22 = vsel %vm206_vm0, %v972_v20, 0.0  ;;  %v240_v23 = vsel %vm206_vm0, %v975_v21, 0.0  ;;  %v982_v24 = vld [vmem:[%s919_s18 + $0x60] sm:$0xff]  ;;  %v985_v25 = vld [vmem:[%s919_s18 + $0x68] sm:$0xff]  ;;  %v992_v28 = vld [vmem:[%s919_s18 + $0x70] sm:$0xff] }
  0x15   : > { %v243_v26 = vsel %vm206_vm0, %v982_v24, 0.0  ;;  %v246_v27 = vsel %vm206_vm0, %v985_v25, 0.0  ;;  %v995_v29 = vld [vmem:[%s919_s18 + $0x78] sm:$0xff]  ;;  %v249_v30 = vsel %vm206_vm0, %v992_v28, 0.0  ;;  %v1002_v32 = vld [vmem:[%s919_s18 + $0x80] sm:$0xff]  ;;  %v1005_v33 = vld [vmem:[%s919_s18 + $0x88] sm:$0xff] }
  0x16   : > { %211 = vadd.xlane.f32.xlu0 %v210_v6  ;;  %217 = vadd.xlane.f32.xlu1 %v216_v7  ;;  %v252_v31 = vsel %vm206_vm0, %v995_v29, 0.0  ;;  %v255_v34 = vsel %vm206_vm0, %v1002_v32, 0.0  ;;  %v258_v35 = vsel %vm206_vm0, %v1005_v33, 0.0  ;;  %v1012_v36 = vld [vmem:[%s919_s18 + $0x90] sm:$0xff]  ;;  %v1015_v37 = vld [vmem:[%s919_s18 + $0x98] sm:$0xff]  ;;  %v1022_v40 = vld [vmem:[%s919_s18 + $0xa0] sm:$0xff] }
  0x17   : > { %v261_v38 = vsel %vm206_vm0, %v1012_v36, 0.0  ;;  %v264_v39 = vsel %vm206_vm0, %v1015_v37, 0.0  ;;  %v1025_v41 = vld [vmem:[%s919_s18 + $0xa8] sm:$0xff]  ;;  %v267_v42 = vsel %vm206_vm0, %v1022_v40, 0.0  ;;  %v1032_v44 = vld [vmem:[%s919_s18 + $0xb0] sm:$0xff]  ;;  %v1035_v45 = vld [vmem:[%s919_s18 + $0xb8] sm:$0xff] }
  0x18   : > { %v270_v43 = vsel %vm206_vm0, %v1025_v41, 0.0  ;;  %v273_v46 = vsel %vm206_vm0, %v1032_v44, 0.0  ;;  %v276_v47 = vsel %vm206_vm0, %v1035_v45, 0.0  ;;  %v1042_v48 = vld [vmem:[%s919_s18 + $0xc0] sm:$0xff]  ;;  %v1045_v49 = vld [vmem:[%s919_s18 + $0xc8] sm:$0xff]  ;;  %v1052_v52 = vld [vmem:[%s919_s18 + $0xd0] sm:$0xff] }
  0x19   : > { %v279_v50 = vsel %vm206_vm0, %v1042_v48, 0.0  ;;  %v282_v51 = vsel %vm206_vm0, %v1045_v49, 0.0  ;;  %v1055_v53 = vld [vmem:[%s919_s18 + $0xd8] sm:$0xff]  ;;  %v285_v54 = vsel %vm206_vm0, %v1052_v52, 0.0  ;;  %v1062_v56 = vld [vmem:[%s919_s18 + $0xe0] sm:$0xff]  ;;  %v1065_v57 = vld [vmem:[%s919_s18 + $0xe8] sm:$0xff] }
  0x1a   : > { %220 = vadd.xlane.f32.xlu0 %v219_v10  ;;  %223 = vadd.xlane.f32.xlu1 %v222_v11  ;;  %v288_v55 = vsel %vm206_vm0, %v1055_v53, 0.0  ;;  %v291_v58 = vsel %vm206_vm0, %v1062_v56, 0.0  ;;  %v294_v59 = vsel %vm206_vm0, %v1065_v57, 0.0  ;;  %v1072_v60 = vld [vmem:[%s919_s18 + $0xf0] sm:$0xff]  ;;  %v1075_v61 = vld [vmem:[%s919_s18 + $0xf8] sm:$0xff] }
  0x1b   : > { %v297_v62 = vsel %vm206_vm0, %v1072_v60, 0.0  ;;  %v300_v63 = vsel %vm206_vm0, %v1075_v61, 0.0 }
  0x1e   : > { %226 = vadd.xlane.f32.xlu0 %v225_v14  ;;  %229 = vadd.xlane.f32.xlu1 %v228_v15 }
  0x22   : > { %232 = vadd.xlane.f32.xlu0 %v231_v18  ;;  %235 = vadd.xlane.f32.xlu1 %v234_v19 }
  0x26   : > { %238 = vadd.xlane.f32.xlu0 %v237_v22  ;;  %241 = vadd.xlane.f32.xlu1 %v240_v23 }
  0x2a   : > { %244 = vadd.xlane.f32.xlu0 %v243_v26  ;;  %247 = vadd.xlane.f32.xlu1 %v246_v27 }
  0x2e   : > { %250 = vadd.xlane.f32.xlu0 %v249_v30  ;;  %253 = vadd.xlane.f32.xlu1 %v252_v31 }
  0x32   : > { %256 = vadd.xlane.f32.xlu0 %v255_v34  ;;  %259 = vadd.xlane.f32.xlu1 %v258_v35 }
  0x36   : > { %262 = vadd.xlane.f32.xlu0 %v261_v38  ;;  %265 = vadd.xlane.f32.xlu1 %v264_v39 }
  0x3a   : > { %268 = vadd.xlane.f32.xlu0 %v267_v42  ;;  %271 = vadd.xlane.f32.xlu1 %v270_v43 }
  0x3e   : > { %274 = vadd.xlane.f32.xlu0 %v273_v46  ;;  %277 = vadd.xlane.f32.xlu1 %v276_v47 }
  0x42   : > { %280 = vadd.xlane.f32.xlu0 %v279_v50  ;;  %283 = vadd.xlane.f32.xlu1 %v282_v51 }
  0x46   : > { %286 = vadd.xlane.f32.xlu0 %v285_v54  ;;  %289 = vadd.xlane.f32.xlu1 %v288_v55 }
  0x4a   : > { %292 = vadd.xlane.f32.xlu0 %v291_v58  ;;  %295 = vadd.xlane.f32.xlu1 %v294_v59 }
  0x4e   : > { %298 = vadd.xlane.f32.xlu0 %v297_v62  ;;  %301 = vadd.xlane.f32.xlu1 %v300_v63 }
  0x9f   : > { %v209_v3 = vpop.xlane.xlu0 %208  ;;  %v215_v4 = vpop.xlane.xlu1 %214 }
  0xa0   : > { %v304_v6 = vmul.f32 0.0625, %v209_v3  ;;  %v306_v7 = vmul.f32 0.0625, %v215_v4 }
  0xa2   : > { %v1082_v10 = vsub.f32 %v922_v0, %v304_v6  ;;  %v1085_v11 = vsub.f32 %v925_v1, %v306_v7 }
  0xa3   : > { %v212_v14 = vpop.xlane.xlu0 %211  ;;  %v218_v15 = vpop.xlane.xlu1 %217 }
  0xa4   : > { %v305_v18 = vmul.f32 0.0625, %v212_v14  ;;  %v307_v19 = vmul.f32 0.0625, %v218_v15  ;;  %v368_v22 = vmul.f32 %v1082_v10, %v1082_v10  ;;  %v370_v23 = vmul.f32 %v1085_v11, %v1085_v11 }
  0xa6   : > { %v1092_v26 = vsub.f32 %v928_v2, %v305_v18  ;;  %v1095_v27 = vsub.f32 %v935_v5, %v307_v19  ;;  %v400_v0 = vsel %vm206_vm0, %v368_v22, 0.0  ;;  %v406_v31 = vsel %vm206_vm0, %v370_v23, 0.0 }
  0xa7   : > { %401 = vadd.xlane.f32.xlu0 %v400_v0  ;;  %v221_v1 = vpop.xlane.xlu0 %220  ;;  %v224_v30 = vpop.xlane.xlu1 %223 }
  0xa8   : > { %v308_v34 = vmul.f32 0.0625, %v221_v1  ;;  %v309_v35 = vmul.f32 0.0625, %v224_v30  ;;  %v369_v38 = vmul.f32 %v1092_v26, %v1092_v26  ;;  %v371_v39 = vmul.f32 %v1095_v27, %v1095_v27 }
  0xaa   : > { %v1104_v2 = vsub.f32 %v942_v8, %v308_v34  ;;  %v1107_v5 = vsub.f32 %v945_v9, %v309_v35  ;;  %v403_v42 = vsel %vm206_vm0, %v369_v38, 0.0  ;;  %v409_v47 = vsel %vm206_vm0, %v371_v39, 0.0 }
  0xab   : > { %407 = vadd.xlane.f32.xlu0 %v406_v31  ;;  %404 = vadd.xlane.f32.xlu1 %v403_v42  ;;  %v227_v43 = vpop.xlane.xlu0 %226  ;;  %v230_v46 = vpop.xlane.xlu1 %229 }
  0xac   : > { %v310_v50 = vmul.f32 0.0625, %v227_v43  ;;  %v311_v51 = vmul.f32 0.0625, %v230_v46  ;;  %v372_v54 = vmul.f32 %v1104_v2, %v1104_v2  ;;  %v373_v8 = vmul.f32 %v1107_v5, %v1107_v5 }
  0xae   : > { %v1116_v55 = vsub.f32 %v952_v12, %v310_v50  ;;  %v1119_v9 = vsub.f32 %v955_v13, %v311_v51  ;;  %v412_v58 = vsel %vm206_vm0, %v372_v54, 0.0  ;;  %v415_v63 = vsel %vm206_vm0, %v373_v8, 0.0 }
  0xaf   : > { %410 = vadd.xlane.f32.xlu1 %v409_v47  ;;  %413 = vadd.xlane.f32.xlu0 %v412_v58  ;;  %v233_v59 = vpop.xlane.xlu0 %232  ;;  %v236_v62 = vpop.xlane.xlu1 %235 }
  0xb0   : > { %v312_v3 = vmul.f32 0.0625, %v233_v59  ;;  %v313_v4 = vmul.f32 0.0625, %v236_v62  ;;  %v374_v6 = vmul.f32 %v1116_v55, %v1116_v55  ;;  %v375_v12 = vmul.f32 %v1119_v9, %v1119_v9 }
  0xb2   : > { %v1128_v7 = vsub.f32 %v962_v16, %v312_v3  ;;  %v1131_v13 = vsub.f32 %v965_v17, %v313_v4  ;;  %v418_v14 = vsel %vm206_vm0, %v374_v6, 0.0  ;;  %v421_v19 = vsel %vm206_vm0, %v375_v12, 0.0 }
  0xb3   : > { %416 = vadd.xlane.f32.xlu1 %v415_v63  ;;  %419 = vadd.xlane.f32.xlu0 %v418_v14  ;;  %v239_v15 = vpop.xlane.xlu0 %238  ;;  %v242_v18 = vpop.xlane.xlu1 %241 }
  0xb4   : > { %v314_v22 = vmul.f32 0.0625, %v239_v15  ;;  %v315_v23 = vmul.f32 0.0625, %v242_v18  ;;  %v376_v0 = vmul.f32 %v1128_v7, %v1128_v7  ;;  %v377_v16 = vmul.f32 %v1131_v13, %v1131_v13 }
  0xb6   : > { %v1140_v1 = vsub.f32 %v972_v20, %v314_v22  ;;  %v1143_v17 = vsub.f32 %v975_v21, %v315_v23  ;;  %v424_v30 = vsel %vm206_vm0, %v376_v0, 0.0  ;;  %v427_v35 = vsel %vm206_vm0, %v377_v16, 0.0 }
  0xb7   : > { %422 = vadd.xlane.f32.xlu1 %v421_v19  ;;  %425 = vadd.xlane.f32.xlu0 %v424_v30  ;;  %v245_v31 = vpop.xlane.xlu0 %244  ;;  %v248_v34 = vpop.xlane.xlu1 %247 }
  0xb8   : > { %v316_v38 = vmul.f32 0.0625, %v245_v31  ;;  %v317_v39 = vmul.f32 0.0625, %v248_v34  ;;  %v378_v42 = vmul.f32 %v1140_v1, %v1140_v1  ;;  %v379_v20 = vmul.f32 %v1143_v17, %v1143_v17 }
  0xba   : > { %v1152_v43 = vsub.f32 %v982_v24, %v316_v38  ;;  %v1155_v21 = vsub.f32 %v985_v25, %v317_v39  ;;  %v430_v46 = vsel %vm206_vm0, %v378_v42, 0.0  ;;  %v433_v51 = vsel %vm206_vm0, %v379_v20, 0.0 }
  0xbb   : > { %428 = vadd.xlane.f32.xlu1 %v427_v35  ;;  %431 = vadd.xlane.f32.xlu0 %v430_v46  ;;  %v251_v47 = vpop.xlane.xlu0 %250  ;;  %v254_v50 = vpop.xlane.xlu1 %253 }
  0xbc   : > { %v318_v54 = vmul.f32 0.0625, %v251_v47  ;;  %v319_v8 = vmul.f32 0.0625, %v254_v50  ;;  %v380_v58 = vmul.f32 %v1152_v43, %v1152_v43  ;;  %v381_v24 = vmul.f32 %v1155_v21, %v1155_v21 }
  0xbe   : > { %v1164_v59 = vsub.f32 %v992_v28, %v318_v54  ;;  %v1167_v25 = vsub.f32 %v995_v29, %v319_v8  ;;  %v436_v62 = vsel %vm206_vm0, %v380_v58, 0.0  ;;  %v439_v4 = vsel %vm206_vm0, %v381_v24, 0.0 }
  0xbf   : > { %434 = vadd.xlane.f32.xlu1 %v433_v51  ;;  %437 = vadd.xlane.f32.xlu0 %v436_v62  ;;  %v257_v63 = vpop.xlane.xlu0 %256  ;;  %v260_v3 = vpop.xlane.xlu1 %259 }
  0xc0   : > { %v320_v6 = vmul.f32 0.0625, %v257_v63  ;;  %v321_v12 = vmul.f32 0.0625, %v260_v3  ;;  %v382_v14 = vmul.f32 %v1164_v59, %v1164_v59  ;;  %v383_v28 = vmul.f32 %v1167_v25, %v1167_v25 }
  0xc2   : > { %v1176_v15 = vsub.f32 %v1002_v32, %v320_v6  ;;  %v1179_v29 = vsub.f32 %v1005_v33, %v321_v12  ;;  %v442_v18 = vsel %vm206_vm0, %v382_v14, 0.0  ;;  %v445_v23 = vsel %vm206_vm0, %v383_v28, 0.0 }
  0xc3   : > { %440 = vadd.xlane.f32.xlu1 %v439_v4  ;;  %443 = vadd.xlane.f32.xlu0 %v442_v18  ;;  %v263_v19 = vpop.xlane.xlu0 %262  ;;  %v266_v22 = vpop.xlane.xlu1 %265 }
  0xc4   : > { %v322_v0 = vmul.f32 0.0625, %v263_v19  ;;  %v323_v16 = vmul.f32 0.0625, %v266_v22  ;;  %v384_v30 = vmul.f32 %v1176_v15, %v1176_v15  ;;  %v385_v32 = vmul.f32 %v1179_v29, %v1179_v29 }
  0xc6   : > { %v1188_v31 = vsub.f32 %v1012_v36, %v322_v0  ;;  %v1191_v33 = vsub.f32 %v1015_v37, %v323_v16  ;;  %v448_v34 = vsel %vm206_vm0, %v384_v30, 0.0  ;;  %v451_v39 = vsel %vm206_vm0, %v385_v32, 0.0 }
  0xc7   : > { %446 = vadd.xlane.f32.xlu1 %v445_v23  ;;  %449 = vadd.xlane.f32.xlu0 %v448_v34  ;;  %v269_v35 = vpop.xlane.xlu0 %268  ;;  %v272_v38 = vpop.xlane.xlu1 %271 }
  0xc8   : > { %v324_v42 = vmul.f32 0.0625, %v269_v35  ;;  %v325_v20 = vmul.f32 0.0625, %v272_v38  ;;  %v386_v46 = vmul.f32 %v1188_v31, %v1188_v31  ;;  %v387_v36 = vmul.f32 %v1191_v33, %v1191_v33 }
  0xca   : > { %v1200_v47 = vsub.f32 %v1022_v40, %v324_v42  ;;  %v1203_v37 = vsub.f32 %v1025_v41, %v325_v20  ;;  %v454_v50 = vsel %vm206_vm0, %v386_v46, 0.0  ;;  %v457_v8 = vsel %vm206_vm0, %v387_v36, 0.0 }
  0xcb   : > { %452 = vadd.xlane.f32.xlu1 %v451_v39  ;;  %455 = vadd.xlane.f32.xlu0 %v454_v50  ;;  %v275_v51 = vpop.xlane.xlu0 %274  ;;  %v278_v54 = vpop.xlane.xlu1 %277 }
  0xcc   : > { %v326_v58 = vmul.f32 0.0625, %v275_v51  ;;  %v327_v24 = vmul.f32 0.0625, %v278_v54  ;;  %v388_v62 = vmul.f32 %v1200_v47, %v1200_v47  ;;  %v389_v40 = vmul.f32 %v1203_v37, %v1203_v37 }
  0xce   : > { %v1212_v63 = vsub.f32 %v1032_v44, %v326_v58  ;;  %v1215_v41 = vsub.f32 %v1035_v45, %v327_v24  ;;  %v460_v3 = vsel %vm206_vm0, %v388_v62, 0.0  ;;  %v463_v12 = vsel %vm206_vm0, %v389_v40, 0.0 }
  0xcf   : > { %458 = vadd.xlane.f32.xlu1 %v457_v8  ;;  %461 = vadd.xlane.f32.xlu0 %v460_v3  ;;  %v281_v4 = vpop.xlane.xlu0 %280  ;;  %v284_v6 = vpop.xlane.xlu1 %283 }
  0xd0   : > { %v328_v14 = vmul.f32 0.0625, %v281_v4  ;;  %v329_v28 = vmul.f32 0.0625, %v284_v6  ;;  %v390_v18 = vmul.f32 %v1212_v63, %v1212_v63  ;;  %v391_v44 = vmul.f32 %v1215_v41, %v1215_v41 }
  0xd2   : > { %v1224_v19 = vsub.f32 %v1042_v48, %v328_v14  ;;  %v1227_v45 = vsub.f32 %v1045_v49, %v329_v28  ;;  %v466_v22 = vsel %vm206_vm0, %v390_v18, 0.0  ;;  %v469_v16 = vsel %vm206_vm0, %v391_v44, 0.0 }
  0xd3   : > { %464 = vadd.xlane.f32.xlu1 %v463_v12  ;;  %467 = vadd.xlane.f32.xlu0 %v466_v22  ;;  %v287_v23 = vpop.xlane.xlu0 %286  ;;  %v290_v0 = vpop.xlane.xlu1 %289 }
  0xd4   : > { %v330_v30 = vmul.f32 0.0625, %v287_v23  ;;  %v331_v32 = vmul.f32 0.0625, %v290_v0  ;;  %v392_v34 = vmul.f32 %v1224_v19, %v1224_v19  ;;  %v393_v48 = vmul.f32 %v1227_v45, %v1227_v45 }
  0xd6   : > { %v1236_v35 = vsub.f32 %v1052_v52, %v330_v30  ;;  %v1239_v49 = vsub.f32 %v1055_v53, %v331_v32  ;;  %v472_v38 = vsel %vm206_vm0, %v392_v34, 0.0  ;;  %v475_v20 = vsel %vm206_vm0, %v393_v48, 0.0 }
  0xd7   : > { %470 = vadd.xlane.f32.xlu1 %v469_v16  ;;  %473 = vadd.xlane.f32.xlu0 %v472_v38  ;;  %v293_v39 = vpop.xlane.xlu0 %292  ;;  %v296_v42 = vpop.xlane.xlu1 %295 }
  0xd8   : > { %v332_v46 = vmul.f32 0.0625, %v293_v39  ;;  %v333_v36 = vmul.f32 0.0625, %v296_v42  ;;  %v394_v50 = vmul.f32 %v1236_v35, %v1236_v35  ;;  %v395_v52 = vmul.f32 %v1239_v49, %v1239_v49 }
  0xda   : > { %v1248_v51 = vsub.f32 %v1062_v56, %v332_v46  ;;  %v1251_v53 = vsub.f32 %v1065_v57, %v333_v36  ;;  %v478_v54 = vsel %vm206_vm0, %v394_v50, 0.0  ;;  %v481_v24 = vsel %vm206_vm0, %v395_v52, 0.0 }
  0xdb   : > { %476 = vadd.xlane.f32.xlu1 %v475_v20  ;;  %479 = vadd.xlane.f32.xlu0 %v478_v54  ;;  %v299_v8 = vpop.xlane.xlu0 %298  ;;  %v302_v58 = vpop.xlane.xlu1 %301 }
  0xdc   : > { %v334_v62 = vmul.f32 0.0625, %v299_v8  ;;  %v335_v40 = vmul.f32 0.0625, %v302_v58  ;;  %v396_v3 = vmul.f32 %v1248_v51, %v1248_v51  ;;  %v397_v56 = vmul.f32 %v1251_v53, %v1251_v53  ;;  %v1276_v58 = vld [vmem:[%s1454_s1] ss:$0 sm:$0xff] }
  0xde   : > { %v1260_v4 = vsub.f32 %v1072_v60, %v334_v62  ;;  %v1263_v57 = vsub.f32 %v1075_v61, %v335_v40  ;;  %v484_v6 = vsel %vm206_vm0, %v396_v3, 0.0  ;;  %v487_v12 = vsel %vm206_vm0, %v397_v56, 0.0 }
  0xdf   : > { %482 = vadd.xlane.f32.xlu1 %v481_v24  ;;  %485 = vadd.xlane.f32.xlu0 %v484_v6  ;;  %v1282_v6 = vld [vmem:[%s1455_s2] ss:$0 sm:$0xff] }
  0xe0   : > { %v398_v14 = vmul.f32 %v1260_v4, %v1260_v4  ;;  %v399_v28 = vmul.f32 %v1263_v57, %v1263_v57 }
  0xe2   : > { %v490_v18 = vsel %vm206_vm0, %v398_v14, 0.0  ;;  %v493_v60 = vsel %vm206_vm0, %v399_v28, 0.0 }
  0xe3   : > { %488 = vadd.xlane.f32.xlu1 %v487_v12  ;;  %491 = vadd.xlane.f32.xlu0 %v490_v18 }
  0xe7   : > { %494 = vadd.xlane.f32.xlu1 %v493_v60 }
 0x134   : > { %v402_v61 = vpop.xlane.xlu0 %401 }
 0x135   : > { %v496_v44 = vmul.f32 0.0625, %v402_v61 }
 0x137   : > { %v528_v22 = vadd.f32 1e-05, %v496_v44 }
 0x138   : > { %v405_v23 = vpop.xlane.xlu1 %404  ;;  %v408_v0 = vpop.xlane.xlu0 %407 }
 0x139   : > { %811 = vrsqrt.f32 %v528_v22  ;;  %v497_v16 = vmul.f32 0.0625, %v405_v23  ;;  %v498_v30 = vmul.f32 0.0625, %v408_v0 }
 0x13b   : > { %v529_v32 = vadd.f32 1e-05, %v497_v16  ;;  %v530_v34 = vadd.f32 1e-05, %v498_v30 }
 0x13c   : > { %v411_v48 = vpop.xlane.xlu1 %410  ;;  %v414_v38 = vpop.xlane.xlu0 %413 }
 0x13d   : > { %813 = vrsqrt.f32 %v529_v32  ;;  %v499_v39 = vmul.f32 0.0625, %v411_v48  ;;  %v500_v42 = vmul.f32 0.0625, %v414_v38 }
 0x13e   : > { %815 = vrsqrt.f32 %v530_v34 }
 0x13f   : > { %v531_v20 = vadd.f32 1e-05, %v499_v39  ;;  %v532_v46 = vadd.f32 1e-05, %v500_v42 }
 0x140   : > { %v417_v36 = vpop.xlane.xlu1 %416  ;;  %v420_v50 = vpop.xlane.xlu0 %419 }
 0x141   : > { %817 = vrsqrt.f32 %v531_v20  ;;  %v501_v52 = vmul.f32 0.0625, %v417_v36  ;;  %v502_v54 = vmul.f32 0.0625, %v420_v50 }
 0x142   : > { %819 = vrsqrt.f32 %v532_v46 }
 0x143   : > { %v812_v8 = vpop.eup %811  ;;  %v533_v24 = vadd.f32 1e-05, %v501_v52  ;;  %v534_v62 = vadd.f32 1e-05, %v502_v54 }
 0x144   : > { %v592_v40 = vmul.f32 %v812_v8, %v1082_v10  ;;  %v423_v3 = vpop.xlane.xlu1 %422  ;;  %v426_v56 = vpop.xlane.xlu0 %425 }
 0x145   : > { %821 = vrsqrt.f32 %v533_v24  ;;  %v503_v12 = vmul.f32 0.0625, %v423_v3  ;;  %v504_v14 = vmul.f32 0.0625, %v426_v56 }
 0x146   : > { %v631_v28 = vmul.f32 %v1276_v58, %v592_v40  ;;  %823 = vrsqrt.f32 %v534_v62 }
 0x147   : > { %v814_v18 = vpop.eup %813  ;;  %v535_v10 = vadd.f32 1e-05, %v503_v12  ;;  %v536_v60 = vadd.f32 1e-05, %v504_v14 }
 0x148   : > { %v816_v61 = vpop.eup %815  ;;  %v670_v44 = vadd.f32 %v1282_v6, %v631_v28  ;;  %v593_v22 = vmul.f32 %v814_v18, %v1092_v26  ;;  %v429_v23 = vpop.xlane.xlu1 %428 }
 0x149   : > { %v432_v0 = vpop.xlane.xlu0 %431  ;;  %v594_v16 = vmul.f32 %v816_v61, %v1085_v11  ;;  %825 = vrsqrt.f32 %v535_v10  ;;  %v505_v30 = vmul.f32 0.0625, %v429_v23 }
 0x14a   : > { %v506_v32 = vmul.f32 0.0625, %v432_v0  ;;  %702 = vst.msk [vmem:[%s1290_s25] sm:$0xff] %vm206_vm0, %v670_v44  ;;  %v632_v34 = vmul.f32 %v1276_v58, %v593_v22  ;;  %827 = vrsqrt.f32 %v536_v60 }
 0x14b   : > { %v818_v48 = vpop.eup %817  ;;  %v633_v38 = vmul.f32 %v1276_v58, %v594_v16  ;;  %v537_v39 = vadd.f32 1e-05, %v505_v30 }
 0x14c   : > { %v538_v42 = vadd.f32 1e-05, %v506_v32  ;;  %v820_v26 = vpop.eup %819  ;;  %v671_v20 = vadd.f32 %v1282_v6, %v632_v34  ;;  %v595_v11 = vmul.f32 %v818_v48, %v1095_v27  ;;  %v435_v46 = vpop.xlane.xlu1 %434 }
 0x14d   : > { %v438_v36 = vpop.xlane.xlu0 %437  ;;  %v672_v50 = vadd.f32 %v1282_v6, %v633_v38  ;;  %v596_v52 = vmul.f32 %v820_v26, %v1104_v2  ;;  %829 = vrsqrt.f32 %v537_v39  ;;  %v507_v54 = vmul.f32 0.0625, %v435_v46 }
 0x14e   : > { %703 = vst.msk [vmem:[%s1290_s25 + $0x8] sm:$0xff] %vm206_vm0, %v671_v20  ;;  %v634_v8 = vmul.f32 %v1276_v58, %v595_v11  ;;  %831 = vrsqrt.f32 %v538_v42  ;;  %v508_v24 = vmul.f32 0.0625, %v438_v36 }
 0x14f   : > { %v822_v62 = vpop.eup %821  ;;  %704 = vst.msk [vmem:[%s1290_s25 + $0x10] sm:$0xff] %vm206_vm0, %v672_v50  ;;  %v635_v27 = vmul.f32 %v1276_v58, %v596_v52  ;;  %v539_v40 = vadd.f32 1e-05, %v507_v54 }
 0x150   : > { %v824_v3 = vpop.eup %823  ;;  %v673_v56 = vadd.f32 %v1282_v6, %v634_v8  ;;  %v597_v2 = vmul.f32 %v822_v62, %v1107_v5  ;;  %v540_v12 = vadd.f32 1e-05, %v508_v24  ;;  %v441_v14 = vpop.xlane.xlu1 %440 }
 0x151   : > { %v444_v28 = vpop.xlane.xlu0 %443  ;;  %v674_v18 = vadd.f32 %v1282_v6, %v635_v27  ;;  %v598_v10 = vmul.f32 %v824_v3, %v1116_v55  ;;  %833 = vrsqrt.f32 %v539_v40  ;;  %v509_v60 = vmul.f32 0.0625, %v441_v14 }
 0x152   : > { %705 = vst.msk [vmem:[%s1290_s25 + $0x18] sm:$0xff] %vm206_vm0, %v673_v56  ;;  %v636_v61 = vmul.f32 %v1276_v58, %v597_v2  ;;  %835 = vrsqrt.f32 %v540_v12  ;;  %v510_v44 = vmul.f32 0.0625, %v444_v28 }
 0x153   : > { %v826_v22 = vpop.eup %825  ;;  %706 = vst.msk [vmem:[%s1290_s25 + $0x20] sm:$0xff] %vm206_vm0, %v674_v18  ;;  %v637_v5 = vmul.f32 %v1276_v58, %v598_v10  ;;  %v541_v23 = vadd.f32 1e-05, %v509_v60 }
 0x154   : > { %v828_v0 = vpop.eup %827  ;;  %v675_v16 = vadd.f32 %v1282_v6, %v636_v61  ;;  %v599_v55 = vmul.f32 %v826_v22, %v1119_v9  ;;  %v542_v30 = vadd.f32 1e-05, %v510_v44  ;;  %v447_v32 = vpop.xlane.xlu1 %446 }
 0x155   : > { %v450_v34 = vpop.xlane.xlu0 %449  ;;  %v676_v48 = vadd.f32 %v1282_v6, %v637_v5  ;;  %v600_v38 = vmul.f32 %v828_v0, %v1128_v7  ;;  %837 = vrsqrt.f32 %v541_v23  ;;  %v511_v39 = vmul.f32 0.0625, %v447_v32 }
 0x156   : > { %707 = vst.msk [vmem:[%s1290_s25 + $0x28] sm:$0xff] %vm206_vm0, %v675_v16  ;;  %v638_v42 = vmul.f32 %v1276_v58, %v599_v55  ;;  %839 = vrsqrt.f32 %v542_v30  ;;  %v512_v26 = vmul.f32 0.0625, %v450_v34 }
 0x157   : > { %v830_v20 = vpop.eup %829  ;;  %708 = vst.msk [vmem:[%s1290_s25 + $0x30] sm:$0xff] %vm206_vm0, %v676_v48  ;;  %v639_v9 = vmul.f32 %v1276_v58, %v600_v38  ;;  %v543_v11 = vadd.f32 1e-05, %v511_v39 }
 0x158   : > { %v832_v46 = vpop.eup %831  ;;  %v677_v36 = vadd.f32 %v1282_v6, %v638_v42  ;;  %v601_v7 = vmul.f32 %v830_v20, %v1131_v13  ;;  %v544_v50 = vadd.f32 1e-05, %v512_v26  ;;  %v453_v52 = vpop.xlane.xlu1 %452 }
 0x159   : > { %v456_v54 = vpop.xlane.xlu0 %455  ;;  %v678_v8 = vadd.f32 %v1282_v6, %v639_v9  ;;  %v602_v24 = vmul.f32 %v832_v46, %v1140_v1  ;;  %841 = vrsqrt.f32 %v543_v11  ;;  %v513_v62 = vmul.f32 0.0625, %v453_v52 }
 0x15a   : > { %709 = vst.msk [vmem:[%s1290_s25 + $0x38] sm:$0xff] %vm206_vm0, %v677_v36  ;;  %v640_v27 = vmul.f32 %v1276_v58, %v601_v7  ;;  %843 = vrsqrt.f32 %v544_v50  ;;  %v514_v40 = vmul.f32 0.0625, %v456_v54 }
 0x15b   : > { %v834_v3 = vpop.eup %833  ;;  %710 = vst.msk [vmem:[%s1290_s25 + $0x40] sm:$0xff] %vm206_vm0, %v678_v8  ;;  %v641_v13 = vmul.f32 %v1276_v58, %v602_v24  ;;  %v545_v56 = vadd.f32 1e-05, %v513_v62 }
 0x15c   : > { %v836_v2 = vpop.eup %835  ;;  %v679_v12 = vadd.f32 %v1282_v6, %v640_v27  ;;  %v603_v1 = vmul.f32 %v834_v3, %v1143_v17  ;;  %v546_v14 = vadd.f32 1e-05, %v514_v40  ;;  %v459_v28 = vpop.xlane.xlu1 %458 }
 0x15d   : > { %v462_v18 = vpop.xlane.xlu0 %461  ;;  %v680_v10 = vadd.f32 %v1282_v6, %v641_v13  ;;  %v604_v60 = vmul.f32 %v836_v2, %v1152_v43  ;;  %845 = vrsqrt.f32 %v545_v56  ;;  %v515_v61 = vmul.f32 0.0625, %v459_v28 }
 0x15e   : > { %711 = vst.msk [vmem:[%s1290_s25 + $0x48] sm:$0xff] %vm206_vm0, %v679_v12  ;;  %v642_v44 = vmul.f32 %v1276_v58, %v603_v1  ;;  %847 = vrsqrt.f32 %v546_v14  ;;  %v516_v22 = vmul.f32 0.0625, %v462_v18 }
 0x15f   : > { %v838_v5 = vpop.eup %837  ;;  %712 = vst.msk [vmem:[%s1290_s25 + $0x50] sm:$0xff] %vm206_vm0, %v680_v10  ;;  %v643_v17 = vmul.f32 %v1276_v58, %v604_v60  ;;  %v547_v23 = vadd.f32 1e-05, %v515_v61 }
 0x160   : > { %v840_v0 = vpop.eup %839  ;;  %v681_v16 = vadd.f32 %v1282_v6, %v642_v44  ;;  %v605_v43 = vmul.f32 %v838_v5, %v1155_v21  ;;  %v548_v55 = vadd.f32 1e-05, %v516_v22  ;;  %v465_v30 = vpop.xlane.xlu1 %464 }
 0x161   : > { %v468_v32 = vpop.xlane.xlu0 %467  ;;  %v682_v34 = vadd.f32 %v1282_v6, %v643_v17  ;;  %v606_v48 = vmul.f32 %v840_v0, %v1164_v59  ;;  %849 = vrsqrt.f32 %v547_v23  ;;  %v517_v38 = vmul.f32 0.0625, %v465_v30 }
 0x162   : > { %713 = vst.msk [vmem:[%s1290_s25 + $0x58] sm:$0xff] %vm206_vm0, %v681_v16  ;;  %v644_v39 = vmul.f32 %v1276_v58, %v605_v43  ;;  %851 = vrsqrt.f32 %v548_v55  ;;  %v518_v42 = vmul.f32 0.0625, %v468_v32 }
 0x163   : > { %v842_v26 = vpop.eup %841  ;;  %714 = vst.msk [vmem:[%s1290_s25 + $0x60] sm:$0xff] %vm206_vm0, %v682_v34  ;;  %v645_v21 = vmul.f32 %v1276_v58, %v606_v48  ;;  %v549_v20 = vadd.f32 1e-05, %v517_v38 }
 0x164   : > { %v844_v9 = vpop.eup %843  ;;  %v683_v11 = vadd.f32 %v1282_v6, %v644_v39  ;;  %v607_v59 = vmul.f32 %v842_v26, %v1167_v25  ;;  %v550_v46 = vadd.f32 1e-05, %v518_v42  ;;  %v471_v36 = vpop.xlane.xlu1 %470 }
 0x165   : > { %v474_v7 = vpop.xlane.xlu0 %473  ;;  %v684_v50 = vadd.f32 %v1282_v6, %v645_v21  ;;  %v608_v52 = vmul.f32 %v844_v9, %v1176_v15  ;;  %853 = vrsqrt.f32 %v549_v20  ;;  %v519_v54 = vmul.f32 0.0625, %v471_v36 }
 0x166   : > { %715 = vst.msk [vmem:[%s1290_s25 + $0x68] sm:$0xff] %vm206_vm0, %v683_v11  ;;  %v646_v8 = vmul.f32 %v1276_v58, %v607_v59  ;;  %855 = vrsqrt.f32 %v550_v46  ;;  %v520_v24 = vmul.f32 0.0625, %v474_v7 }
 0x167   : > { %v846_v62 = vpop.eup %845  ;;  %716 = vst.msk [vmem:[%s1290_s25 + $0x70] sm:$0xff] %vm206_vm0, %v684_v50  ;;  %v647_v25 = vmul.f32 %v1276_v58, %v608_v52  ;;  %v551_v27 = vadd.f32 1e-05, %v519_v54 }
 0x168   : > { %v848_v40 = vpop.eup %847  ;;  %v685_v3 = vadd.f32 %v1282_v6, %v646_v8  ;;  %v609_v15 = vmul.f32 %v846_v62, %v1179_v29  ;;  %v552_v13 = vadd.f32 1e-05, %v520_v24  ;;  %v477_v56 = vpop.xlane.xlu1 %476 }
 0x169   : > { %v480_v2 = vpop.xlane.xlu0 %479  ;;  %v686_v12 = vadd.f32 %v1282_v6, %v647_v25  ;;  %v610_v1 = vmul.f32 %v848_v40, %v1188_v31  ;;  %857 = vrsqrt.f32 %v551_v27  ;;  %v521_v14 = vmul.f32 0.0625, %v477_v56 }
 0x16a   : > { %717 = vst.msk [vmem:[%s1290_s25 + $0x78] sm:$0xff] %vm206_vm0, %v685_v3  ;;  %v648_v28 = vmul.f32 %v1276_v58, %v609_v15  ;;  %859 = vrsqrt.f32 %v552_v13  ;;  %v522_v18 = vmul.f32 0.0625, %v480_v2 }
 0x16b   : > { %v850_v10 = vpop.eup %849  ;;  %718 = vst.msk [vmem:[%s1290_s25 + $0x80] sm:$0xff] %vm206_vm0, %v686_v12  ;;  %v649_v29 = vmul.f32 %v1276_v58, %v610_v1  ;;  %v553_v60 = vadd.f32 1e-05, %v521_v14 }
 0x16c   : > { %v852_v61 = vpop.eup %851  ;;  %v687_v44 = vadd.f32 %v1282_v6, %v648_v28  ;;  %v611_v31 = vmul.f32 %v850_v10, %v1191_v33  ;;  %v554_v22 = vadd.f32 1e-05, %v522_v18  ;;  %v483_v5 = vpop.xlane.xlu1 %482 }
 0x16d   : > { %v486_v17 = vpop.xlane.xlu0 %485  ;;  %v688_v23 = vadd.f32 %v1282_v6, %v649_v29  ;;  %v612_v0 = vmul.f32 %v852_v61, %v1200_v47  ;;  %861 = vrsqrt.f32 %v553_v60  ;;  %v523_v16 = vmul.f32 0.0625, %v483_v5 }
 0x16e   : > { %719 = vst.msk [vmem:[%s1290_s25 + $0x88] sm:$0xff] %vm206_vm0, %v687_v44  ;;  %v650_v43 = vmul.f32 %v1276_v58, %v611_v31  ;;  %863 = vrsqrt.f32 %v554_v22  ;;  %v524_v55 = vmul.f32 0.0625, %v486_v17 }
 0x16f   : > { %v854_v30 = vpop.eup %853  ;;  %720 = vst.msk [vmem:[%s1290_s25 + $0x90] sm:$0xff] %vm206_vm0, %v688_v23  ;;  %v651_v33 = vmul.f32 %v1276_v58, %v612_v0  ;;  %v555_v32 = vadd.f32 1e-05, %v523_v16 }
 0x170   : > { %v856_v34 = vpop.eup %855  ;;  %v689_v48 = vadd.f32 %v1282_v6, %v650_v43  ;;  %v613_v47 = vmul.f32 %v854_v30, %v1203_v37  ;;  %v556_v38 = vadd.f32 1e-05, %v524_v55  ;;  %v489_v39 = vpop.xlane.xlu1 %488 }
 0x171   : > { %v492_v42 = vpop.xlane.xlu0 %491  ;;  %v690_v26 = vadd.f32 %v1282_v6, %v651_v33  ;;  %v614_v21 = vmul.f32 %v856_v34, %v1212_v63  ;;  %865 = vrsqrt.f32 %v555_v32  ;;  %v525_v20 = vmul.f32 0.0625, %v489_v39 }
 0x172   : > { %721 = vst.msk [vmem:[%s1290_s25 + $0x98] sm:$0xff] %vm206_vm0, %v689_v48  ;;  %v652_v9 = vmul.f32 %v1276_v58, %v613_v47  ;;  %867 = vrsqrt.f32 %v556_v38  ;;  %v526_v11 = vmul.f32 0.0625, %v492_v42 }
 0x173   : > { %v858_v59 = vpop.eup %857  ;;  %722 = vst.msk [vmem:[%s1290_s25 + $0xa0] sm:$0xff] %vm206_vm0, %v690_v26  ;;  %v653_v37 = vmul.f32 %v1276_v58, %v614_v21  ;;  %v557_v46 = vadd.f32 1e-05, %v525_v20 }
 0x174   : > { %v860_v36 = vpop.eup %859  ;;  %v691_v7 = vadd.f32 %v1282_v6, %v652_v9  ;;  %v615_v63 = vmul.f32 %v858_v59, %v1215_v41  ;;  %v558_v50 = vadd.f32 1e-05, %v526_v11  ;;  %v495_v52 = vpop.xlane.xlu1 %494 }
 0x175   : > { %v692_v54 = vadd.f32 %v1282_v6, %v653_v37  ;;  %v616_v8 = vmul.f32 %v860_v36, %v1224_v19  ;;  %869 = vrsqrt.f32 %v557_v46  ;;  %v527_v24 = vmul.f32 0.0625, %v495_v52 }
 0x176   : > { %723 = vst.msk [vmem:[%s1290_s25 + $0xa8] sm:$0xff] %vm206_vm0, %v691_v7  ;;  %v654_v62 = vmul.f32 %v1276_v58, %v615_v63  ;;  %871 = vrsqrt.f32 %v558_v50 }
 0x177   : > { %v862_v25 = vpop.eup %861  ;;  %724 = vst.msk [vmem:[%s1290_s25 + $0xb0] sm:$0xff] %vm206_vm0, %v692_v54  ;;  %v655_v41 = vmul.f32 %v1276_v58, %v616_v8  ;;  %v559_v27 = vadd.f32 1e-05, %v527_v24 }
 0x178   : > { %v864_v40 = vpop.eup %863  ;;  %v693_v3 = vadd.f32 %v1282_v6, %v654_v62  ;;  %v617_v19 = vmul.f32 %v862_v25, %v1227_v45 }
 0x179   : > { %v694_v15 = vadd.f32 %v1282_v6, %v655_v41  ;;  %v618_v13 = vmul.f32 %v864_v40, %v1236_v35  ;;  %873 = vrsqrt.f32 %v559_v27 }
 0x17a   : > { %725 = vst.msk [vmem:[%s1290_s25 + $0xb8] sm:$0xff] %vm206_vm0, %v693_v3  ;;  %v656_v56 = vmul.f32 %v1276_v58, %v617_v19 }
 0x17b   : > { %v866_v2 = vpop.eup %865  ;;  %726 = vst.msk [vmem:[%s1290_s25 + $0xc0] sm:$0xff] %vm206_vm0, %v694_v15  ;;  %v657_v12 = vmul.f32 %v1276_v58, %v618_v13 }
 0x17c   : > { %v868_v1 = vpop.eup %867  ;;  %v695_v14 = vadd.f32 %v1282_v6, %v656_v56  ;;  %v619_v45 = vmul.f32 %v866_v2, %v1239_v49 }
 0x17d   : > { %v696_v28 = vadd.f32 %v1282_v6, %v657_v12  ;;  %v620_v35 = vmul.f32 %v868_v1, %v1248_v51 }
 0x17e   : > { %727 = vst.msk [vmem:[%s1290_s25 + $0xc8] sm:$0xff] %vm206_vm0, %v695_v14  ;;  %v658_v18 = vmul.f32 %v1276_v58, %v619_v45 }
 0x17f   : > { %v870_v10 = vpop.eup %869  ;;  %728 = vst.msk [vmem:[%s1290_s25 + $0xd0] sm:$0xff] %vm206_vm0, %v696_v28  ;;  %v659_v29 = vmul.f32 %v1276_v58, %v620_v35 }
 0x180   : > { %v872_v60 = vpop.eup %871  ;;  %v697_v61 = vadd.f32 %v1282_v6, %v658_v18  ;;  %v621_v49 = vmul.f32 %v870_v10, %v1251_v53 }
 0x181   : > { %v698_v44 = vadd.f32 %v1282_v6, %v659_v29  ;;  %v622_v51 = vmul.f32 %v872_v60, %v1260_v4 }
 0x182   : > { %729 = vst.msk [vmem:[%s1290_s25 + $0xd8] sm:$0xff] %vm206_vm0, %v697_v61  ;;  %v660_v31 = vmul.f32 %v1276_v58, %v621_v49 }
 0x183   : > { %v874_v22 = vpop.eup %873  ;;  %730 = vst.msk [vmem:[%s1290_s25 + $0xe0] sm:$0xff] %vm206_vm0, %v698_v44  ;;  %v661_v5 = vmul.f32 %v1276_v58, %v622_v51 }
 0x184   : > { %v699_v17 = vadd.f32 %v1282_v6, %v660_v31  ;;  %v623_v23 = vmul.f32 %v874_v22, %v1263_v57 }
 0x185   : > { %v700_v0 = vadd.f32 %v1282_v6, %v661_v5 }
 0x186   : > { %731 = vst.msk [vmem:[%s1290_s25 + $0xe8] sm:$0xff] %vm206_vm0, %v699_v17  ;;  %v662_v53 = vmul.f32 %v1276_v58, %v623_v23 }
 0x187   : > { %732 = vst.msk [vmem:[%s1290_s25 + $0xf0] sm:$0xff] %vm206_vm0, %v700_v0 }
 0x188   : > { %v701_v4 = vadd.f32 %v1282_v6, %v662_v53 }
 0x18a   : > { %733 = vst.msk [vmem:[%s1290_s25 + $0xf8] sm:$0xff] %vm206_vm0, %v701_v4 }
 0x18b PF: > { %s13_s12 = sadd.s32 1, %s881_s12  }
 0x18c   : > { %p10_p4 = scmp.ge.s32.totalorder %s13_s12, 4  }
 0x18e   :  { %12 = sbr.rel (!%p10_p4) target bundleno = 1 (0x1), region = 62 }

// kernel: _lambda_.47
= control target key start
LH: loop header
LB: loop body
LE: loop exit
PB: predicated region body
PF: predicated region fallthrough
CT: control target
= control target key end

     0   :  { %s1128_s12 = smov 0   ;;  %s1130_s13 = smov 0   ;;  %s1382_s0 = inlined_call_operand.vmem [shape: bf16[512,16], index: 0, kind: input, shape index: {}]   ;;  %s1383_s1 = inlined_call_operand.vmem [shape: bf16[16,48], index: 1, kind: input, shape index: {}]   ;;  %s1384_s2 = inlined_call_operand.vmem [shape: f32[1,48], index: 2, kind: input, shape index: {}]   ;;  %s1385_s3 = inlined_call_operand.vmem [shape: f32[512,48], index: 3, kind: output, shape index: {}]  }
   0x1   :  { %s1132_s14 = smov 0  }
   0x2 LB: > { %s32_s15 = sadd.s32 1, %s1101_s13  ;;  %p947_p0 = scmp.ge.s32.totalorder %s1105_s14, 1  ;;  %s1105_s14 = sphi %s1132_s14, %s13_s14   ;;  %s1101_s13 = sphi %s1130_s13, %s1388_s13   ;;  %s1097_s12 = sphi %s1128_s12, %s1387_s12  }
   0x3   : > { %p34_p1 = scmp.ge.s32.totalorder %s32_s15, 2  ;;  %p188_p2 = scmp.lt.s32.totalorder %s1105_s14, 3 }
   0x5   : > { %s1390_s15 = smov (%p34_p1, %s32_s15), 0  ;;  %p189_p3 = pnand %p947_p0, %p188_p2 }
   0x6   : > { %v1066_v0 = vld [vmem:[%s1383_s1] sm:$0xff] (!%p189_p3)   ;;  %s948_s18 = sshll.u32 (!%p189_p3), %s1097_s12, 5  ;;  %vm264_vm0 = vcmask (!%p189_p3), 392192   ;;  %v1107_v1 = vmov (!%p189_p3), 0.0   ;;  %vm449_vm1 = vcmask (!%p189_p3), 130048  }
   0x7   : > { %192 = sbr.rel (%p189_p3) target bundleno = 274 (0x112), region = 32  ;;  %p1154_p4 = scmp.lt.s32.totalorder (!%p189_p3), %s948_s18, 63  ;;  %1005 = vmatprep.subr.bf16.mxu0 (!%p189_p3), %v1066_v0  ;;  %1039 = vmatprep.subr.bf16.mxu1 (!%p189_p3), %v1066_v0  ;;  %267 = vst.msk [vmem:[#allocation2 + $0x10] sm:$0xff] (!%p189_p3), %vm264_vm0, %v1107_v1  ;;  %265 = vst.msk [vmem:[#allocation2] sm:$0xff] (!%p189_p3), %vm264_vm0, %v1107_v1  ;;  %v1246_v45 = vld [vmem:[%s1384_s2] ss:$0 sm:$0xff] (!%p189_p3) }
   0x8   : > { %266 = vst.msk [vmem:[#allocation2 + $0x8] sm:$0xff] (!%p189_p3), %vm264_vm0, %v1107_v1  ;;  %268 = vst.msk [vmem:[#allocation2 + $0x18] sm:$0xff] (!%p189_p3), %vm264_vm0, %v1107_v1  ;;  %1006 = vmatpush3.bf16.msra.mxu0 (!%p189_p3), %v1066_v0  ;;  %1040 = vmatpush3.bf16.msra.mxu1 (!%p189_p3), %v1066_v0 }
   0x9   : > { %269 = vst.msk [vmem:[#allocation2 + $0x20] sm:$0xff] (!%p189_p3), %vm264_vm0, %v1107_v1  ;;  %270 = vst.msk [vmem:[#allocation2 + $0x28] sm:$0xff] (!%p189_p3), %vm264_vm0, %v1107_v1 }
   0xa   : > { %271 = vst.msk [vmem:[#allocation2 + $0x30] sm:$0xff] (!%p189_p3), %vm264_vm0, %v1107_v1  ;;  %272 = vst.msk [vmem:[#allocation2 + $0x38] sm:$0xff] (!%p189_p3), %vm264_vm0, %v1107_v1 }
   0xb   : > { %273 = vst.msk [vmem:[#allocation2 + $0x40] sm:$0xff] (!%p189_p3), %vm264_vm0, %v1107_v1  ;;  %274 = vst.msk [vmem:[#allocation2 + $0x48] sm:$0xff] (!%p189_p3), %vm264_vm0, %v1107_v1 }
   0xc   : > { %275 = vst.msk [vmem:[#allocation2 + $0x50] sm:$0xff] (!%p189_p3), %vm264_vm0, %v1107_v1  ;;  %276 = vst.msk [vmem:[#allocation2 + $0x58] sm:$0xff] (!%p189_p3), %vm264_vm0, %v1107_v1 }
   0xd   : > { %277 = vst.msk [vmem:[#allocation2 + $0x60] sm:$0xff] (!%p189_p3), %vm264_vm0, %v1107_v1  ;;  %278 = vst.msk [vmem:[#allocation2 + $0x68] sm:$0xff] (!%p189_p3), %vm264_vm0, %v1107_v1 }
   0xe   : > { %279 = vst.msk [vmem:[#allocation2 + $0x70] sm:$0xff] %vm264_vm0, %v1107_v1  ;;  %280 = vst.msk [vmem:[#allocation2 + $0x78] sm:$0xff] %vm264_vm0, %v1107_v1  ;;  %s1392_s18 = smov (!%p1154_p4, %s948_s18), 63  ;;  %v299_v18 = vld [vmem:[#allocation2 + $0x10] sm:$0xff]  ;;  %v297_v20 = vld [vmem:[#allocation2] sm:$0xff] }
   0xf   : > { %281 = vst.msk [vmem:[#allocation2 + $0x80] sm:$0xff] %vm264_vm0, %v1107_v1  ;;  %282 = vst.msk [vmem:[#allocation2 + $0x88] sm:$0xff] %vm264_vm0, %v1107_v1  ;;  %s949_s20 = sshll.u32 %s1392_s18, 2  ;;  %v300_v23 = vld [vmem:[#allocation2 + $0x18] sm:$0xff]  ;;  %v298_v28 = vld [vmem:[#allocation2 + $0x8] sm:$0xff]  ;;  %s951_s24 = sshll.u32 %s1392_s18, 3 }
  0x10   : > { %283 = vst.msk [vmem:[#allocation2 + $0x90] sm:$0xff] %vm264_vm0, %v1107_v1  ;;  %284 = vst.msk [vmem:[#allocation2 + $0x98] sm:$0xff] %vm264_vm0, %v1107_v1  ;;  %s1200_s23 = scalar_lea.vmem %s1382_s0, %s949_s20  ;;  %v301_v44 = vld [vmem:[#allocation2 + $0x20] sm:$0xff]  ;;  %v302_v53 = vld [vmem:[#allocation2 + $0x28] sm:$0xff]  ;;  %s1251_s29 = scalar_lea.vmem %s1385_s3, %s951_s24 }
  0x11   : > { %285 = vst.msk [vmem:[#allocation2 + $0xa0] sm:$0xff] %vm264_vm0, %v1107_v1  ;;  %286 = vst.msk [vmem:[#allocation2 + $0xa8] sm:$0xff] %vm264_vm0, %v1107_v1  ;;  %v1067_v2 = vld [vmem:[%s1200_s23] sm:$0xff]   ;;  %v1069_v4 = vld [vmem:[%s1200_s23 + $0x8] sm:$0xff]  }
  0x12   : > { %287 = vst.msk [vmem:[#allocation2 + $0xb0] sm:$0xff] %vm264_vm0, %v1107_v1  ;;  %288 = vst.msk [vmem:[#allocation2 + $0xb8] sm:$0xff] %vm264_vm0, %v1107_v1  ;;  %v1068_v3 = vld [vmem:[%s1200_s23 + $0x40] sm:$0xff]   ;;  %1007 = vmatprep.mubr.msk.bf16.mxu0 %vm449_vm1, %v1067_v2  ;;  %v1070_v5 = vld [vmem:[%s1200_s23 + $0x48] sm:$0xff]  }
  0x13   : > { %289 = vst.msk [vmem:[#allocation2 + $0xc0] sm:$0xff] %vm264_vm0, %v1107_v1  ;;  %290 = vst.msk [vmem:[#allocation2 + $0xc8] sm:$0xff] %vm264_vm0, %v1107_v1  ;;  %1023 = vmatprep.mubr.msk.bf16.mxu1 %vm449_vm1, %v1068_v3  ;;  %1008 = vmatmul.mubr.msk.bf16.vlgmr.msra.gmra.mrb[0].mxu0 %vm449_vm1, %v1069_v4  ;;  %v1071_v6 = vld [vmem:[%s1200_s23 + $0x10] sm:$0xff]   ;;  %v1073_v8 = vld [vmem:[%s1200_s23 + $0x18] sm:$0xff]  }
  0x14   : > { %291 = vst.msk [vmem:[#allocation2 + $0xd0] sm:$0xff] %vm264_vm0, %v1107_v1  ;;  %292 = vst.msk [vmem:[#allocation2 + $0xd8] sm:$0xff] %vm264_vm0, %v1107_v1  ;;  %1024 = vmatmul.mubr.msk.bf16.vlgmr.msra.gmra.mrb[0].mxu1 %vm449_vm1, %v1070_v5  ;;  %v1072_v7 = vld [vmem:[%s1200_s23 + $0x50] sm:$0xff]   ;;  %1011 = vmatprep.mubr.msk.bf16.mxu0 %vm449_vm1, %v1071_v6  ;;  %v1074_v9 = vld [vmem:[%s1200_s23 + $0x58] sm:$0xff]  }
  0x15   : > { %293 = vst.msk [vmem:[#allocation2 + $0xe0] sm:$0xff] %vm264_vm0, %v1107_v1  ;;  %294 = vst.msk [vmem:[#allocation2 + $0xe8] sm:$0xff] %vm264_vm0, %v1107_v1  ;;  %1027 = vmatprep.mubr.msk.bf16.mxu1 %vm449_vm1, %v1072_v7  ;;  %v1075_v10 = vld [vmem:[%s1200_s23 + $0x20] sm:$0xff]   ;;  %v1077_v12 = vld [vmem:[%s1200_s23 + $0x28] sm:$0xff]  }
  0x16   : > { %295 = vst.msk [vmem:[#allocation2 + $0xf0] sm:$0xff] %vm264_vm0, %v1107_v1  ;;  %296 = vst.msk [vmem:[#allocation2 + $0xf8] sm:$0xff] %vm264_vm0, %v1107_v1  ;;  %v1076_v11 = vld [vmem:[%s1200_s23 + $0x60] sm:$0xff]   ;;  %v1078_v13 = vld [vmem:[%s1200_s23 + $0x68] sm:$0xff]  }
  0x17   : > { %v1079_v14 = vld [vmem:[%s1200_s23 + $0x30] sm:$0xff]   ;;  %v1081_v16 = vld [vmem:[%s1200_s23 + $0x38] sm:$0xff]   ;;  %v313_v22 = vld [vmem:[#allocation2 + $0x80] sm:$0xff] }
  0x18   : > { %v1080_v15 = vld [vmem:[%s1200_s23 + $0x70] sm:$0xff]   ;;  %v1082_v17 = vld [vmem:[%s1200_s23 + $0x78] sm:$0xff]   ;;  %v314_v33 = vld [vmem:[#allocation2 + $0x88] sm:$0xff] }
  0x19   : > { %v315_v19 = vld [vmem:[#allocation2 + $0x90] sm:$0xff]  ;;  %v316_v27 = vld [vmem:[#allocation2 + $0x98] sm:$0xff]  ;;  %v317_v47 = vld [vmem:[#allocation2 + $0xa0] sm:$0xff] }
  0x1a   : > { %v303_v42 = vld [vmem:[#allocation2 + $0x30] sm:$0xff]  ;;  %v304_v48 = vld [vmem:[#allocation2 + $0x38] sm:$0xff]  ;;  %v318_v59 = vld [vmem:[#allocation2 + $0xa8] sm:$0xff] }
  0x1b   : > { %1012 = vmatmul.mubr.msk.bf16.gmra.mrb[4].mxu0 %vm449_vm1, %v1073_v8  ;;  %v319_v43 = vld [vmem:[#allocation2 + $0xb0] sm:$0xff]  ;;  %v320_v52 = vld [vmem:[#allocation2 + $0xb8] sm:$0xff] }
  0x1c   : > { %1028 = vmatmul.mubr.msk.bf16.gmra.mrb[4].mxu1 %vm449_vm1, %v1074_v9  ;;  %1015 = vmatprep.mubr.msk.bf16.mxu0 %vm449_vm1, %v1075_v10 }
  0x1d   : > { %1031 = vmatprep.mubr.msk.bf16.mxu1 %vm449_vm1, %v1076_v11 }
  0x23   : > { %1016 = vmatmul.mubr.msk.bf16.gmra.mrb[8].mxu0 %vm449_vm1, %v1077_v12 }
  0x24   : > { %1032 = vmatmul.mubr.msk.bf16.gmra.mrb[8].mxu1 %vm449_vm1, %v1078_v13  ;;  %1019 = vmatprep.mubr.msk.bf16.mxu0 %vm449_vm1, %v1079_v14 }
  0x25   : > { %1035 = vmatprep.mubr.msk.bf16.mxu1 %vm449_vm1, %v1080_v15 }
  0x2b   : > { %1020 = vmatmul.mubr.msk.bf16.gmra.mrb[12].mxu0 %vm449_vm1, %v1081_v16 }
  0x2c   : > { %1036 = vmatmul.mubr.msk.bf16.gmra.mrb[12].mxu1 %vm449_vm1, %v1082_v17 }
  0xe6   : > { %v1009_v21 = vpop.f32.mrb[0].mxu0 }
  0xe7   : > { %v661_v24 = vadd.f32 %v1009_v21, %v299_v18  ;;  %v1025_v25 = vpop.f32.mrb[0].mxu1  ;;  %v532_v26 = vpop.f32.mrb[1].mxu0  ;;  %v307_v18 = vld [vmem:[#allocation2 + $0x50] sm:$0xff]  ;;  %v305_v21 = vld [vmem:[#allocation2 + $0x40] sm:$0xff] }
  0xe8   : > { %v677_v29 = vadd.f32 %v1025_v25, %v315_v19  ;;  %v659_v30 = vadd.f32 %v532_v26, %v297_v20  ;;  %v596_v31 = vpop.f32.mrb[1].mxu1  ;;  %v1010_v32 = vpop.f32.mrb[2].mxu0  ;;  %v323_v20 = vld [vmem:[#allocation2 + $0xd0] sm:$0xff] }
  0xe9   : > { %694 = vst.msk [vmem:[#allocation2 + $0x10] sm:$0xff] %vm264_vm0, %v661_v24  ;;  %v675_v34 = vadd.f32 %v596_v31, %v313_v22  ;;  %v662_v35 = vadd.f32 %v1010_v32, %v300_v23  ;;  %v1026_v36 = vpop.f32.mrb[2].mxu1  ;;  %v535_v37 = vpop.f32.mrb[3].mxu0  ;;  %v321_v23 = vld [vmem:[#allocation2 + $0xc0] sm:$0xff]  ;;  %v308_v24 = vld [vmem:[#allocation2 + $0x58] sm:$0xff] }
  0xea   : > { %710 = vst.msk [vmem:[#allocation2 + $0x90] sm:$0xff] %vm264_vm0, %v677_v29  ;;  %692 = vst.msk [vmem:[#allocation2] sm:$0xff] %vm264_vm0, %v659_v30  ;;  %v678_v38 = vadd.f32 %v1026_v36, %v316_v27  ;;  %v660_v39 = vadd.f32 %v535_v37, %v298_v28  ;;  %v599_v40 = vpop.f32.mrb[3].mxu1  ;;  %v324_v28 = vld [vmem:[#allocation2 + $0xd8] sm:$0xff]  ;;  %v306_v29 = vld [vmem:[#allocation2 + $0x48] sm:$0xff] }
  0xeb   : > { %708 = vst.msk [vmem:[#allocation2 + $0x80] sm:$0xff] %vm264_vm0, %v675_v34  ;;  %695 = vst.msk [vmem:[#allocation2 + $0x18] sm:$0xff] %vm264_vm0, %v662_v35  ;;  %v676_v41 = vadd.f32 %v599_v40, %v314_v33  ;;  %v322_v35 = vld [vmem:[#allocation2 + $0xc8] sm:$0xff] }
  0xec   : > { %711 = vst.msk [vmem:[#allocation2 + $0x98] sm:$0xff] %vm264_vm0, %v678_v38  ;;  %693 = vst.msk [vmem:[#allocation2 + $0x8] sm:$0xff] %vm264_vm0, %v660_v39 }
  0xed   : > { %709 = vst.msk [vmem:[#allocation2 + $0x88] sm:$0xff] %vm264_vm0, %v676_v41 }
  0xee   : > { %v1013_v46 = vpop.f32.mrb[4].mxu0 }
  0xef   : > { %v665_v49 = vadd.f32 %v1013_v46, %v303_v42  ;;  %v1029_v50 = vpop.f32.mrb[4].mxu1  ;;  %v548_v51 = vpop.f32.mrb[5].mxu0 }
  0xf0   : > { %v729_v54 = vld [vmem:[#allocation2 + $0x10] sm:$0xff]  ;;  %v681_v55 = vadd.f32 %v1029_v50, %v319_v43  ;;  %v663_v56 = vadd.f32 %v548_v51, %v301_v44  ;;  %v612_v57 = vpop.f32.mrb[5].mxu1  ;;  %v1014_v58 = vpop.f32.mrb[6].mxu0 }
  0xf1   : > { %v768_v60 = vadd.f32 %v1246_v45, %v729_v54  ;;  %v745_v61 = vld [vmem:[#allocation2 + $0x90] sm:$0xff]  ;;  %v727_v62 = vld [vmem:[#allocation2] sm:$0xff]  ;;  %698 = vst.msk [vmem:[#allocation2 + $0x30] sm:$0xff] %vm264_vm0, %v665_v49  ;;  %v679_v63 = vadd.f32 %v612_v57, %v317_v47  ;;  %v666_v0 = vadd.f32 %v1014_v58, %v304_v48  ;;  %v1030_v1 = vpop.f32.mrb[6].mxu1  ;;  %v551_v2 = vpop.f32.mrb[7].mxu0 }
  0xf2   : > { %v784_v3 = vadd.f32 %v1246_v45, %v745_v61  ;;  %v766_v4 = vadd.f32 %v1246_v45, %v727_v62  ;;  %v743_v5 = vld [vmem:[#allocation2 + $0x80] sm:$0xff]  ;;  %v730_v6 = vld [vmem:[#allocation2 + $0x18] sm:$0xff]  ;;  %714 = vst.msk [vmem:[#allocation2 + $0xb0] sm:$0xff] %vm264_vm0, %v681_v55  ;;  %696 = vst.msk [vmem:[#allocation2 + $0x20] sm:$0xff] %vm264_vm0, %v663_v56  ;;  %v682_v7 = vadd.f32 %v1030_v1, %v320_v52  ;;  %v615_v9 = vpop.f32.mrb[7].mxu1 }
  0xf3   : > { %v664_v8 = vadd.f32 %v551_v2, %v302_v53  ;;  %800 = vst.msk [vmem:[%s1251_s29 + $0x10] sm:$0xff] %vm264_vm0, %v768_v60  ;;  %v782_v10 = vadd.f32 %v1246_v45, %v743_v5  ;;  %v769_v11 = vadd.f32 %v1246_v45, %v730_v6  ;;  %v746_v12 = vld [vmem:[#allocation2 + $0x98] sm:$0xff]  ;;  %v728_v13 = vld [vmem:[#allocation2 + $0x8] sm:$0xff]  ;;  %712 = vst.msk [vmem:[#allocation2 + $0xa0] sm:$0xff] %vm264_vm0, %v679_v63 }
  0xf4   : > { %699 = vst.msk [vmem:[#allocation2 + $0x38] sm:$0xff] %vm264_vm0, %v666_v0  ;;  %v680_v14 = vadd.f32 %v615_v9, %v318_v59  ;;  %816 = vst.msk [vmem:[%s1251_s29 + $0x90] sm:$0xff] %vm264_vm0, %v784_v3  ;;  %v785_v15 = vadd.f32 %v1246_v45, %v746_v12  ;;  %v767_v16 = vadd.f32 %v1246_v45, %v728_v13  ;;  %v744_v17 = vld [vmem:[#allocation2 + $0x88] sm:$0xff]  ;;  %v311_v59 = vld [vmem:[#allocation2 + $0x70] sm:$0xff] }
  0xf5   : > { %798 = vst.msk [vmem:[%s1251_s29] sm:$0xff] %vm264_vm0, %v766_v4  ;;  %715 = vst.msk [vmem:[#allocation2 + $0xb8] sm:$0xff] %vm264_vm0, %v682_v7  ;;  %v783_v19 = vadd.f32 %v1246_v45, %v744_v17  ;;  %v327_v61 = vld [vmem:[#allocation2 + $0xf0] sm:$0xff]  ;;  %v309_v62 = vld [vmem:[#allocation2 + $0x60] sm:$0xff] }
  0xf6   : > { %697 = vst.msk [vmem:[#allocation2 + $0x28] sm:$0xff] %vm264_vm0, %v664_v8  ;;  %814 = vst.msk [vmem:[%s1251_s29 + $0x80] sm:$0xff] %vm264_vm0, %v782_v10  ;;  %v1017_v22 = vpop.f32.mrb[8].mxu0  ;;  %v325_v0 = vld [vmem:[#allocation2 + $0xe0] sm:$0xff]  ;;  %v312_v1 = vld [vmem:[#allocation2 + $0x78] sm:$0xff] }
  0xf7   : > { %801 = vst.msk [vmem:[%s1251_s29 + $0x18] sm:$0xff] %vm264_vm0, %v769_v11  ;;  %713 = vst.msk [vmem:[#allocation2 + $0xa8] sm:$0xff] %vm264_vm0, %v680_v14  ;;  %v669_v25 = vadd.f32 %v1017_v22, %v307_v18  ;;  %v1033_v26 = vpop.f32.mrb[8].mxu1  ;;  %v564_v27 = vpop.f32.mrb[9].mxu0  ;;  %v328_v5 = vld [vmem:[#allocation2 + $0xf8] sm:$0xff]  ;;  %v310_v6 = vld [vmem:[#allocation2 + $0x68] sm:$0xff] }
  0xf8   : > { %817 = vst.msk [vmem:[%s1251_s29 + $0x98] sm:$0xff] %vm264_vm0, %v785_v15  ;;  %799 = vst.msk [vmem:[%s1251_s29 + $0x8] sm:$0xff] %vm264_vm0, %v767_v16  ;;  %v733_v30 = vld [vmem:[#allocation2 + $0x30] sm:$0xff]  ;;  %v685_v31 = vadd.f32 %v1033_v26, %v323_v20  ;;  %v667_v32 = vadd.f32 %v564_v27, %v305_v21  ;;  %v628_v33 = vpop.f32.mrb[9].mxu1  ;;  %v1018_v34 = vpop.f32.mrb[10].mxu0  ;;  %v326_v12 = vld [vmem:[#allocation2 + $0xe8] sm:$0xff] }
  0xf9   : > { %815 = vst.msk [vmem:[%s1251_s29 + $0x88] sm:$0xff] %vm264_vm0, %v783_v19  ;;  %v772_v36 = vadd.f32 %v1246_v45, %v733_v30  ;;  %v749_v37 = vld [vmem:[#allocation2 + $0xb0] sm:$0xff]  ;;  %v731_v38 = vld [vmem:[#allocation2 + $0x20] sm:$0xff]  ;;  %702 = vst.msk [vmem:[#allocation2 + $0x50] sm:$0xff] %vm264_vm0, %v669_v25  ;;  %v683_v39 = vadd.f32 %v628_v33, %v321_v23  ;;  %v670_v40 = vadd.f32 %v1018_v34, %v308_v24  ;;  %v1034_v41 = vpop.f32.mrb[10].mxu1  ;;  %v567_v42 = vpop.f32.mrb[11].mxu0 }
  0xfa   : > { %v788_v43 = vadd.f32 %v1246_v45, %v749_v37  ;;  %v770_v44 = vadd.f32 %v1246_v45, %v731_v38  ;;  %v747_v46 = vld [vmem:[#allocation2 + $0xa0] sm:$0xff]  ;;  %718 = vst.msk [vmem:[#allocation2 + $0xd0] sm:$0xff] %vm264_vm0, %v685_v31  ;;  %700 = vst.msk [vmem:[#allocation2 + $0x40] sm:$0xff] %vm264_vm0, %v667_v32  ;;  %v686_v48 = vadd.f32 %v1034_v41, %v324_v28  ;;  %v631_v50 = vpop.f32.mrb[11].mxu1 }
  0xfb   : > { %v734_v47 = vld [vmem:[#allocation2 + $0x38] sm:$0xff]  ;;  %v668_v49 = vadd.f32 %v567_v42, %v306_v29  ;;  %804 = vst.msk [vmem:[%s1251_s29 + $0x30] sm:$0xff] %vm264_vm0, %v772_v36  ;;  %v786_v51 = vadd.f32 %v1246_v45, %v747_v46  ;;  %716 = vst.msk [vmem:[#allocation2 + $0xc0] sm:$0xff] %vm264_vm0, %v683_v39  ;;  %v684_v55 = vadd.f32 %v631_v50, %v322_v35 }
  0xfc   : > { %v773_v52 = vadd.f32 %v1246_v45, %v734_v47  ;;  %v750_v53 = vld [vmem:[#allocation2 + $0xb8] sm:$0xff]  ;;  %703 = vst.msk [vmem:[#allocation2 + $0x58] sm:$0xff] %vm264_vm0, %v670_v40  ;;  %820 = vst.msk [vmem:[%s1251_s29 + $0xb0] sm:$0xff] %vm264_vm0, %v788_v43 }
  0xfd   : > { %v732_v54 = vld [vmem:[#allocation2 + $0x28] sm:$0xff]  ;;  %802 = vst.msk [vmem:[%s1251_s29 + $0x20] sm:$0xff] %vm264_vm0, %v770_v44  ;;  %v789_v56 = vadd.f32 %v1246_v45, %v750_v53  ;;  %719 = vst.msk [vmem:[#allocation2 + $0xd8] sm:$0xff] %vm264_vm0, %v686_v48 }
  0xfe   : > { %v771_v57 = vadd.f32 %v1246_v45, %v732_v54  ;;  %v748_v58 = vld [vmem:[#allocation2 + $0xa8] sm:$0xff]  ;;  %701 = vst.msk [vmem:[#allocation2 + $0x48] sm:$0xff] %vm264_vm0, %v668_v49  ;;  %818 = vst.msk [vmem:[%s1251_s29 + $0xa0] sm:$0xff] %vm264_vm0, %v786_v51  ;;  %v1021_v63 = vpop.f32.mrb[12].mxu0 }
  0xff   : > { %805 = vst.msk [vmem:[%s1251_s29 + $0x38] sm:$0xff] %vm264_vm0, %v773_v52  ;;  %v787_v60 = vadd.f32 %v1246_v45, %v748_v58  ;;  %717 = vst.msk [vmem:[#allocation2 + $0xc8] sm:$0xff] %vm264_vm0, %v684_v55  ;;  %v673_v2 = vadd.f32 %v1021_v63, %v311_v59  ;;  %v1037_v3 = vpop.f32.mrb[12].mxu1  ;;  %v580_v4 = vpop.f32.mrb[13].mxu0 }
 0x100   : > { %821 = vst.msk [vmem:[%s1251_s29 + $0xb8] sm:$0xff] %vm264_vm0, %v789_v56  ;;  %803 = vst.msk [vmem:[%s1251_s29 + $0x28] sm:$0xff] %vm264_vm0, %v771_v57  ;;  %v737_v7 = vld [vmem:[#allocation2 + $0x50] sm:$0xff]  ;;  %v689_v8 = vadd.f32 %v1037_v3, %v327_v61  ;;  %v671_v9 = vadd.f32 %v580_v4, %v309_v62  ;;  %v644_v10 = vpop.f32.mrb[13].mxu1  ;;  %v1022_v11 = vpop.f32.mrb[14].mxu0 }
 0x101   : > { %819 = vst.msk [vmem:[%s1251_s29 + $0xa8] sm:$0xff] %vm264_vm0, %v787_v60  ;;  %v776_v13 = vadd.f32 %v1246_v45, %v737_v7  ;;  %v753_v14 = vld [vmem:[#allocation2 + $0xd0] sm:$0xff]  ;;  %v735_v15 = vld [vmem:[#allocation2 + $0x40] sm:$0xff]  ;;  %706 = vst.msk [vmem:[#allocation2 + $0x70] sm:$0xff] %vm264_vm0, %v673_v2  ;;  %v687_v16 = vadd.f32 %v644_v10, %v325_v0  ;;  %v674_v17 = vadd.f32 %v1022_v11, %v312_v1  ;;  %v1038_v18 = vpop.f32.mrb[14].mxu1  ;;  %v583_v19 = vpop.f32.mrb[15].mxu0 }
 0x102   : > { %v792_v20 = vadd.f32 %v1246_v45, %v753_v14  ;;  %v774_v21 = vadd.f32 %v1246_v45, %v735_v15  ;;  %v751_v22 = vld [vmem:[#allocation2 + $0xc0] sm:$0xff]  ;;  %722 = vst.msk [vmem:[#allocation2 + $0xf0] sm:$0xff] %vm264_vm0, %v689_v8  ;;  %704 = vst.msk [vmem:[#allocation2 + $0x60] sm:$0xff] %vm264_vm0, %v671_v9  ;;  %v690_v24 = vadd.f32 %v1038_v18, %v328_v5  ;;  %v647_v26 = vpop.f32.mrb[15].mxu1 }
 0x103   : > { %v738_v23 = vld [vmem:[#allocation2 + $0x58] sm:$0xff]  ;;  %v672_v25 = vadd.f32 %v583_v19, %v310_v6  ;;  %808 = vst.msk [vmem:[%s1251_s29 + $0x50] sm:$0xff] %vm264_vm0, %v776_v13  ;;  %v790_v27 = vadd.f32 %v1246_v45, %v751_v22  ;;  %720 = vst.msk [vmem:[#allocation2 + $0xe0] sm:$0xff] %vm264_vm0, %v687_v16  ;;  %v688_v31 = vadd.f32 %v647_v26, %v326_v12 }
 0x104   : > { %v777_v28 = vadd.f32 %v1246_v45, %v738_v23  ;;  %v754_v29 = vld [vmem:[#allocation2 + $0xd8] sm:$0xff]  ;;  %707 = vst.msk [vmem:[#allocation2 + $0x78] sm:$0xff] %vm264_vm0, %v674_v17  ;;  %824 = vst.msk [vmem:[%s1251_s29 + $0xd0] sm:$0xff] %vm264_vm0, %v792_v20 }
 0x105   : > { %v736_v30 = vld [vmem:[#allocation2 + $0x48] sm:$0xff]  ;;  %806 = vst.msk [vmem:[%s1251_s29 + $0x40] sm:$0xff] %vm264_vm0, %v774_v21  ;;  %v793_v32 = vadd.f32 %v1246_v45, %v754_v29  ;;  %723 = vst.msk [vmem:[#allocation2 + $0xf8] sm:$0xff] %vm264_vm0, %v690_v24 }
 0x106   : > { %v775_v33 = vadd.f32 %v1246_v45, %v736_v30  ;;  %v752_v34 = vld [vmem:[#allocation2 + $0xc8] sm:$0xff]  ;;  %705 = vst.msk [vmem:[#allocation2 + $0x68] sm:$0xff] %vm264_vm0, %v672_v25  ;;  %822 = vst.msk [vmem:[%s1251_s29 + $0xc0] sm:$0xff] %vm264_vm0, %v790_v27 }
 0x107   : > { %809 = vst.msk [vmem:[%s1251_s29 + $0x58] sm:$0xff] %vm264_vm0, %v777_v28  ;;  %v791_v35 = vadd.f32 %v1246_v45, %v752_v34  ;;  %721 = vst.msk [vmem:[#allocation2 + $0xe8] sm:$0xff] %vm264_vm0, %v688_v31 }
 0x108   : > { %825 = vst.msk [vmem:[%s1251_s29 + $0xd8] sm:$0xff] %vm264_vm0, %v793_v32  ;;  %807 = vst.msk [vmem:[%s1251_s29 + $0x48] sm:$0xff] %vm264_vm0, %v775_v33  ;;  %v741_v36 = vld [vmem:[#allocation2 + $0x70] sm:$0xff] }
 0x109   : > { %823 = vst.msk [vmem:[%s1251_s29 + $0xc8] sm:$0xff] %vm264_vm0, %v791_v35  ;;  %v780_v37 = vadd.f32 %v1246_v45, %v741_v36  ;;  %v757_v38 = vld [vmem:[#allocation2 + $0xf0] sm:$0xff]  ;;  %v739_v39 = vld [vmem:[#allocation2 + $0x60] sm:$0xff] }
 0x10a   : > { %v796_v40 = vadd.f32 %v1246_v45, %v757_v38  ;;  %v778_v41 = vadd.f32 %v1246_v45, %v739_v39  ;;  %v755_v42 = vld [vmem:[#allocation2 + $0xe0] sm:$0xff] }
 0x10b   : > { %v742_v43 = vld [vmem:[#allocation2 + $0x78] sm:$0xff]  ;;  %812 = vst.msk [vmem:[%s1251_s29 + $0x70] sm:$0xff] %vm264_vm0, %v780_v37  ;;  %v794_v44 = vadd.f32 %v1246_v45, %v755_v42 }
 0x10c   : > { %v781_v46 = vadd.f32 %v1246_v45, %v742_v43  ;;  %v758_v47 = vld [vmem:[#allocation2 + $0xf8] sm:$0xff]  ;;  %828 = vst.msk [vmem:[%s1251_s29 + $0xf0] sm:$0xff] %vm264_vm0, %v796_v40  ;;  %810 = vst.msk [vmem:[%s1251_s29 + $0x60] sm:$0xff] %vm264_vm0, %v778_v41 }
 0x10d   : > { %v740_v48 = vld [vmem:[#allocation2 + $0x68] sm:$0xff]  ;;  %v797_v49 = vadd.f32 %v1246_v45, %v758_v47  ;;  %826 = vst.msk [vmem:[%s1251_s29 + $0xe0] sm:$0xff] %vm264_vm0, %v794_v44 }
 0x10e   : > { %v779_v50 = vadd.f32 %v1246_v45, %v740_v48  ;;  %v756_v51 = vld [vmem:[#allocation2 + $0xe8] sm:$0xff]  ;;  %813 = vst.msk [vmem:[%s1251_s29 + $0x78] sm:$0xff] %vm264_vm0, %v781_v46 }
 0x10f   : > { %v795_v52 = vadd.f32 %v1246_v45, %v756_v51  ;;  %829 = vst.msk [vmem:[%s1251_s29 + $0xf8] sm:$0xff] %vm264_vm0, %v797_v49 }
 0x110   : > { %811 = vst.msk [vmem:[%s1251_s29 + $0x68] sm:$0xff] %vm264_vm0, %v779_v50 }
 0x111   : > { %827 = vst.msk [vmem:[%s1251_s29 + $0xe8] sm:$0xff] %vm264_vm0, %v795_v52 }
 0x112 PF: > { %s13_s14 = sadd.s32 1, %s1105_s14   ;;  %s1387_s12 = smov %s1101_s13 }
 0x113   : > { %p10_p5 = scmp.ge.s32.totalorder %s13_s14, 4   ;;  %s1388_s13 = smov %s1390_s15 }
 0x115   :  { %12 = sbr.rel (!%p10_p5) target bundleno = 2 (0x2), region = 76 }

// kernel: _lambda_.49
= control target key start
LH: loop header
LB: loop body
LE: loop exit
PB: predicated region body
PF: predicated region fallthrough
CT: control target
= control target key end

     0   :  { %s1127_s12 = smov 0   ;;  %s1129_s13 = smov 0   ;;  %s1363_s0 = inlined_call_operand.vmem [shape: bf16[512,16], index: 0, kind: input, shape index: {}]   ;;  %s1364_s1 = inlined_call_operand.vmem [shape: bf16[16,16], index: 1, kind: input, shape index: {}]   ;;  %s1365_s2 = inlined_call_operand.vmem [shape: f32[1,16], index: 2, kind: input, shape index: {}]   ;;  %s1366_s3 = inlined_call_operand.vmem [shape: f32[512,16], index: 3, kind: output, shape index: {}]  }
   0x1   :  { %s1131_s14 = smov 0  }
   0x2 LB: > { %s32_s15 = sadd.s32 1, %s1100_s13  ;;  %p946_p0 = scmp.ge.s32.totalorder %s1104_s14, 1  ;;  %s1104_s14 = sphi %s1131_s14, %s13_s14   ;;  %s1100_s13 = sphi %s1129_s13, %s1369_s13   ;;  %s1096_s12 = sphi %s1127_s12, %s1368_s12  }
   0x3   : > { %p34_p1 = scmp.ge.s32.totalorder %s32_s15, 2  ;;  %p188_p2 = scmp.lt.s32.totalorder %s1104_s14, 3 }
   0x5   : > { %s1371_s15 = smov (%p34_p1, %s32_s15), 0  ;;  %p189_p3 = pnand %p946_p0, %p188_p2 }
   0x6   : > { %v1065_v0 = vld [vmem:[%s1364_s1] sm:$0xff] (!%p189_p3)   ;;  %s947_s18 = sshll.u32 (!%p189_p3), %s1096_s12, 5  ;;  %vm264_vm0 = vcmask (!%p189_p3), 130048   ;;  %v1106_v1 = vmov (!%p189_p3), 0.0  }
   0x7   : > { %192 = sbr.rel (%p189_p3) target bundleno = 274 (0x112), region = 32  ;;  %p1153_p4 = scmp.lt.s32.totalorder (!%p189_p3), %s947_s18, 63  ;;  %1004 = vmatprep.subr.bf16.mxu0 (!%p189_p3), %v1065_v0  ;;  %1038 = vmatprep.subr.bf16.mxu1 (!%p189_p3), %v1065_v0  ;;  %267 = vst.msk [vmem:[#allocation2 + $0x10] sm:$0xff] (!%p189_p3), %vm264_vm0, %v1106_v1  ;;  %265 = vst.msk [vmem:[#allocation2] sm:$0xff] (!%p189_p3), %vm264_vm0, %v1106_v1  ;;  %v1227_v45 = vld [vmem:[%s1365_s2] ss:$0 sm:$0xff] (!%p189_p3) }
   0x8   : > { %266 = vst.msk [vmem:[#allocation2 + $0x8] sm:$0xff] (!%p189_p3), %vm264_vm0, %v1106_v1  ;;  %268 = vst.msk [vmem:[#allocation2 + $0x18] sm:$0xff] (!%p189_p3), %vm264_vm0, %v1106_v1  ;;  %1005 = vmatpush3.bf16.msra.mxu0 (!%p189_p3), %v1065_v0  ;;  %1039 = vmatpush3.bf16.msra.mxu1 (!%p189_p3), %v1065_v0 }
   0x9   : > { %269 = vst.msk [vmem:[#allocation2 + $0x20] sm:$0xff] (!%p189_p3), %vm264_vm0, %v1106_v1  ;;  %270 = vst.msk [vmem:[#allocation2 + $0x28] sm:$0xff] (!%p189_p3), %vm264_vm0, %v1106_v1 }
   0xa   : > { %271 = vst.msk [vmem:[#allocation2 + $0x30] sm:$0xff] (!%p189_p3), %vm264_vm0, %v1106_v1  ;;  %272 = vst.msk [vmem:[#allocation2 + $0x38] sm:$0xff] (!%p189_p3), %vm264_vm0, %v1106_v1 }
   0xb   : > { %273 = vst.msk [vmem:[#allocation2 + $0x40] sm:$0xff] (!%p189_p3), %vm264_vm0, %v1106_v1  ;;  %274 = vst.msk [vmem:[#allocation2 + $0x48] sm:$0xff] (!%p189_p3), %vm264_vm0, %v1106_v1 }
   0xc   : > { %275 = vst.msk [vmem:[#allocation2 + $0x50] sm:$0xff] (!%p189_p3), %vm264_vm0, %v1106_v1  ;;  %276 = vst.msk [vmem:[#allocation2 + $0x58] sm:$0xff] (!%p189_p3), %vm264_vm0, %v1106_v1 }
   0xd   : > { %277 = vst.msk [vmem:[#allocation2 + $0x60] sm:$0xff] (!%p189_p3), %vm264_vm0, %v1106_v1  ;;  %278 = vst.msk [vmem:[#allocation2 + $0x68] sm:$0xff] (!%p189_p3), %vm264_vm0, %v1106_v1 }
   0xe   : > { %279 = vst.msk [vmem:[#allocation2 + $0x70] sm:$0xff] %vm264_vm0, %v1106_v1  ;;  %280 = vst.msk [vmem:[#allocation2 + $0x78] sm:$0xff] %vm264_vm0, %v1106_v1  ;;  %s1373_s18 = smov (!%p1153_p4, %s947_s18), 63  ;;  %v299_v18 = vld [vmem:[#allocation2 + $0x10] sm:$0xff]  ;;  %v297_v20 = vld [vmem:[#allocation2] sm:$0xff] }
   0xf   : > { %281 = vst.msk [vmem:[#allocation2 + $0x80] sm:$0xff] %vm264_vm0, %v1106_v1  ;;  %282 = vst.msk [vmem:[#allocation2 + $0x88] sm:$0xff] %vm264_vm0, %v1106_v1  ;;  %s948_s20 = sshll.u32 %s1373_s18, 2  ;;  %v300_v23 = vld [vmem:[#allocation2 + $0x18] sm:$0xff]  ;;  %v298_v28 = vld [vmem:[#allocation2 + $0x8] sm:$0xff]  ;;  %s950_s24 = sshll.u32 %s1373_s18, 3 }
  0x10   : > { %283 = vst.msk [vmem:[#allocation2 + $0x90] sm:$0xff] %vm264_vm0, %v1106_v1  ;;  %284 = vst.msk [vmem:[#allocation2 + $0x98] sm:$0xff] %vm264_vm0, %v1106_v1  ;;  %s236_s23 = scalar_lea.vmem %s1363_s0, %s948_s20  ;;  %v301_v44 = vld [vmem:[#allocation2 + $0x20] sm:$0xff]  ;;  %v302_v53 = vld [vmem:[#allocation2 + $0x28] sm:$0xff]  ;;  %s1232_s29 = scalar_lea.vmem %s1366_s3, %s950_s24 }
  0x11   : > { %285 = vst.msk [vmem:[#allocation2 + $0xa0] sm:$0xff] %vm264_vm0, %v1106_v1  ;;  %286 = vst.msk [vmem:[#allocation2 + $0xa8] sm:$0xff] %vm264_vm0, %v1106_v1  ;;  %v1066_v2 = vld [vmem:[%s236_s23] sm:$0xff]   ;;  %v1068_v4 = vld [vmem:[%s236_s23 + $0x8] sm:$0xff]  }
  0x12   : > { %287 = vst.msk [vmem:[#allocation2 + $0xb0] sm:$0xff] %vm264_vm0, %v1106_v1  ;;  %288 = vst.msk [vmem:[#allocation2 + $0xb8] sm:$0xff] %vm264_vm0, %v1106_v1  ;;  %v1067_v3 = vld [vmem:[%s236_s23 + $0x40] sm:$0xff]   ;;  %1006 = vmatprep.mubr.msk.bf16.mxu0 %vm264_vm0, %v1066_v2  ;;  %v1069_v5 = vld [vmem:[%s236_s23 + $0x48] sm:$0xff]  }
  0x13   : > { %289 = vst.msk [vmem:[#allocation2 + $0xc0] sm:$0xff] %vm264_vm0, %v1106_v1  ;;  %290 = vst.msk [vmem:[#allocation2 + $0xc8] sm:$0xff] %vm264_vm0, %v1106_v1  ;;  %1022 = vmatprep.mubr.msk.bf16.mxu1 %vm264_vm0, %v1067_v3  ;;  %1007 = vmatmul.mubr.msk.bf16.vlgmr.msra.gmra.mrb[0].mxu0 %vm264_vm0, %v1068_v4  ;;  %v1070_v6 = vld [vmem:[%s236_s23 + $0x10] sm:$0xff]   ;;  %v1072_v8 = vld [vmem:[%s236_s23 + $0x18] sm:$0xff]  }
  0x14   : > { %291 = vst.msk [vmem:[#allocation2 + $0xd0] sm:$0xff] %vm264_vm0, %v1106_v1  ;;  %292 = vst.msk [vmem:[#allocation2 + $0xd8] sm:$0xff] %vm264_vm0, %v1106_v1  ;;  %1023 = vmatmul.mubr.msk.bf16.vlgmr.msra.gmra.mrb[0].mxu1 %vm264_vm0, %v1069_v5  ;;  %v1071_v7 = vld [vmem:[%s236_s23 + $0x50] sm:$0xff]   ;;  %1010 = vmatprep.mubr.msk.bf16.mxu0 %vm264_vm0, %v1070_v6  ;;  %v1073_v9 = vld [vmem:[%s236_s23 + $0x58] sm:$0xff]  }
  0x15   : > { %293 = vst.msk [vmem:[#allocation2 + $0xe0] sm:$0xff] %vm264_vm0, %v1106_v1  ;;  %294 = vst.msk [vmem:[#allocation2 + $0xe8] sm:$0xff] %vm264_vm0, %v1106_v1  ;;  %1026 = vmatprep.mubr.msk.bf16.mxu1 %vm264_vm0, %v1071_v7  ;;  %v1074_v10 = vld [vmem:[%s236_s23 + $0x20] sm:$0xff]   ;;  %v1076_v12 = vld [vmem:[%s236_s23 + $0x28] sm:$0xff]  }
  0x16   : > { %295 = vst.msk [vmem:[#allocation2 + $0xf0] sm:$0xff] %vm264_vm0, %v1106_v1  ;;  %296 = vst.msk [vmem:[#allocation2 + $0xf8] sm:$0xff] %vm264_vm0, %v1106_v1  ;;  %v1075_v11 = vld [vmem:[%s236_s23 + $0x60] sm:$0xff]   ;;  %v1077_v13 = vld [vmem:[%s236_s23 + $0x68] sm:$0xff]  }
  0x17   : > { %v1078_v14 = vld [vmem:[%s236_s23 + $0x30] sm:$0xff]   ;;  %v1080_v16 = vld [vmem:[%s236_s23 + $0x38] sm:$0xff]   ;;  %v313_v22 = vld [vmem:[#allocation2 + $0x80] sm:$0xff] }
  0x18   : > { %v1079_v15 = vld [vmem:[%s236_s23 + $0x70] sm:$0xff]   ;;  %v1081_v17 = vld [vmem:[%s236_s23 + $0x78] sm:$0xff]   ;;  %v314_v33 = vld [vmem:[#allocation2 + $0x88] sm:$0xff] }
  0x19   : > { %v315_v19 = vld [vmem:[#allocation2 + $0x90] sm:$0xff]  ;;  %v316_v27 = vld [vmem:[#allocation2 + $0x98] sm:$0xff]  ;;  %v317_v47 = vld [vmem:[#allocation2 + $0xa0] sm:$0xff] }
  0x1a   : > { %v303_v42 = vld [vmem:[#allocation2 + $0x30] sm:$0xff]  ;;  %v304_v48 = vld [vmem:[#allocation2 + $0x38] sm:$0xff]  ;;  %v318_v59 = vld [vmem:[#allocation2 + $0xa8] sm:$0xff] }
  0x1b   : > { %1011 = vmatmul.mubr.msk.bf16.gmra.mrb[4].mxu0 %vm264_vm0, %v1072_v8  ;;  %v319_v43 = vld [vmem:[#allocation2 + $0xb0] sm:$0xff]  ;;  %v320_v52 = vld [vmem:[#allocation2 + $0xb8] sm:$0xff] }
  0x1c   : > { %1027 = vmatmul.mubr.msk.bf16.gmra.mrb[4].mxu1 %vm264_vm0, %v1073_v9  ;;  %1014 = vmatprep.mubr.msk.bf16.mxu0 %vm264_vm0, %v1074_v10 }
  0x1d   : > { %1030 = vmatprep.mubr.msk.bf16.mxu1 %vm264_vm0, %v1075_v11 }
  0x23   : > { %1015 = vmatmul.mubr.msk.bf16.gmra.mrb[8].mxu0 %vm264_vm0, %v1076_v12 }
  0x24   : > { %1031 = vmatmul.mubr.msk.bf16.gmra.mrb[8].mxu1 %vm264_vm0, %v1077_v13  ;;  %1018 = vmatprep.mubr.msk.bf16.mxu0 %vm264_vm0, %v1078_v14 }
  0x25   : > { %1034 = vmatprep.mubr.msk.bf16.mxu1 %vm264_vm0, %v1079_v15 }
  0x2b   : > { %1019 = vmatmul.mubr.msk.bf16.gmra.mrb[12].mxu0 %vm264_vm0, %v1080_v16 }
  0x2c   : > { %1035 = vmatmul.mubr.msk.bf16.gmra.mrb[12].mxu1 %vm264_vm0, %v1081_v17 }
  0xe6   : > { %v1008_v21 = vpop.f32.mrb[0].mxu0 }
  0xe7   : > { %v661_v24 = vadd.f32 %v1008_v21, %v299_v18  ;;  %v1024_v25 = vpop.f32.mrb[0].mxu1  ;;  %v532_v26 = vpop.f32.mrb[1].mxu0  ;;  %v307_v18 = vld [vmem:[#allocation2 + $0x50] sm:$0xff]  ;;  %v305_v21 = vld [vmem:[#allocation2 + $0x40] sm:$0xff] }
  0xe8   : > { %v677_v29 = vadd.f32 %v1024_v25, %v315_v19  ;;  %v659_v30 = vadd.f32 %v532_v26, %v297_v20  ;;  %v596_v31 = vpop.f32.mrb[1].mxu1  ;;  %v1009_v32 = vpop.f32.mrb[2].mxu0  ;;  %v323_v20 = vld [vmem:[#allocation2 + $0xd0] sm:$0xff] }
  0xe9   : > { %693 = vst.msk [vmem:[#allocation2 + $0x10] sm:$0xff] %vm264_vm0, %v661_v24  ;;  %v675_v34 = vadd.f32 %v596_v31, %v313_v22  ;;  %v662_v35 = vadd.f32 %v1009_v32, %v300_v23  ;;  %v1025_v36 = vpop.f32.mrb[2].mxu1  ;;  %v535_v37 = vpop.f32.mrb[3].mxu0  ;;  %v321_v23 = vld [vmem:[#allocation2 + $0xc0] sm:$0xff]  ;;  %v308_v24 = vld [vmem:[#allocation2 + $0x58] sm:$0xff] }
  0xea   : > { %709 = vst.msk [vmem:[#allocation2 + $0x90] sm:$0xff] %vm264_vm0, %v677_v29  ;;  %691 = vst.msk [vmem:[#allocation2] sm:$0xff] %vm264_vm0, %v659_v30  ;;  %v678_v38 = vadd.f32 %v1025_v36, %v316_v27  ;;  %v660_v39 = vadd.f32 %v535_v37, %v298_v28  ;;  %v599_v40 = vpop.f32.mrb[3].mxu1  ;;  %v324_v28 = vld [vmem:[#allocation2 + $0xd8] sm:$0xff]  ;;  %v306_v29 = vld [vmem:[#allocation2 + $0x48] sm:$0xff] }
  0xeb   : > { %707 = vst.msk [vmem:[#allocation2 + $0x80] sm:$0xff] %vm264_vm0, %v675_v34  ;;  %694 = vst.msk [vmem:[#allocation2 + $0x18] sm:$0xff] %vm264_vm0, %v662_v35  ;;  %v676_v41 = vadd.f32 %v599_v40, %v314_v33  ;;  %v322_v35 = vld [vmem:[#allocation2 + $0xc8] sm:$0xff] }
  0xec   : > { %710 = vst.msk [vmem:[#allocation2 + $0x98] sm:$0xff] %vm264_vm0, %v678_v38  ;;  %692 = vst.msk [vmem:[#allocation2 + $0x8] sm:$0xff] %vm264_vm0, %v660_v39 }
  0xed   : > { %708 = vst.msk [vmem:[#allocation2 + $0x88] sm:$0xff] %vm264_vm0, %v676_v41 }
  0xee   : > { %v1012_v46 = vpop.f32.mrb[4].mxu0 }
  0xef   : > { %v665_v49 = vadd.f32 %v1012_v46, %v303_v42  ;;  %v1028_v50 = vpop.f32.mrb[4].mxu1  ;;  %v548_v51 = vpop.f32.mrb[5].mxu0 }
  0xf0   : > { %v728_v54 = vld [vmem:[#allocation2 + $0x10] sm:$0xff]  ;;  %v681_v55 = vadd.f32 %v1028_v50, %v319_v43  ;;  %v663_v56 = vadd.f32 %v548_v51, %v301_v44  ;;  %v612_v57 = vpop.f32.mrb[5].mxu1  ;;  %v1013_v58 = vpop.f32.mrb[6].mxu0 }
  0xf1   : > { %v767_v60 = vadd.f32 %v1227_v45, %v728_v54  ;;  %v744_v61 = vld [vmem:[#allocation2 + $0x90] sm:$0xff]  ;;  %v726_v62 = vld [vmem:[#allocation2] sm:$0xff]  ;;  %697 = vst.msk [vmem:[#allocation2 + $0x30] sm:$0xff] %vm264_vm0, %v665_v49  ;;  %v679_v63 = vadd.f32 %v612_v57, %v317_v47  ;;  %v666_v0 = vadd.f32 %v1013_v58, %v304_v48  ;;  %v1029_v1 = vpop.f32.mrb[6].mxu1  ;;  %v551_v2 = vpop.f32.mrb[7].mxu0 }
  0xf2   : > { %v783_v3 = vadd.f32 %v1227_v45, %v744_v61  ;;  %v765_v4 = vadd.f32 %v1227_v45, %v726_v62  ;;  %v742_v5 = vld [vmem:[#allocation2 + $0x80] sm:$0xff]  ;;  %v729_v6 = vld [vmem:[#allocation2 + $0x18] sm:$0xff]  ;;  %713 = vst.msk [vmem:[#allocation2 + $0xb0] sm:$0xff] %vm264_vm0, %v681_v55  ;;  %695 = vst.msk [vmem:[#allocation2 + $0x20] sm:$0xff] %vm264_vm0, %v663_v56  ;;  %v682_v7 = vadd.f32 %v1029_v1, %v320_v52  ;;  %v615_v9 = vpop.f32.mrb[7].mxu1 }
  0xf3   : > { %v664_v8 = vadd.f32 %v551_v2, %v302_v53  ;;  %799 = vst.msk [vmem:[%s1232_s29 + $0x10] sm:$0xff] %vm264_vm0, %v767_v60  ;;  %v781_v10 = vadd.f32 %v1227_v45, %v742_v5  ;;  %v768_v11 = vadd.f32 %v1227_v45, %v729_v6  ;;  %v745_v12 = vld [vmem:[#allocation2 + $0x98] sm:$0xff]  ;;  %v727_v13 = vld [vmem:[#allocation2 + $0x8] sm:$0xff]  ;;  %711 = vst.msk [vmem:[#allocation2 + $0xa0] sm:$0xff] %vm264_vm0, %v679_v63 }
  0xf4   : > { %698 = vst.msk [vmem:[#allocation2 + $0x38] sm:$0xff] %vm264_vm0, %v666_v0  ;;  %v680_v14 = vadd.f32 %v615_v9, %v318_v59  ;;  %815 = vst.msk [vmem:[%s1232_s29 + $0x90] sm:$0xff] %vm264_vm0, %v783_v3  ;;  %v784_v15 = vadd.f32 %v1227_v45, %v745_v12  ;;  %v766_v16 = vadd.f32 %v1227_v45, %v727_v13  ;;  %v743_v17 = vld [vmem:[#allocation2 + $0x88] sm:$0xff]  ;;  %v311_v59 = vld [vmem:[#allocation2 + $0x70] sm:$0xff] }
  0xf5   : > { %797 = vst.msk [vmem:[%s1232_s29] sm:$0xff] %vm264_vm0, %v765_v4  ;;  %714 = vst.msk [vmem:[#allocation2 + $0xb8] sm:$0xff] %vm264_vm0, %v682_v7  ;;  %v782_v19 = vadd.f32 %v1227_v45, %v743_v17  ;;  %v327_v61 = vld [vmem:[#allocation2 + $0xf0] sm:$0xff]  ;;  %v309_v62 = vld [vmem:[#allocation2 + $0x60] sm:$0xff] }
  0xf6   : > { %696 = vst.msk [vmem:[#allocation2 + $0x28] sm:$0xff] %vm264_vm0, %v664_v8  ;;  %813 = vst.msk [vmem:[%s1232_s29 + $0x80] sm:$0xff] %vm264_vm0, %v781_v10  ;;  %v1016_v22 = vpop.f32.mrb[8].mxu0  ;;  %v325_v0 = vld [vmem:[#allocation2 + $0xe0] sm:$0xff]  ;;  %v312_v1 = vld [vmem:[#allocation2 + $0x78] sm:$0xff] }
  0xf7   : > { %800 = vst.msk [vmem:[%s1232_s29 + $0x18] sm:$0xff] %vm264_vm0, %v768_v11  ;;  %712 = vst.msk [vmem:[#allocation2 + $0xa8] sm:$0xff] %vm264_vm0, %v680_v14  ;;  %v669_v25 = vadd.f32 %v1016_v22, %v307_v18  ;;  %v1032_v26 = vpop.f32.mrb[8].mxu1  ;;  %v564_v27 = vpop.f32.mrb[9].mxu0  ;;  %v328_v5 = vld [vmem:[#allocation2 + $0xf8] sm:$0xff]  ;;  %v310_v6 = vld [vmem:[#allocation2 + $0x68] sm:$0xff] }
  0xf8   : > { %816 = vst.msk [vmem:[%s1232_s29 + $0x98] sm:$0xff] %vm264_vm0, %v784_v15  ;;  %798 = vst.msk [vmem:[%s1232_s29 + $0x8] sm:$0xff] %vm264_vm0, %v766_v16  ;;  %v732_v30 = vld [vmem:[#allocation2 + $0x30] sm:$0xff]  ;;  %v685_v31 = vadd.f32 %v1032_v26, %v323_v20  ;;  %v667_v32 = vadd.f32 %v564_v27, %v305_v21  ;;  %v628_v33 = vpop.f32.mrb[9].mxu1  ;;  %v1017_v34 = vpop.f32.mrb[10].mxu0  ;;  %v326_v12 = vld [vmem:[#allocation2 + $0xe8] sm:$0xff] }
  0xf9   : > { %814 = vst.msk [vmem:[%s1232_s29 + $0x88] sm:$0xff] %vm264_vm0, %v782_v19  ;;  %v771_v36 = vadd.f32 %v1227_v45, %v732_v30  ;;  %v748_v37 = vld [vmem:[#allocation2 + $0xb0] sm:$0xff]  ;;  %v730_v38 = vld [vmem:[#allocation2 + $0x20] sm:$0xff]  ;;  %701 = vst.msk [vmem:[#allocation2 + $0x50] sm:$0xff] %vm264_vm0, %v669_v25  ;;  %v683_v39 = vadd.f32 %v628_v33, %v321_v23  ;;  %v670_v40 = vadd.f32 %v1017_v34, %v308_v24  ;;  %v1033_v41 = vpop.f32.mrb[10].mxu1  ;;  %v567_v42 = vpop.f32.mrb[11].mxu0 }
  0xfa   : > { %v787_v43 = vadd.f32 %v1227_v45, %v748_v37  ;;  %v769_v44 = vadd.f32 %v1227_v45, %v730_v38  ;;  %v746_v46 = vld [vmem:[#allocation2 + $0xa0] sm:$0xff]  ;;  %717 = vst.msk [vmem:[#allocation2 + $0xd0] sm:$0xff] %vm264_vm0, %v685_v31  ;;  %699 = vst.msk [vmem:[#allocation2 + $0x40] sm:$0xff] %vm264_vm0, %v667_v32  ;;  %v686_v48 = vadd.f32 %v1033_v41, %v324_v28  ;;  %v631_v50 = vpop.f32.mrb[11].mxu1 }
  0xfb   : > { %v733_v47 = vld [vmem:[#allocation2 + $0x38] sm:$0xff]  ;;  %v668_v49 = vadd.f32 %v567_v42, %v306_v29  ;;  %803 = vst.msk [vmem:[%s1232_s29 + $0x30] sm:$0xff] %vm264_vm0, %v771_v36  ;;  %v785_v51 = vadd.f32 %v1227_v45, %v746_v46  ;;  %715 = vst.msk [vmem:[#allocation2 + $0xc0] sm:$0xff] %vm264_vm0, %v683_v39  ;;  %v684_v55 = vadd.f32 %v631_v50, %v322_v35 }
  0xfc   : > { %v772_v52 = vadd.f32 %v1227_v45, %v733_v47  ;;  %v749_v53 = vld [vmem:[#allocation2 + $0xb8] sm:$0xff]  ;;  %702 = vst.msk [vmem:[#allocation2 + $0x58] sm:$0xff] %vm264_vm0, %v670_v40  ;;  %819 = vst.msk [vmem:[%s1232_s29 + $0xb0] sm:$0xff] %vm264_vm0, %v787_v43 }
  0xfd   : > { %v731_v54 = vld [vmem:[#allocation2 + $0x28] sm:$0xff]  ;;  %801 = vst.msk [vmem:[%s1232_s29 + $0x20] sm:$0xff] %vm264_vm0, %v769_v44  ;;  %v788_v56 = vadd.f32 %v1227_v45, %v749_v53  ;;  %718 = vst.msk [vmem:[#allocation2 + $0xd8] sm:$0xff] %vm264_vm0, %v686_v48 }
  0xfe   : > { %v770_v57 = vadd.f32 %v1227_v45, %v731_v54  ;;  %v747_v58 = vld [vmem:[#allocation2 + $0xa8] sm:$0xff]  ;;  %700 = vst.msk [vmem:[#allocation2 + $0x48] sm:$0xff] %vm264_vm0, %v668_v49  ;;  %817 = vst.msk [vmem:[%s1232_s29 + $0xa0] sm:$0xff] %vm264_vm0, %v785_v51  ;;  %v1020_v63 = vpop.f32.mrb[12].mxu0 }
  0xff   : > { %804 = vst.msk [vmem:[%s1232_s29 + $0x38] sm:$0xff] %vm264_vm0, %v772_v52  ;;  %v786_v60 = vadd.f32 %v1227_v45, %v747_v58  ;;  %716 = vst.msk [vmem:[#allocation2 + $0xc8] sm:$0xff] %vm264_vm0, %v684_v55  ;;  %v673_v2 = vadd.f32 %v1020_v63, %v311_v59  ;;  %v1036_v3 = vpop.f32.mrb[12].mxu1  ;;  %v580_v4 = vpop.f32.mrb[13].mxu0 }
 0x100   : > { %820 = vst.msk [vmem:[%s1232_s29 + $0xb8] sm:$0xff] %vm264_vm0, %v788_v56  ;;  %802 = vst.msk [vmem:[%s1232_s29 + $0x28] sm:$0xff] %vm264_vm0, %v770_v57  ;;  %v736_v7 = vld [vmem:[#allocation2 + $0x50] sm:$0xff]  ;;  %v689_v8 = vadd.f32 %v1036_v3, %v327_v61  ;;  %v671_v9 = vadd.f32 %v580_v4, %v309_v62  ;;  %v644_v10 = vpop.f32.mrb[13].mxu1  ;;  %v1021_v11 = vpop.f32.mrb[14].mxu0 }
 0x101   : > { %818 = vst.msk [vmem:[%s1232_s29 + $0xa8] sm:$0xff] %vm264_vm0, %v786_v60  ;;  %v775_v13 = vadd.f32 %v1227_v45, %v736_v7  ;;  %v752_v14 = vld [vmem:[#allocation2 + $0xd0] sm:$0xff]  ;;  %v734_v15 = vld [vmem:[#allocation2 + $0x40] sm:$0xff]  ;;  %705 = vst.msk [vmem:[#allocation2 + $0x70] sm:$0xff] %vm264_vm0, %v673_v2  ;;  %v687_v16 = vadd.f32 %v644_v10, %v325_v0  ;;  %v674_v17 = vadd.f32 %v1021_v11, %v312_v1  ;;  %v1037_v18 = vpop.f32.mrb[14].mxu1  ;;  %v583_v19 = vpop.f32.mrb[15].mxu0 }
 0x102   : > { %v791_v20 = vadd.f32 %v1227_v45, %v752_v14  ;;  %v773_v21 = vadd.f32 %v1227_v45, %v734_v15  ;;  %v750_v22 = vld [vmem:[#allocation2 + $0xc0] sm:$0xff]  ;;  %721 = vst.msk [vmem:[#allocation2 + $0xf0] sm:$0xff] %vm264_vm0, %v689_v8  ;;  %703 = vst.msk [vmem:[#allocation2 + $0x60] sm:$0xff] %vm264_vm0, %v671_v9  ;;  %v690_v24 = vadd.f32 %v1037_v18, %v328_v5  ;;  %v647_v26 = vpop.f32.mrb[15].mxu1 }
 0x103   : > { %v737_v23 = vld [vmem:[#allocation2 + $0x58] sm:$0xff]  ;;  %v672_v25 = vadd.f32 %v583_v19, %v310_v6  ;;  %807 = vst.msk [vmem:[%s1232_s29 + $0x50] sm:$0xff] %vm264_vm0, %v775_v13  ;;  %v789_v27 = vadd.f32 %v1227_v45, %v750_v22  ;;  %719 = vst.msk [vmem:[#allocation2 + $0xe0] sm:$0xff] %vm264_vm0, %v687_v16  ;;  %v688_v31 = vadd.f32 %v647_v26, %v326_v12 }
 0x104   : > { %v776_v28 = vadd.f32 %v1227_v45, %v737_v23  ;;  %v753_v29 = vld [vmem:[#allocation2 + $0xd8] sm:$0xff]  ;;  %706 = vst.msk [vmem:[#allocation2 + $0x78] sm:$0xff] %vm264_vm0, %v674_v17  ;;  %823 = vst.msk [vmem:[%s1232_s29 + $0xd0] sm:$0xff] %vm264_vm0, %v791_v20 }
 0x105   : > { %v735_v30 = vld [vmem:[#allocation2 + $0x48] sm:$0xff]  ;;  %805 = vst.msk [vmem:[%s1232_s29 + $0x40] sm:$0xff] %vm264_vm0, %v773_v21  ;;  %v792_v32 = vadd.f32 %v1227_v45, %v753_v29  ;;  %722 = vst.msk [vmem:[#allocation2 + $0xf8] sm:$0xff] %vm264_vm0, %v690_v24 }
 0x106   : > { %v774_v33 = vadd.f32 %v1227_v45, %v735_v30  ;;  %v751_v34 = vld [vmem:[#allocation2 + $0xc8] sm:$0xff]  ;;  %704 = vst.msk [vmem:[#allocation2 + $0x68] sm:$0xff] %vm264_vm0, %v672_v25  ;;  %821 = vst.msk [vmem:[%s1232_s29 + $0xc0] sm:$0xff] %vm264_vm0, %v789_v27 }
 0x107   : > { %808 = vst.msk [vmem:[%s1232_s29 + $0x58] sm:$0xff] %vm264_vm0, %v776_v28  ;;  %v790_v35 = vadd.f32 %v1227_v45, %v751_v34  ;;  %720 = vst.msk [vmem:[#allocation2 + $0xe8] sm:$0xff] %vm264_vm0, %v688_v31 }
 0x108   : > { %824 = vst.msk [vmem:[%s1232_s29 + $0xd8] sm:$0xff] %vm264_vm0, %v792_v32  ;;  %806 = vst.msk [vmem:[%s1232_s29 + $0x48] sm:$0xff] %vm264_vm0, %v774_v33  ;;  %v740_v36 = vld [vmem:[#allocation2 + $0x70] sm:$0xff] }
 0x109   : > { %822 = vst.msk [vmem:[%s1232_s29 + $0xc8] sm:$0xff] %vm264_vm0, %v790_v35  ;;  %v779_v37 = vadd.f32 %v1227_v45, %v740_v36  ;;  %v756_v38 = vld [vmem:[#allocation2 + $0xf0] sm:$0xff]  ;;  %v738_v39 = vld [vmem:[#allocation2 + $0x60] sm:$0xff] }
 0x10a   : > { %v795_v40 = vadd.f32 %v1227_v45, %v756_v38  ;;  %v777_v41 = vadd.f32 %v1227_v45, %v738_v39  ;;  %v754_v42 = vld [vmem:[#allocation2 + $0xe0] sm:$0xff] }
 0x10b   : > { %v741_v43 = vld [vmem:[#allocation2 + $0x78] sm:$0xff]  ;;  %811 = vst.msk [vmem:[%s1232_s29 + $0x70] sm:$0xff] %vm264_vm0, %v779_v37  ;;  %v793_v44 = vadd.f32 %v1227_v45, %v754_v42 }
 0x10c   : > { %v780_v46 = vadd.f32 %v1227_v45, %v741_v43  ;;  %v757_v47 = vld [vmem:[#allocation2 + $0xf8] sm:$0xff]  ;;  %827 = vst.msk [vmem:[%s1232_s29 + $0xf0] sm:$0xff] %vm264_vm0, %v795_v40  ;;  %809 = vst.msk [vmem:[%s1232_s29 + $0x60] sm:$0xff] %vm264_vm0, %v777_v41 }
 0x10d   : > { %v739_v48 = vld [vmem:[#allocation2 + $0x68] sm:$0xff]  ;;  %v796_v49 = vadd.f32 %v1227_v45, %v757_v47  ;;  %825 = vst.msk [vmem:[%s1232_s29 + $0xe0] sm:$0xff] %vm264_vm0, %v793_v44 }
 0x10e   : > { %v778_v50 = vadd.f32 %v1227_v45, %v739_v48  ;;  %v755_v51 = vld [vmem:[#allocation2 + $0xe8] sm:$0xff]  ;;  %812 = vst.msk [vmem:[%s1232_s29 + $0x78] sm:$0xff] %vm264_vm0, %v780_v46 }
 0x10f   : > { %v794_v52 = vadd.f32 %v1227_v45, %v755_v51  ;;  %828 = vst.msk [vmem:[%s1232_s29 + $0xf8] sm:$0xff] %vm264_vm0, %v796_v49 }
 0x110   : > { %810 = vst.msk [vmem:[%s1232_s29 + $0x68] sm:$0xff] %vm264_vm0, %v778_v50 }
 0x111   : > { %826 = vst.msk [vmem:[%s1232_s29 + $0xe8] sm:$0xff] %vm264_vm0, %v794_v52 }
 0x112 PF: > { %s13_s14 = sadd.s32 1, %s1104_s14   ;;  %s1368_s12 = smov %s1100_s13 }
 0x113   : > { %p10_p5 = scmp.ge.s32.totalorder %s13_s14, 4   ;;  %s1369_s13 = smov %s1371_s15 }
 0x115   :  { %12 = sbr.rel (!%p10_p5) target bundleno = 2 (0x2), region = 76 }

// kernel: _lambda_.51
= control target key start
LH: loop header
LB: loop body
LE: loop exit
PB: predicated region body
PF: predicated region fallthrough
CT: control target
= control target key end

     0   :  { %s2072_s9 = smov 0   ;;  %s2898_s0 = inlined_call_operand.vmem [shape: f32[2,256,48], index: 0, kind: input, shape index: {}]   ;;  %s2899_s1 = inlined_call_operand.vmem [shape: f32[2,1,1], index: 1, kind: input, shape index: {}]   ;;  %s2900_s2 = inlined_call_operand.vmem [shape: f32[2,256,16], index: 2, kind: output, shape index: {}]  }
   0x1 LB: > { %s1725_s10 = sadd.s32 4294967295, %s2048_s9   ;;  %p1729_p0 = scmp.ge.s32.totalorder %s2048_s9, 1  ;;  %s2048_s9 = sphi %s2072_s9, %s12_s9  }
   0x2   : > { %p112_p1 = scmp.lt.s32.totalorder %s2048_s9, 3 }
   0x4   : > { %p113_p2 = pnand %p1729_p0, %p112_p1 }
   0x5   : > { %p134_p3 = scmp.lt.s32.totalorder (!%p113_p2), %s1725_s10, 1  ;;  %s2050_s15 = smov (!%p113_p2), 112   ;;  %vm667_vm0 = vcmask (!%p113_p2), 64512   ;;  %vm685_vm1 = vcmask (!%p113_p2), 1043456   ;;  %vm1637_vm2 = vcmask (!%p113_p2), 130048  }
   0x6   : > { %116 = sbr.rel (%p113_p2) target bundleno = 2274 (0x8e2), region = 28  ;;  %s2052_s16 = smov (!%p113_p2), 96  }
   0x7   : > { %s2053_s17 = smov (!%p113_p2), 104   ;;  %s2054_s20 = smov (!%p113_p2), 120  }
   0x8   : > { %s2055_s23 = smov (!%p113_p2), 88   ;;  %s2056_s24 = smov (!%p113_p2), 8  }
   0xd   : > { %s2902_s10 = smov (!%p134_p3, %s1725_s10), 1 }
   0xe   : > { %s1742_s11 = sshll.u32 %s2902_s10, 8 }
   0xf   : > { %s2088_s14 = scalar_lea.vmem %s2898_s0, %s1742_s11  ;;  %s2765_s27 = scalar_lea.vmem %s2900_s2, %s1742_s11 }
  0x10   : > { %v2091_v0 = vld [vmem:[%s2088_s14] sm:$0xff]  ;;  %v2094_v1 = vld [vmem:[%s2088_s14 + $0x8] sm:$0xff]  ;;  %v2111_v4 = vld [vmem:[%s2088_s14 + $0x10] sm:$0xff] }
  0x11   : > { %275 = vrot.lane.b32.xlu0 %v2091_v0, %s2050_s15  ;;  %277 = vrot.lane.b32.xlu1 %v2094_v1, %s2050_s15  ;;  %v2101_v2 = vld [vmem:[%s2088_s14 + $0x80] sm:$0xff]  ;;  %v2104_v3 = vld [vmem:[%s2088_s14 + $0x88] sm:$0xff] }
  0x12   : > { %v2114_v5 = vld [vmem:[%s2088_s14 + $0x90] sm:$0xff]  ;;  %v2121_v6 = vld [vmem:[%s2088_s14 + $0x18] sm:$0xff]  ;;  %v2131_v8 = vld [vmem:[%s2088_s14 + $0x20] sm:$0xff] }
  0x13   : > { %v2124_v7 = vld [vmem:[%s2088_s14 + $0x98] sm:$0xff]  ;;  %v2134_v9 = vld [vmem:[%s2088_s14 + $0xa0] sm:$0xff]  ;;  %v2141_v10 = vld [vmem:[%s2088_s14 + $0x28] sm:$0xff] }
  0x14   : > { %v2144_v11 = vld [vmem:[%s2088_s14 + $0xa8] sm:$0xff]  ;;  %v2151_v12 = vld [vmem:[%s2088_s14 + $0x30] sm:$0xff]  ;;  %v2161_v14 = vld [vmem:[%s2088_s14 + $0x38] sm:$0xff] }
  0x15   : > { %307 = vrot.lane.b32.xlu0 %v2101_v2, %s2050_s15  ;;  %309 = vrot.lane.b32.xlu1 %v2104_v3, %s2050_s15  ;;  %v2154_v13 = vld [vmem:[%s2088_s14 + $0xb0] sm:$0xff]  ;;  %v2164_v15 = vld [vmem:[%s2088_s14 + $0xb8] sm:$0xff] }
  0x16   : > { %v2171_v16 = vld [vmem:[%s2088_s14 + $0x40] sm:$0xff]  ;;  %v2181_v18 = vld [vmem:[%s2088_s14 + $0x48] sm:$0xff]  ;;  %v2191_v20 = vld [vmem:[%s2088_s14 + $0x50] sm:$0xff] }
  0x17   : > { %v2174_v17 = vld [vmem:[%s2088_s14 + $0xc0] sm:$0xff]  ;;  %v2184_v19 = vld [vmem:[%s2088_s14 + $0xc8] sm:$0xff]  ;;  %v2194_v21 = vld [vmem:[%s2088_s14 + $0xd0] sm:$0xff] }
  0x18   : > { %v2201_v22 = vld [vmem:[%s2088_s14 + $0x58] sm:$0xff]  ;;  %v2211_v24 = vld [vmem:[%s2088_s14 + $0x60] sm:$0xff]  ;;  %v2221_v26 = vld [vmem:[%s2088_s14 + $0x68] sm:$0xff] }
  0x19   : > { %279 = vrot.lane.b32.xlu0 %v2111_v4, %s2050_s15  ;;  %311 = vrot.lane.b32.xlu1 %v2114_v5, %s2050_s15  ;;  %v2204_v23 = vld [vmem:[%s2088_s14 + $0xd8] sm:$0xff]  ;;  %v2214_v25 = vld [vmem:[%s2088_s14 + $0xe0] sm:$0xff] }
  0x1a   : > { %v2224_v27 = vld [vmem:[%s2088_s14 + $0xe8] sm:$0xff]  ;;  %v2231_v28 = vld [vmem:[%s2088_s14 + $0x70] sm:$0xff]  ;;  %v2241_v30 = vld [vmem:[%s2088_s14 + $0x78] sm:$0xff] }
  0x1b   : > { %v2234_v29 = vld [vmem:[%s2088_s14 + $0xf0] sm:$0xff]  ;;  %v2244_v31 = vld [vmem:[%s2088_s14 + $0xf8] sm:$0xff] }
  0x1d   : > { %281 = vrot.lane.b32.xlu0 %v2121_v6, %s2050_s15  ;;  %313 = vrot.lane.b32.xlu1 %v2124_v7, %s2050_s15 }
  0x21   : > { %283 = vrot.lane.b32.xlu0 %v2131_v8, %s2050_s15  ;;  %315 = vrot.lane.b32.xlu1 %v2134_v9, %s2050_s15 }
  0x25   : > { %285 = vrot.lane.b32.xlu0 %v2141_v10, %s2050_s15  ;;  %317 = vrot.lane.b32.xlu1 %v2144_v11, %s2050_s15 }
  0x29   : > { %287 = vrot.lane.b32.xlu0 %v2151_v12, %s2050_s15  ;;  %319 = vrot.lane.b32.xlu1 %v2154_v13, %s2050_s15 }
  0x2d   : > { %289 = vrot.lane.b32.xlu0 %v2161_v14, %s2050_s15  ;;  %321 = vrot.lane.b32.xlu1 %v2164_v15, %s2050_s15 }
  0x31   : > { %291 = vrot.lane.b32.xlu0 %v2171_v16, %s2050_s15  ;;  %323 = vrot.lane.b32.xlu1 %v2174_v17, %s2050_s15 }
  0x35   : > { %293 = vrot.lane.b32.xlu0 %v2181_v18, %s2050_s15  ;;  %325 = vrot.lane.b32.xlu1 %v2184_v19, %s2050_s15 }
  0x39   : > { %295 = vrot.lane.b32.xlu0 %v2191_v20, %s2050_s15  ;;  %327 = vrot.lane.b32.xlu1 %v2194_v21, %s2050_s15 }
  0x3d   : > { %297 = vrot.lane.b32.xlu0 %v2201_v22, %s2050_s15  ;;  %329 = vrot.lane.b32.xlu1 %v2204_v23, %s2050_s15 }
  0x41   : > { %299 = vrot.lane.b32.xlu0 %v2211_v24, %s2050_s15  ;;  %331 = vrot.lane.b32.xlu1 %v2214_v25, %s2050_s15 }
  0x45   : > { %301 = vrot.lane.b32.xlu0 %v2221_v26, %s2050_s15  ;;  %333 = vrot.lane.b32.xlu1 %v2224_v27, %s2050_s15 }
  0x49   : > { %303 = vrot.lane.b32.xlu0 %v2231_v28, %s2050_s15  ;;  %335 = vrot.lane.b32.xlu1 %v2234_v29, %s2050_s15 }
  0x4d   : > { %305 = vrot.lane.b32.xlu0 %v2241_v30, %s2050_s15  ;;  %337 = vrot.lane.b32.xlu1 %v2244_v31, %s2050_s15 }
  0x83   : > { %v276_v32 = vpop.permute.xlu0 %275  ;;  %v278_v33 = vpop.permute.xlu1 %277 }
  0x84   : > { %371 = vxpose.xlu0.b32.start [1/16] (narrow) %v276_v32, 8  ;;  %v2051_v32 = vmov 0  }
  0x85   : > { %724 = vmatprep.mubr.bf16.mxu1 %v2051_v32 }
  0x87   : > { %v308_v34 = vpop.permute.xlu0 %307  ;;  %v310_v35 = vpop.permute.xlu1 %309 }
  0x88   : > { %372 = vxpose.xlu0.b32.cont [2/16] (narrow) %v278_v33, 8  ;;  %403 = vxpose.xlu1.b32.start [1/16] (narrow) %v308_v34, 8 }
  0x8b   : > { %v280_v36 = vpop.permute.xlu0 %279  ;;  %v312_v37 = vpop.permute.xlu1 %311 }
  0x8c   : > { %404 = vxpose.xlu1.b32.cont [2/16] (narrow) %v310_v35, 8  ;;  %373 = vxpose.xlu0.b32.cont [3/16] (narrow) %v280_v36, 8 }
  0x8f   : > { %v282_v38 = vpop.permute.xlu0 %281  ;;  %v314_v39 = vpop.permute.xlu1 %313 }
  0x90   : > { %405 = vxpose.xlu1.b32.cont [3/16] (narrow) %v312_v37, 8  ;;  %374 = vxpose.xlu0.b32.cont [4/16] (narrow) %v282_v38, 8  ;;  %v1760_v38 = vpack.i.bf16 %v2094_v1, %v2091_v0 }
  0x93   : > { %v284_v40 = vpop.permute.xlu0 %283  ;;  %v316_v41 = vpop.permute.xlu1 %315 }
  0x94   : > { %406 = vxpose.xlu1.b32.cont [4/16] (narrow) %v314_v39, 8  ;;  %375 = vxpose.xlu0.b32.cont [5/16] (narrow) %v284_v40, 8  ;;  %v1770_v39 = vpack.i.bf16 %v2141_v10, %v2131_v8 }
  0x97   : > { %v286_v42 = vpop.permute.xlu0 %285  ;;  %v318_v43 = vpop.permute.xlu1 %317 }
  0x98   : > { %407 = vxpose.xlu1.b32.cont [5/16] (narrow) %v316_v41, 8  ;;  %376 = vxpose.xlu0.b32.cont [6/16] (narrow) %v286_v42, 8  ;;  %v1780_v42 = vpack.i.bf16 %v2181_v18, %v2171_v16 }
  0x9b   : > { %v288_v44 = vpop.permute.xlu0 %287  ;;  %v320_v45 = vpop.permute.xlu1 %319 }
  0x9c   : > { %408 = vxpose.xlu1.b32.cont [6/16] (narrow) %v318_v43, 8  ;;  %377 = vxpose.xlu0.b32.cont [7/16] (narrow) %v288_v44, 8 }
  0x9f   : > { %v290_v46 = vpop.permute.xlu0 %289  ;;  %v322_v47 = vpop.permute.xlu1 %321 }
  0xa0   : > { %409 = vxpose.xlu1.b32.cont [7/16] (narrow) %v320_v45, 8  ;;  %378 = vxpose.xlu0.b32.cont [8/16] (narrow) %v290_v46, 8  ;;  %v1790_v46 = vpack.i.bf16 %v2221_v26, %v2211_v24 }
  0xa3   : > { %v292_v48 = vpop.permute.xlu0 %291  ;;  %v324_v49 = vpop.permute.xlu1 %323 }
  0xa4   : > { %410 = vxpose.xlu1.b32.cont [8/16] (narrow) %v322_v47, 8  ;;  %379 = vxpose.xlu0.b32.cont [9/16] (narrow) %v292_v48, 8  ;;  %v1796_v47 = vpack.i.bf16 %v2241_v30, %v2231_v28  ;;  %v1806_v48 = vpack.i.bf16 %v2124_v7, %v2114_v5 }
  0xa7   : > { %v294_v50 = vpop.permute.xlu0 %293  ;;  %v326_v51 = vpop.permute.xlu1 %325 }
  0xa8   : > { %411 = vxpose.xlu1.b32.cont [9/16] (narrow) %v324_v49, 8  ;;  %380 = vxpose.xlu0.b32.cont [10/16] (narrow) %v294_v50, 8  ;;  %v1816_v49 = vpack.i.bf16 %v2164_v15, %v2154_v13  ;;  %v1765_v50 = vpack.i.bf16 %v2121_v6, %v2111_v4 }
  0xab   : > { %v296_v52 = vpop.permute.xlu0 %295  ;;  %v328_v53 = vpop.permute.xlu1 %327 }
  0xac   : > { %412 = vxpose.xlu1.b32.cont [10/16] (narrow) %v326_v51, 8  ;;  %381 = vxpose.xlu0.b32.cont [11/16] (narrow) %v296_v52, 8  ;;  %v1775_v51 = vpack.i.bf16 %v2161_v14, %v2151_v12  ;;  %v1785_v52 = vpack.i.bf16 %v2201_v22, %v2191_v20 }
  0xaf   : > { %v298_v54 = vpop.permute.xlu0 %297  ;;  %v330_v55 = vpop.permute.xlu1 %329 }
  0xb0   : > { %413 = vxpose.xlu1.b32.cont [11/16] (narrow) %v328_v53, 8  ;;  %382 = vxpose.xlu0.b32.cont [12/16] (narrow) %v298_v54, 8  ;;  %v1734_v53 = vld [vmem:[%s2899_s1] ss:$0 sm:$0xff]  ;;  %v1801_v54 = vpack.i.bf16 %v2104_v3, %v2101_v2 }
  0xb3   : > { %v300_v56 = vpop.permute.xlu0 %299  ;;  %v332_v57 = vpop.permute.xlu1 %331 }
  0xb4   : > { %414 = vxpose.xlu1.b32.cont [12/16] (narrow) %v330_v55, 8  ;;  %383 = vxpose.xlu0.b32.cont [13/16] (narrow) %v300_v56, 8  ;;  %v1811_v55 = vpack.i.bf16 %v2144_v11, %v2134_v9  ;;  %v1821_v56 = vpack.i.bf16 %v2184_v19, %v2174_v17 }
  0xb7   : > { %v302_v58 = vpop.permute.xlu0 %301  ;;  %v334_v59 = vpop.permute.xlu1 %333 }
  0xb8   : > { %415 = vxpose.xlu1.b32.cont [13/16] (narrow) %v332_v57, 8  ;;  %384 = vxpose.xlu0.b32.cont [14/16] (narrow) %v302_v58, 8 }
  0xbb   : > { %v304_v60 = vpop.permute.xlu0 %303  ;;  %v336_v61 = vpop.permute.xlu1 %335 }
  0xbc   : > { %416 = vxpose.xlu1.b32.cont [14/16] (narrow) %v334_v59, 8  ;;  %385 = vxpose.xlu0.b32.cont [15/16] (narrow) %v304_v60, 8 }
  0xbf   : > { %v306_v62 = vpop.permute.xlu0 %305  ;;  %v338_v63 = vpop.permute.xlu1 %337 }
  0xc0   : > { %417 = vxpose.xlu1.b32.cont [15/16] (narrow) %v336_v61, 8  ;;  %386 = vxpose.xlu0.b32.end [16/16] (narrow) %v306_v62, 8 }
  0xc4   : > { %418 = vxpose.xlu1.b32.end [16/16] (narrow) %v338_v63, 8  ;;  %179 = vxpose.xlu0.b32.start [1/16] (narrow) %v2091_v0, 8 }
  0xc8   : > { %211 = vxpose.xlu1.b32.start [1/16] (narrow) %v2101_v2, 8  ;;  %180 = vxpose.xlu0.b32.cont [2/16] (narrow) %v2094_v1, 8 }
  0xcc   : > { %212 = vxpose.xlu1.b32.cont [2/16] (narrow) %v2104_v3, 8  ;;  %181 = vxpose.xlu0.b32.cont [3/16] (narrow) %v2111_v4, 8 }
  0xd0   : > { %213 = vxpose.xlu1.b32.cont [3/16] (narrow) %v2114_v5, 8  ;;  %182 = vxpose.xlu0.b32.cont [4/16] (narrow) %v2121_v6, 8 }
  0xd4   : > { %214 = vxpose.xlu1.b32.cont [4/16] (narrow) %v2124_v7, 8  ;;  %183 = vxpose.xlu0.b32.cont [5/16] (narrow) %v2131_v8, 8 }
  0xd8   : > { %215 = vxpose.xlu1.b32.cont [5/16] (narrow) %v2134_v9, 8  ;;  %184 = vxpose.xlu0.b32.cont [6/16] (narrow) %v2141_v10, 8 }
  0xdc   : > { %216 = vxpose.xlu1.b32.cont [6/16] (narrow) %v2144_v11, 8  ;;  %185 = vxpose.xlu0.b32.cont [7/16] (narrow) %v2151_v12, 8 }
  0xe0   : > { %217 = vxpose.xlu1.b32.cont [7/16] (narrow) %v2154_v13, 8  ;;  %186 = vxpose.xlu0.b32.cont [8/16] (narrow) %v2161_v14, 8 }
  0xe4   : > { %218 = vxpose.xlu1.b32.cont [8/16] (narrow) %v2164_v15, 8  ;;  %187 = vxpose.xlu0.b32.cont [9/16] (narrow) %v2171_v16, 8 }
  0xe8   : > { %219 = vxpose.xlu1.b32.cont [9/16] (narrow) %v2174_v17, 8  ;;  %188 = vxpose.xlu0.b32.cont [10/16] (narrow) %v2181_v18, 8 }
  0xec   : > { %220 = vxpose.xlu1.b32.cont [10/16] (narrow) %v2184_v19, 8  ;;  %189 = vxpose.xlu0.b32.cont [11/16] (narrow) %v2191_v20, 8 }
  0xf0   : > { %221 = vxpose.xlu1.b32.cont [11/16] (narrow) %v2194_v21, 8  ;;  %190 = vxpose.xlu0.b32.cont [12/16] (narrow) %v2201_v22, 8 }
  0xf4   : > { %222 = vxpose.xlu1.b32.cont [12/16] (narrow) %v2204_v23, 8  ;;  %191 = vxpose.xlu0.b32.cont [13/16] (narrow) %v2211_v24, 8 }
  0xf8   : > { %223 = vxpose.xlu1.b32.cont [13/16] (narrow) %v2214_v25, 8  ;;  %192 = vxpose.xlu0.b32.cont [14/16] (narrow) %v2221_v26, 8 }
  0xfc   : > { %224 = vxpose.xlu1.b32.cont [14/16] (narrow) %v2224_v27, 8  ;;  %193 = vxpose.xlu0.b32.cont [15/16] (narrow) %v2231_v28, 8 }
 0x100   : > { %225 = vxpose.xlu1.b32.cont [15/16] (narrow) %v2234_v29, 8  ;;  %194 = vxpose.xlu0.b32.end [16/16] (narrow) %v2241_v30, 8 }
 0x104   : > { %226 = vxpose.xlu1.b32.end [16/16] (narrow) %v2244_v31, 8  ;;  %v2285_v34 = vpop.trf.xlu0 }
 0x105   : > { %v604_v35 = vmul.f32 %v2285_v34, %v2285_v34 }
 0x108   : > { %v2283_v33 = vpop.trf.xlu1 }
 0x109   : > { %v605_v36 = vmul.f32 %v2283_v33, %v2283_v33 }
 0x10b   : > { %v606_v37 = vadd.f32 %v605_v36, %v604_v35 }
 0x122   : > { %1795 = vset.pattern.permute.xlu1 %v2051_v32 }
 0x12d   : > { %607 = vadd.xlane.f32.xlu0 %v606_v37 }
 0x143   : > { %1761 = vrot.lane.b32.xlu0 %v1760_v38, %s2052_s16 }
 0x144   : > { %v2297_v40 = vpop.trf.xlu0 }
 0x145   : > { %v595_v41 = vmul.f32 %v2297_v40, %v2297_v40 }
 0x147   : > { %1771 = vrot.lane.b32.xlu0 %v1770_v39, %s2052_s16 }
 0x148   : > { %v2304_v43 = vpop.trf.xlu1 }
 0x149   : > { %v596_v44 = vmul.f32 %v2304_v43, %v2304_v43 }
 0x14b   : > { %v597_v45 = vadd.f32 %v596_v44, %v595_v41  ;;  %1781 = vrot.lane.b32.xlu0 %v1780_v42, %s2052_s16 }
 0x14d   : > { %598 = vadd.xlane.f32.xlu1 %v597_v45 }
 0x14f   : > { %1791 = vrot.lane.b32.xlu0 %v1790_v46, %s2052_s16 }
 0x153   : > { %1797 = vrot.lane.b32.xlu0 %v1796_v47, %s2052_s16 }
 0x157   : > { %1807 = vrot.lane.b32.xlu0 %v1806_v48, %s2052_s16 }
 0x15b   : > { %1817 = vrot.lane.b32.xlu0 %v1816_v49, %s2052_s16 }
 0x15e   : > { %1766 = vrot.lane.b32.xlu1 %v1765_v50, %s2052_s16 }
 0x15f   : > { %957 = vrot.lane.b32.xlu0 %v2091_v0, %s2053_s17 }
 0x162   : > { %1776 = vrot.lane.b32.xlu1 %v1775_v51, %s2052_s16 }
 0x163   : > { %959 = vrot.lane.b32.xlu0 %v2094_v1, %s2053_s17 }
 0x166   : > { %1786 = vrot.lane.b32.xlu1 %v1785_v52, %s2052_s16 }
 0x167   : > { %961 = vrot.lane.b32.xlu0 %v2111_v4, %s2053_s17 }
 0x16a   : > { %663 = vperm.xlu1 %1795, %v1734_v53  }
 0x16b   : > { %963 = vrot.lane.b32.xlu0 %v2121_v6, %s2053_s17 }
 0x16e   : > { %1802 = vrot.lane.b32.xlu1 %v1801_v54, %s2052_s16 }
 0x16f   : > { %797 = vrot.lane.b32.xlu0 %v2091_v0, %s2054_s20 }
 0x172   : > { %1812 = vrot.lane.b32.xlu1 %v1811_v55, %s2052_s16 }
 0x173   : > { %965 = vrot.lane.b32.xlu0 %v2131_v8, %s2053_s17 }
 0x176   : > { %1822 = vrot.lane.b32.xlu1 %v1821_v56, %s2052_s16 }
 0x177   : > { %799 = vrot.lane.b32.xlu0 %v2094_v1, %s2054_s20 }
 0x17a   : > { %989 = vrot.lane.b32.xlu1 %v2101_v2, %s2053_s17 }
 0x17b   : > { %967 = vrot.lane.b32.xlu0 %v2141_v10, %s2053_s17 }
 0x17e   : > { %991 = vrot.lane.b32.xlu1 %v2104_v3, %s2053_s17 }
 0x17f   : > { %801 = vrot.lane.b32.xlu0 %v2111_v4, %s2054_s20 }
 0x182   : > { %993 = vrot.lane.b32.xlu1 %v2114_v5, %s2053_s17 }
 0x183   : > { %969 = vrot.lane.b32.xlu0 %v2151_v12, %s2053_s17 }
 0x186   : > { %995 = vrot.lane.b32.xlu1 %v2124_v7, %s2053_s17 }
 0x187   : > { %803 = vrot.lane.b32.xlu0 %v2121_v6, %s2054_s20 }
 0x18a   : > { %829 = vrot.lane.b32.xlu1 %v2101_v2, %s2054_s20 }
 0x18b   : > { %971 = vrot.lane.b32.xlu0 %v2161_v14, %s2053_s17 }
 0x18e   : > { %997 = vrot.lane.b32.xlu1 %v2134_v9, %s2053_s17 }
 0x18f   : > { %805 = vrot.lane.b32.xlu0 %v2131_v8, %s2054_s20 }
 0x192   : > { %831 = vrot.lane.b32.xlu1 %v2104_v3, %s2054_s20 }
 0x193   : > { %973 = vrot.lane.b32.xlu0 %v2171_v16, %s2053_s17 }
 0x196   : > { %999 = vrot.lane.b32.xlu1 %v2144_v11, %s2053_s17 }
 0x197   : > { %807 = vrot.lane.b32.xlu0 %v2141_v10, %s2054_s20 }
 0x19a   : > { %833 = vrot.lane.b32.xlu1 %v2114_v5, %s2054_s20 }
 0x19b   : > { %975 = vrot.lane.b32.xlu0 %v2181_v18, %s2053_s17 }
 0x19e   : > { %1001 = vrot.lane.b32.xlu1 %v2154_v13, %s2053_s17 }
 0x19f   : > { %809 = vrot.lane.b32.xlu0 %v2151_v12, %s2054_s20 }
 0x1a2   : > { %835 = vrot.lane.b32.xlu1 %v2124_v7, %s2054_s20 }
 0x1a3   : > { %977 = vrot.lane.b32.xlu0 %v2191_v20, %s2053_s17 }
 0x1a6   : > { %1003 = vrot.lane.b32.xlu1 %v2164_v15, %s2053_s17 }
 0x1a7   : > { %811 = vrot.lane.b32.xlu0 %v2161_v14, %s2054_s20 }
 0x1aa   : > { %837 = vrot.lane.b32.xlu1 %v2134_v9, %s2054_s20 }
 0x1ab   : > { %979 = vrot.lane.b32.xlu0 %v2201_v22, %s2053_s17 }
 0x1ae   : > { %1005 = vrot.lane.b32.xlu1 %v2174_v17, %s2053_s17 }
 0x1af   : > { %813 = vrot.lane.b32.xlu0 %v2171_v16, %s2054_s20 }
 0x1b2   : > { %839 = vrot.lane.b32.xlu1 %v2144_v11, %s2054_s20 }
 0x1b3   : > { %981 = vrot.lane.b32.xlu0 %v2211_v24, %s2053_s17 }
 0x1b6   : > { %1007 = vrot.lane.b32.xlu1 %v2184_v19, %s2053_s17 }
 0x1b7   : > { %815 = vrot.lane.b32.xlu0 %v2181_v18, %s2054_s20 }
 0x1ba   : > { %841 = vrot.lane.b32.xlu1 %v2154_v13, %s2054_s20  ;;  %v608_v0 = vpop.xlane.xlu0 %607 }
 0x1bb   : > { %1996 = vrsqrt.f32 %v608_v0  ;;  %983 = vrot.lane.b32.xlu0 %v2221_v26, %s2053_s17 }
 0x1be   : > { %1009 = vrot.lane.b32.xlu1 %v2194_v21, %s2053_s17  ;;  %v2426_v2 = vpop.permute.xlu0 %1761 }
 0x1bf   : > { %817 = vrot.lane.b32.xlu0 %v2191_v20, %s2054_s20 }
 0x1c2   : > { %843 = vrot.lane.b32.xlu1 %v2164_v15, %s2054_s20  ;;  %v2432_v4 = vpop.permute.xlu0 %1771 }
 0x1c3   : > { %985 = vrot.lane.b32.xlu0 %v2231_v28, %s2053_s17 }
 0x1c5   : > { %v1997_v5 = vpop.eup %1996 }
 0x1c6   : > { %1011 = vrot.lane.b32.xlu1 %v2204_v23, %s2053_s17  ;;  %v2438_v6 = vpop.permute.xlu0 %1781  ;;  %v610_v7 = vmin.f32 %v1997_v5, 1e+12 }
 0x1c7   : > { %819 = vrot.lane.b32.xlu0 %v2201_v22, %s2054_s20 }
 0x1c8   : > { %v612_v8 = vmul.f32 %v610_v7, %v2283_v33  ;;  %v611_v9 = vmul.f32 %v610_v7, %v2285_v34 }
 0x1ca   : > { %845 = vrot.lane.b32.xlu1 %v2174_v17, %s2054_s20  ;;  %v616_v10 = vpack.c.bf16 %v612_v8, %v612_v8  ;;  %v615_v11 = vpack.c.bf16 %v611_v9, %v611_v9  ;;  %v2446_v12 = vpop.permute.xlu0 %1791 }
 0x1cb   : > { %987 = vrot.lane.b32.xlu0 %v2241_v30, %s2053_s17 }
 0x1cc   : > { %617 = vmatprep.subr.bf16.mxu0 %v616_v10 }
 0x1cd   : > { %618 = vmatpush1.bf16.xpose.msra.mxu0 %v615_v11 }
 0x1ce   : > { %1013 = vrot.lane.b32.xlu1 %v2214_v25, %s2053_s17  ;;  %v2452_v13 = vpop.permute.xlu0 %1797 }
 0x1d2   : > { %847 = vrot.lane.b32.xlu1 %v2184_v19, %s2054_s20  ;;  %v2456_v14 = vpop.permute.xlu0 %1807 }
 0x1d6   : > { %1015 = vrot.lane.b32.xlu1 %v2224_v27, %s2053_s17  ;;  %v2460_v15 = vpop.permute.xlu0 %1817 }
 0x1da   : > { %849 = vrot.lane.b32.xlu1 %v2194_v21, %s2054_s20  ;;  %v599_v16 = vpop.xlane.xlu1 %598  ;;  %v958_v17 = vpop.permute.xlu0 %957 }
 0x1db   : > { %1998 = vrsqrt.f32 %v599_v16 }
 0x1de   : > { %1017 = vrot.lane.b32.xlu1 %v2234_v29, %s2053_s17  ;;  %v2466_v18 = vpop.permute.xlu1 %1766  ;;  %v960_v20 = vpop.permute.xlu0 %959 }
 0x1e2   : > { %851 = vrot.lane.b32.xlu1 %v2204_v23, %s2054_s20  ;;  %v2470_v19 = vpop.permute.xlu1 %1776  ;;  %v962_v22 = vpop.permute.xlu0 %961 }
 0x1e5   : > { %v1999_v57 = vpop.eup %1998 }
 0x1e6   : > { %1019 = vrot.lane.b32.xlu1 %v2244_v31, %s2053_s17  ;;  %v2474_v58 = vpop.permute.xlu1 %1786  ;;  %v964_v59 = vpop.permute.xlu0 %963  ;;  %v601_v60 = vmin.f32 %v1999_v57, 1e+12 }
 0x1e8   : > { %v603_v61 = vmul.f32 %v601_v60, %v2304_v43  ;;  %v602_v62 = vmul.f32 %v601_v60, %v2297_v40 }
 0x1ea   : > { %v2478_v63 = vpop.permute.xlu1 %663  ;;  %v614_v33 = vpack.c.bf16 %v603_v61, %v603_v61  ;;  %v613_v34 = vpack.c.bf16 %v602_v62, %v602_v62  ;;  %v2480_v35 = vpop.permute.xlu0 %797 }
 0x1ec   : > { %649 = vmatprep.mubr.bf16.mxu0 %v614_v33 }
 0x1ed   : > { %650 = vmatmul.mubr.bf16.vlgmr.msra.gmra.mrb[0].mxu0 %v613_v34 }
 0x1ee   : > { %v2482_v36 = vpop.permute.xlu1 %1802  ;;  %v966_v37 = vpop.permute.xlu0 %965  ;;  %1404 = vmatprep.mubr.bf16.mxu0 %v2051_v32 }
 0x1f2   : > { %v2485_v38 = vpop.permute.xlu1 %1812  ;;  %v2487_v39 = vpop.permute.xlu0 %799 }
 0x1f6   : > { %v2489_v41 = vpop.permute.xlu1 %1822  ;;  %v968_v40 = vpop.permute.xlu0 %967 }
 0x1fa   : > { %v990_v42 = vpop.permute.xlu1 %989  ;;  %v2491_v43 = vpop.permute.xlu0 %801 }
 0x1fb   : > { %1085 = vxpose.xlu0.b32.start [1/16] (narrow) %v990_v42, 8 }
 0x1fe   : > { %v992_v44 = vpop.permute.xlu1 %991  ;;  %v970_v45 = vpop.permute.xlu0 %969 }
 0x1ff   : > { %1086 = vxpose.xlu0.b32.cont [2/16] (narrow) %v992_v44, 8 }
 0x202   : > { %v994_v46 = vpop.permute.xlu1 %993  ;;  %v2493_v47 = vpop.permute.xlu0 %803 }
 0x203   : > { %1087 = vxpose.xlu0.b32.cont [3/16] (narrow) %v994_v46, 8 }
 0x206   : > { %v996_v48 = vpop.permute.xlu1 %995  ;;  %v972_v49 = vpop.permute.xlu0 %971 }
 0x207   : > { %1088 = vxpose.xlu0.b32.cont [4/16] (narrow) %v996_v48, 8 }
 0x20a   : > { %v2495_v50 = vpop.permute.xlu1 %829  ;;  %v2497_v51 = vpop.permute.xlu0 %805 }
 0x20e   : > { %v998_v52 = vpop.permute.xlu1 %997  ;;  %v974_v53 = vpop.permute.xlu0 %973 }
 0x20f   : > { %1089 = vxpose.xlu0.b32.cont [5/16] (narrow) %v998_v52, 8  ;;  %1053 = vxpose.xlu1.b32.start [1/16] (narrow) %v958_v17, 8 }
 0x212   : > { %v2499_v54 = vpop.permute.xlu1 %831  ;;  %v2501_v55 = vpop.permute.xlu0 %807 }
 0x213   : > { %1054 = vxpose.xlu1.b32.cont [2/16] (narrow) %v960_v20, 8 }
 0x216   : > { %v1000_v56 = vpop.permute.xlu1 %999  ;;  %v976_v0 = vpop.permute.xlu0 %975 }
 0x217   : > { %1090 = vxpose.xlu0.b32.cont [6/16] (narrow) %v1000_v56, 8  ;;  %1055 = vxpose.xlu1.b32.cont [3/16] (narrow) %v962_v22, 8 }
 0x21a   : > { %v2503_v5 = vpop.permute.xlu1 %833  ;;  %v810_v7 = vpop.permute.xlu0 %809 }
 0x21b   : > { %1056 = vxpose.xlu1.b32.cont [4/16] (narrow) %v964_v59, 8 }
 0x21e   : > { %v1002_v8 = vpop.permute.xlu1 %1001  ;;  %v978_v9 = vpop.permute.xlu0 %977 }
 0x21f   : > { %1091 = vxpose.xlu0.b32.cont [7/16] (narrow) %v1002_v8, 8  ;;  %1057 = vxpose.xlu1.b32.cont [5/16] (narrow) %v966_v37, 8 }
 0x222   : > { %v2505_v10 = vpop.permute.xlu1 %835  ;;  %v812_v11 = vpop.permute.xlu0 %811 }
 0x223   : > { %1058 = vxpose.xlu1.b32.cont [6/16] (narrow) %v968_v40, 8 }
 0x226   : > { %v1004_v16 = vpop.permute.xlu1 %1003  ;;  %v980_v17 = vpop.permute.xlu0 %979 }
 0x227   : > { %1092 = vxpose.xlu0.b32.cont [8/16] (narrow) %v1004_v16, 8  ;;  %1059 = vxpose.xlu1.b32.cont [7/16] (narrow) %v970_v45, 8 }
 0x22a   : > { %v2507_v20 = vpop.permute.xlu1 %837  ;;  %v814_v57 = vpop.permute.xlu0 %813 }
 0x22b   : > { %1060 = vxpose.xlu1.b32.cont [8/16] (narrow) %v972_v49, 8 }
 0x22e   : > { %v1006_v22 = vpop.permute.xlu1 %1005  ;;  %v982_v60 = vpop.permute.xlu0 %981 }
 0x22f   : > { %1093 = vxpose.xlu0.b32.cont [9/16] (narrow) %v1006_v22, 8  ;;  %1061 = vxpose.xlu1.b32.cont [9/16] (narrow) %v974_v53, 8 }
 0x232   : > { %v2509_v59 = vpop.permute.xlu1 %839  ;;  %v816_v61 = vpop.permute.xlu0 %815 }
 0x233   : > { %1062 = vxpose.xlu1.b32.cont [10/16] (narrow) %v976_v0, 8 }
 0x236   : > { %v1008_v62 = vpop.permute.xlu1 %1007  ;;  %v984_v33 = vpop.permute.xlu0 %983 }
 0x237   : > { %1094 = vxpose.xlu0.b32.cont [10/16] (narrow) %v1008_v62, 8  ;;  %1063 = vxpose.xlu1.b32.cont [11/16] (narrow) %v978_v9, 8 }
 0x23a   : > { %v842_v34 = vpop.permute.xlu1 %841  ;;  %v818_v37 = vpop.permute.xlu0 %817 }
 0x23b   : > { %1064 = vxpose.xlu1.b32.cont [12/16] (narrow) %v980_v17, 8 }
 0x23e   : > { %v1010_v40 = vpop.permute.xlu1 %1009  ;;  %v986_v42 = vpop.permute.xlu0 %985 }
 0x23f   : > { %1095 = vxpose.xlu0.b32.cont [11/16] (narrow) %v1010_v40, 8  ;;  %1065 = vxpose.xlu1.b32.cont [13/16] (narrow) %v982_v60, 8  ;;  %v1805_v40 = vunpack.i.h.bf16 %v2482_v36 }
 0x242   : > { %v844_v44 = vpop.permute.xlu1 %843  ;;  %v820_v45 = vpop.permute.xlu0 %819 }
 0x243   : > { %1066 = vxpose.xlu1.b32.cont [14/16] (narrow) %v984_v33, 8  ;;  %v1763_v33 = vunpack.i.l.bf16 %v2426_v2 }
 0x246   : > { %v1012_v46 = vpop.permute.xlu1 %1011  ;;  %v988_v48 = vpop.permute.xlu0 %987 }
 0x247   : > { %1096 = vxpose.xlu0.b32.cont [12/16] (narrow) %v1012_v46, 8  ;;  %1067 = vxpose.xlu1.b32.cont [15/16] (narrow) %v986_v42, 8 }
 0x24a   : > { %v846_v49 = vpop.permute.xlu1 %845 }
 0x24b   : > { %1068 = vxpose.xlu1.b32.end [16/16] (narrow) %v988_v48, 8  ;;  %v1810_v48 = vunpack.i.h.bf16 %v2456_v14 }
 0x24e   : > { %v1014_v52 = vpop.permute.xlu1 %1013 }
 0x24f   : > { %1097 = vxpose.xlu0.b32.cont [13/16] (narrow) %v1014_v52, 8  ;;  %893 = vxpose.xlu1.b32.start [1/16] (narrow) %v2480_v35, 8 }
 0x252   : > { %v848_v53 = vpop.permute.xlu1 %847 }
 0x253   : > { %894 = vxpose.xlu1.b32.cont [2/16] (narrow) %v2487_v39, 8 }
 0x256   : > { %v1016_v56 = vpop.permute.xlu1 %1015 }
 0x257   : > { %1098 = vxpose.xlu0.b32.cont [14/16] (narrow) %v1016_v56, 8  ;;  %895 = vxpose.xlu1.b32.cont [3/16] (narrow) %v2491_v43, 8 }
 0x25a   : > { %v850_v0 = vpop.permute.xlu1 %849 }
 0x25b   : > { %896 = vxpose.xlu1.b32.cont [4/16] (narrow) %v2493_v47, 8 }
 0x25e   : > { %v1018_v8 = vpop.permute.xlu1 %1017 }
 0x25f   : > { %1099 = vxpose.xlu0.b32.cont [15/16] (narrow) %v1018_v8, 8  ;;  %897 = vxpose.xlu1.b32.cont [5/16] (narrow) %v2497_v51, 8 }
 0x262   : > { %v852_v9 = vpop.permute.xlu1 %851 }
 0x263   : > { %898 = vxpose.xlu1.b32.cont [6/16] (narrow) %v2501_v55, 8 }
 0x266   : > { %v1020_v16 = vpop.permute.xlu1 %1019 }
 0x267   : > { %1100 = vxpose.xlu0.b32.end [16/16] (narrow) %v1020_v16, 8  ;;  %899 = vxpose.xlu1.b32.cont [7/16] (narrow) %v810_v7, 8 }
 0x26b   : > { %900 = vxpose.xlu1.b32.cont [8/16] (narrow) %v812_v11, 8 }
 0x26f   : > { %901 = vxpose.xlu1.b32.cont [9/16] (narrow) %v814_v57, 8 }
 0x273   : > { %902 = vxpose.xlu1.b32.cont [10/16] (narrow) %v816_v61, 8 }
 0x277   : > { %903 = vxpose.xlu1.b32.cont [11/16] (narrow) %v818_v37, 8  ;;  %v1764_v37 = vunpack.i.h.bf16 %v2426_v2  ;;  %v1814_v2 = vunpack.i.l.bf16 %v2485_v38 }
 0x279   : > { %v1843_v46 = vpack.i.bf16 %v1805_v40, %v1764_v37 }
 0x27b   : > { %904 = vxpose.xlu1.b32.cont [12/16] (narrow) %v820_v45, 8  ;;  %v1768_v45 = vunpack.i.l.bf16 %v2466_v18 }
 0x28f   : > { %v2552_v7 = vpop.trf.xlu1 }
 0x290   : > { %821 = vrot.lane.b32.xlu0 %v2211_v24, %s2054_s20 }
 0x294   : > { %823 = vrot.lane.b32.xlu0 %v2221_v26, %s2054_s20 }
 0x298   : > { %825 = vrot.lane.b32.xlu0 %v2231_v28, %s2054_s20 }
 0x29c   : > { %827 = vrot.lane.b32.xlu0 %v2241_v30, %s2054_s20 }
 0x2ab   : > { %v2530_v24 = vpop.trf.xlu0 }
 0x2c0   : > { %v651_v35 = vpop.f32.mrb[0].mxu0 }
 0x2c1   : > { %v666_v39 = vmul.f32 %v2478_v63, %v651_v35  ;;  %v653_v43 = vpop.f32.mrb[1].mxu0  ;;  %v1779_v35 = vunpack.i.h.bf16 %v2470_v19 }
 0x2c2   : > { %v654_v47 = vpop.f32.mrb[2].mxu0  ;;  %v1737_v43 = vld [vmem:[%s2899_s1 + $0x1] ss:$0 sm:$0xff] }
 0x2c3   : > { %v655_v51 = vpop.f32.mrb[3].mxu0  ;;  %v668_v55 = vsel %vm667_vm0, %v666_v39, -inf }
 0x2c4   : > { %669 = vmax.xlane.f32.xlu0 %v668_v55  ;;  %v1824_v51 = vunpack.i.l.bf16 %v2489_v41 }
 0x2f1   : > { %925 = vxpose.xlu0.b32.start [1/16] (narrow) %v2495_v50, 8  ;;  %v1826_v50 = vpack.i.bf16 %v2204_v23, %v2194_v21 }
 0x2f5   : > { %926 = vxpose.xlu0.b32.cont [2/16] (narrow) %v2499_v54, 8  ;;  %v1831_v54 = vpack.i.bf16 %v2224_v27, %v2214_v25 }
 0x2f9   : > { %927 = vxpose.xlu0.b32.cont [3/16] (narrow) %v2503_v5, 8  ;;  %v1836_v5 = vpack.i.bf16 %v2244_v31, %v2234_v29 }
 0x2fd   : > { %928 = vxpose.xlu0.b32.cont [4/16] (narrow) %v2505_v10, 8 }
 0x301   : > { %929 = vxpose.xlu0.b32.cont [5/16] (narrow) %v2507_v20, 8 }
 0x302   : > { %v822_v26 = vpop.permute.xlu0 %821 }
 0x303   : > { %905 = vxpose.xlu1.b32.cont [13/16] (narrow) %v822_v26, 8 }
 0x305   : > { %930 = vxpose.xlu0.b32.cont [6/16] (narrow) %v2509_v59, 8 }
 0x306   : > { %v824_v28 = vpop.permute.xlu0 %823 }
 0x307   : > { %906 = vxpose.xlu1.b32.cont [14/16] (narrow) %v824_v28, 8 }
 0x309   : > { %931 = vxpose.xlu0.b32.cont [7/16] (narrow) %v842_v34, 8  ;;  %v1804_v34 = vunpack.i.l.bf16 %v2482_v36  ;;  %v1774_v36 = vunpack.i.h.bf16 %v2432_v4 }
 0x30a   : > { %v826_v30 = vpop.permute.xlu0 %825 }
 0x30b   : > { %907 = vxpose.xlu1.b32.cont [15/16] (narrow) %v826_v30, 8  ;;  %v1841_v42 = vpack.i.bf16 %v1804_v34, %v1763_v33 }
 0x30d   : > { %932 = vxpose.xlu0.b32.cont [8/16] (narrow) %v844_v44, 8  ;;  %v1809_v44 = vunpack.i.l.bf16 %v2456_v14  ;;  %v1778_v14 = vunpack.i.l.bf16 %v2470_v19  ;;  %v1825_v19 = vunpack.i.h.bf16 %v2489_v41 }
 0x30e   : > { %v828_v63 = vpop.permute.xlu0 %827 }
 0x30f   : > { %908 = vxpose.xlu1.b32.end [16/16] (narrow) %v828_v63, 8  ;;  %v1845_v52 = vpack.i.bf16 %v1809_v44, %v1768_v45 }
 0x311   : > { %933 = vxpose.xlu0.b32.cont [9/16] (narrow) %v846_v49, 8  ;;  %v1769_v49 = vunpack.i.h.bf16 %v2466_v18  ;;  %v1820_v18 = vunpack.i.h.bf16 %v2460_v15 }
 0x313   : > { %v1847_v56 = vpack.i.bf16 %v1810_v48, %v1769_v49  ;;  %v1855_v47 = vpack.i.bf16 %v1820_v18, %v1779_v35  ;;  %v2016_v18 = vld [vmem:[%s2088_s14 + $0x18] sm:$0xff] }
 0x315   : > { %934 = vxpose.xlu0.b32.cont [10/16] (narrow) %v848_v53, 8  ;;  %v1773_v53 = vunpack.i.l.bf16 %v2432_v4  ;;  %v1884_v4 = vpack.i.bf16 %v2104_v3, %v2094_v1  ;;  %v1788_v1 = vunpack.i.l.bf16 %v2474_v58 }
 0x317   : > { %v1849_v8 = vpack.i.bf16 %v1814_v2, %v1773_v53 }
 0x319   : > { %935 = vxpose.xlu0.b32.cont [11/16] (narrow) %v850_v0, 8  ;;  %v1815_v0 = vunpack.i.h.bf16 %v2485_v38  ;;  %v1783_v38 = vunpack.i.l.bf16 %v2438_v6 }
 0x31b   : > { %v1851_v16 = vpack.i.bf16 %v1815_v0, %v1774_v36  ;;  %v1857_v55 = vpack.i.bf16 %v1824_v51, %v1783_v38  ;;  %v2012_v0 = vld [vmem:[%s2088_s14] sm:$0xff]  ;;  %v2020_v38 = vld [vmem:[%s2088_s14 + $0x28] sm:$0xff] }
 0x31d   : > { %936 = vxpose.xlu0.b32.cont [12/16] (narrow) %v852_v9, 8  ;;  %v1819_v9 = vunpack.i.l.bf16 %v2460_v15  ;;  %v1784_v15 = vunpack.i.h.bf16 %v2438_v6  ;;  %v1793_v6 = vunpack.i.l.bf16 %v2446_v12 }
 0x31f   : > { %v1859_v28 = vpack.i.bf16 %v1825_v19, %v1784_v15  ;;  %v2022_v15 = vld [vmem:[%s2088_s14 + $0x30] sm:$0xff] }
 0x320   : > { %v2023_v19 = vld [vmem:[%s2088_s14 + $0xb0] sm:$0xff] }
 0x32d   : > { %853 = vrot.lane.b32.xlu1 %v2214_v25, %s2054_s20  ;;  %v1287_v25 = vmul.f32 %v2530_v24, %v2530_v24 }
 0x331   : > { %855 = vrot.lane.b32.xlu1 %v2224_v27, %s2054_s20  ;;  %v1286_v27 = vmul.f32 %v2552_v7, %v2552_v7 }
 0x335   : > { %857 = vrot.lane.b32.xlu1 %v2234_v29, %s2054_s20  ;;  %v1288_v29 = vadd.f32 %v1287_v25, %v1286_v27 }
 0x339   : > { %859 = vrot.lane.b32.xlu1 %v2244_v31, %s2054_s20 }
 0x33d   : > { %1827 = vrot.lane.b32.xlu1 %v1826_v50, %s2052_s16 }
 0x341   : > { %1832 = vrot.lane.b32.xlu1 %v1831_v54, %s2052_s16  ;;  %v1789_v54 = vunpack.i.h.bf16 %v2474_v58  ;;  %v1800_v58 = vunpack.i.h.bf16 %v2452_v13 }
 0x345   : > { %1837 = vrot.lane.b32.xlu1 %v1836_v5, %s2052_s16 }
 0x351   : > { %v670_v31 = vpop.xlane.xlu0 %669 }
 0x352   : > { %v671_v20 = vsub.f32 %v666_v39, %v670_v31  ;;  %v1853_v39 = vpack.i.bf16 %v1819_v9, %v1778_v14  ;;  %v2015_v14 = vld [vmem:[%s2088_s14 + $0x90] sm:$0xff] }
 0x353   : > { %v2554_v10 = vpop.trf.xlu1 }
 0x354   : > { %v672_v57 = vmul.f32 1.442695, %v671_v20  ;;  %v1277_v60 = vmul.f32 %v2554_v10, %v2554_v10 }
 0x356   : > { %2000 = vpow2.f32 %v672_v57 }
 0x360   : > { %v2567_v62 = vpop.eup %2000 }
 0x39f   : > { %v854_v11 = vpop.permute.xlu1 %853 }
 0x3a0   : > { %937 = vxpose.xlu0.b32.cont [13/16] (narrow) %v854_v11, 8 }
 0x3a3   : > { %v856_v17 = vpop.permute.xlu1 %855 }
 0x3a4   : > { %938 = vxpose.xlu0.b32.cont [14/16] (narrow) %v856_v17, 8 }
 0x3a7   : > { %v858_v21 = vpop.permute.xlu1 %857 }
 0x3a8   : > { %939 = vxpose.xlu0.b32.cont [15/16] (narrow) %v858_v21, 8 }
 0x3ab   : > { %v860_v23 = vpop.permute.xlu1 %859 }
 0x3ac   : > { %940 = vxpose.xlu0.b32.end [16/16] (narrow) %v860_v23, 8  ;;  %v1794_v23 = vunpack.i.h.bf16 %v2446_v12 }
 0x3af   : > { %v1828_v26 = vpop.permute.xlu1 %1827 }
 0x3b0   : > { %v1829_v30 = vunpack.i.l.bf16 %v1828_v26  ;;  %v1830_v3 = vunpack.i.h.bf16 %v1828_v26  ;;  %v2024_v26 = vld [vmem:[%s2088_s14 + $0x38] sm:$0xff] }
 0x3b2   : > { %v1861_v63 = vpack.i.bf16 %v1829_v30, %v1788_v1  ;;  %v1863_v5 = vpack.i.bf16 %v1830_v3, %v1789_v54  ;;  %v2026_v1 = vld [vmem:[%s2088_s14 + $0x40] sm:$0xff]  ;;  %v2029_v54 = vld [vmem:[%s2088_s14 + $0xc8] sm:$0xff] }
 0x3b3   : > { %v1833_v50 = vpop.permute.xlu1 %1832  ;;  %v2027_v3 = vld [vmem:[%s2088_s14 + $0xc0] sm:$0xff] }
 0x3b4   : > { %v1834_v11 = vunpack.i.l.bf16 %v1833_v50  ;;  %v1835_v41 = vunpack.i.h.bf16 %v1833_v50  ;;  %v2028_v50 = vld [vmem:[%s2088_s14 + $0x48] sm:$0xff] }
 0x3b6   : > { %v1865_v17 = vpack.i.bf16 %v1834_v11, %v1793_v6  ;;  %v1867_v25 = vpack.i.bf16 %v1835_v41, %v1794_v23  ;;  %v2030_v11 = vld [vmem:[%s2088_s14 + $0x50] sm:$0xff] }
 0x3b7   : > { %v1838_v21 = vpop.permute.xlu1 %1837  ;;  %v2031_v6 = vld [vmem:[%s2088_s14 + $0xd0] sm:$0xff] }
 0x3b8   : > { %v1839_v27 = vunpack.i.l.bf16 %v1838_v21  ;;  %v1840_v31 = vunpack.i.h.bf16 %v1838_v21  ;;  %v1929_v41 = vpack.i.bf16 %v2031_v6, %v2030_v11  ;;  %v2033_v21 = vld [vmem:[%s2088_s14 + $0xd8] sm:$0xff] }
 0x3ba   : > { %v1871_v57 = vpack.i.bf16 %v1840_v31, %v1800_v58  ;;  %v2036_v31 = vld [vmem:[%s2088_s14 + $0x68] sm:$0xff] }
 0x3d5   : > { %1878 = vset.pattern.permute.xlu0 %v2051_v32  ;;  %v674_v32 = vsel %vm667_vm0, %v2567_v62, 0.0 }
 0x3d9   : > { %1289 = vadd.xlane.f32.xlu0 %v1288_v29  ;;  %v1799_v29 = vunpack.i.l.bf16 %v2452_v13 }
 0x3db   : > { %v1869_v20 = vpack.i.bf16 %v1839_v27, %v1799_v29  ;;  %v2035_v27 = vld [vmem:[%s2088_s14 + $0xe0] sm:$0xff] }
 0x3ef   : > { %1345 = vperm.xlu0 %1878, %v1737_v43   ;;  %v2019_v43 = vld [vmem:[%s2088_s14 + $0xa0] sm:$0xff] }
 0x3f0   : > { %v2561_v22 = vpop.trf.xlu0 }
 0x3f1   : > { %v1278_v59 = vmul.f32 %v2561_v22, %v2561_v22 }
 0x3f3   : > { %v1279_v61 = vadd.f32 %v1278_v59, %v1277_v60  ;;  %1885 = vrot.lane.b32.xlu0 %v1884_v4, %s2055_s23 }
 0x3f5   : > { %1280 = vadd.xlane.f32.xlu1 %v1279_v61 }
 0x3f9   : > { %675 = vadd.xlane.f32.xlu1 %v674_v32 }
 0x42c   : > { %1842 = vxpose.xlu1.b32.start [1/16] (narrow) %v1841_v42, 8 }
 0x430   : > { %1844 = vxpose.xlu1.b32.cont [2/16] (narrow) %v1843_v46, 8 }
 0x434   : > { %1846 = vxpose.xlu1.b32.cont [3/16] (narrow) %v1845_v52, 8 }
 0x438   : > { %1848 = vxpose.xlu1.b32.cont [4/16] (narrow) %v1847_v56, 8 }
 0x43c   : > { %1850 = vxpose.xlu1.b32.cont [5/16] (narrow) %v1849_v8, 8  ;;  %v2013_v8 = vld [vmem:[%s2088_s14 + $0x80] sm:$0xff] }
 0x43d   : > { %v1879_v9 = vpack.i.bf16 %v2013_v8, %v2012_v0 }
 0x440   : > { %1852 = vxpose.xlu1.b32.cont [6/16] (narrow) %v1851_v16, 8 }
 0x444   : > { %1854 = vxpose.xlu1.b32.cont [7/16] (narrow) %v1853_v39, 8  ;;  %v2018_v39 = vld [vmem:[%s2088_s14 + $0x20] sm:$0xff] }
 0x445   : > { %v1899_v4 = vpack.i.bf16 %v2019_v43, %v2018_v39 }
 0x448   : > { %1856 = vxpose.xlu1.b32.cont [8/16] (narrow) %v1855_v47, 8  ;;  %v2021_v47 = vld [vmem:[%s2088_s14 + $0xa8] sm:$0xff] }
 0x449   : > { %v1904_v51 = vpack.i.bf16 %v2021_v47, %v2020_v38 }
 0x44c   : > { %1858 = vxpose.xlu1.b32.cont [9/16] (narrow) %v1857_v55, 8  ;;  %v1909_v55 = vpack.i.bf16 %v2023_v19, %v2022_v15 }
 0x450   : > { %1860 = vxpose.xlu1.b32.cont [10/16] (narrow) %v1859_v28, 8  ;;  %v2025_v28 = vld [vmem:[%s2088_s14 + $0xb8] sm:$0xff] }
 0x451   : > { %v1914_v30 = vpack.i.bf16 %v2025_v28, %v2024_v26 }
 0x454   : > { %1862 = vxpose.xlu1.b32.cont [11/16] (narrow) %v1861_v63, 8  ;;  %v1919_v63 = vpack.i.bf16 %v2027_v3, %v2026_v1 }
 0x458   : > { %1864 = vxpose.xlu1.b32.cont [12/16] (narrow) %v1863_v5, 8  ;;  %v1924_v5 = vpack.i.bf16 %v2029_v54, %v2028_v50 }
 0x45c   : > { %1866 = vxpose.xlu1.b32.cont [13/16] (narrow) %v1865_v17, 8  ;;  %v2032_v17 = vld [vmem:[%s2088_s14 + $0x58] sm:$0xff] }
 0x45d   : > { %v1934_v23 = vpack.i.bf16 %v2033_v21, %v2032_v17 }
 0x460   : > { %1868 = vxpose.xlu1.b32.cont [14/16] (narrow) %v1867_v25, 8  ;;  %v2034_v25 = vld [vmem:[%s2088_s14 + $0x60] sm:$0xff] }
 0x461   : > { %v1939_v29 = vpack.i.bf16 %v2035_v27, %v2034_v25 }
 0x464   : > { %1870 = vxpose.xlu1.b32.cont [15/16] (narrow) %v1869_v20, 8  ;;  %v2037_v20 = vld [vmem:[%s2088_s14 + $0xe8] sm:$0xff] }
 0x465   : > { %v1944_v58 = vpack.i.bf16 %v2037_v20, %v2036_v31 }
 0x466   : > { %v1290_v60 = vpop.xlane.xlu0 %1289 }
 0x467   : > { %2002 = vrsqrt.f32 %v1290_v60  ;;  %v2039_v60 = vld [vmem:[%s2088_s14 + $0xf0] sm:$0xff] }
 0x468   : > { %1872 = vxpose.xlu1.b32.end [16/16] (narrow) %v1871_v57, 8  ;;  %v2038_v57 = vld [vmem:[%s2088_s14 + $0x70] sm:$0xff] }
 0x471   : > { %v2003_v12 = vpop.eup %2002 }
 0x472   : > { %v1292_v32 = vmin.f32 %v2003_v12, 1e+12 }
 0x474   : > { %v1294_v42 = vmul.f32 %v1292_v32, %v2530_v24  ;;  %v1293_v2 = vmul.f32 %v1292_v32, %v2552_v7  ;;  %v2014_v7 = vld [vmem:[%s2088_s14 + $0x10] sm:$0xff]  ;;  %v2040_v32 = vld [vmem:[%s2088_s14 + $0x78] sm:$0xff] }
 0x475   : > { %v1889_v16 = vpack.i.bf16 %v2015_v14, %v2014_v7 }
 0x476   : > { %v1298_v53 = vpack.c.bf16 %v1294_v42, %v1294_v42  ;;  %v1346_v42 = vpop.permute.xlu0 %1345 }
 0x482   : > { %v1281_v59 = vpop.xlane.xlu1 %1280 }
 0x483   : > { %2004 = vrsqrt.f32 %v1281_v59  ;;  %v1949_v59 = vpack.i.bf16 %v2039_v60, %v2038_v57 }
 0x486   : > { %v676_v61 = vpop.xlane.xlu1 %675  ;;  %1880 = vrot.lane.b32.xlu1 %v1879_v9, %s2055_s23 }
 0x487   : > { %2006 = vrcp.f32 %v676_v61 }
 0x48a   : > { %1890 = vrot.lane.b32.xlu1 %v1889_v16, %s2055_s23 }
 0x48d   : > { %v2005_v33 = vpop.eup %2004 }
 0x48e   : > { %v1283_v37 = vmin.f32 %v2005_v33, 1e+12  ;;  %v2041_v33 = vld [vmem:[%s2088_s14 + $0xf8] sm:$0xff] }
 0x490   : > { %v1285_v49 = vmul.f32 %v1283_v37, %v2561_v22  ;;  %v1297_v22 = vpack.c.bf16 %v1293_v2, %v1293_v2 }
 0x491   : > { %v2007_v34 = vpop.eup %2006 }
 0x492   : > { %v678_v48 = vmul.f32 %v2007_v34, %v2567_v62  ;;  %v1296_v56 = vpack.c.bf16 %v1285_v49, %v1285_v49  ;;  %v1284_v62 = vmul.f32 %v1283_v37, %v2554_v10  ;;  %v2017_v10 = vld [vmem:[%s2088_s14 + $0x98] sm:$0xff]  ;;  %v1954_v34 = vpack.i.bf16 %v2041_v33, %v2040_v32 }
 0x493   : > { %v1894_v35 = vpack.i.bf16 %v2017_v10, %v2016_v18 }
 0x494   : > { %v679_v24 = vpack.c.bf16 %v678_v48, %v678_v48  ;;  %v1295_v36 = vpack.c.bf16 %v1284_v62, %v1284_v62 }
 0x495   : > { %1895 = vrot.lane.b32.xlu1 %v1894_v35, %s2055_s23 }
 0x499   : > { %1900 = vrot.lane.b32.xlu1 %v1899_v4, %s2055_s23 }
 0x49d   : > { %1905 = vrot.lane.b32.xlu1 %v1904_v51, %s2055_s23 }
 0x4a1   : > { %1910 = vrot.lane.b32.xlu1 %v1909_v55, %s2055_s23 }
 0x4a5   : > { %1915 = vrot.lane.b32.xlu1 %v1914_v30, %s2055_s23 }
 0x4a9   : > { %1920 = vrot.lane.b32.xlu1 %v1919_v63, %s2055_s23 }
 0x4ac   : > { %v1873_v40 = vpop.trf.xlu1 }
 0x4ad   : > { %v1877_v44 = vunpack.i.h.bf16 %v1873_v40  ;;  %v1874_v45 = vunpack.i.l.bf16 %v1873_v40  ;;  %1925 = vrot.lane.b32.xlu1 %v1924_v5, %s2055_s23 }
 0x4af   : > { %v681_v13 = vpack.c.bf16 %v1877_v44, %v1877_v44  ;;  %v680_v46 = vpack.c.bf16 %v1874_v45, %v1874_v45 }
 0x4b1   : > { %1735 = vmatprep.subr.msk.bf16.mxu1 %vm685_vm1, %v681_v13  ;;  %v687_v52 = vsel %vm685_vm1, %v680_v46, 0  ;;  %1930 = vrot.lane.b32.xlu1 %v1929_v41, %s2055_s23 }
 0x4b2   : > { %693 = vmatpush1.bf16.msra.mxu1 %v687_v52 }
 0x4b3   : > { %1299 = vmatprep.subr.bf16.mxu1 %v1298_v53 }
 0x4b5   : > { %1736 = vmatmul.mubr.msk.bf16.vlgmr.msra.gmra.mrb[0].mxu1 %vm667_vm0, %v679_v24  ;;  %1935 = vrot.lane.b32.xlu1 %v1934_v23, %s2055_s23 }
 0x4b6   : > { %1331 = vmatprep.mubr.bf16.mxu1 %v1296_v56 }
 0x4b9   : > { %1940 = vrot.lane.b32.xlu1 %v1939_v29, %s2055_s23 }
 0x4bb   : > { %1300 = vmatpush1.bf16.xpose.msra.mxu1 %v1297_v22  ;;  %v1886_v22 = vpop.permute.xlu0 %1885 }
 0x4bd   : > { %1945 = vrot.lane.b32.xlu1 %v1944_v58, %s2055_s23 }
 0x4c1   : > { %1950 = vrot.lane.b32.xlu1 %v1949_v59, %s2055_s23 }
 0x4c2   : > { %1332 = vmatmul.mubr.bf16.vlgmr.msra.gmra.mrb[4].mxu1 %v1295_v36 }
 0x4c5   : > { %1955 = vrot.lane.b32.xlu1 %v1954_v34, %s2055_s23 }
 0x4f8   : > { %v1881_v52 = vpop.permute.xlu1 %1880 }
 0x4fc   : > { %v1891_v53 = vpop.permute.xlu1 %1890 }
 0x507   : > { %v1896_v24 = vpop.permute.xlu1 %1895 }
 0x50b   : > { %v1901_v56 = vpop.permute.xlu1 %1900 }
 0x50f   : > { %v1906_v2 = vpop.permute.xlu1 %1905 }
 0x513   : > { %v1911_v62 = vpop.permute.xlu1 %1910 }
 0x517   : > { %v1916_v36 = vpop.permute.xlu1 %1915 }
 0x51b   : > { %v1921_v0 = vpop.permute.xlu1 %1920 }
 0x51f   : > { %v1926_v8 = vpop.permute.xlu1 %1925 }
 0x523   : > { %v1931_v9 = vpop.permute.xlu1 %1930 }
 0x527   : > { %v1936_v7 = vpop.permute.xlu1 %1935 }
 0x52b   : > { %v1941_v14 = vpop.permute.xlu1 %1940 }
 0x52f   : > { %v1946_v10 = vpop.permute.xlu1 %1945 }
 0x533   : > { %v1951_v39 = vpop.permute.xlu1 %1950 }
 0x537   : > { %v1956_v43 = vpop.permute.xlu1 %1955 }
 0x588   : > { %v726_v61 = vpop.f32.mrb[0].mxu1 }
 0x589   : > { %v2652_v12 = vpop.f32.mrb[1].mxu1 }
 0x58a   : > { %v730_v37 = vpop.f32.mrb[2].mxu1 }
 0x58b   : > { %v731_v40 = vpop.f32.mrb[3].mxu1 }
 0x595   : > { %v1333_v44 = vpop.f32.mrb[4].mxu1 }
 0x596   : > { %v1348_v45 = vmul.f32 %v1346_v42, %v1333_v44  ;;  %v1335_v13 = vpop.f32.mrb[5].mxu1 }
 0x597   : > { %v1336_v46 = vpop.f32.mrb[6].mxu1 }
 0x598   : > { %v1337_v48 = vpop.f32.mrb[7].mxu1  ;;  %v1349_v49 = vsel %vm667_vm0, %v1348_v45, -inf }
 0x599   : > { %1350 = vmax.xlane.f32.xlu0 %v1349_v49 }
 0x5c6   : > { %733 = vxpose.xlu0.b32.start.end [1/1] (short) %v726_v61, 128 }
 0x603   : > { %1960 = vxpose.xlu0.b32.start [1/16] (narrow) %v1881_v52, 8 }
 0x607   : > { %1962 = vxpose.xlu0.b32.cont [2/16] (narrow) %v1886_v22, 8 }
 0x60b   : > { %1964 = vxpose.xlu0.b32.cont [3/16] (narrow) %v1891_v53, 8 }
 0x60f   : > { %1966 = vxpose.xlu0.b32.cont [4/16] (narrow) %v1896_v24, 8 }
 0x613   : > { %1968 = vxpose.xlu0.b32.cont [5/16] (narrow) %v1901_v56, 8 }
 0x617   : > { %1970 = vxpose.xlu0.b32.cont [6/16] (narrow) %v1906_v2, 8 }
 0x61b   : > { %1972 = vxpose.xlu0.b32.cont [7/16] (narrow) %v1911_v62, 8 }
 0x61f   : > { %1974 = vxpose.xlu0.b32.cont [8/16] (narrow) %v1916_v36, 8 }
 0x623   : > { %1976 = vxpose.xlu0.b32.cont [9/16] (narrow) %v1921_v0, 8 }
 0x626   : > { %v1351_v16 = vpop.xlane.xlu0 %1350 }
 0x627   : > { %v1352_v18 = vsub.f32 %v1348_v45, %v1351_v16  ;;  %1978 = vxpose.xlu0.b32.cont [10/16] (narrow) %v1926_v8, 8 }
 0x629   : > { %v1353_v35 = vmul.f32 1.442695, %v1352_v18 }
 0x62b   : > { %2008 = vpow2.f32 %v1353_v35  ;;  %1980 = vxpose.xlu0.b32.cont [11/16] (narrow) %v1931_v9, 8 }
 0x62f   : > { %1982 = vxpose.xlu0.b32.cont [12/16] (narrow) %v1936_v7, 8 }
 0x633   : > { %1984 = vxpose.xlu0.b32.cont [13/16] (narrow) %v1941_v14, 8 }
 0x635   : > { %v2009_v4 = vpop.eup %2008 }
 0x636   : > { %v1355_v38 = vsel %vm667_vm0, %v2009_v4, 0.0 }
 0x637   : > { %1356 = vadd.xlane.f32.xlu1 %v1355_v38  ;;  %1986 = vxpose.xlu0.b32.cont [14/16] (narrow) %v1946_v10, 8 }
 0x63b   : > { %1988 = vxpose.xlu0.b32.cont [15/16] (narrow) %v1951_v39, 8 }
 0x63f   : > { %1990 = vxpose.xlu0.b32.end [16/16] (narrow) %v1956_v43, 8 }
 0x646   : > { %v2660_v47 = vpop.trf.xlu0 }
 0x64a   : > { %v2662_v51 = vpop.trf.xlu0 }
 0x64e   : > { %v2664_v15 = vpop.trf.xlu0 }
 0x652   : > { %v2666_v19 = vpop.trf.xlu0 }
 0x656   : > { %v2668_v55 = vpop.trf.xlu0 }
 0x65a   : > { %v2670_v26 = vpop.trf.xlu0 }
 0x65e   : > { %v2672_v28 = vpop.trf.xlu0 }
 0x662   : > { %v2674_v30 = vpop.trf.xlu0 }
 0x666   : > { %v2676_v1 = vpop.trf.xlu0 }
 0x66a   : > { %765 = vxpose.xlu1.b32.start.end [1/1] (short) %v2652_v12, 128  ;;  %v2679_v3 = vpop.trf.xlu0 }
 0x66e   : > { %v2681_v63 = vpop.trf.xlu0 }
 0x672   : > { %v2683_v50 = vpop.trf.xlu0 }
 0x676   : > { %v2685_v54 = vpop.trf.xlu0 }
 0x67a   : > { %v2687_v5 = vpop.trf.xlu0 }
 0x67e   : > { %v2689_v11 = vpop.trf.xlu0 }
 0x682   : > { %v2691_v6 = vpop.trf.xlu0 }
 0x686   : > { %v1991_v41 = vpop.trf.xlu0 }
 0x687   : > { %v1995_v17 = vunpack.i.h.bf16 %v1991_v41  ;;  %v1992_v21 = vunpack.i.l.bf16 %v1991_v41 }
 0x689   : > { %v1362_v23 = vpack.c.bf16 %v1995_v17, %v1995_v17  ;;  %v1361_v25 = vpack.c.bf16 %v1992_v21, %v1992_v21 }
 0x68b   : > { %1738 = vmatprep.subr.msk.bf16.mxu0 %vm685_vm1, %v1362_v23  ;;  %v1367_v27 = vsel %vm685_vm1, %v1361_v25, 0 }
 0x68c   : > { %1373 = vmatpush1.bf16.msra.mxu0 %v1367_v27 }
 0x6c4   : > { %v1357_v29 = vpop.xlane.xlu1 %1356 }
 0x6c5   : > { %2010 = vrcp.f32 %v1357_v29 }
 0x6cf   : > { %v2011_v31 = vpop.eup %2010 }
 0x6d0   : > { %v1359_v20 = vmul.f32 %v2011_v31, %v2009_v4 }
 0x6d2   : > { %v1360_v58 = vpack.c.bf16 %v1359_v20, %v1359_v20 }
 0x6d4   : > { %1739 = vmatmul.mubr.msk.bf16.vlgmr.msra.gmra.mrb[4].mxu0 %vm667_vm0, %v1360_v58 }
 0x6ea   : > { %v2696_v12 = vpop.trf.xlu1 }
 0x6ee   : > { %v2698_v32 = vpop.trf.xlu1 }
 0x6f2   : > { %v2700_v33 = vpop.trf.xlu1 }
 0x6f6   : > { %v2702_v34 = vpop.trf.xlu1 }
 0x6fa   : > { %v2704_v37 = vpop.trf.xlu1 }
 0x6fe   : > { %v2706_v40 = vpop.trf.xlu1 }
 0x702   : > { %v2708_v42 = vpop.trf.xlu1 }
 0x706   : > { %v2710_v44 = vpop.trf.xlu1 }
 0x70a   : > { %v2712_v45 = vpop.trf.xlu1 }
 0x70e   : > { %v2714_v13 = vpop.trf.xlu1 }
 0x712   : > { %v2716_v46 = vpop.trf.xlu1 }
 0x716   : > { %v2718_v48 = vpop.trf.xlu1 }
 0x71a   : > { %v2720_v49 = vpop.trf.xlu1 }
 0x71e   : > { %v2722_v52 = vpop.trf.xlu1 }
 0x722   : > { %v2724_v53 = vpop.trf.xlu1 }
 0x726   : > { %v2726_v24 = vpop.trf.xlu1 }
 0x7a7   : > { %v1406_v57 = vpop.f32.mrb[4].mxu0 }
 0x7a8   : > { %1413 = vxpose.xlu1.b32.start.end [1/1] (short) %v1406_v57, 128  ;;  %v1408_v60 = vpop.f32.mrb[5].mxu0 }
 0x7a9   : > { %1445 = vxpose.xlu0.b32.start.end [1/1] (short) %v1408_v60, 128  ;;  %v1410_v59 = vpop.f32.mrb[6].mxu0 }
 0x7aa   : > { %v1411_v61 = vpop.f32.mrb[7].mxu0 }
 0x828   : > { %v1429_v56 = vpop.trf.xlu1 }
 0x829   : > { %1509 = vrot.lane.b32.xlu0 %v1429_v56, %s2056_s24  ;;  %v1461_v2 = vpop.trf.xlu0 }
 0x82c   : > { %v1430_v22 = vpop.trf.xlu1 }
 0x82d   : > { %1511 = vrot.lane.b32.xlu1 %v1430_v22, %s2056_s24  ;;  %1541 = vrot.lane.b32.xlu0 %v1461_v2, %s2056_s24  ;;  %v1462_v62 = vpop.trf.xlu0 }
 0x830   : > { %v1431_v36 = vpop.trf.xlu1 }
 0x831   : > { %1513 = vrot.lane.b32.xlu0 %v1431_v36, %s2056_s24  ;;  %1543 = vrot.lane.b32.xlu1 %v1462_v62, %s2056_s24  ;;  %v1463_v0 = vpop.trf.xlu0 }
 0x834   : > { %v1432_v8 = vpop.trf.xlu1 }
 0x835   : > { %1545 = vrot.lane.b32.xlu0 %v1463_v0, %s2056_s24  ;;  %v1464_v9 = vpop.trf.xlu0 }
 0x836   : > { %1547 = vrot.lane.b32.xlu1 %v1464_v9, %s2056_s24 }
 0x838   : > { %v1433_v7 = vpop.trf.xlu1 }
 0x839   : > { %1515 = vrot.lane.b32.xlu0 %v1432_v8, %s2056_s24  ;;  %v1465_v14 = vpop.trf.xlu0 }
 0x83c   : > { %v1434_v16 = vpop.trf.xlu1 }
 0x83d   : > { %1517 = vrot.lane.b32.xlu0 %v1433_v7, %s2056_s24  ;;  %v1466_v18 = vpop.trf.xlu0 }
 0x83e   : > { %1551 = vrot.lane.b32.xlu1 %v1466_v18, %s2056_s24 }
 0x840   : > { %v1435_v10 = vpop.trf.xlu1 }
 0x841   : > { %1549 = vrot.lane.b32.xlu0 %v1465_v14, %s2056_s24  ;;  %v1467_v35 = vpop.trf.xlu0 }
 0x844   : > { %v1436_v39 = vpop.trf.xlu1 }
 0x845   : > { %1519 = vrot.lane.b32.xlu0 %v1434_v16, %s2056_s24  ;;  %1523 = vrot.lane.b32.xlu1 %v1436_v39, %s2056_s24  ;;  %v1468_v43 = vpop.trf.xlu0 }
 0x848   : > { %v1437_v4 = vpop.trf.xlu1 }
 0x849   : > { %1521 = vrot.lane.b32.xlu0 %v1435_v10, %s2056_s24  ;;  %1555 = vrot.lane.b32.xlu1 %v1468_v43, %s2056_s24  ;;  %v1469_v38 = vpop.trf.xlu0 }
 0x84c   : > { %v1438_v41 = vpop.trf.xlu1 }
 0x84d   : > { %1553 = vrot.lane.b32.xlu0 %v1467_v35, %s2056_s24  ;;  %1527 = vrot.lane.b32.xlu1 %v1438_v41, %s2056_s24  ;;  %v1470_v17 = vpop.trf.xlu0 }
 0x850   : > { %v1439_v21 = vpop.trf.xlu1 }
 0x851   : > { %1525 = vrot.lane.b32.xlu0 %v1437_v4, %s2056_s24  ;;  %1559 = vrot.lane.b32.xlu1 %v1470_v17, %s2056_s24  ;;  %v1471_v23 = vpop.trf.xlu0 }
 0x854   : > { %v1440_v25 = vpop.trf.xlu1 }
 0x855   : > { %1557 = vrot.lane.b32.xlu0 %v1469_v38, %s2056_s24  ;;  %1531 = vrot.lane.b32.xlu1 %v1440_v25, %s2056_s24  ;;  %v1472_v27 = vpop.trf.xlu0 }
 0x858   : > { %v1441_v29 = vpop.trf.xlu1 }
 0x859   : > { %1529 = vrot.lane.b32.xlu0 %v1439_v21, %s2056_s24  ;;  %1563 = vrot.lane.b32.xlu1 %v1472_v27, %s2056_s24  ;;  %v1473_v31 = vpop.trf.xlu0 }
 0x85c   : > { %v1442_v20 = vpop.trf.xlu1 }
 0x85d   : > { %1561 = vrot.lane.b32.xlu0 %v1471_v23, %s2056_s24  ;;  %1535 = vrot.lane.b32.xlu1 %v1442_v20, %s2056_s24  ;;  %v1474_v58 = vpop.trf.xlu0 }
 0x860   : > { %v1443_v57 = vpop.trf.xlu1 }
 0x861   : > { %1533 = vrot.lane.b32.xlu0 %v1441_v29, %s2056_s24  ;;  %1567 = vrot.lane.b32.xlu1 %v1474_v58, %s2056_s24  ;;  %v1475_v60 = vpop.trf.xlu0 }
 0x864   : > { %v1444_v59 = vpop.trf.xlu1 }
 0x865   : > { %1565 = vrot.lane.b32.xlu0 %v1473_v31, %s2056_s24  ;;  %1539 = vrot.lane.b32.xlu1 %v1444_v59, %s2056_s24  ;;  %v1476_v61 = vpop.trf.xlu0 }
 0x869   : > { %1537 = vrot.lane.b32.xlu0 %v1443_v57, %s2056_s24  ;;  %1571 = vrot.lane.b32.xlu1 %v1476_v61, %s2056_s24 }
 0x86d   : > { %1569 = vrot.lane.b32.xlu0 %v1475_v60, %s2056_s24 }
 0x89b   : > { %v1510_v56 = vpop.permute.xlu0 %1509 }
 0x89c   : > { %v1605_v2 = vsel %vm667_vm0, %v2660_v47, %v1510_v56 }
 0x89d   : > { %1638 = vst.msk [vmem:[%s2765_s27] sm:$0xff] %vm1637_vm2, %v1605_v2 }
 0x89f   : > { %v1512_v22 = vpop.permute.xlu1 %1511  ;;  %v1542_v62 = vpop.permute.xlu0 %1541 }
 0x8a0   : > { %v1606_v36 = vsel %vm667_vm0, %v2662_v51, %v1512_v22  ;;  %v1621_v0 = vsel %vm667_vm0, %v2696_v12, %v1542_v62 }
 0x8a1   : > { %1639 = vst.msk [vmem:[%s2765_s27 + $0x8] sm:$0xff] %vm1637_vm2, %v1606_v36  ;;  %1654 = vst.msk [vmem:[%s2765_s27 + $0x80] sm:$0xff] %vm1637_vm2, %v1621_v0 }
 0x8a3   : > { %v1544_v8 = vpop.permute.xlu1 %1543  ;;  %v1514_v9 = vpop.permute.xlu0 %1513 }
 0x8a4   : > { %v1622_v47 = vsel %vm667_vm0, %v2698_v32, %v1544_v8  ;;  %v1607_v7 = vsel %vm667_vm0, %v2664_v15, %v1514_v9 }
 0x8a5   : > { %1655 = vst.msk [vmem:[%s2765_s27 + $0x88] sm:$0xff] %vm1637_vm2, %v1622_v47  ;;  %1640 = vst.msk [vmem:[%s2765_s27 + $0x10] sm:$0xff] %vm1637_vm2, %v1607_v7 }
 0x8a7   : > { %v1546_v51 = vpop.permute.xlu0 %1545 }
 0x8a8   : > { %v1623_v12 = vsel %vm667_vm0, %v2700_v33, %v1546_v51  ;;  %v1548_v14 = vpop.permute.xlu1 %1547 }
 0x8a9   : > { %1656 = vst.msk [vmem:[%s2765_s27 + $0x90] sm:$0xff] %vm1637_vm2, %v1623_v12  ;;  %v1624_v32 = vsel %vm667_vm0, %v2702_v34, %v1548_v14 }
 0x8aa   : > { %1657 = vst.msk [vmem:[%s2765_s27 + $0x98] sm:$0xff] %vm1637_vm2, %v1624_v32 }
 0x8ab   : > { %v1516_v16 = vpop.permute.xlu0 %1515 }
 0x8ac   : > { %v1608_v15 = vsel %vm667_vm0, %v2666_v19, %v1516_v16 }
 0x8ad   : > { %1641 = vst.msk [vmem:[%s2765_s27 + $0x18] sm:$0xff] %vm1637_vm2, %v1608_v15 }
 0x8af   : > { %v1518_v18 = vpop.permute.xlu0 %1517 }
 0x8b0   : > { %v1609_v33 = vsel %vm667_vm0, %v2668_v55, %v1518_v18  ;;  %v1552_v10 = vpop.permute.xlu1 %1551 }
 0x8b1   : > { %1642 = vst.msk [vmem:[%s2765_s27 + $0x20] sm:$0xff] %vm1637_vm2, %v1609_v33  ;;  %v1626_v34 = vsel %vm667_vm0, %v2706_v40, %v1552_v10 }
 0x8b2   : > { %1659 = vst.msk [vmem:[%s2765_s27 + $0xa8] sm:$0xff] %vm1637_vm2, %v1626_v34 }
 0x8b3   : > { %v1550_v35 = vpop.permute.xlu0 %1549 }
 0x8b4   : > { %v1625_v19 = vsel %vm667_vm0, %v2704_v37, %v1550_v35 }
 0x8b5   : > { %1658 = vst.msk [vmem:[%s2765_s27 + $0xa0] sm:$0xff] %vm1637_vm2, %v1625_v19 }
 0x8b7   : > { %v1524_v39 = vpop.permute.xlu1 %1523  ;;  %v1520_v43 = vpop.permute.xlu0 %1519 }
 0x8b8   : > { %v1612_v55 = vsel %vm667_vm0, %v2674_v30, %v1524_v39  ;;  %v1610_v4 = vsel %vm667_vm0, %v2670_v26, %v1520_v43 }
 0x8b9   : > { %1645 = vst.msk [vmem:[%s2765_s27 + $0x38] sm:$0xff] %vm1637_vm2, %v1612_v55  ;;  %1643 = vst.msk [vmem:[%s2765_s27 + $0x28] sm:$0xff] %vm1637_vm2, %v1610_v4 }
 0x8bb   : > { %v1556_v40 = vpop.permute.xlu1 %1555  ;;  %v1522_v38 = vpop.permute.xlu0 %1521 }
 0x8bc   : > { %v1628_v37 = vsel %vm667_vm0, %v2710_v44, %v1556_v40  ;;  %v1611_v41 = vsel %vm667_vm0, %v2672_v28, %v1522_v38 }
 0x8bd   : > { %1661 = vst.msk [vmem:[%s2765_s27 + $0xb8] sm:$0xff] %vm1637_vm2, %v1628_v37  ;;  %1644 = vst.msk [vmem:[%s2765_s27 + $0x30] sm:$0xff] %vm1637_vm2, %v1611_v41 }
 0x8bf   : > { %v1528_v30 = vpop.permute.xlu1 %1527  ;;  %v1554_v26 = vpop.permute.xlu0 %1553 }
 0x8c0   : > { %v1614_v17 = vsel %vm667_vm0, %v2679_v3, %v1528_v30  ;;  %v1627_v21 = vsel %vm667_vm0, %v2708_v42, %v1554_v26 }
 0x8c1   : > { %1647 = vst.msk [vmem:[%s2765_s27 + $0x48] sm:$0xff] %vm1637_vm2, %v1614_v17  ;;  %1660 = vst.msk [vmem:[%s2765_s27 + $0xb0] sm:$0xff] %vm1637_vm2, %v1627_v21 }
 0x8c3   : > { %v1560_v44 = vpop.permute.xlu1 %1559  ;;  %v1526_v28 = vpop.permute.xlu0 %1525 }
 0x8c4   : > { %v1630_v23 = vsel %vm667_vm0, %v2714_v13, %v1560_v44  ;;  %v1613_v25 = vsel %vm667_vm0, %v2676_v1, %v1526_v28 }
 0x8c5   : > { %1663 = vst.msk [vmem:[%s2765_s27 + $0xc8] sm:$0xff] %vm1637_vm2, %v1630_v23  ;;  %1646 = vst.msk [vmem:[%s2765_s27 + $0x40] sm:$0xff] %vm1637_vm2, %v1613_v25 }
 0x8c7   : > { %v1532_v3 = vpop.permute.xlu1 %1531  ;;  %v1558_v42 = vpop.permute.xlu0 %1557 }
 0x8c8   : > { %v1616_v27 = vsel %vm667_vm0, %v2683_v50, %v1532_v3  ;;  %v1629_v29 = vsel %vm667_vm0, %v2712_v45, %v1558_v42 }
 0x8c9   : > { %1649 = vst.msk [vmem:[%s2765_s27 + $0x58] sm:$0xff] %vm1637_vm2, %v1616_v27  ;;  %1662 = vst.msk [vmem:[%s2765_s27 + $0xc0] sm:$0xff] %vm1637_vm2, %v1629_v29 }
 0x8cb   : > { %v1564_v13 = vpop.permute.xlu1 %1563  ;;  %v1530_v1 = vpop.permute.xlu0 %1529 }
 0x8cc   : > { %v1632_v31 = vsel %vm667_vm0, %v2718_v48, %v1564_v13  ;;  %v1615_v20 = vsel %vm667_vm0, %v2681_v63, %v1530_v1 }
 0x8cd   : > { %1665 = vst.msk [vmem:[%s2765_s27 + $0xd8] sm:$0xff] %vm1637_vm2, %v1632_v31  ;;  %1648 = vst.msk [vmem:[%s2765_s27 + $0x50] sm:$0xff] %vm1637_vm2, %v1615_v20 }
 0x8cf   : > { %v1536_v50 = vpop.permute.xlu1 %1535  ;;  %v1562_v45 = vpop.permute.xlu0 %1561 }
 0x8d0   : > { %v1618_v58 = vsel %vm667_vm0, %v2687_v5, %v1536_v50  ;;  %v1631_v57 = vsel %vm667_vm0, %v2716_v46, %v1562_v45 }
 0x8d1   : > { %1651 = vst.msk [vmem:[%s2765_s27 + $0x68] sm:$0xff] %vm1637_vm2, %v1618_v58  ;;  %1664 = vst.msk [vmem:[%s2765_s27 + $0xd0] sm:$0xff] %vm1637_vm2, %v1631_v57 }
 0x8d3   : > { %v1568_v48 = vpop.permute.xlu1 %1567  ;;  %v1534_v63 = vpop.permute.xlu0 %1533 }
 0x8d4   : > { %v1634_v60 = vsel %vm667_vm0, %v2722_v52, %v1568_v48  ;;  %v1617_v59 = vsel %vm667_vm0, %v2685_v54, %v1534_v63 }
 0x8d5   : > { %1667 = vst.msk [vmem:[%s2765_s27 + $0xe8] sm:$0xff] %vm1637_vm2, %v1634_v60  ;;  %1650 = vst.msk [vmem:[%s2765_s27 + $0x60] sm:$0xff] %vm1637_vm2, %v1617_v59 }
 0x8d7   : > { %v1540_v5 = vpop.permute.xlu1 %1539  ;;  %v1566_v46 = vpop.permute.xlu0 %1565 }
 0x8d8   : > { %v1620_v61 = vsel %vm667_vm0, %v2691_v6, %v1540_v5  ;;  %v1633_v56 = vsel %vm667_vm0, %v2720_v49, %v1566_v46 }
 0x8d9   : > { %1653 = vst.msk [vmem:[%s2765_s27 + $0x78] sm:$0xff] %vm1637_vm2, %v1620_v61  ;;  %1666 = vst.msk [vmem:[%s2765_s27 + $0xe0] sm:$0xff] %vm1637_vm2, %v1633_v56 }
 0x8db   : > { %v1572_v52 = vpop.permute.xlu1 %1571  ;;  %v1538_v2 = vpop.permute.xlu0 %1537 }
 0x8dc   : > { %v1636_v54 = vsel %vm667_vm0, %v2726_v24, %v1572_v52  ;;  %v1619_v22 = vsel %vm667_vm0, %v2689_v11, %v1538_v2 }
 0x8dd   : > { %1669 = vst.msk [vmem:[%s2765_s27 + $0xf8] sm:$0xff] %vm1637_vm2, %v1636_v54  ;;  %1652 = vst.msk [vmem:[%s2765_s27 + $0x70] sm:$0xff] %vm1637_vm2, %v1619_v22 }
 0x8df   : > { %v1570_v6 = vpop.permute.xlu0 %1569 }
 0x8e0   : > { %v1635_v49 = vsel %vm667_vm0, %v2724_v53, %v1570_v6 }
 0x8e1   : > { %1668 = vst.msk [vmem:[%s2765_s27 + $0xf0] sm:$0xff] %vm1637_vm2, %v1635_v49 }
 0x8e2 PF: > { %s12_s9 = sadd.s32 1, %s2048_s9  }
 0x8e3   : > { %p9_p4 = scmp.ge.s32.totalorder %s12_s9, 4  }
 0x8e5   :  { %11 = sbr.rel (!%p9_p4) target bundleno = 1 (0x1), region = 58 }

// kernel: _lambda_.48
= control target key start
LH: loop header
LB: loop body
LE: loop exit
PB: predicated region body
PF: predicated region fallthrough
CT: control target
= control target key end

     0   :  { %s5421_s12 = smov 0   ;;  %s7242_s0 = inlined_call_operand.vmem [shape: f32[2,16,16,48], index: 0, kind: input, shape index: {}]   ;;  %s7243_s1 = inlined_call_operand.vmem [shape: f32[2,16,16], index: 1, kind: input, shape index: {}]   ;;  %s7244_s2 = inlined_call_operand.vmem [shape: f32[16,16,16], index: 2, kind: input, shape index: {}]   ;;  %s7245_s3 = inlined_call_operand.vmem [shape: f32[2,16,16,16], index: 3, kind: output, shape index: {}]  }
   0x1 LB: > { %s4490_s13 = sadd.s32 4294967295, %s5391_s12   ;;  %p4494_p0 = scmp.ge.s32.totalorder %s5391_s12, 1  ;;  %s5391_s12 = sphi %s5421_s12, %s13_s12  }
   0x2   : > { %p137_p1 = scmp.lt.s32.totalorder %s5391_s12, 3 }
   0x4   : > { %p138_p2 = pnand %p4494_p0, %p137_p1 }
   0x6   : > { %141 = sbr.rel (%p138_p2) target bundleno = 1676 (0x68c), region = 32 }
   0xd   : > { %p161_p3 = scmp.lt.s32.totalorder %s4490_s13, 1  ;;  %v7246_v0 = vmov 0.0   ;;  %vm5394_vm0 = vmmov 0   ;;  %s5395_s18 = smov 112   ;;  %vm305_vm1 = vcmask 64512   ;;  %vm1135_vm2 = vcmask 130048  }
   0xe   : > { %4697 = vmatprep.subr.bf16.mxu0 %v7246_v0  ;;  %4703 = vmatprep.subr.bf16.mxu1 %v7246_v0  ;;  %s5396_s19 = smov 96   ;;  %s5399_s20 = smov 88  }
   0xf   : > { %s7377_s13 = smov (!%p161_p3, %s4490_s13), 1  ;;  %4699 = vmatprep.mubr.msk.bf16.mxu0 %vm5394_vm0, %v7246_v0  ;;  %4705 = vmatprep.mubr.msk.bf16.mxu1 %vm5394_vm0, %v7246_v0 }
  0x10   : > { %s4567_s14 = sshll.u32 %s7377_s13, 8 }
  0x11   : > { %s5443_s17 = scalar_lea.vmem %s7242_s0, %s4567_s14  ;;  %s7109_s22 = scalar_lea.vmem %s7245_s3, %s4567_s14 }
  0x12   : > { %v172_v1 = vld [vmem:[%s5443_s17] sm:$0xff]  ;;  %v5447_v2 = vld [vmem:[%s5443_s17 + $0x8] sm:$0xff]  ;;  %v5450_v3 = vld [vmem:[%s5443_s17 + $0x10] sm:$0xff] }
  0x13   : > { %v5453_v4 = vpack.c.bf16 %v5447_v2, %v172_v1  ;;  %v5456_v5 = vld [vmem:[%s5443_s17 + $0x18] sm:$0xff]  ;;  %v176_v6 = vld [vmem:[%s5443_s17 + $0x20] sm:$0xff]  ;;  %v177_v7 = vld [vmem:[%s5443_s17 + $0x28] sm:$0xff]  ;;  %v5460_v8 = vmul.f32 0.35355338, %v172_v1 }
  0x14   : > { %v241_v9 = vmul.f32 0.35355338, %v177_v7  ;;  %v5462_v10 = vpack.c.bf16 %v177_v7, %v176_v6  ;;  %v240_v11 = vmul.f32 0.35355338, %v176_v6  ;;  %v178_v12 = vld [vmem:[%s5443_s17 + $0x30] sm:$0xff]  ;;  %v179_v13 = vld [vmem:[%s5443_s17 + $0x38] sm:$0xff]  ;;  %v5470_v14 = vpack.c.bf16 %v5456_v5, %v5450_v3 }
  0x15   : > { %303 = vrot.lane.b32.xlu0 %v5453_v4, %s5395_s18  ;;  %v242_v15 = vmul.f32 0.35355338, %v178_v12  ;;  %v243_v16 = vmul.f32 0.35355338, %v179_v13  ;;  %v180_v17 = vld [vmem:[%s5443_s17 + $0x40] sm:$0xff]  ;;  %v181_v18 = vld [vmem:[%s5443_s17 + $0x48] sm:$0xff]  ;;  %v5478_v20 = vpack.c.bf16 %v179_v13, %v178_v12 }
  0x16   : > { %404 = vrot.lane.b32.xlu1 %v5462_v10, %s5395_s18  ;;  %v5476_v19 = vpack.c.bf16 %v241_v9, %v240_v11  ;;  %v244_v21 = vmul.f32 0.35355338, %v180_v17  ;;  %v245_v22 = vmul.f32 0.35355338, %v181_v18  ;;  %v182_v23 = vld [vmem:[%s5443_s17 + $0x50] sm:$0xff]  ;;  %v183_v24 = vld [vmem:[%s5443_s17 + $0x58] sm:$0xff]  ;;  %v5492_v35 = vpack.c.bf16 %v181_v18, %v180_v17 }
  0x17   : > { %v5482_v25 = vpack.c.bf16 %v243_v16, %v242_v15  ;;  %v246_v26 = vmul.f32 0.35355338, %v182_v23  ;;  %v247_v27 = vmul.f32 0.35355338, %v183_v24  ;;  %v184_v28 = vld [vmem:[%s5443_s17 + $0x60] sm:$0xff]  ;;  %v185_v29 = vld [vmem:[%s5443_s17 + $0x68] sm:$0xff]  ;;  %v5500_v41 = vpack.c.bf16 %v183_v24, %v182_v23 }
  0x18   : > { %v5486_v30 = vpack.c.bf16 %v245_v22, %v244_v21  ;;  %v248_v31 = vmul.f32 0.35355338, %v184_v28  ;;  %v249_v32 = vmul.f32 0.35355338, %v185_v29  ;;  %v186_v33 = vld [vmem:[%s5443_s17 + $0x70] sm:$0xff]  ;;  %v187_v34 = vld [vmem:[%s5443_s17 + $0x78] sm:$0xff]  ;;  %v5516_v57 = vpack.c.bf16 %v185_v29, %v184_v28 }
  0x19   : > { %354 = vrot.lane.b32.xlu0 %v5470_v14, %s5395_s18  ;;  %v5494_v36 = vpack.c.bf16 %v247_v27, %v246_v26  ;;  %v250_v37 = vmul.f32 0.35355338, %v186_v33  ;;  %v251_v38 = vmul.f32 0.35355338, %v187_v34  ;;  %v188_v39 = vld [vmem:[%s5443_s17 + $0x80] sm:$0xff]  ;;  %v189_v40 = vld [vmem:[%s5443_s17 + $0x88] sm:$0xff]  ;;  %v5524_v63 = vpack.c.bf16 %v187_v34, %v186_v33 }
  0x1a   : > { %454 = vrot.lane.b32.xlu1 %v5478_v20, %s5395_s18  ;;  %v5502_v42 = vpack.c.bf16 %v249_v32, %v248_v31  ;;  %v252_v43 = vmul.f32 0.35355338, %v188_v39  ;;  %v253_v44 = vmul.f32 0.35355338, %v189_v40  ;;  %v190_v45 = vld [vmem:[%s5443_s17 + $0x90] sm:$0xff]  ;;  %v191_v46 = vld [vmem:[%s5443_s17 + $0x98] sm:$0xff]  ;;  %v5534_v18 = vpack.c.bf16 %v189_v40, %v188_v39 }
  0x1b   : > { %v5506_v47 = vpack.c.bf16 %v251_v38, %v250_v37  ;;  %v254_v48 = vmul.f32 0.35355338, %v190_v45  ;;  %v255_v49 = vmul.f32 0.35355338, %v191_v46  ;;  %v192_v50 = vld [vmem:[%s5443_s17 + $0xa0] sm:$0xff]  ;;  %v193_v51 = vld [vmem:[%s5443_s17 + $0xa8] sm:$0xff]  ;;  %v5542_v27 = vpack.c.bf16 %v191_v46, %v190_v45 }
  0x1c   : > { %v5510_v52 = vpack.c.bf16 %v253_v44, %v252_v43  ;;  %v256_v53 = vmul.f32 0.35355338, %v192_v50  ;;  %v257_v54 = vmul.f32 0.35355338, %v193_v51  ;;  %v194_v55 = vld [vmem:[%s5443_s17 + $0xb0] sm:$0xff]  ;;  %v195_v56 = vld [vmem:[%s5443_s17 + $0xb8] sm:$0xff]  ;;  %v5562_v43 = vpack.c.bf16 %v193_v51, %v192_v50 }
  0x1d   : > { %504 = vrot.lane.b32.xlu0 %v5492_v35, %s5395_s18  ;;  %v5518_v58 = vpack.c.bf16 %v255_v49, %v254_v48  ;;  %v258_v59 = vmul.f32 0.35355338, %v194_v55  ;;  %v259_v60 = vmul.f32 0.35355338, %v195_v56  ;;  %v196_v61 = vld [vmem:[%s5443_s17 + $0xc0] sm:$0xff]  ;;  %v197_v62 = vld [vmem:[%s5443_s17 + $0xc8] sm:$0xff] }
  0x1e   : > { %7269 = vst [vmem:[#allocation2_spill] sm:$0xff] %v5510_v52  ;;  %554 = vrot.lane.b32.xlu1 %v5500_v41, %s5395_s18  ;;  %v5526_v1 = vpack.c.bf16 %v257_v54, %v256_v53  ;;  %v260_v6 = vmul.f32 0.35355338, %v196_v61  ;;  %v261_v7 = vmul.f32 0.35355338, %v197_v62  ;;  %v198_v9 = vld [vmem:[%s5443_s17 + $0xd0] sm:$0xff] }
  0x1f   : > { %v199_v11 = vld [vmem:[%s5443_s17 + $0xd8] sm:$0xff]  ;;  %v5530_v12 = vpack.c.bf16 %v259_v60, %v258_v59  ;;  %v262_v13 = vmul.f32 0.35355338, %v198_v9  ;;  %v200_v16 = vld [vmem:[%s5443_s17 + $0xe0] sm:$0xff]  ;;  %v201_v17 = vld [vmem:[%s5443_s17 + $0xe8] sm:$0xff]  ;;  %7272 = vst [vmem:[#allocation5_spill] sm:$0xff] %v5534_v18 }
  0x20   : > { %7270 = vst [vmem:[#allocation3_spill] sm:$0xff] %v5526_v1  ;;  %v263_v15 = vmul.f32 0.35355338, %v199_v11  ;;  %v5536_v21 = vpack.c.bf16 %v261_v7, %v260_v6  ;;  %v264_v22 = vmul.f32 0.35355338, %v200_v16  ;;  %v202_v24 = vld [vmem:[%s5443_s17 + $0xf0] sm:$0xff] }
  0x21   : > { %7271 = vst [vmem:[#allocation4_spill] sm:$0xff] %v5530_v12  ;;  %v265_v23 = vmul.f32 0.35355338, %v201_v17  ;;  %v203_v26 = vld [vmem:[%s5443_s17 + $0xf8] sm:$0xff]  ;;  %604 = vrot.lane.b32.xlu0 %v5516_v57, %s5395_s18  ;;  %v266_v29 = vmul.f32 0.35355338, %v202_v24 }
  0x22   : > { %7273 = vst [vmem:[#allocation6_spill] sm:$0xff] %v5536_v21  ;;  %v5544_v28 = vpack.c.bf16 %v263_v15, %v262_v13  ;;  %v267_v31 = vmul.f32 0.35355338, %v203_v26  ;;  %654 = vrot.lane.b32.xlu1 %v5524_v63, %s5395_s18  ;;  %v237_v33 = vmul.f32 0.35355338, %v5447_v2  ;;  %7277 = vst [vmem:[#allocation10_spill] sm:$0xff] %v5562_v43  ;;  %v5566_v2 = vpack.c.bf16 %v195_v56, %v194_v55 }
  0x23   : > { %v5548_v32 = vpack.c.bf16 %v265_v23, %v264_v22  ;;  %v238_v34 = vmul.f32 0.35355338, %v5450_v3  ;;  %v239_v37 = vmul.f32 0.35355338, %v5456_v5  ;;  %v5570_v3 = vpack.c.bf16 %v197_v62, %v196_v61 }
  0x24   : > { %7274 = vst [vmem:[#allocation7_spill] sm:$0xff] %v5544_v28  ;;  %v5553_v38 = vpack.c.bf16 %v267_v31, %v266_v29  ;;  %v5556_v39 = vpack.c.bf16 %v237_v33, %v5460_v8  ;;  %7278 = vst [vmem:[#allocation11_spill] sm:$0xff] %v5566_v2  ;;  %v5574_v5 = vpack.c.bf16 %v199_v11, %v198_v9 }
  0x25   : > { %7275 = vst [vmem:[#allocation8_spill] sm:$0xff] %v5548_v32  ;;  %v5558_v40 = vpack.c.bf16 %v239_v37, %v238_v34  ;;  %704 = vrot.lane.b32.xlu0 %v5534_v18, %s5395_s18  ;;  %7279 = vst [vmem:[#allocation12_spill] sm:$0xff] %v5570_v3  ;;  %v5578_v8 = vpack.c.bf16 %v201_v17, %v200_v16  ;;  %v5582_v44 = vpack.c.bf16 %v203_v26, %v202_v24 }
  0x26   : > { %7276 = vst [vmem:[#allocation9_spill] sm:$0xff] %v5553_v38  ;;  %754 = vrot.lane.b32.xlu1 %v5542_v27, %s5395_s18  ;;  %7280 = vst [vmem:[#allocation13_spill] sm:$0xff] %v5574_v5 }
  0x27   : > { %7281 = vst [vmem:[#allocation14_spill] sm:$0xff] %v5578_v8  ;;  %7282 = vst [vmem:[#allocation15_spill] sm:$0xff] %v5582_v44 }
  0x29   : > { %804 = vrot.lane.b32.xlu0 %v5562_v43, %s5395_s18 }
  0x2a   : > { %854 = vrot.lane.b32.xlu1 %v5566_v2, %s5395_s18 }
  0x2d   : > { %904 = vrot.lane.b32.xlu0 %v5570_v3, %s5395_s18 }
  0x2e   : > { %954 = vrot.lane.b32.xlu1 %v5574_v5, %s5395_s18 }
  0x31   : > { %1004 = vrot.lane.b32.xlu0 %v5578_v8, %s5395_s18 }
  0x32   : > { %1054 = vrot.lane.b32.xlu1 %v5582_v44, %s5395_s18  ;;  %s5398_s18 = smov 120  }
  0x35   : > { %1551 = vrot.lane.b32.xlu0 %v5470_v14, %s5396_s19 }
  0x36   : > { %1504 = vrot.lane.b32.xlu1 %v5453_v4, %s5396_s19 }
  0x39   : > { %1645 = vrot.lane.b32.xlu0 %v5478_v20, %s5396_s19 }
  0x3a   : > { %1598 = vrot.lane.b32.xlu1 %v5462_v10, %s5396_s19 }
  0x3d   : > { %1739 = vrot.lane.b32.xlu0 %v5500_v41, %s5396_s19 }
  0x3e   : > { %1692 = vrot.lane.b32.xlu1 %v5492_v35, %s5396_s19 }
  0x41   : > { %1833 = vrot.lane.b32.xlu0 %v5524_v63, %s5396_s19 }
  0x42   : > { %1786 = vrot.lane.b32.xlu1 %v5516_v57, %s5396_s19 }
  0x45   : > { %1927 = vrot.lane.b32.xlu0 %v5542_v27, %s5396_s19 }
  0x46   : > { %1880 = vrot.lane.b32.xlu1 %v5534_v18, %s5396_s19  ;;  %v234_v18 = vld [vmem:[%s7244_s2 + $0xf0] sm:$0xff] }
  0x49   : > { %2068 = vrot.lane.b32.xlu0 %v5570_v3, %s5396_s19 }
  0x4a   : > { %1974 = vrot.lane.b32.xlu1 %v5562_v43, %s5396_s19  ;;  %v230_v43 = vld [vmem:[%s7244_s2 + $0xd0] sm:$0xff] }
  0x4e   : > { %2021 = vrot.lane.b32.xlu1 %v5566_v2, %s5396_s19 }
  0x52   : > { %2115 = vrot.lane.b32.xlu1 %v5574_v5, %s5396_s19 }
  0x87   : > { %v304_v45 = vpop.permute.xlu0 %303 }
  0x88   : > { %v310_v46 = vsel %vm305_vm1, %v304_v45, 0  ;;  %v405_v48 = vpop.permute.xlu1 %404 }
  0x89   : > { %4698 = vmatpush3.bf16.xpose.msra.mxu0 %v310_v46  ;;  %v410_v51 = vsel %vm305_vm1, %v405_v48, 0 }
  0x8a   : > { %4709 = vmatprep.subr.bf16.mxu0 %v7246_v0 }
  0x8b   : > { %v355_v49 = vpop.permute.xlu0 %354 }
  0x8c   : > { %v360_v50 = vsel %vm305_vm1, %v355_v49, 0  ;;  %v455_v53 = vpop.permute.xlu1 %454  ;;  %v5717_v49 = vld [vmem:[%s7243_s1] sm:$0xff] }
  0x8d   : > { %4704 = vmatpush3.bf16.xpose.msra.mxu1 %v360_v50  ;;  %v460_v54 = vsel %vm305_vm1, %v455_v53, 0  ;;  %v204_v53 = vld [vmem:[%s7244_s2] sm:$0xff] }
  0x8e   : > { %4715 = vmatprep.subr.bf16.mxu1 %v7246_v0 }
  0x8f   : > { %v505_v55 = vpop.permute.xlu0 %504 }
  0x90   : > { %4700 = vmatmul.mubr.msk.bf16.vlgmr.msra.gmra.mrb[0].mxu0 %vm305_vm1, %v5556_v39  ;;  %v510_v56 = vsel %vm305_vm1, %v505_v55, 0  ;;  %v555_v59 = vpop.permute.xlu1 %554 }
  0x91   : > { %4710 = vmatpush3.bf16.xpose.msra.mxu0 %v410_v51  ;;  %4711 = vmatprep.mubr.msk.bf16.mxu0 %vm5394_vm0, %v7246_v0  ;;  %v560_v60 = vsel %vm305_vm1, %v555_v59, 0  ;;  %v5722_v51 = vld [vmem:[%s7243_s1 + $0x8] sm:$0xff] }
  0x92   : > { %4721 = vmatprep.subr.bf16.mxu0 %v7246_v0  ;;  %v205_v59 = vld [vmem:[%s7244_s2 + $0x8] sm:$0xff] }
  0x93   : > { %v605_v61 = vpop.permute.xlu0 %604 }
  0x94   : > { %4706 = vmatmul.mubr.msk.bf16.vlgmr.msra.gmra.mrb[0].mxu1 %vm305_vm1, %v5558_v40  ;;  %v610_v62 = vsel %vm305_vm1, %v605_v61, 0  ;;  %v655_v6 = vpop.permute.xlu1 %654 }
  0x95   : > { %4716 = vmatpush3.bf16.xpose.msra.mxu1 %v460_v54  ;;  %4717 = vmatprep.mubr.msk.bf16.mxu1 %vm5394_vm0, %v7246_v0  ;;  %v660_v7 = vsel %vm305_vm1, %v655_v6, 0 }
  0x96   : > { %4727 = vmatprep.subr.bf16.mxu1 %v7246_v0 }
  0x97   : > { %v705_v9 = vpop.permute.xlu0 %704 }
  0x98   : > { %4712 = vmatmul.mubr.msk.bf16.vlgmr.msra.gmra.mrb[4].mxu0 %vm305_vm1, %v5476_v19  ;;  %v710_v11 = vsel %vm305_vm1, %v705_v9, 0  ;;  %v755_v13 = vpop.permute.xlu1 %754 }
  0x99   : > { %4722 = vmatpush3.bf16.xpose.msra.mxu0 %v510_v56  ;;  %4723 = vmatprep.mubr.msk.bf16.mxu0 %vm5394_vm0, %v7246_v0  ;;  %v760_v15 = vsel %vm305_vm1, %v755_v13, 0 }
  0x9a   : > { %4733 = vmatprep.subr.bf16.mxu0 %v7246_v0 }
  0x9b   : > { %v805_v16 = vpop.permute.xlu0 %804 }
  0x9c   : > { %4718 = vmatmul.mubr.msk.bf16.vlgmr.msra.gmra.mrb[4].mxu1 %vm305_vm1, %v5482_v25  ;;  %v810_v17 = vsel %vm305_vm1, %v805_v16, 0  ;;  %v855_v22 = vpop.permute.xlu1 %854 }
  0x9d   : > { %4728 = vmatpush3.bf16.xpose.msra.mxu1 %v560_v60  ;;  %4729 = vmatprep.mubr.msk.bf16.mxu1 %vm5394_vm0, %v7246_v0  ;;  %v860_v23 = vsel %vm305_vm1, %v855_v22, 0 }
  0x9e   : > { %4739 = vmatprep.subr.bf16.mxu1 %v7246_v0 }
  0x9f   : > { %v905_v24 = vpop.permute.xlu0 %904 }
  0xa0   : > { %4724 = vmatmul.mubr.msk.bf16.vlgmr.msra.gmra.mrb[8].mxu0 %vm305_vm1, %v5486_v30  ;;  %v910_v26 = vsel %vm305_vm1, %v905_v24, 0  ;;  %v955_v29 = vpop.permute.xlu1 %954 }
  0xa1   : > { %4734 = vmatpush3.bf16.xpose.msra.mxu0 %v610_v62  ;;  %4735 = vmatprep.mubr.msk.bf16.mxu0 %vm5394_vm0, %v7246_v0  ;;  %v960_v31 = vsel %vm305_vm1, %v955_v29, 0 }
  0xa2   : > { %4745 = vmatprep.subr.bf16.mxu0 %v7246_v0 }
  0xa3   : > { %v1005_v33 = vpop.permute.xlu0 %1004 }
  0xa4   : > { %4730 = vmatmul.mubr.msk.bf16.vlgmr.msra.gmra.mrb[8].mxu1 %vm305_vm1, %v5494_v36  ;;  %v1010_v34 = vsel %vm305_vm1, %v1005_v33, 0  ;;  %v1055_v37 = vpop.permute.xlu1 %1054 }
  0xa5   : > { %4740 = vmatpush3.bf16.xpose.msra.mxu1 %v660_v7  ;;  %4741 = vmatprep.mubr.msk.bf16.mxu1 %vm5394_vm0, %v7246_v0  ;;  %v1060_v45 = vsel %vm305_vm1, %v1055_v37, 0  ;;  %v206_v7 = vld [vmem:[%s7244_s2 + $0x10] sm:$0xff] }
  0xa6   : > { %4751 = vmatprep.subr.bf16.mxu1 %v7246_v0 }
  0xa7   : > { %v1552_v48 = vpop.permute.xlu0 %1551 }
  0xa8   : > { %4736 = vmatmul.mubr.msk.bf16.vlgmr.msra.gmra.mrb[12].mxu0 %vm305_vm1, %v5502_v42  ;;  %v1505_v46 = vpop.permute.xlu1 %1504 }
  0xa9   : > { %4746 = vmatpush3.bf16.xpose.msra.mxu0 %v710_v11  ;;  %4747 = vmatprep.mubr.msk.bf16.mxu0 %vm5394_vm0, %v7246_v0 }
  0xaa   : > { %4757 = vmatprep.subr.bf16.mxu0 %v7246_v0 }
  0xac   : > { %4742 = vmatmul.mubr.msk.bf16.vlgmr.msra.gmra.mrb[12].mxu1 %vm305_vm1, %v5506_v47 }
  0xad   : > { %4752 = vmatpush3.bf16.xpose.msra.mxu1 %v760_v15  ;;  %4753 = vmatprep.mubr.msk.bf16.mxu1 %vm5394_vm0, %v7246_v0 }
  0xae   : > { %4763 = vmatprep.subr.bf16.mxu1 %v7246_v0 }
  0xb0   : > { %4748 = vmatmul.mubr.msk.bf16.vlgmr.msra.gmra.mrb[16].mxu0 %vm305_vm1, %v5510_v52  ;;  %v232_v52 = vld [vmem:[%s7244_s2 + $0xe0] sm:$0xff] }
  0xb1   : > { %4758 = vmatpush3.bf16.xpose.msra.mxu0 %v810_v17  ;;  %4759 = vmatprep.mubr.msk.bf16.mxu0 %vm5394_vm0, %v7246_v0  ;;  %v207_v17 = vld [vmem:[%s7244_s2 + $0x18] sm:$0xff] }
  0xb2   : > { %4769 = vmatprep.subr.bf16.mxu0 %v7246_v0 }
  0xb4   : > { %4754 = vmatmul.mubr.msk.bf16.vlgmr.msra.gmra.mrb[16].mxu1 %vm305_vm1, %v5518_v58 }
  0xb5   : > { %4764 = vmatpush3.bf16.xpose.msra.mxu1 %v860_v23  ;;  %4765 = vmatprep.mubr.msk.bf16.mxu1 %vm5394_vm0, %v7246_v0 }
  0xb6   : > { %4775 = vmatprep.subr.bf16.mxu1 %v7246_v0 }
  0xb8   : > { %4760 = vmatmul.mubr.msk.bf16.vlgmr.msra.gmra.mrb[20].mxu0 %vm305_vm1, %v5526_v1  ;;  %v228_v1 = vld [vmem:[%s7244_s2 + $0xc0] sm:$0xff] }
  0xb9   : > { %4770 = vmatpush3.bf16.xpose.msra.mxu0 %v910_v26  ;;  %4771 = vmatprep.mubr.msk.bf16.mxu0 %vm5394_vm0, %v7246_v0 }
  0xba   : > { %4781 = vmatprep.subr.bf16.mxu0 %v7246_v0 }
  0xbc   : > { %4766 = vmatmul.mubr.msk.bf16.vlgmr.msra.gmra.mrb[20].mxu1 %vm305_vm1, %v5530_v12 }
  0xbd   : > { %4776 = vmatpush3.bf16.xpose.msra.mxu1 %v960_v31  ;;  %4777 = vmatprep.mubr.msk.bf16.mxu1 %vm5394_vm0, %v7246_v0  ;;  %v208_v31 = vld [vmem:[%s7244_s2 + $0x20] sm:$0xff] }
  0xbe   : > { %4787 = vmatprep.subr.bf16.mxu1 %v7246_v0 }
  0xc0   : > { %4772 = vmatmul.mubr.msk.bf16.vlgmr.msra.gmra.mrb[24].mxu0 %vm305_vm1, %v5536_v21 }
  0xc1   : > { %4782 = vmatpush3.bf16.xpose.msra.mxu0 %v1010_v34  ;;  %4783 = vmatprep.mubr.msk.bf16.mxu0 %vm5394_vm0, %v7246_v0 }
  0xc2   : > { %4793 = vmatprep.subr.bf16.mxu0 %v7246_v0 }
  0xc4   : > { %4778 = vmatmul.mubr.msk.bf16.vlgmr.msra.gmra.mrb[24].mxu1 %vm305_vm1, %v5544_v28 }
  0xc5   : > { %4788 = vmatpush3.bf16.xpose.msra.mxu1 %v1060_v45  ;;  %4789 = vmatprep.mubr.msk.bf16.mxu1 %vm5394_vm0, %v7246_v0 }
  0xc6   : > { %4799 = vmatprep.subr.bf16.mxu1 %v7246_v0 }
  0xc8   : > { %4784 = vmatmul.mubr.msk.bf16.vlgmr.msra.gmra.mrb[28].mxu0 %vm305_vm1, %v5548_v32  ;;  %v224_v32 = vld [vmem:[%s7244_s2 + $0xa0] sm:$0xff] }
  0xc9   : > { %4795 = vmatprep.mubr.msk.bf16.mxu0 %vm5394_vm0, %v7246_v0  ;;  %4794 = vmatpush3.bf16.msra.mxu0 %v1505_v46 }
  0xca   : > { %4805 = vmatprep.subr.bf16.mxu0 %v7246_v0 }
  0xcc   : > { %4790 = vmatmul.mubr.msk.bf16.vlgmr.msra.gmra.mrb[28].mxu1 %vm305_vm1, %v5553_v38  ;;  %v226_v38 = vld [vmem:[%s7244_s2 + $0xb0] sm:$0xff] }
  0xcd   : > { %4801 = vmatprep.mubr.msk.bf16.mxu1 %vm5394_vm0, %v7246_v0  ;;  %4800 = vmatpush3.bf16.msra.mxu1 %v1552_v48  ;;  %v209_v48 = vld [vmem:[%s7244_s2 + $0x28] sm:$0xff] }
  0xce   : > { %4811 = vmatprep.subr.bf16.mxu1 %v7246_v0 }
 0x163   : > { %v346_v50 = vpop.f32.mrb[0].mxu0 }
 0x164   : > { %v347_v54 = vadd.f32 %v346_v50, %v5717_v49  ;;  %v4701_v55 = vpop.f32.mrb[1].mxu0 }
 0x165   : > { %v349_v56 = vpop.f32.mrb[2].mxu0 }
 0x166   : > { %v350_v60 = vadd.f32 %v349_v56, %v5722_v51  ;;  %v4702_v61 = vpop.f32.mrb[3].mxu0  ;;  %v5732_v62 = vadd.f32 %v347_v54, %v204_v53  ;;  %v210_v56 = vld [vmem:[%s7244_s2 + $0x30] sm:$0xff] }
 0x167   : > { %v396_v6 = vpop.f32.mrb[0].mxu1 }
 0x168   : > { %v397_v9 = vadd.f32 %v396_v6, %v5717_v49  ;;  %v4707_v11 = vpop.f32.mrb[1].mxu1  ;;  %v1136_v13 = vsel %vm1135_vm2, %v5732_v62, -inf  ;;  %v5740_v15 = vadd.f32 %v350_v60, %v205_v59 }
 0x169   : > { %v399_v16 = vpop.f32.mrb[2].mxu1  ;;  %1137 = vmax.xlane.f32.xlu0 %v1136_v13  ;;  %v211_v11 = vld [vmem:[%s7244_s2 + $0x38] sm:$0xff] }
 0x16a   : > { %v400_v22 = vadd.f32 %v399_v16, %v5722_v51  ;;  %v4708_v23 = vpop.f32.mrb[3].mxu1  ;;  %v1139_v24 = vsel %vm1135_vm2, %v5740_v15, -inf  ;;  %v5748_v26 = vadd.f32 %v397_v9, %v206_v7 }
 0x16b   : > { %1140 = vmax.xlane.f32.xlu1 %v1139_v24  ;;  %v446_v29 = vpop.f32.mrb[4].mxu0  ;;  %v212_v23 = vld [vmem:[%s7244_s2 + $0x40] sm:$0xff] }
 0x16c   : > { %v447_v33 = vadd.f32 %v446_v29, %v5717_v49  ;;  %v4713_v34 = vpop.f32.mrb[5].mxu0  ;;  %v1142_v37 = vsel %vm1135_vm2, %v5748_v26, -inf  ;;  %v5756_v45 = vadd.f32 %v400_v22, %v207_v17 }
 0x16d   : > { %1143 = vmax.xlane.f32.xlu0 %v1142_v37  ;;  %v449_v46 = vpop.f32.mrb[6].mxu0 }
 0x16e   : > { %v450_v50 = vadd.f32 %v449_v46, %v5722_v51  ;;  %v4714_v53 = vpop.f32.mrb[7].mxu0  ;;  %v5762_v54 = vadd.f32 %v447_v33, %v208_v31  ;;  %v1145_v61 = vsel %vm1135_vm2, %v5756_v45, -inf  ;;  %v213_v46 = vld [vmem:[%s7244_s2 + $0x48] sm:$0xff] }
 0x16f   : > { %v496_v55 = vpop.f32.mrb[4].mxu1 }
 0x170   : > { %v497_v59 = vadd.f32 %v496_v55, %v5717_v49  ;;  %v4719_v60 = vpop.f32.mrb[5].mxu1  ;;  %v1148_v6 = vsel %vm1135_vm2, %v5762_v54, -inf  ;;  %v5772_v7 = vadd.f32 %v450_v50, %v209_v48 }
 0x171   : > { %v499_v9 = vpop.f32.mrb[6].mxu1  ;;  %1146 = vmax.xlane.f32.xlu0 %v1145_v61  ;;  %1149 = vmax.xlane.f32.xlu1 %v1148_v6 }
 0x172   : > { %v500_v13 = vadd.f32 %v499_v9, %v5722_v51  ;;  %v4720_v16 = vpop.f32.mrb[7].mxu1  ;;  %v5778_v17 = vadd.f32 %v497_v59, %v210_v56  ;;  %v1151_v33 = vsel %vm1135_vm2, %v5772_v7, -inf  ;;  %v214_v56 = vld [vmem:[%s7244_s2 + $0x50] sm:$0xff] }
 0x173   : > { %v546_v22 = vpop.f32.mrb[8].mxu0 }
 0x174   : > { %v547_v24 = vadd.f32 %v546_v22, %v5717_v49  ;;  %v4725_v29 = vpop.f32.mrb[9].mxu0  ;;  %v1154_v31 = vsel %vm1135_vm2, %v5778_v17, -inf  ;;  %v5788_v34 = vadd.f32 %v500_v13, %v211_v11  ;;  %v215_v13 = vld [vmem:[%s7244_s2 + $0x58] sm:$0xff] }
 0x175   : > { %1155 = vmax.xlane.f32.xlu1 %v1154_v31  ;;  %1152 = vmax.xlane.f32.xlu0 %v1151_v33  ;;  %v549_v37 = vpop.f32.mrb[10].mxu0  ;;  %v216_v29 = vld [vmem:[%s7244_s2 + $0x60] sm:$0xff] }
 0x176   : > { %v550_v48 = vadd.f32 %v549_v37, %v5722_v51  ;;  %v4726_v50 = vpop.f32.mrb[11].mxu0  ;;  %v5794_v53 = vadd.f32 %v547_v24, %v212_v23  ;;  %v1157_v61 = vsel %vm1135_vm2, %v5788_v34, -inf }
 0x177   : > { %v596_v55 = vpop.f32.mrb[8].mxu1 }
 0x178   : > { %v597_v59 = vadd.f32 %v596_v55, %v5717_v49  ;;  %v4731_v60 = vpop.f32.mrb[9].mxu1  ;;  %v1160_v6 = vsel %vm1135_vm2, %v5794_v53, -inf  ;;  %v5804_v9 = vadd.f32 %v550_v48, %v213_v46  ;;  %v217_v55 = vld [vmem:[%s7244_s2 + $0x68] sm:$0xff] }
 0x179   : > { %v599_v11 = vpop.f32.mrb[10].mxu1  ;;  %1158 = vmax.xlane.f32.xlu0 %v1157_v61  ;;  %1161 = vmax.xlane.f32.xlu1 %v1160_v6  ;;  %v218_v6 = vld [vmem:[%s7244_s2 + $0x70] sm:$0xff] }
 0x17a   : > { %v600_v16 = vadd.f32 %v599_v11, %v5722_v51  ;;  %v4732_v22 = vpop.f32.mrb[11].mxu1  ;;  %v5810_v23 = vadd.f32 %v597_v59, %v214_v56  ;;  %v1163_v46 = vsel %vm1135_vm2, %v5804_v9, -inf }
 0x17b   : > { %v646_v24 = vpop.f32.mrb[12].mxu0 }
 0x17c   : > { %v647_v31 = vadd.f32 %v646_v24, %v5717_v49  ;;  %v4737_v33 = vpop.f32.mrb[13].mxu0  ;;  %v1166_v37 = vsel %vm1135_vm2, %v5810_v23, -inf  ;;  %v5820_v48 = vadd.f32 %v600_v16, %v215_v13 }
 0x17d   : > { %1167 = vmax.xlane.f32.xlu1 %v1166_v37  ;;  %1164 = vmax.xlane.f32.xlu0 %v1163_v46  ;;  %v649_v50 = vpop.f32.mrb[14].mxu0 }
 0x17e   : > { %v650_v56 = vadd.f32 %v649_v50, %v5722_v51  ;;  %v4738_v59 = vpop.f32.mrb[15].mxu0  ;;  %v5826_v60 = vadd.f32 %v647_v31, %v216_v29  ;;  %v1169_v16 = vsel %vm1135_vm2, %v5820_v48, -inf  ;;  %v219_v29 = vld [vmem:[%s7244_s2 + $0x78] sm:$0xff] }
 0x17f   : > { %v696_v61 = vpop.f32.mrb[12].mxu1  ;;  %v220_v59 = vld [vmem:[%s7244_s2 + $0x80] sm:$0xff] }
 0x180   : > { %v697_v11 = vadd.f32 %v696_v61, %v5717_v49  ;;  %v4743_v13 = vpop.f32.mrb[13].mxu1  ;;  %v1172_v22 = vsel %vm1135_vm2, %v5826_v60, -inf  ;;  %v5836_v24 = vadd.f32 %v650_v56, %v217_v55 }
 0x181   : > { %v699_v33 = vpop.f32.mrb[14].mxu1  ;;  %1170 = vmax.xlane.f32.xlu0 %v1169_v16  ;;  %1173 = vmax.xlane.f32.xlu1 %v1172_v22 }
 0x182   : > { %v700_v31 = vadd.f32 %v699_v33, %v5722_v51  ;;  %v4744_v37 = vpop.f32.mrb[15].mxu1  ;;  %v5842_v46 = vadd.f32 %v697_v11, %v218_v6  ;;  %v1175_v13 = vsel %vm1135_vm2, %v5836_v24, -inf  ;;  %v221_v11 = vld [vmem:[%s7244_s2 + $0x88] sm:$0xff] }
 0x183   : > { %v746_v50 = vpop.f32.mrb[16].mxu0 }
 0x184   : > { %v747_v55 = vadd.f32 %v746_v50, %v5717_v49  ;;  %v4749_v56 = vpop.f32.mrb[17].mxu0  ;;  %v1178_v61 = vsel %vm1135_vm2, %v5842_v46, -inf  ;;  %v5852_v16 = vadd.f32 %v700_v31, %v219_v29 }
 0x185   : > { %1179 = vmax.xlane.f32.xlu1 %v1178_v61  ;;  %1176 = vmax.xlane.f32.xlu0 %v1175_v13  ;;  %v749_v6 = vpop.f32.mrb[18].mxu0  ;;  %v222_v56 = vld [vmem:[%s7244_s2 + $0x90] sm:$0xff] }
 0x186   : > { %v750_v22 = vadd.f32 %v749_v6, %v5722_v51  ;;  %v4750_v33 = vpop.f32.mrb[19].mxu0  ;;  %v5858_v37 = vadd.f32 %v747_v55, %v220_v59  ;;  %v1181_v61 = vsel %vm1135_vm2, %v5852_v16, -inf  ;;  %v223_v59 = vld [vmem:[%s7244_s2 + $0x98] sm:$0xff] }
 0x187   : > { %v796_v50 = vpop.f32.mrb[16].mxu1 }
 0x188   : > { %v797_v29 = vadd.f32 %v796_v50, %v5717_v49  ;;  %v4755_v31 = vpop.f32.mrb[17].mxu1  ;;  %v1184_v13 = vsel %vm1135_vm2, %v5858_v37, -inf  ;;  %v5868_v0 = vadd.f32 %v750_v22, %v221_v11 }
 0x189   : > { %v799_v6 = vpop.f32.mrb[18].mxu1  ;;  %1182 = vmax.xlane.f32.xlu0 %v1181_v61  ;;  %1185 = vmax.xlane.f32.xlu1 %v1184_v13 }
 0x18a   : > { %v800_v55 = vadd.f32 %v799_v6, %v5722_v51  ;;  %v4756_v33 = vpop.f32.mrb[19].mxu1  ;;  %v5874_v50 = vadd.f32 %v797_v29, %v222_v56  ;;  %v1187_v13 = vsel %vm1135_vm2, %v5868_v0, -inf  ;;  %v225_v29 = vld [vmem:[%s7244_s2 + $0xa8] sm:$0xff] }
 0x18b   : > { %v846_v31 = vpop.f32.mrb[20].mxu0 }
 0x18c   : > { %v847_v11 = vadd.f32 %v846_v31, %v5717_v49  ;;  %v4761_v22 = vpop.f32.mrb[21].mxu0  ;;  %v1190_v61 = vsel %vm1135_vm2, %v5874_v50, -inf  ;;  %v5884_v21 = vadd.f32 %v800_v55, %v223_v59 }
 0x18d   : > { %1191 = vmax.xlane.f32.xlu1 %v1190_v61  ;;  %1188 = vmax.xlane.f32.xlu0 %v1187_v13  ;;  %v849_v56 = vpop.f32.mrb[22].mxu0 }
 0x18e   : > { %v850_v6 = vadd.f32 %v849_v56, %v5722_v51  ;;  %v4762_v33 = vpop.f32.mrb[23].mxu0  ;;  %v5890_v31 = vadd.f32 %v847_v11, %v224_v32  ;;  %v1193_v61 = vsel %vm1135_vm2, %v5884_v21, -inf  ;;  %v227_v32 = vld [vmem:[%s7244_s2 + $0xb8] sm:$0xff] }
 0x18f   : > { %v896_v22 = vpop.f32.mrb[20].mxu1 }
 0x190   : > { %v897_v59 = vadd.f32 %v896_v22, %v5717_v49  ;;  %v4767_v55 = vpop.f32.mrb[21].mxu1  ;;  %v1196_v13 = vsel %vm1135_vm2, %v5890_v31, -inf  ;;  %v5900_v3 = vadd.f32 %v850_v6, %v225_v29 }
 0x191   : > { %v899_v56 = vpop.f32.mrb[22].mxu1  ;;  %1194 = vmax.xlane.f32.xlu0 %v1193_v61  ;;  %1197 = vmax.xlane.f32.xlu1 %v1196_v13 }
 0x192   : > { %v900_v11 = vadd.f32 %v899_v56, %v5722_v51  ;;  %v4768_v33 = vpop.f32.mrb[23].mxu1  ;;  %v5906_v22 = vadd.f32 %v897_v59, %v226_v38  ;;  %v1199_v13 = vsel %vm1135_vm2, %v5900_v3, -inf  ;;  %v229_v59 = vld [vmem:[%s7244_s2 + $0xc8] sm:$0xff] }
 0x193   : > { %v946_v55 = vpop.f32.mrb[24].mxu0 }
 0x194   : > { %v947_v29 = vadd.f32 %v946_v55, %v5717_v49  ;;  %v4773_v6 = vpop.f32.mrb[25].mxu0  ;;  %v1202_v61 = vsel %vm1135_vm2, %v5906_v22, -inf  ;;  %v5916_v28 = vadd.f32 %v900_v11, %v227_v32 }
 0x195   : > { %1203 = vmax.xlane.f32.xlu1 %v1202_v61  ;;  %1200 = vmax.xlane.f32.xlu0 %v1199_v13  ;;  %v949_v38 = vpop.f32.mrb[26].mxu0 }
 0x196   : > { %v950_v56 = vadd.f32 %v949_v38, %v5722_v51  ;;  %v4774_v33 = vpop.f32.mrb[27].mxu0  ;;  %v5922_v55 = vadd.f32 %v947_v29, %v228_v1  ;;  %v1205_v61 = vsel %vm1135_vm2, %v5916_v28, -inf  ;;  %v231_v1 = vld [vmem:[%s7244_s2 + $0xd8] sm:$0xff] }
 0x197   : > { %v996_v6 = vpop.f32.mrb[24].mxu1 }
 0x198   : > { %v997_v32 = vadd.f32 %v996_v6, %v5717_v49  ;;  %v4779_v11 = vpop.f32.mrb[25].mxu1  ;;  %v1208_v13 = vsel %vm1135_vm2, %v5922_v55, -inf  ;;  %v5932_v5 = vadd.f32 %v950_v56, %v229_v59 }
 0x199   : > { %v999_v38 = vpop.f32.mrb[26].mxu1  ;;  %1206 = vmax.xlane.f32.xlu0 %v1205_v61  ;;  %1209 = vmax.xlane.f32.xlu1 %v1208_v13 }
 0x19a   : > { %v1000_v29 = vadd.f32 %v999_v38, %v5722_v51  ;;  %v4780_v33 = vpop.f32.mrb[27].mxu1  ;;  %v5938_v6 = vadd.f32 %v997_v32, %v230_v43  ;;  %v1211_v13 = vsel %vm1135_vm2, %v5932_v5, -inf  ;;  %v233_v32 = vld [vmem:[%s7244_s2 + $0xe8] sm:$0xff] }
 0x19b   : > { %v1046_v11 = vpop.f32.mrb[28].mxu0 }
 0x19c   : > { %v1047_v59 = vadd.f32 %v1046_v11, %v5717_v49  ;;  %v4785_v56 = vpop.f32.mrb[29].mxu0  ;;  %v1214_v61 = vsel %vm1135_vm2, %v5938_v6, -inf  ;;  %v5948_v12 = vadd.f32 %v1000_v29, %v231_v1 }
 0x19d   : > { %1215 = vmax.xlane.f32.xlu1 %v1214_v61  ;;  %1212 = vmax.xlane.f32.xlu0 %v1211_v13  ;;  %v1049_v43 = vpop.f32.mrb[30].mxu0 }
 0x19e   : > { %v1050_v38 = vadd.f32 %v1049_v43, %v5722_v51  ;;  %v4786_v33 = vpop.f32.mrb[31].mxu0  ;;  %v5954_v11 = vadd.f32 %v1047_v59, %v232_v52  ;;  %v1217_v61 = vsel %vm1135_vm2, %v5948_v12, -inf  ;;  %v235_v52 = vld [vmem:[%s7244_s2 + $0xf8] sm:$0xff] }
 0x19f   : > { %v1096_v56 = vpop.f32.mrb[28].mxu1 }
 0x1a0   : > { %v1097_v1 = vadd.f32 %v1096_v56, %v5717_v49  ;;  %v4791_v29 = vpop.f32.mrb[29].mxu1  ;;  %v1220_v13 = vsel %vm1135_vm2, %v5954_v11, -inf  ;;  %v5964_v2 = vadd.f32 %v1050_v38, %v233_v32 }
 0x1a1   : > { %v1099_v43 = vpop.f32.mrb[30].mxu1  ;;  %1218 = vmax.xlane.f32.xlu0 %v1217_v61  ;;  %1221 = vmax.xlane.f32.xlu1 %v1220_v13 }
 0x1a2   : > { %v1100_v59 = vadd.f32 %v1099_v43, %v5722_v51  ;;  %v4792_v33 = vpop.f32.mrb[31].mxu1  ;;  %v5970_v49 = vadd.f32 %v1097_v1, %v234_v18  ;;  %v1223_v29 = vsel %vm1135_vm2, %v5964_v2, -inf  ;;  %v5984_v18 = vpop.permute.xlu1 %1598 }
 0x1a3   : > { %7283 = vst [vmem:[#allocation16_spill] sm:$0xff] %v5984_v18  ;;  %v5988_v1 = vpop.permute.xlu0 %1645 }
 0x1a4   : > { %v1226_v56 = vsel %vm1135_vm2, %v5970_v49, -inf  ;;  %v5976_v32 = vadd.f32 %v1100_v59, %v235_v52  ;;  %7285 = vst [vmem:[#allocation18_spill] sm:$0xff] %v5988_v1 }
 0x1a5   : > { %1227 = vmax.xlane.f32.xlu1 %v1226_v56  ;;  %1224 = vmax.xlane.f32.xlu0 %v1223_v29 }
 0x1a6   : > { %v1229_v38 = vsel %vm1135_vm2, %v5976_v32, -inf  ;;  %v5986_v51 = vpop.permute.xlu1 %1692 }
 0x1a7   : > { %7284 = vst [vmem:[#allocation17_spill] sm:$0xff] %v5986_v51  ;;  %v5992_v13 = vpop.permute.xlu0 %1739 }
 0x1a8   : > { %7287 = vst [vmem:[#allocation20_spill] sm:$0xff] %v5992_v13 }
 0x1a9   : > { %1230 = vmax.xlane.f32.xlu0 %v1229_v38 }
 0x1aa   : > { %v5990_v61 = vpop.permute.xlu1 %1786 }
 0x1ab   : > { %7286 = vst [vmem:[#allocation19_spill] sm:$0xff] %v5990_v61  ;;  %v5996_v52 = vpop.permute.xlu0 %1833 }
 0x1ac   : > { %7289 = vst [vmem:[#allocation22_spill] sm:$0xff] %v5996_v52 }
 0x1ae   : > { %v5994_v43 = vpop.permute.xlu1 %1880 }
 0x1af   : > { %7288 = vst [vmem:[#allocation21_spill] sm:$0xff] %v5994_v43  ;;  %v6000_v33 = vpop.permute.xlu0 %1927 }
 0x1b0   : > { %7291 = vst [vmem:[#allocation24_spill] sm:$0xff] %v6000_v33 }
 0x1b2   : > { %v5998_v59 = vpop.permute.xlu1 %1974 }
 0x1b3   : > { %7290 = vst [vmem:[#allocation23_spill] sm:$0xff] %v5998_v59  ;;  %v6004_v29 = vpop.permute.xlu0 %2068 }
 0x1b4   : > { %7293 = vst [vmem:[#allocation26_spill] sm:$0xff] %v6004_v29 }
 0x1b6   : > { %2209 = vrot.lane.b32.xlu1 %v5582_v44, %s5396_s19  ;;  %v6002_v56 = vpop.permute.xlu1 %2021 }
 0x1b7   : > { %7292 = vst [vmem:[#allocation25_spill] sm:$0xff] %v6002_v56 }
 0x1ba   : > { %v6006_v38 = vpop.permute.xlu1 %2115 }
 0x1bb   : > { %7294 = vst [vmem:[#allocation27_spill] sm:$0xff] %v6006_v38 }
 0x1bf   : > { %2162 = vrot.lane.b32.xlu0 %v5578_v8, %s5396_s19  ;;  %s5397_s19 = smov 104  }
 0x1f6   : > { %v1138_v51 = vpop.xlane.xlu0 %1137 }
 0x1f7   : > { %v1232_v1 = vsub.f32 %v5732_v62, %v1138_v51 }
 0x1f8   : > { %v1141_v61 = vpop.xlane.xlu1 %1140 }
 0x1f9   : > { %v1264_v18 = vmul.f32 1.442695, %v1232_v1  ;;  %v1233_v13 = vsub.f32 %v5740_v15, %v1141_v61 }
 0x1fa   : > { %v1144_v43 = vpop.xlane.xlu0 %1143 }
 0x1fb   : > { %5097 = vpow2.f32 %v1264_v18  ;;  %v1266_v52 = vmul.f32 1.442695, %v1233_v13  ;;  %v1234_v59 = vsub.f32 %v5748_v26, %v1144_v43 }
 0x1fd   : > { %5099 = vpow2.f32 %v1266_v52  ;;  %v1268_v33 = vmul.f32 1.442695, %v1234_v59 }
 0x1fe   : > { %v1147_v8 = vpop.xlane.xlu0 %1146  ;;  %v1150_v56 = vpop.xlane.xlu1 %1149 }
 0x1ff   : > { %5101 = vpow2.f32 %v1268_v33  ;;  %v1235_v29 = vsub.f32 %v5756_v45, %v1147_v8  ;;  %v1236_v38 = vsub.f32 %v5762_v54, %v1150_v56 }
 0x201   : > { %v1270_v44 = vmul.f32 1.442695, %v1235_v29  ;;  %v1272_v62 = vmul.f32 1.442695, %v1236_v38 }
 0x202   : > { %v1156_v51 = vpop.xlane.xlu1 %1155  ;;  %v1153_v1 = vpop.xlane.xlu0 %1152 }
 0x203   : > { %5103 = vpow2.f32 %v1270_v44  ;;  %v1238_v15 = vsub.f32 %v5778_v17, %v1156_v51  ;;  %v1237_v18 = vsub.f32 %v5772_v7, %v1153_v1 }
 0x204   : > { %5105 = vpow2.f32 %v1272_v62 }
 0x205   : > { %v6015_v26 = vpop.eup %5097  ;;  %v1276_v61 = vmul.f32 1.442695, %v1238_v15  ;;  %v1274_v13 = vmul.f32 1.442695, %v1237_v18 }
 0x206   : > { %v1159_v43 = vpop.xlane.xlu0 %1158  ;;  %v1162_v52 = vpop.xlane.xlu1 %1161  ;;  %v1328_v8 = vsel %vm1135_vm2, %v6015_v26, 0.0 }
 0x207   : > { %v6019_v45 = vpop.eup %5099  ;;  %5107 = vpow2.f32 %v1276_v61  ;;  %v1239_v54 = vsub.f32 %v5788_v34, %v1159_v43  ;;  %v1240_v44 = vsub.f32 %v5794_v53, %v1162_v52  ;;  %1329 = vadd.xlane.f32.xlu1 %v1328_v8 }
 0x208   : > { %5109 = vpow2.f32 %v1274_v13  ;;  %v1331_v7 = vsel %vm1135_vm2, %v6019_v45, 0.0 }
 0x209   : > { %v6025_v17 = vpop.eup %5101  ;;  %v1278_v59 = vmul.f32 1.442695, %v1239_v54  ;;  %v1280_v33 = vmul.f32 1.442695, %v1240_v44  ;;  %1332 = vadd.xlane.f32.xlu0 %v1331_v7 }
 0x20a   : > { %v1168_v56 = vpop.xlane.xlu1 %1167  ;;  %v1165_v29 = vpop.xlane.xlu0 %1164  ;;  %v1334_v38 = vsel %vm1135_vm2, %v6025_v17, 0.0 }
 0x20b   : > { %5111 = vpow2.f32 %v1278_v59  ;;  %v1242_v34 = vsub.f32 %v5810_v23, %v1168_v56  ;;  %v1241_v53 = vsub.f32 %v5804_v9, %v1165_v29  ;;  %1335 = vadd.xlane.f32.xlu1 %v1334_v38 }
 0x20c   : > { %5113 = vpow2.f32 %v1280_v33 }
 0x20d   : > { %v6031_v62 = vpop.eup %5103  ;;  %v1284_v51 = vmul.f32 1.442695, %v1242_v34  ;;  %v1282_v1 = vmul.f32 1.442695, %v1241_v53 }
 0x20e   : > { %v6033_v15 = vpop.eup %5105  ;;  %v1171_v18 = vpop.xlane.xlu0 %1170  ;;  %v1337_v13 = vsel %vm1135_vm2, %v6031_v62, 0.0 }
 0x20f   : > { %v1174_v61 = vpop.xlane.xlu1 %1173  ;;  %5115 = vpow2.f32 %v1284_v51  ;;  %v1243_v43 = vsub.f32 %v5820_v48, %v1171_v18  ;;  %v1340_v9 = vsel %vm1135_vm2, %v6033_v15, 0.0  ;;  %1338 = vadd.xlane.f32.xlu0 %v1337_v13 }
 0x210   : > { %v1244_v23 = vsub.f32 %v5826_v60, %v1174_v61  ;;  %5117 = vpow2.f32 %v1282_v1  ;;  %1341 = vadd.xlane.f32.xlu1 %v1340_v9 }
 0x211   : > { %v6041_v52 = vpop.eup %5107  ;;  %v1286_v8 = vmul.f32 1.442695, %v1243_v43 }
 0x212   : > { %v1288_v54 = vmul.f32 1.442695, %v1244_v23  ;;  %v6043_v44 = vpop.eup %5109  ;;  %v1177_v59 = vpop.xlane.xlu0 %1176  ;;  %v1346_v33 = vsel %vm1135_vm2, %v6041_v52, 0.0 }
 0x213   : > { %v1180_v7 = vpop.xlane.xlu1 %1179  ;;  %5119 = vpow2.f32 %v1286_v8  ;;  %v1245_v60 = vsub.f32 %v5836_v24, %v1177_v59  ;;  %v1343_v56 = vsel %vm1135_vm2, %v6043_v44, 0.0 }
 0x214   : > { %v1246_v48 = vsub.f32 %v5842_v46, %v1180_v7  ;;  %5121 = vpow2.f32 %v1288_v54  ;;  %1347 = vadd.xlane.f32.xlu1 %v1346_v33  ;;  %1344 = vadd.xlane.f32.xlu0 %v1343_v56 }
 0x215   : > { %v6051_v29 = vpop.eup %5111  ;;  %v1290_v34 = vmul.f32 1.442695, %v1245_v60 }
 0x216   : > { %v1292_v38 = vmul.f32 1.442695, %v1246_v48  ;;  %v6053_v53 = vpop.eup %5113  ;;  %v1183_v51 = vpop.xlane.xlu0 %1182  ;;  %v1349_v18 = vsel %vm1135_vm2, %v6051_v29, 0.0 }
 0x217   : > { %v1186_v1 = vpop.xlane.xlu1 %1185  ;;  %v1247_v24 = vsub.f32 %v5852_v16, %v1183_v51  ;;  %v1352_v61 = vsel %vm1135_vm2, %v6053_v53, 0.0 }
 0x218   : > { %5123 = vpow2.f32 %v1292_v38  ;;  %v1248_v46 = vsub.f32 %v5858_v37, %v1186_v1  ;;  %1353 = vadd.xlane.f32.xlu1 %v1352_v61  ;;  %1350 = vadd.xlane.f32.xlu0 %v1349_v18 }
 0x219   : > { %5125 = vpow2.f32 %v1290_v34  ;;  %v6061_v13 = vpop.eup %5115  ;;  %v1294_v43 = vmul.f32 1.442695, %v1247_v24 }
 0x21a   : > { %v1296_v23 = vmul.f32 1.442695, %v1248_v46  ;;  %v6063_v9 = vpop.eup %5117  ;;  %v1189_v54 = vpop.xlane.xlu0 %1188  ;;  %v1358_v7 = vsel %vm1135_vm2, %v6061_v13, 0.0 }
 0x21b   : > { %v1192_v8 = vpop.xlane.xlu1 %1191  ;;  %5127 = vpow2.f32 %v1294_v43  ;;  %v1249_v37 = vsub.f32 %v5868_v0, %v1189_v54  ;;  %v1355_v59 = vsel %vm1135_vm2, %v6063_v9, 0.0 }
 0x21c   : > { %v1250_v16 = vsub.f32 %v5874_v50, %v1192_v8  ;;  %5129 = vpow2.f32 %v1296_v23  ;;  %1359 = vadd.xlane.f32.xlu1 %v1358_v7  ;;  %1356 = vadd.xlane.f32.xlu0 %v1355_v59 }
 0x21d   : > { %v6071_v33 = vpop.eup %5119  ;;  %v1298_v60 = vmul.f32 1.442695, %v1249_v37 }
 0x21e   : > { %v1300_v48 = vmul.f32 1.442695, %v1250_v16  ;;  %v6073_v56 = vpop.eup %5121  ;;  %v1195_v38 = vpop.xlane.xlu0 %1194  ;;  %v1361_v51 = vsel %vm1135_vm2, %v6071_v33, 0.0 }
 0x21f   : > { %v1198_v34 = vpop.xlane.xlu1 %1197  ;;  %v1251_v0 = vsub.f32 %v5884_v21, %v1195_v38  ;;  %v1364_v1 = vsel %vm1135_vm2, %v6073_v56, 0.0 }
 0x220   : > { %5131 = vpow2.f32 %v1300_v48  ;;  %v1252_v50 = vsub.f32 %v5890_v31, %v1198_v34  ;;  %1365 = vadd.xlane.f32.xlu1 %v1364_v1  ;;  %1362 = vadd.xlane.f32.xlu0 %v1361_v51 }
 0x221   : > { %5133 = vpow2.f32 %v1298_v60  ;;  %v1302_v24 = vmul.f32 1.442695, %v1251_v0 }
 0x222   : > { %v6081_v18 = vpop.eup %5123  ;;  %v1304_v46 = vmul.f32 1.442695, %v1252_v50  ;;  %v1201_v23 = vpop.xlane.xlu0 %1200 }
 0x223   : > { %v6083_v61 = vpop.eup %5125  ;;  %v1204_v43 = vpop.xlane.xlu1 %1203  ;;  %v1370_v8 = vsel %vm1135_vm2, %v6081_v18, 0.0  ;;  %5135 = vpow2.f32 %v1302_v24  ;;  %v1253_v31 = vsub.f32 %v5900_v3, %v1201_v23 }
 0x224   : > { %v1254_v21 = vsub.f32 %v5906_v22, %v1204_v43  ;;  %v1367_v54 = vsel %vm1135_vm2, %v6083_v61, 0.0  ;;  %5137 = vpow2.f32 %v1304_v46  ;;  %1371 = vadd.xlane.f32.xlu1 %v1370_v8 }
 0x225   : > { %1368 = vadd.xlane.f32.xlu0 %v1367_v54  ;;  %v6091_v7 = vpop.eup %5127  ;;  %v1306_v37 = vmul.f32 1.442695, %v1253_v31 }
 0x226   : > { %v1308_v16 = vmul.f32 1.442695, %v1254_v21  ;;  %v6093_v59 = vpop.eup %5129  ;;  %v1207_v48 = vpop.xlane.xlu0 %1206  ;;  %v1373_v38 = vsel %vm1135_vm2, %v6091_v7, 0.0 }
 0x227   : > { %v1210_v60 = vpop.xlane.xlu1 %1209  ;;  %v1255_v3 = vsub.f32 %v5916_v28, %v1207_v48  ;;  %v1376_v34 = vsel %vm1135_vm2, %v6093_v59, 0.0 }
 0x228   : > { %5139 = vpow2.f32 %v1308_v16  ;;  %v1256_v22 = vsub.f32 %v5922_v55, %v1210_v60  ;;  %1377 = vadd.xlane.f32.xlu1 %v1376_v34 }
 0x229   : > { %5141 = vpow2.f32 %v1306_v37  ;;  %1374 = vadd.xlane.f32.xlu0 %v1373_v38  ;;  %v1310_v0 = vmul.f32 1.442695, %v1255_v3 }
 0x22a   : > { %v6101_v51 = vpop.eup %5131  ;;  %v1312_v50 = vmul.f32 1.442695, %v1256_v22  ;;  %v1213_v46 = vpop.xlane.xlu0 %1212 }
 0x22b   : > { %v6103_v1 = vpop.eup %5133  ;;  %v1216_v24 = vpop.xlane.xlu1 %1215  ;;  %v1382_v43 = vsel %vm1135_vm2, %v6101_v51, 0.0  ;;  %5143 = vpow2.f32 %v1310_v0  ;;  %v1257_v55 = vsub.f32 %v5932_v5, %v1213_v46 }
 0x22c   : > { %v1258_v28 = vsub.f32 %v5938_v6, %v1216_v24  ;;  %v1379_v23 = vsel %vm1135_vm2, %v6103_v1, 0.0  ;;  %5145 = vpow2.f32 %v1312_v50  ;;  %1383 = vadd.xlane.f32.xlu1 %v1382_v43 }
 0x22d   : > { %1380 = vadd.xlane.f32.xlu0 %v1379_v23  ;;  %v6111_v8 = vpop.eup %5135  ;;  %v1314_v31 = vmul.f32 1.442695, %v1257_v55 }
 0x22e   : > { %v1316_v21 = vmul.f32 1.442695, %v1258_v28  ;;  %v6113_v54 = vpop.eup %5137  ;;  %v1219_v16 = vpop.xlane.xlu0 %1218  ;;  %v1385_v48 = vsel %vm1135_vm2, %v6111_v8, 0.0 }
 0x22f   : > { %v1222_v37 = vpop.xlane.xlu1 %1221  ;;  %v1259_v5 = vsub.f32 %v5948_v12, %v1219_v16  ;;  %v1388_v60 = vsel %vm1135_vm2, %v6113_v54, 0.0 }
 0x230   : > { %5147 = vpow2.f32 %v1316_v21  ;;  %v1260_v6 = vsub.f32 %v5954_v11, %v1222_v37  ;;  %1389 = vadd.xlane.f32.xlu1 %v1388_v60 }
 0x231   : > { %5149 = vpow2.f32 %v1314_v31  ;;  %1386 = vadd.xlane.f32.xlu0 %v1385_v48  ;;  %v1318_v3 = vmul.f32 1.442695, %v1259_v5 }
 0x232   : > { %v6121_v38 = vpop.eup %5139  ;;  %v1320_v22 = vmul.f32 1.442695, %v1260_v6  ;;  %v1225_v50 = vpop.xlane.xlu0 %1224 }
 0x233   : > { %v6123_v34 = vpop.eup %5141  ;;  %v1228_v0 = vpop.xlane.xlu1 %1227  ;;  %v1394_v24 = vsel %vm1135_vm2, %v6121_v38, 0.0  ;;  %5151 = vpow2.f32 %v1318_v3  ;;  %v1261_v11 = vsub.f32 %v5964_v2, %v1225_v50 }
 0x234   : > { %v1262_v12 = vsub.f32 %v5970_v49, %v1228_v0  ;;  %v1391_v46 = vsel %vm1135_vm2, %v6123_v34, 0.0  ;;  %5153 = vpow2.f32 %v1320_v22  ;;  %1395 = vadd.xlane.f32.xlu1 %v1394_v24 }
 0x235   : > { %1392 = vadd.xlane.f32.xlu0 %v1391_v46  ;;  %v6131_v43 = vpop.eup %5143  ;;  %v1322_v55 = vmul.f32 1.442695, %v1261_v11 }
 0x236   : > { %v1324_v28 = vmul.f32 1.442695, %v1262_v12  ;;  %v6133_v23 = vpop.eup %5145  ;;  %v1231_v21 = vpop.xlane.xlu0 %1230  ;;  %v1397_v31 = vsel %vm1135_vm2, %v6131_v43, 0.0 }
 0x237   : > { %v1263_v49 = vsub.f32 %v5976_v32, %v1231_v21  ;;  %v1400_v2 = vsel %vm1135_vm2, %v6133_v23, 0.0  ;;  %v7305_v21 = vld [vmem:[#allocation9_spill] sm:$0xff] }
 0x238   : > { %5155 = vpow2.f32 %v1324_v28  ;;  %1401 = vadd.xlane.f32.xlu1 %v1400_v2  ;;  %v7304_v28 = vld [vmem:[#allocation12_spill] sm:$0xff] }
 0x239   : > { %5157 = vpow2.f32 %v1322_v55  ;;  %1398 = vadd.xlane.f32.xlu0 %v1397_v31  ;;  %v1326_v37 = vmul.f32 1.442695, %v1263_v49  ;;  %v6224_v55 = vpop.permute.xlu1 %2209  ;;  %v7306_v49 = vld [vmem:[#allocation6_spill] sm:$0xff] }
 0x23a   : > { %v6140_v16 = vpop.eup %5147  ;;  %v6228_v31 = vpop.permute.xlu0 %2162 }
 0x23b   : > { %v6142_v48 = vpop.eup %5149  ;;  %v1406_v5 = vsel %vm1135_vm2, %v6140_v16, 0.0  ;;  %5159 = vpow2.f32 %v1326_v37 }
 0x23c   : > { %v1403_v6 = vsel %vm1135_vm2, %v6142_v48, 0.0  ;;  %1407 = vadd.xlane.f32.xlu1 %v1406_v5  ;;  %v7307_v5 = vld [vmem:[#allocation14_spill] sm:$0xff] }
 0x23d   : > { %1404 = vadd.xlane.f32.xlu0 %v1403_v6  ;;  %v6148_v32 = vpop.eup %5151 }
 0x23e   : > { %v6150_v60 = vpop.eup %5153  ;;  %v1409_v3 = vsel %vm1135_vm2, %v6148_v32, 0.0 }
 0x23f   : > { %v1412_v22 = vsel %vm1135_vm2, %v6150_v60, 0.0 }
 0x240   : > { %1413 = vadd.xlane.f32.xlu1 %v1412_v22 }
 0x241   : > { %1410 = vadd.xlane.f32.xlu0 %v1409_v3  ;;  %v7308_v3 = vld [vmem:[#allocation8_spill] sm:$0xff] }
 0x242   : > { %v6156_v0 = vpop.eup %5155 }
 0x243   : > { %v6158_v50 = vpop.eup %5157  ;;  %v1418_v24 = vsel %vm1135_vm2, %v6156_v0, 0.0 }
 0x244   : > { %v1415_v12 = vsel %vm1135_vm2, %v6158_v50, 0.0  ;;  %1419 = vadd.xlane.f32.xlu1 %v1418_v24 }
 0x245   : > { %1416 = vadd.xlane.f32.xlu0 %v1415_v12  ;;  %v6164_v11 = vpop.eup %5159 }
 0x246   : > { %v1421_v46 = vsel %vm1135_vm2, %v6164_v11, 0.0 }
 0x249   : > { %1422 = vadd.xlane.f32.xlu0 %v1421_v46 }
 0x255   : > { %2314 = vrot.lane.b32.xlu1 %v5470_v14, %s5397_s19 }
 0x259   : > { %2312 = vrot.lane.b32.xlu1 %v5558_v40, %s5398_s18  ;;  %v7303_v40 = vld [vmem:[#allocation15_spill] sm:$0xff] }
 0x25d   : > { %2418 = vrot.lane.b32.xlu1 %v5478_v20, %s5397_s19 }
 0x25f   : > { %2262 = vrot.lane.b32.xlu0 %v5453_v4, %s5397_s19 }
 0x261   : > { %2416 = vrot.lane.b32.xlu1 %v5482_v25, %s5398_s18  ;;  %v7296_v25 = vld [vmem:[#allocation5_spill] sm:$0xff] }
 0x263   : > { %2260 = vrot.lane.b32.xlu0 %v5556_v39, %s5398_s18  ;;  %v7302_v39 = vld [vmem:[#allocation3_spill] sm:$0xff] }
 0x265   : > { %2522 = vrot.lane.b32.xlu1 %v5500_v41, %s5397_s19 }
 0x267   : > { %2366 = vrot.lane.b32.xlu0 %v5462_v10, %s5397_s19 }
 0x269   : > { %2520 = vrot.lane.b32.xlu1 %v5494_v36, %s5398_s18  ;;  %v7298_v36 = vld [vmem:[#allocation2_spill] sm:$0xff] }
 0x26b   : > { %2364 = vrot.lane.b32.xlu0 %v5476_v19, %s5398_s18  ;;  %v7295_v19 = vld [vmem:[#allocation11_spill] sm:$0xff] }
 0x26d   : > { %2626 = vrot.lane.b32.xlu1 %v5524_v63, %s5397_s19 }
 0x26f   : > { %2470 = vrot.lane.b32.xlu0 %v5492_v35, %s5397_s19 }
 0x271   : > { %2624 = vrot.lane.b32.xlu1 %v5506_v47, %s5398_s18  ;;  %v7299_v47 = vld [vmem:[#allocation13_spill] sm:$0xff] }
 0x273   : > { %2468 = vrot.lane.b32.xlu0 %v5486_v30, %s5398_s18  ;;  %v7297_v30 = vld [vmem:[#allocation4_spill] sm:$0xff] }
 0x275   : > { %2730 = vrot.lane.b32.xlu1 %v5542_v27, %s5397_s19 }
 0x277   : > { %2574 = vrot.lane.b32.xlu0 %v5516_v57, %s5397_s19 }
 0x279   : > { %2728 = vrot.lane.b32.xlu1 %v5518_v58, %s5398_s18  ;;  %v7300_v58 = vld [vmem:[#allocation10_spill] sm:$0xff] }
 0x27b   : > { %2572 = vrot.lane.b32.xlu0 %v5502_v42, %s5398_s18  ;;  %v7301_v42 = vld [vmem:[#allocation7_spill] sm:$0xff] }
 0x27d   : > { %2834 = vrot.lane.b32.xlu1 %v7295_v19, %s5397_s19 }
 0x27f   : > { %2678 = vrot.lane.b32.xlu0 %v7296_v25, %s5397_s19 }
 0x281   : > { %2832 = vrot.lane.b32.xlu1 %v7297_v30, %s5398_s18 }
 0x283   : > { %2676 = vrot.lane.b32.xlu0 %v7298_v36, %s5398_s18 }
 0x285   : > { %2938 = vrot.lane.b32.xlu1 %v7299_v47, %s5397_s19 }
 0x287   : > { %2782 = vrot.lane.b32.xlu0 %v7300_v58, %s5397_s19 }
 0x289   : > { %2936 = vrot.lane.b32.xlu1 %v7301_v42, %s5398_s18 }
 0x28b   : > { %2780 = vrot.lane.b32.xlu0 %v7302_v39, %s5398_s18 }
 0x28d   : > { %3042 = vrot.lane.b32.xlu1 %v7303_v40, %s5397_s19 }
 0x28f   : > { %2886 = vrot.lane.b32.xlu0 %v7304_v28, %s5397_s19 }
 0x291   : > { %3040 = vrot.lane.b32.xlu1 %v7305_v21, %s5398_s18 }
 0x293   : > { %2884 = vrot.lane.b32.xlu0 %v7306_v49, %s5398_s18 }
 0x294   : > { %v1330_v2 = vpop.xlane.xlu1 %1329 }
 0x295   : > { %5161 = vrcp.f32 %v1330_v2  ;;  %3491 = vrot.lane.b32.xlu1 %v5453_v4, %s5399_s20 }
 0x296   : > { %v1333_v37 = vpop.xlane.xlu0 %1332 }
 0x297   : > { %2990 = vrot.lane.b32.xlu0 %v7307_v5, %s5397_s19  ;;  %5163 = vrcp.f32 %v1333_v37 }
 0x298   : > { %v1336_v6 = vpop.xlane.xlu1 %1335 }
 0x299   : > { %5165 = vrcp.f32 %v1336_v6  ;;  %3585 = vrot.lane.b32.xlu1 %v5462_v10, %s5399_s20 }
 0x29b   : > { %2988 = vrot.lane.b32.xlu0 %v7308_v3, %s5398_s18  ;;  %v7309_v3 = vld [vmem:[#allocation16_spill] sm:$0xff] }
 0x29c   : > { %v1339_v22 = vpop.xlane.xlu0 %1338 }
 0x29d   : > { %v1342_v24 = vpop.xlane.xlu1 %1341  ;;  %5167 = vrcp.f32 %v1339_v22  ;;  %v7310_v22 = vmov 0.0   ;;  %3679 = vrot.lane.b32.xlu1 %v5492_v35, %s5399_s20 }
 0x29e   : > { %5169 = vrcp.f32 %v1342_v24 }
 0x29f   : > { %v5162_v12 = vpop.eup %5161  ;;  %3538 = vrot.lane.b32.xlu0 %v5470_v14, %s5399_s20 }
 0x2a0   : > { %v1456_v42 = vmul.f32 %v5162_v12, %v6015_v26 }
 0x2a1   : > { %v5164_v46 = vpop.eup %5163  ;;  %v1348_v30 = vpop.xlane.xlu1 %1347  ;;  %3773 = vrot.lane.b32.xlu1 %v5516_v57, %s5399_s20 }
 0x2a2   : > { %v1345_v36 = vpop.xlane.xlu0 %1344  ;;  %v1457_v39 = vmul.f32 %v5164_v46, %v6019_v45 }
 0x2a3   : > { %5171 = vrcp.f32 %v1345_v36  ;;  %v5166_v49 = vpop.eup %5165  ;;  %3632 = vrot.lane.b32.xlu0 %v5478_v20, %s5399_s20 }
 0x2a4   : > { %v1488_v21 = vpack.c.bf16 %v1457_v39, %v1456_v42  ;;  %5173 = vrcp.f32 %v1348_v30  ;;  %v1458_v24 = vmul.f32 %v5166_v49, %v6025_v17  ;;  %v7311_v39 = vld [vmem:[#allocation18_spill] sm:$0xff] }
 0x2a5   : > { %v1354_v2 = vpop.xlane.xlu1 %1353  ;;  %3867 = vrot.lane.b32.xlu1 %v7296_v25, %s5399_s20 }
 0x2a6   : > { %v1351_v37 = vpop.xlane.xlu0 %1350  ;;  %4796 = vmatmul.mubr.msk.bf16.vlgmr.msra.gmra.mrb[32].mxu0 %vm1135_vm2, %v1488_v21 }
 0x2a7   : > { %v5168_v6 = vpop.eup %5167  ;;  %5175 = vrcp.f32 %v1351_v37  ;;  %4806 = vmatpush3.bf16.msra.mxu0 %v7309_v3  ;;  %4807 = vmatprep.mubr.msk.bf16.mxu0 %vm5394_vm0, %v7310_v22 }
 0x2a8   : > { %v1459_v26 = vmul.f32 %v5168_v6, %v6031_v62  ;;  %4817 = vmatprep.subr.bf16.mxu0 %v7310_v22  ;;  %5177 = vrcp.f32 %v1354_v2  ;;  %v5170_v30 = vpop.eup %5169  ;;  %3726 = vrot.lane.b32.xlu0 %v5500_v41, %s5399_s20 }
 0x2a9   : > { %v1360_v45 = vpop.xlane.xlu1 %1359  ;;  %v1460_v17 = vmul.f32 %v5170_v30, %v6033_v15  ;;  %3961 = vrot.lane.b32.xlu1 %v7300_v58, %s5399_s20 }
 0x2aa   : > { %v1357_v12 = vpop.xlane.xlu0 %1356  ;;  %v1489_v46 = vpack.c.bf16 %v1459_v26, %v1458_v24 }
 0x2ab   : > { %5179 = vrcp.f32 %v1357_v12  ;;  %v7312_v12 = vld [vmem:[#allocation17_spill] sm:$0xff] }
 0x2ac   : > { %4802 = vmatmul.mubr.msk.bf16.vlgmr.msra.gmra.mrb[32].mxu1 %vm1135_vm2, %v1489_v46  ;;  %5181 = vrcp.f32 %v1360_v45  ;;  %3820 = vrot.lane.b32.xlu0 %v5524_v63, %s5399_s20 }
 0x2ad   : > { %v5172_v36 = vpop.eup %5171  ;;  %v1366_v42 = vpop.xlane.xlu1 %1365  ;;  %4812 = vmatpush3.bf16.msra.mxu1 %v7311_v39  ;;  %4813 = vmatprep.mubr.msk.bf16.mxu1 %vm5394_vm0, %v7310_v22 }
 0x2ae   : > { %v1363_v21 = vpop.xlane.xlu0 %1362  ;;  %v1461_v62 = vmul.f32 %v5172_v36, %v6043_v44  ;;  %4823 = vmatprep.subr.bf16.mxu1 %v7310_v22  ;;  %v5174_v49 = vpop.eup %5173  ;;  %4008 = vrot.lane.b32.xlu1 %v7295_v19, %s5399_s20 }
 0x2af   : > { %5183 = vrcp.f32 %v1363_v21  ;;  %v1462_v24 = vmul.f32 %v5174_v49, %v6041_v52 }
 0x2b0   : > { %v1490_v2 = vpack.c.bf16 %v1461_v62, %v1460_v17  ;;  %5185 = vrcp.f32 %v1366_v42  ;;  %v7313_v42 = vld [vmem:[#allocation20_spill] sm:$0xff]  ;;  %3914 = vrot.lane.b32.xlu0 %v5542_v27, %s5399_s20 }
 0x2b1   : > { %v5176_v37 = vpop.eup %5175  ;;  %v1372_v6 = vpop.xlane.xlu1 %1371 }
 0x2b2   : > { %v1369_v3 = vpop.xlane.xlu0 %1368  ;;  %v1463_v26 = vmul.f32 %v5176_v37, %v6051_v29  ;;  %4808 = vmatmul.mubr.msk.bf16.vlgmr.msra.gmra.mrb[36].mxu0 %vm1135_vm2, %v1490_v2  ;;  %v5178_v45 = vpop.eup %5177  ;;  %v7314_v2 = vld [vmem:[#allocation19_spill] sm:$0xff] }
 0x2b3   : > { %4818 = vmatpush3.bf16.msra.mxu0 %v7312_v12  ;;  %5187 = vrcp.f32 %v1369_v3  ;;  %4819 = vmatprep.mubr.msk.bf16.mxu0 %vm5394_vm0, %v7310_v22  ;;  %v1464_v52 = vmul.f32 %v5178_v45, %v6053_v53  ;;  %v7315_v45 = vld [vmem:[#allocation22_spill] sm:$0xff] }
 0x2b4   : > { %v1491_v15 = vpack.c.bf16 %v1463_v26, %v1462_v24  ;;  %4829 = vmatprep.subr.bf16.mxu0 %v7310_v22  ;;  %5189 = vrcp.f32 %v1372_v6 }
 0x2b5   : > { %v5180_v44 = vpop.eup %5179  ;;  %v1378_v46 = vpop.xlane.xlu1 %1377 }
 0x2b6   : > { %v1375_v30 = vpop.xlane.xlu0 %1374  ;;  %v1465_v29 = vmul.f32 %v5180_v44, %v6063_v9  ;;  %4814 = vmatmul.mubr.msk.bf16.vlgmr.msra.gmra.mrb[36].mxu1 %vm1135_vm2, %v1491_v15  ;;  %v5182_v36 = vpop.eup %5181 }
 0x2b7   : > { %4824 = vmatpush3.bf16.msra.mxu1 %v7313_v42  ;;  %5191 = vrcp.f32 %v1375_v30  ;;  %4825 = vmatprep.mubr.msk.bf16.mxu1 %vm5394_vm0, %v7310_v22  ;;  %v1466_v53 = vmul.f32 %v5182_v36, %v6061_v13 }
 0x2b8   : > { %v1492_v39 = vpack.c.bf16 %v1465_v29, %v1464_v52  ;;  %4835 = vmatprep.subr.bf16.mxu1 %v7310_v22  ;;  %5193 = vrcp.f32 %v1378_v46  ;;  %v7316_v52 = vld [vmem:[#allocation21_spill] sm:$0xff] }
 0x2b9   : > { %v5184_v21 = vpop.eup %5183  ;;  %v1384_v17 = vpop.xlane.xlu1 %1383 }
 0x2ba   : > { %v1381_v62 = vpop.xlane.xlu0 %1380  ;;  %v1467_v9 = vmul.f32 %v5184_v21, %v6071_v33  ;;  %4820 = vmatmul.mubr.msk.bf16.vlgmr.msra.gmra.mrb[40].mxu0 %vm1135_vm2, %v1492_v39  ;;  %v5186_v49 = vpop.eup %5185 }
 0x2bb   : > { %4830 = vmatpush3.bf16.msra.mxu0 %v7314_v2  ;;  %5195 = vrcp.f32 %v1381_v62  ;;  %4831 = vmatprep.mubr.msk.bf16.mxu0 %vm5394_vm0, %v7310_v22  ;;  %v1468_v13 = vmul.f32 %v5186_v49, %v6073_v56 }
 0x2bc   : > { %v1493_v37 = vpack.c.bf16 %v1467_v9, %v1466_v53  ;;  %4841 = vmatprep.subr.bf16.mxu0 %v7310_v22  ;;  %5197 = vrcp.f32 %v1384_v17  ;;  %v7317_v17 = vld [vmem:[#allocation24_spill] sm:$0xff] }
 0x2bd   : > { %v5188_v6 = vpop.eup %5187  ;;  %v1390_v3 = vpop.xlane.xlu1 %1389 }
 0x2be   : > { %v1387_v24 = vpop.xlane.xlu0 %1386  ;;  %v1469_v33 = vmul.f32 %v5188_v6, %v6083_v61  ;;  %4826 = vmatmul.mubr.msk.bf16.vlgmr.msra.gmra.mrb[40].mxu1 %vm1135_vm2, %v1493_v37  ;;  %v5190_v26 = vpop.eup %5189  ;;  %v7318_v37 = vld [vmem:[#allocation23_spill] sm:$0xff] }
 0x2bf   : > { %4836 = vmatpush3.bf16.msra.mxu1 %v7315_v45  ;;  %5199 = vrcp.f32 %v1387_v24  ;;  %4837 = vmatprep.mubr.msk.bf16.mxu1 %vm5394_vm0, %v7310_v22  ;;  %v1470_v56 = vmul.f32 %v5190_v26, %v6081_v18  ;;  %v7319_v26 = vld [vmem:[#allocation25_spill] sm:$0xff] }
 0x2c0   : > { %v1494_v12 = vpack.c.bf16 %v1469_v33, %v1468_v13  ;;  %4847 = vmatprep.subr.bf16.mxu1 %v7310_v22  ;;  %5201 = vrcp.f32 %v1390_v3 }
 0x2c1   : > { %v5192_v15 = vpop.eup %5191  ;;  %v1396_v44 = vpop.xlane.xlu1 %1395 }
 0x2c2   : > { %v1393_v46 = vpop.xlane.xlu0 %1392  ;;  %v1471_v61 = vmul.f32 %v5192_v15, %v6091_v7  ;;  %4832 = vmatmul.mubr.msk.bf16.vlgmr.msra.gmra.mrb[44].mxu0 %vm1135_vm2, %v1494_v12  ;;  %v5194_v30 = vpop.eup %5193 }
 0x2c3   : > { %4842 = vmatpush3.bf16.msra.mxu0 %v7316_v52  ;;  %5203 = vrcp.f32 %v1393_v46  ;;  %4843 = vmatprep.mubr.msk.bf16.mxu0 %vm5394_vm0, %v7310_v22  ;;  %v1472_v18 = vmul.f32 %v5194_v30, %v6093_v59 }
 0x2c4   : > { %v1495_v29 = vpack.c.bf16 %v1471_v61, %v1470_v56  ;;  %4853 = vmatprep.subr.bf16.mxu0 %v7310_v22  ;;  %5205 = vrcp.f32 %v1396_v44  ;;  %v7320_v56 = vld [vmem:[#allocation26_spill] sm:$0xff] }
 0x2c5   : > { %v5196_v36 = vpop.eup %5195  ;;  %v1402_v42 = vpop.xlane.xlu1 %1401 }
 0x2c6   : > { %v1399_v39 = vpop.xlane.xlu0 %1398  ;;  %v1473_v7 = vmul.f32 %v5196_v36, %v6103_v1  ;;  %4838 = vmatmul.mubr.msk.bf16.vlgmr.msra.gmra.mrb[44].mxu1 %vm1135_vm2, %v1495_v29  ;;  %v5198_v21 = vpop.eup %5197 }
 0x2c7   : > { %4848 = vmatpush3.bf16.msra.mxu1 %v7317_v17  ;;  %5207 = vrcp.f32 %v1399_v39  ;;  %4849 = vmatprep.mubr.msk.bf16.mxu1 %vm5394_vm0, %v7310_v22  ;;  %v1474_v59 = vmul.f32 %v5198_v21, %v6101_v51 }
 0x2c8   : > { %v1496_v62 = vpack.c.bf16 %v1473_v7, %v1472_v18  ;;  %4859 = vmatprep.subr.bf16.mxu1 %v7310_v22  ;;  %5209 = vrcp.f32 %v1402_v42  ;;  %v7321_v42 = vld [vmem:[#allocation27_spill] sm:$0xff] }
 0x2c9   : > { %v5200_v53 = vpop.eup %5199  ;;  %v1408_v9 = vpop.xlane.xlu1 %1407 }
 0x2ca   : > { %v1405_v49 = vpop.xlane.xlu0 %1404  ;;  %v1475_v1 = vmul.f32 %v5200_v53, %v6111_v8  ;;  %4844 = vmatmul.mubr.msk.bf16.vlgmr.msra.gmra.mrb[48].mxu0 %vm1135_vm2, %v1496_v62  ;;  %v5202_v2 = vpop.eup %5201 }
 0x2cb   : > { %4854 = vmatpush3.bf16.msra.mxu0 %v7318_v37  ;;  %5211 = vrcp.f32 %v1405_v49  ;;  %4855 = vmatprep.mubr.msk.bf16.mxu0 %vm5394_vm0, %v7310_v22  ;;  %v1476_v51 = vmul.f32 %v5202_v2, %v6113_v54 }
 0x2cc   : > { %v1497_v6 = vpack.c.bf16 %v1475_v1, %v1474_v59  ;;  %4865 = vmatprep.subr.bf16.mxu0 %v7310_v22  ;;  %5213 = vrcp.f32 %v1408_v9 }
 0x2cd   : > { %v5204_v3 = vpop.eup %5203  ;;  %v1414_v24 = vpop.xlane.xlu1 %1413 }
 0x2ce   : > { %v1411_v13 = vpop.xlane.xlu0 %1410  ;;  %v1477_v8 = vmul.f32 %v5204_v3, %v6123_v34  ;;  %4850 = vmatmul.mubr.msk.bf16.vlgmr.msra.gmra.mrb[48].mxu1 %vm1135_vm2, %v1497_v6  ;;  %v5206_v33 = vpop.eup %5205 }
 0x2cf   : > { %4860 = vmatpush3.bf16.msra.mxu1 %v7319_v26  ;;  %5215 = vrcp.f32 %v1411_v13  ;;  %4861 = vmatprep.mubr.msk.bf16.mxu1 %vm5394_vm0, %v7310_v22  ;;  %v1478_v54 = vmul.f32 %v5206_v33, %v6121_v38 }
 0x2d0   : > { %v1498_v45 = vpack.c.bf16 %v1477_v8, %v1476_v51  ;;  %4871 = vmatprep.subr.bf16.mxu1 %v7310_v22  ;;  %5217 = vrcp.f32 %v1414_v24 }
 0x2d1   : > { %v5208_v12 = vpop.eup %5207  ;;  %v1420_v15 = vpop.xlane.xlu1 %1419 }
 0x2d2   : > { %v1417_v44 = vpop.xlane.xlu0 %1416  ;;  %v1479_v34 = vmul.f32 %v5208_v12, %v6131_v43  ;;  %4856 = vmatmul.mubr.msk.bf16.vlgmr.msra.gmra.mrb[52].mxu0 %vm1135_vm2, %v1498_v45  ;;  %v5210_v46 = vpop.eup %5209 }
 0x2d3   : > { %4866 = vmatpush3.bf16.msra.mxu0 %v7320_v56  ;;  %5219 = vrcp.f32 %v1417_v44  ;;  %4867 = vmatprep.mubr.msk.bf16.mxu0 %vm5394_vm0, %v7310_v22  ;;  %v1480_v38 = vmul.f32 %v5210_v46, %v6133_v23 }
 0x2d4   : > { %5221 = vrcp.f32 %v1420_v15  ;;  %v1499_v61 = vpack.c.bf16 %v1479_v34, %v1478_v54  ;;  %4877 = vmatprep.subr.bf16.mxu0 %v7310_v22 }
 0x2d5   : > { %v5212_v30 = vpop.eup %5211  ;;  %v2315_v29 = vpop.permute.xlu1 %2314 }
 0x2d6   : > { %v1423_v52 = vpop.xlane.xlu0 %1422  ;;  %v1481_v43 = vmul.f32 %v5212_v30, %v6142_v48  ;;  %4862 = vmatmul.mubr.msk.bf16.vlgmr.msra.gmra.mrb[52].mxu1 %vm1135_vm2, %v1499_v61  ;;  %v5214_v36 = vpop.eup %5213 }
 0x2d7   : > { %5223 = vrcp.f32 %v1423_v52  ;;  %4872 = vmatpush3.bf16.msra.mxu1 %v7321_v42  ;;  %4873 = vmatprep.mubr.msk.bf16.mxu1 %vm5394_vm0, %v7310_v22  ;;  %v1482_v17 = vmul.f32 %v5214_v36, %v6140_v16 }
 0x2d8   : > { %v1500_v39 = vpack.c.bf16 %v1481_v43, %v1480_v38  ;;  %4883 = vmatprep.subr.bf16.mxu1 %v7310_v22 }
 0x2d9   : > { %v5216_v18 = vpop.eup %5215  ;;  %v2313_v21 = vpop.permute.xlu1 %2312 }
 0x2da   : > { %v2263_v7 = vpop.permute.xlu0 %2262  ;;  %v1483_v23 = vmul.f32 %v5216_v18, %v6148_v32  ;;  %4868 = vmatmul.mubr.msk.bf16.vlgmr.msra.gmra.mrb[56].mxu0 %vm1135_vm2, %v1500_v39  ;;  %v5218_v48 = vpop.eup %5217 }
 0x2db   : > { %4878 = vmatpush3.bf16.msra.mxu0 %v6228_v31  ;;  %4879 = vmatprep.mubr.msk.bf16.mxu0 %vm5394_vm0, %v7310_v22  ;;  %v1484_v1 = vmul.f32 %v5218_v48, %v6150_v60  ;;  %v2268_v6 = vsel %vm305_vm1, %v2263_v7, 0 }
 0x2dc   : > { %v1501_v62 = vpack.c.bf16 %v1483_v23, %v1482_v17  ;;  %4889 = vmatprep.subr.bf16.mxu0 %v7310_v22 }
 0x2dd   : > { %v5220_v53 = vpop.eup %5219  ;;  %v2419_v49 = vpop.permute.xlu1 %2418 }
 0x2de   : > { %v2261_v9 = vpop.permute.xlu0 %2260  ;;  %v5222_v59 = vpop.eup %5221  ;;  %v1485_v16 = vmul.f32 %v5220_v53, %v6158_v50  ;;  %4874 = vmatmul.mubr.msk.bf16.vlgmr.msra.gmra.mrb[56].mxu1 %vm1135_vm2, %v1501_v62  ;;  %v2424_v8 = vsel %vm305_vm1, %v2419_v49, 0 }
 0x2df   : > { %4884 = vmatpush3.bf16.msra.mxu1 %v6224_v55  ;;  %4885 = vmatprep.mubr.msk.bf16.mxu1 %vm5394_vm0, %v7310_v22  ;;  %v1486_v2 = vmul.f32 %v5222_v59, %v6156_v0  ;;  %v2320_v55 = vsel %vm305_vm1, %v2315_v29, 0 }
 0x2e0   : > { %v1502_v31 = vpack.c.bf16 %v1485_v16, %v1484_v1  ;;  %4895 = vmatprep.subr.bf16.mxu1 %v7310_v22 }
 0x2e1   : > { %v5224_v32 = vpop.eup %5223  ;;  %v2417_v3 = vpop.permute.xlu1 %2416 }
 0x2e2   : > { %v1487_v37 = vmul.f32 %v5224_v32, %v6164_v11  ;;  %v2367_v60 = vpop.permute.xlu0 %2366  ;;  %4880 = vmatmul.mubr.msk.bf16.vlgmr.msra.gmra.mrb[60].mxu0 %vm1135_vm2, %v1502_v31 }
 0x2e3   : > { %4891 = vmatprep.mubr.msk.bf16.mxu0 %vm5394_vm0, %v7310_v22  ;;  %v2372_v0 = vsel %vm305_vm1, %v2367_v60, 0 }
 0x2e4   : > { %v1503_v50 = vpack.c.bf16 %v1487_v37, %v1486_v2  ;;  %4890 = vmatpush3.bf16.xpose.msra.mxu0 %v2268_v6 }
 0x2e5   : > { %4901 = vmatprep.subr.bf16.mxu0 %v7310_v22  ;;  %v2523_v13 = vpop.permute.xlu1 %2522 }
 0x2e6   : > { %v2365_v24 = vpop.permute.xlu0 %2364  ;;  %4886 = vmatmul.mubr.msk.bf16.vlgmr.msra.gmra.mrb[60].mxu1 %vm1135_vm2, %v1503_v50  ;;  %v2528_v44 = vsel %vm305_vm1, %v2523_v13, 0 }
 0x2e7   : > { %4897 = vmatprep.mubr.msk.bf16.mxu1 %vm5394_vm0, %v7310_v22 }
 0x2e8   : > { %4896 = vmatpush3.bf16.xpose.msra.mxu1 %v2320_v55 }
 0x2e9   : > { %4907 = vmatprep.subr.bf16.mxu1 %v7310_v22  ;;  %v2521_v51 = vpop.permute.xlu1 %2520 }
 0x2ea   : > { %v2471_v11 = vpop.permute.xlu0 %2470 }
 0x2eb   : > { %4892 = vmatmul.mubr.msk.bf16.vlgmr.msra.gmra.mrb[64].mxu0 %vm305_vm1, %v2261_v9  ;;  %v2476_v45 = vsel %vm305_vm1, %v2471_v11, 0 }
 0x2ec   : > { %4902 = vmatpush3.bf16.xpose.msra.mxu0 %v2372_v0  ;;  %4903 = vmatprep.mubr.msk.bf16.mxu0 %vm5394_vm0, %v7310_v22 }
 0x2ed   : > { %4913 = vmatprep.subr.bf16.mxu0 %v7310_v22  ;;  %v2627_v26 = vpop.permute.xlu1 %2626 }
 0x2ee   : > { %v2469_v33 = vpop.permute.xlu0 %2468  ;;  %v2632_v30 = vsel %vm305_vm1, %v2627_v26, 0 }
 0x2ef   : > { %4898 = vmatmul.mubr.msk.bf16.vlgmr.msra.gmra.mrb[64].mxu1 %vm305_vm1, %v2313_v21 }
 0x2f0   : > { %4908 = vmatpush3.bf16.xpose.msra.mxu1 %v2424_v8  ;;  %4909 = vmatprep.mubr.msk.bf16.mxu1 %vm5394_vm0, %v7310_v22 }
 0x2f1   : > { %4919 = vmatprep.subr.bf16.mxu1 %v7310_v22  ;;  %v2625_v15 = vpop.permute.xlu1 %2624 }
 0x2f2   : > { %v2575_v12 = vpop.permute.xlu0 %2574 }
 0x2f3   : > { %4904 = vmatmul.mubr.msk.bf16.vlgmr.msra.gmra.mrb[68].mxu0 %vm305_vm1, %v2365_v24  ;;  %v2580_v46 = vsel %vm305_vm1, %v2575_v12, 0 }
 0x2f4   : > { %4914 = vmatpush3.bf16.xpose.msra.mxu0 %v2476_v45  ;;  %4915 = vmatprep.mubr.msk.bf16.mxu0 %vm5394_vm0, %v7310_v22 }
 0x2f5   : > { %4925 = vmatprep.subr.bf16.mxu0 %v7310_v22  ;;  %v2731_v34 = vpop.permute.xlu1 %2730 }
 0x2f6   : > { %v2573_v54 = vpop.permute.xlu0 %2572  ;;  %v2736_v36 = vsel %vm305_vm1, %v2731_v34, 0 }
 0x2f7   : > { %4910 = vmatmul.mubr.msk.bf16.vlgmr.msra.gmra.mrb[68].mxu1 %vm305_vm1, %v2417_v3 }
 0x2f8   : > { %4920 = vmatpush3.bf16.xpose.msra.mxu1 %v2528_v44  ;;  %4921 = vmatprep.mubr.msk.bf16.mxu1 %vm5394_vm0, %v7310_v22 }
 0x2f9   : > { %4931 = vmatprep.subr.bf16.mxu1 %v7310_v22  ;;  %v2729_v61 = vpop.permute.xlu1 %2728 }
 0x2fa   : > { %v2679_v56 = vpop.permute.xlu0 %2678 }
 0x2fb   : > { %4916 = vmatmul.mubr.msk.bf16.vlgmr.msra.gmra.mrb[72].mxu0 %vm305_vm1, %v2469_v33  ;;  %v2684_v29 = vsel %vm305_vm1, %v2679_v56, 0 }
 0x2fc   : > { %4926 = vmatpush3.bf16.xpose.msra.mxu0 %v2580_v46  ;;  %4927 = vmatprep.mubr.msk.bf16.mxu0 %vm5394_vm0, %v7310_v22 }
 0x2fd   : > { %4937 = vmatprep.subr.bf16.mxu0 %v7310_v22  ;;  %v2835_v43 = vpop.permute.xlu1 %2834 }
 0x2fe   : > { %v2677_v52 = vpop.permute.xlu0 %2676  ;;  %v2840_v21 = vsel %vm305_vm1, %v2835_v43, 0 }
 0x2ff   : > { %4922 = vmatmul.mubr.msk.bf16.vlgmr.msra.gmra.mrb[72].mxu1 %vm305_vm1, %v2521_v51 }
 0x300   : > { %4932 = vmatpush3.bf16.xpose.msra.mxu1 %v2632_v30  ;;  %4933 = vmatprep.mubr.msk.bf16.mxu1 %vm5394_vm0, %v7310_v22 }
 0x301   : > { %4943 = vmatprep.subr.bf16.mxu1 %v7310_v22  ;;  %v2833_v39 = vpop.permute.xlu1 %2832 }
 0x302   : > { %v2783_v38 = vpop.permute.xlu0 %2782 }
 0x303   : > { %4928 = vmatmul.mubr.msk.bf16.vlgmr.msra.gmra.mrb[76].mxu0 %vm305_vm1, %v2573_v54  ;;  %v2788_v18 = vsel %vm305_vm1, %v2783_v38, 0 }
 0x304   : > { %4938 = vmatpush3.bf16.xpose.msra.mxu0 %v2684_v29  ;;  %4939 = vmatprep.mubr.msk.bf16.mxu0 %vm5394_vm0, %v7310_v22 }
 0x305   : > { %4949 = vmatprep.subr.bf16.mxu0 %v7310_v22  ;;  %v2939_v17 = vpop.permute.xlu1 %2938 }
 0x306   : > { %v2781_v42 = vpop.permute.xlu0 %2780  ;;  %v2944_v20 = vsel %vm305_vm1, %v2939_v17, 0 }
 0x307   : > { %4934 = vmatmul.mubr.msk.bf16.vlgmr.msra.gmra.mrb[76].mxu1 %vm305_vm1, %v2625_v15 }
 0x308   : > { %4944 = vmatpush3.bf16.xpose.msra.mxu1 %v2736_v36  ;;  %4945 = vmatprep.mubr.msk.bf16.mxu1 %vm5394_vm0, %v7310_v22 }
 0x309   : > { %4955 = vmatprep.subr.bf16.mxu1 %v7310_v22  ;;  %v2937_v10 = vpop.permute.xlu1 %2936 }
 0x30a   : > { %v2887_v7 = vpop.permute.xlu0 %2886 }
 0x30b   : > { %4940 = vmatmul.mubr.msk.bf16.vlgmr.msra.gmra.mrb[80].mxu0 %vm305_vm1, %v2677_v52  ;;  %v2892_v14 = vsel %vm305_vm1, %v2887_v7, 0 }
 0x30c   : > { %4950 = vmatpush3.bf16.xpose.msra.mxu0 %v2788_v18  ;;  %4951 = vmatprep.mubr.msk.bf16.mxu0 %vm5394_vm0, %v7310_v22 }
 0x30d   : > { %4961 = vmatprep.subr.bf16.mxu0 %v7310_v22  ;;  %v3043_v41 = vpop.permute.xlu1 %3042 }
 0x30e   : > { %v2885_v4 = vpop.permute.xlu0 %2884  ;;  %v3048_v57 = vsel %vm305_vm1, %v3043_v41, 0 }
 0x30f   : > { %4946 = vmatmul.mubr.msk.bf16.vlgmr.msra.gmra.mrb[80].mxu1 %vm305_vm1, %v2729_v61 }
 0x310   : > { %4956 = vmatpush3.bf16.xpose.msra.mxu1 %v2840_v21  ;;  %4957 = vmatprep.mubr.msk.bf16.mxu1 %vm5394_vm0, %v7310_v22 }
 0x311   : > { %4967 = vmatprep.subr.bf16.mxu1 %v7310_v22  ;;  %v3041_v27 = vpop.permute.xlu1 %3040 }
 0x312   : > { %v2991_v23 = vpop.permute.xlu0 %2990 }
 0x313   : > { %4952 = vmatmul.mubr.msk.bf16.vlgmr.msra.gmra.mrb[84].mxu0 %vm305_vm1, %v2781_v42  ;;  %v2996_v35 = vsel %vm305_vm1, %v2991_v23, 0 }
 0x314   : > { %4962 = vmatpush3.bf16.xpose.msra.mxu0 %v2892_v14  ;;  %4963 = vmatprep.mubr.msk.bf16.mxu0 %vm5394_vm0, %v7310_v22 }
 0x315   : > { %4973 = vmatprep.subr.bf16.mxu0 %v7310_v22  ;;  %v3492_v19 = vpop.permute.xlu1 %3491 }
 0x316   : > { %v2989_v63 = vpop.permute.xlu0 %2988 }
 0x317   : > { %4958 = vmatmul.mubr.msk.bf16.vlgmr.msra.gmra.mrb[84].mxu1 %vm305_vm1, %v2833_v39 }
 0x318   : > { %4968 = vmatpush3.bf16.xpose.msra.mxu1 %v2944_v20  ;;  %4969 = vmatprep.mubr.msk.bf16.mxu1 %vm5394_vm0, %v7310_v22 }
 0x319   : > { %4979 = vmatprep.subr.bf16.mxu1 %v7310_v22 }
 0x31a   : > { %v3539_v1 = vpop.permute.xlu0 %3538 }
 0x31b   : > { %4964 = vmatmul.mubr.msk.bf16.vlgmr.msra.gmra.mrb[88].mxu0 %vm305_vm1, %v2885_v4 }
 0x31c   : > { %4974 = vmatpush3.bf16.xpose.msra.mxu0 %v2996_v35  ;;  %4975 = vmatprep.mubr.msk.bf16.mxu0 %vm5394_vm0, %v7310_v22 }
 0x31d   : > { %4985 = vmatprep.subr.bf16.mxu0 %v7310_v22 }
 0x31f   : > { %4970 = vmatmul.mubr.msk.bf16.vlgmr.msra.gmra.mrb[88].mxu1 %vm305_vm1, %v2937_v10 }
 0x320   : > { %4980 = vmatpush3.bf16.xpose.msra.mxu1 %v3048_v57  ;;  %4981 = vmatprep.mubr.msk.bf16.mxu1 %vm5394_vm0, %v7310_v22 }
 0x321   : > { %4991 = vmatprep.subr.bf16.mxu1 %v7310_v22 }
 0x323   : > { %4976 = vmatmul.mubr.msk.bf16.vlgmr.msra.gmra.mrb[92].mxu0 %vm305_vm1, %v2989_v63 }
 0x324   : > { %4987 = vmatprep.mubr.msk.bf16.mxu0 %vm5394_vm0, %v7310_v22  ;;  %4986 = vmatpush3.bf16.msra.mxu0 %v3492_v19 }
 0x325   : > { %4997 = vmatprep.subr.bf16.mxu0 %v7310_v22 }
 0x327   : > { %4982 = vmatmul.mubr.msk.bf16.vlgmr.msra.gmra.mrb[92].mxu1 %vm305_vm1, %v3041_v27 }
 0x328   : > { %4993 = vmatprep.mubr.msk.bf16.mxu1 %vm5394_vm0, %v7310_v22  ;;  %4992 = vmatpush3.bf16.msra.mxu1 %v3539_v1 }
 0x329   : > { %5003 = vmatprep.subr.bf16.mxu1 %v7310_v22 }
 0x379   : > { %v6448_v25 = vpop.f32.mrb[32].mxu0 }
 0x37a   : > { %v4797_v58 = vpop.f32.mrb[33].mxu0 }
 0x37b   : > { %v6450_v48 = vpop.f32.mrb[34].mxu0 }
 0x37c   : > { %v4798_v62 = vpop.f32.mrb[35].mxu0 }
 0x37f   : > { %v6452_v53 = vpop.f32.mrb[32].mxu1 }
 0x380   : > { %v4803_v9 = vpop.f32.mrb[33].mxu1 }
 0x381   : > { %v6455_v49 = vpop.f32.mrb[34].mxu1 }
 0x382   : > { %v4804_v59 = vpop.f32.mrb[35].mxu1 }
 0x385   : > { %v6457_v16 = vpop.f32.mrb[36].mxu0 }
 0x386   : > { %v4809_v32 = vpop.f32.mrb[37].mxu0 }
 0x387   : > { %v6460_v31 = vpop.f32.mrb[38].mxu0 }
 0x388   : > { %7322 = vst [vmem:[#allocation11_spill] sm:$0xff] %v6460_v31  ;;  %v4810_v2 = vpop.f32.mrb[39].mxu0 }
 0x389   : > { %v6462_v37 = vpop.f32.mrb[36].mxu1  ;;  %v6517_v2 = vld [vmem:[%s7243_s1 + $0x10] sm:$0xff] }
 0x38a   : > { %7323 = vst [vmem:[#allocation5_spill] sm:$0xff] %v6462_v37  ;;  %v4815_v6 = vpop.f32.mrb[37].mxu1 }
 0x38b   : > { %v6464_v60 = vpop.f32.mrb[38].mxu1 }
 0x38c   : > { %7324 = vst [vmem:[#allocation4_spill] sm:$0xff] %v6464_v60  ;;  %v4816_v3 = vpop.f32.mrb[39].mxu1 }
 0x38d   : > { %v6466_v50 = vpop.f32.mrb[40].mxu0  ;;  %v6522_v3 = vld [vmem:[%s7243_s1 + $0x18] sm:$0xff] }
 0x38e   : > { %7325 = vst [vmem:[#allocation2_spill] sm:$0xff] %v6466_v50  ;;  %v4821_v55 = vpop.f32.mrb[41].mxu0 }
 0x38f   : > { %v6468_v24 = vpop.f32.mrb[42].mxu0 }
 0x390   : > { %7326 = vst [vmem:[#allocation13_spill] sm:$0xff] %v6468_v24  ;;  %v4822_v13 = vpop.f32.mrb[43].mxu0 }
 0x391   : > { %v6470_v0 = vpop.f32.mrb[40].mxu1 }
 0x392   : > { %7327 = vst [vmem:[#allocation10_spill] sm:$0xff] %v6470_v0  ;;  %v4827_v11 = vpop.f32.mrb[41].mxu1 }
 0x393   : > { %v6472_v51 = vpop.f32.mrb[42].mxu1 }
 0x394   : > { %7328 = vst [vmem:[#allocation7_spill] sm:$0xff] %v6472_v51  ;;  %v4828_v8 = vpop.f32.mrb[43].mxu1 }
 0x395   : > { %v6474_v33 = vpop.f32.mrb[44].mxu0  ;;  %v5353_v8 = vld [vmem:[%s7244_s2] sm:$0xff] }
 0x396   : > { %7329 = vst [vmem:[#allocation3_spill] sm:$0xff] %v6474_v33  ;;  %v4833_v26 = vpop.f32.mrb[45].mxu0 }
 0x397   : > { %v6476_v45 = vpop.f32.mrb[46].mxu0 }
 0x398   : > { %7330 = vst [vmem:[#allocation15_spill] sm:$0xff] %v6476_v45  ;;  %v4834_v12 = vpop.f32.mrb[47].mxu0 }
 0x399   : > { %v6478_v15 = vpop.f32.mrb[44].mxu1 }
 0x39a   : > { %7331 = vst [vmem:[#allocation12_spill] sm:$0xff] %v6478_v15  ;;  %v4839_v44 = vpop.f32.mrb[45].mxu1 }
 0x39b   : > { %v6480_v54 = vpop.f32.mrb[46].mxu1 }
 0x39c   : > { %7332 = vst [vmem:[#allocation9_spill] sm:$0xff] %v6480_v54  ;;  %v4840_v34 = vpop.f32.mrb[47].mxu1 }
 0x39d   : > { %v6482_v46 = vpop.f32.mrb[48].mxu0 }
 0x39e   : > { %7333 = vst [vmem:[#allocation6_spill] sm:$0xff] %v6482_v46  ;;  %v4845_v56 = vpop.f32.mrb[49].mxu0 }
 0x39f   : > { %v6484_v61 = vpop.f32.mrb[50].mxu0  ;;  %v5354_v56 = vld [vmem:[%s7244_s2 + $0x8] sm:$0xff] }
 0x3a0   : > { %7334 = vst [vmem:[#allocation14_spill] sm:$0xff] %v6484_v61  ;;  %v4846_v30 = vpop.f32.mrb[51].mxu0 }
 0x3a1   : > { %v6486_v52 = vpop.f32.mrb[48].mxu1 }
 0x3a2   : > { %7335 = vst [vmem:[#allocation8_spill] sm:$0xff] %v6486_v52  ;;  %v4851_v29 = vpop.f32.mrb[49].mxu1 }
 0x3a3   : > { %v6488_v38 = vpop.f32.mrb[50].mxu1 }
 0x3a4   : > { %7336 = vst [vmem:[#allocation16_spill] sm:$0xff] %v6488_v38  ;;  %v4852_v43 = vpop.f32.mrb[51].mxu1 }
 0x3a5   : > { %v6490_v36 = vpop.f32.mrb[52].mxu0 }
 0x3a6   : > { %7337 = vst [vmem:[#allocation18_spill] sm:$0xff] %v6490_v36  ;;  %v4857_v42 = vpop.f32.mrb[53].mxu0 }
 0x3a7   : > { %v6492_v39 = vpop.f32.mrb[54].mxu0 }
 0x3a8   : > { %7338 = vst [vmem:[#allocation17_spill] sm:$0xff] %v6492_v39  ;;  %v4858_v18 = vpop.f32.mrb[55].mxu0 }
 0x3a9   : > { %v6494_v7 = vpop.f32.mrb[52].mxu1 }
 0x3aa   : > { %7339 = vst [vmem:[#allocation20_spill] sm:$0xff] %v6494_v7  ;;  %v4863_v21 = vpop.f32.mrb[53].mxu1 }
 0x3ab   : > { %v6496_v17 = vpop.f32.mrb[54].mxu1  ;;  %v5355_v21 = vld [vmem:[%s7244_s2 + $0x10] sm:$0xff] }
 0x3ac   : > { %7340 = vst [vmem:[#allocation19_spill] sm:$0xff] %v6496_v17  ;;  %v4864_v4 = vpop.f32.mrb[55].mxu1 }
 0x3ad   : > { %v6498_v14 = vpop.f32.mrb[56].mxu0 }
 0x3ae   : > { %7341 = vst [vmem:[#allocation22_spill] sm:$0xff] %v6498_v14  ;;  %v4869_v10 = vpop.f32.mrb[57].mxu0 }
 0x3af   : > { %v6500_v20 = vpop.f32.mrb[58].mxu0 }
 0x3b0   : > { %7342 = vst [vmem:[#allocation21_spill] sm:$0xff] %v6500_v20  ;;  %v4870_v23 = vpop.f32.mrb[59].mxu0 }
 0x3b1   : > { %v6502_v35 = vpop.f32.mrb[56].mxu1 }
 0x3b2   : > { %7343 = vst [vmem:[#allocation24_spill] sm:$0xff] %v6502_v35  ;;  %v4875_v41 = vpop.f32.mrb[57].mxu1 }
 0x3b3   : > { %v6504_v57 = vpop.f32.mrb[58].mxu1 }
 0x3b4   : > { %7344 = vst [vmem:[#allocation23_spill] sm:$0xff] %v6504_v57  ;;  %v4876_v63 = vpop.f32.mrb[59].mxu1 }
 0x3b5   : > { %v6506_v27 = vpop.f32.mrb[60].mxu0 }
 0x3b6   : > { %7345 = vst [vmem:[#allocation25_spill] sm:$0xff] %v6506_v27  ;;  %v4881_v58 = vpop.f32.mrb[61].mxu0 }
 0x3b7   : > { %v6508_v62 = vpop.f32.mrb[62].mxu0  ;;  %v5356_v58 = vld [vmem:[%s7244_s2 + $0x18] sm:$0xff] }
 0x3b8   : > { %7346 = vst [vmem:[#allocation26_spill] sm:$0xff] %v6508_v62  ;;  %v4882_v19 = vpop.f32.mrb[63].mxu0 }
 0x3b9   : > { %v6510_v9 = vpop.f32.mrb[60].mxu1 }
 0x3ba   : > { %7347 = vst [vmem:[#allocation27_spill] sm:$0xff] %v6510_v9  ;;  %v4887_v59 = vpop.f32.mrb[61].mxu1 }
 0x3bb   : > { %v6512_v1 = vpop.f32.mrb[62].mxu1 }
 0x3bc   : > { %7348 = vst [vmem:[#allocation28_spill] sm:$0xff] %v6512_v1  ;;  %v4888_v32 = vpop.f32.mrb[63].mxu1 }
 0x3be   : > { %v2304_v6 = vpop.f32.mrb[64].mxu0 }
 0x3bf   : > { %v2305_v55 = vadd.f32 %v6517_v2, %v2304_v6  ;;  %v4893_v13 = vpop.f32.mrb[65].mxu0 }
 0x3c0   : > { %v2307_v11 = vpop.f32.mrb[66].mxu0  ;;  %v5357_v13 = vld [vmem:[%s7244_s2 + $0x20] sm:$0xff] }
 0x3c1   : > { %v6528_v26 = vadd.f32 %v5353_v8, %v2305_v55  ;;  %v2308_v12 = vadd.f32 %v6522_v3, %v2307_v11  ;;  %v4894_v44 = vpop.f32.mrb[67].mxu0 }
 0x3c2   : > { %v2356_v34 = vpop.f32.mrb[64].mxu1 }
 0x3c3   : > { %v6534_v30 = vadd.f32 %v5354_v56, %v2308_v12  ;;  %v2357_v29 = vadd.f32 %v6517_v2, %v2356_v34  ;;  %v4899_v43 = vpop.f32.mrb[65].mxu1  ;;  %v3123_v42 = vsel %vm1135_vm2, %v6528_v26, -inf  ;;  %v5358_v34 = vld [vmem:[%s7244_s2 + $0x28] sm:$0xff] }
 0x3c4   : > { %v2359_v18 = vpop.f32.mrb[66].mxu1  ;;  %3124 = vmax.xlane.f32.xlu0 %v3123_v42 }
 0x3c5   : > { %v6542_v4 = vadd.f32 %v5355_v21, %v2357_v29  ;;  %v2360_v10 = vadd.f32 %v6522_v3, %v2359_v18  ;;  %v4900_v23 = vpop.f32.mrb[67].mxu1  ;;  %v3126_v41 = vsel %vm1135_vm2, %v6534_v30, -inf }
 0x3c6   : > { %3127 = vmax.xlane.f32.xlu1 %v3126_v41  ;;  %v2408_v63 = vpop.f32.mrb[68].mxu0 }
 0x3c7   : > { %v6550_v19 = vadd.f32 %v5356_v58, %v2360_v10  ;;  %v2409_v59 = vadd.f32 %v6517_v2, %v2408_v63  ;;  %v4905_v32 = vpop.f32.mrb[69].mxu0  ;;  %v3129_v6 = vsel %vm1135_vm2, %v6542_v4, -inf  ;;  %v5359_v10 = vld [vmem:[%s7244_s2 + $0x30] sm:$0xff] }
 0x3c8   : > { %3130 = vmax.xlane.f32.xlu0 %v3129_v6  ;;  %v2411_v55 = vpop.f32.mrb[70].mxu0 }
 0x3c9   : > { %v6558_v11 = vadd.f32 %v5357_v13, %v2409_v59  ;;  %v2412_v8 = vadd.f32 %v6522_v3, %v2411_v55  ;;  %v4906_v12 = vpop.f32.mrb[71].mxu0  ;;  %v3132_v42 = vsel %vm1135_vm2, %v6550_v19, -inf  ;;  %v5360_v59 = vld [vmem:[%s7244_s2 + $0x38] sm:$0xff] }
 0x3ca   : > { %v2460_v44 = vpop.f32.mrb[68].mxu1 }
 0x3cb   : > { %v6564_v56 = vadd.f32 %v5358_v34, %v2412_v8  ;;  %v2461_v29 = vadd.f32 %v6517_v2, %v2460_v44  ;;  %v4911_v43 = vpop.f32.mrb[69].mxu1  ;;  %v3135_v18 = vsel %vm1135_vm2, %v6558_v11, -inf  ;;  %v5361_v44 = vld [vmem:[%s7244_s2 + $0x40] sm:$0xff] }
 0x3cc   : > { %v2463_v21 = vpop.f32.mrb[70].mxu1  ;;  %3133 = vmax.xlane.f32.xlu0 %v3132_v42  ;;  %3136 = vmax.xlane.f32.xlu1 %v3135_v18  ;;  %v5362_v18 = vld [vmem:[%s7244_s2 + $0x48] sm:$0xff] }
 0x3cd   : > { %v6574_v23 = vadd.f32 %v5359_v10, %v2461_v29  ;;  %v2464_v41 = vadd.f32 %v6522_v3, %v2463_v21  ;;  %v4912_v63 = vpop.f32.mrb[71].mxu1  ;;  %v3138_v8 = vsel %vm1135_vm2, %v6564_v56, -inf }
 0x3ce   : > { %v2512_v58 = vpop.f32.mrb[72].mxu0 }
 0x3cf   : > { %v6580_v32 = vadd.f32 %v5360_v59, %v2464_v41  ;;  %v2513_v6 = vadd.f32 %v6517_v2, %v2512_v58  ;;  %v4917_v55 = vpop.f32.mrb[73].mxu0  ;;  %v3141_v13 = vsel %vm1135_vm2, %v6574_v23, -inf }
 0x3d0   : > { %3142 = vmax.xlane.f32.xlu1 %v3141_v13  ;;  %3139 = vmax.xlane.f32.xlu0 %v3138_v8  ;;  %v2515_v12 = vpop.f32.mrb[74].mxu0 }
 0x3d1   : > { %v6590_v34 = vadd.f32 %v5361_v44, %v2513_v6  ;;  %v2516_v29 = vadd.f32 %v6522_v3, %v2515_v12  ;;  %v4918_v43 = vpop.f32.mrb[75].mxu0  ;;  %v3144_v63 = vsel %vm1135_vm2, %v6580_v32, -inf  ;;  %v5363_v6 = vld [vmem:[%s7244_s2 + $0x50] sm:$0xff]  ;;  %v5364_v44 = vld [vmem:[%s7244_s2 + $0x58] sm:$0xff] }
 0x3d2   : > { %v2564_v42 = vpop.f32.mrb[72].mxu1 }
 0x3d3   : > { %v6596_v21 = vadd.f32 %v5362_v18, %v2516_v29  ;;  %v2565_v10 = vadd.f32 %v6517_v2, %v2564_v42  ;;  %v4923_v41 = vpop.f32.mrb[73].mxu1  ;;  %v3147_v58 = vsel %vm1135_vm2, %v6590_v34, -inf }
 0x3d4   : > { %v2567_v59 = vpop.f32.mrb[74].mxu1  ;;  %3145 = vmax.xlane.f32.xlu0 %v3144_v63  ;;  %3148 = vmax.xlane.f32.xlu1 %v3147_v58  ;;  %v5365_v63 = vld [vmem:[%s7244_s2 + $0x60] sm:$0xff] }
 0x3d5   : > { %v6606_v55 = vadd.f32 %v5363_v6, %v2565_v10  ;;  %v2568_v13 = vadd.f32 %v6522_v3, %v2567_v59  ;;  %v4924_v8 = vpop.f32.mrb[75].mxu1  ;;  %v3150_v10 = vsel %vm1135_vm2, %v6596_v21, -inf }
 0x3d6   : > { %v2616_v12 = vpop.f32.mrb[76].mxu0  ;;  %v5366_v8 = vld [vmem:[%s7244_s2 + $0x68] sm:$0xff] }
 0x3d7   : > { %v6612_v29 = vadd.f32 %v5364_v44, %v2568_v13  ;;  %v2617_v43 = vadd.f32 %v6517_v2, %v2616_v12  ;;  %v4929_v42 = vpop.f32.mrb[77].mxu0  ;;  %v3153_v18 = vsel %vm1135_vm2, %v6606_v55, -inf }
 0x3d8   : > { %3154 = vmax.xlane.f32.xlu1 %v3153_v18  ;;  %3151 = vmax.xlane.f32.xlu0 %v3150_v10  ;;  %v2619_v41 = vpop.f32.mrb[78].mxu0 }
 0x3d9   : > { %v6622_v58 = vadd.f32 %v5365_v63, %v2617_v43  ;;  %v2620_v59 = vadd.f32 %v6522_v3, %v2619_v41  ;;  %v4930_v6 = vpop.f32.mrb[79].mxu0  ;;  %v3156_v18 = vsel %vm1135_vm2, %v6612_v29, -inf  ;;  %v5367_v41 = vld [vmem:[%s7244_s2 + $0x70] sm:$0xff] }
 0x3da   : > { %v2668_v13 = vpop.f32.mrb[76].mxu1 }
 0x3db   : > { %v6628_v12 = vadd.f32 %v5366_v8, %v2620_v59  ;;  %v2669_v44 = vadd.f32 %v6517_v2, %v2668_v13  ;;  %v4935_v42 = vpop.f32.mrb[77].mxu1  ;;  %v3159_v43 = vsel %vm1135_vm2, %v6622_v58, -inf  ;;  %v5368_v8 = vld [vmem:[%s7244_s2 + $0x78] sm:$0xff] }
 0x3dc   : > { %v2671_v10 = vpop.f32.mrb[78].mxu1  ;;  %3157 = vmax.xlane.f32.xlu0 %v3156_v18  ;;  %3160 = vmax.xlane.f32.xlu1 %v3159_v43 }
 0x3dd   : > { %v6638_v63 = vadd.f32 %v5367_v41, %v2669_v44  ;;  %v2672_v59 = vadd.f32 %v6522_v3, %v2671_v10  ;;  %v4936_v6 = vpop.f32.mrb[79].mxu1  ;;  %v3162_v44 = vsel %vm1135_vm2, %v6628_v12, -inf  ;;  %v5369_v41 = vld [vmem:[%s7244_s2 + $0x80] sm:$0xff] }
 0x3de   : > { %v2720_v13 = vpop.f32.mrb[80].mxu0 }
 0x3df   : > { %v6644_v42 = vadd.f32 %v5368_v8, %v2672_v59  ;;  %v2721_v1 = vadd.f32 %v6517_v2, %v2720_v13  ;;  %v4941_v18 = vpop.f32.mrb[81].mxu0  ;;  %v3165_v43 = vsel %vm1135_vm2, %v6638_v63, -inf }
 0x3e0   : > { %3166 = vmax.xlane.f32.xlu1 %v3165_v43  ;;  %3163 = vmax.xlane.f32.xlu0 %v3162_v44  ;;  %v2723_v10 = vpop.f32.mrb[82].mxu0  ;;  %v5370_v18 = vld [vmem:[%s7244_s2 + $0x88] sm:$0xff] }
 0x3e1   : > { %v6654_v6 = vadd.f32 %v5369_v41, %v2721_v1  ;;  %v2724_v59 = vadd.f32 %v6522_v3, %v2723_v10  ;;  %v4942_v8 = vpop.f32.mrb[83].mxu0  ;;  %v3168_v62 = vsel %vm1135_vm2, %v6644_v42, -inf  ;;  %v5371_v10 = vld [vmem:[%s7244_s2 + $0x90] sm:$0xff] }
 0x3e2   : > { %v2772_v13 = vpop.f32.mrb[80].mxu1 }
 0x3e3   : > { %v6660_v9 = vadd.f32 %v5370_v18, %v2724_v59  ;;  %v2773_v43 = vadd.f32 %v6517_v2, %v2772_v13  ;;  %v4947_v44 = vpop.f32.mrb[81].mxu1  ;;  %v3171_v1 = vsel %vm1135_vm2, %v6654_v6, -inf }
 0x3e4   : > { %v2775_v41 = vpop.f32.mrb[82].mxu1  ;;  %3169 = vmax.xlane.f32.xlu0 %v3168_v62  ;;  %3172 = vmax.xlane.f32.xlu1 %v3171_v1  ;;  %v5372_v44 = vld [vmem:[%s7244_s2 + $0x98] sm:$0xff] }
 0x3e5   : > { %v6670_v8 = vadd.f32 %v5371_v10, %v2773_v43  ;;  %v2776_v59 = vadd.f32 %v6522_v3, %v2775_v41  ;;  %v4948_v18 = vpop.f32.mrb[83].mxu1  ;;  %v3174_v43 = vsel %vm1135_vm2, %v6660_v9, -inf  ;;  %v5373_v10 = vld [vmem:[%s7244_s2 + $0xa0] sm:$0xff] }
 0x3e6   : > { %v2824_v13 = vpop.f32.mrb[84].mxu0 }
 0x3e7   : > { %v6676_v27 = vadd.f32 %v5372_v44, %v2776_v59  ;;  %v2825_v57 = vadd.f32 %v6517_v2, %v2824_v13  ;;  %v4953_v62 = vpop.f32.mrb[85].mxu0  ;;  %v3177_v1 = vsel %vm1135_vm2, %v6670_v8, -inf }
 0x3e8   : > { %3178 = vmax.xlane.f32.xlu1 %v3177_v1  ;;  %3175 = vmax.xlane.f32.xlu0 %v3174_v43  ;;  %v2827_v41 = vpop.f32.mrb[86].mxu0  ;;  %v5374_v62 = vld [vmem:[%s7244_s2 + $0xa8] sm:$0xff] }
 0x3e9   : > { %v6686_v18 = vadd.f32 %v5373_v10, %v2825_v57  ;;  %v2828_v59 = vadd.f32 %v6522_v3, %v2827_v41  ;;  %v4954_v44 = vpop.f32.mrb[87].mxu0  ;;  %v3180_v20 = vsel %vm1135_vm2, %v6676_v27, -inf  ;;  %v5375_v41 = vld [vmem:[%s7244_s2 + $0xb0] sm:$0xff] }
 0x3ea   : > { %v2876_v13 = vpop.f32.mrb[84].mxu1 }
 0x3eb   : > { %v6692_v35 = vadd.f32 %v5374_v62, %v2828_v59  ;;  %v2877_v1 = vadd.f32 %v6517_v2, %v2876_v13  ;;  %v4959_v43 = vpop.f32.mrb[85].mxu1  ;;  %v3183_v57 = vsel %vm1135_vm2, %v6686_v18, -inf }
 0x3ec   : > { %v2879_v10 = vpop.f32.mrb[86].mxu1  ;;  %3181 = vmax.xlane.f32.xlu0 %v3180_v20  ;;  %3184 = vmax.xlane.f32.xlu1 %v3183_v57  ;;  %v5376_v43 = vld [vmem:[%s7244_s2 + $0xb8] sm:$0xff] }
 0x3ed   : > { %v6702_v44 = vadd.f32 %v5375_v41, %v2877_v1  ;;  %v2880_v59 = vadd.f32 %v6522_v3, %v2879_v10  ;;  %v4960_v62 = vpop.f32.mrb[87].mxu1  ;;  %v3186_v1 = vsel %vm1135_vm2, %v6692_v35, -inf  ;;  %v5377_v41 = vld [vmem:[%s7244_s2 + $0xc0] sm:$0xff] }
 0x3ee   : > { %v2928_v13 = vpop.f32.mrb[88].mxu0 }
 0x3ef   : > { %v6708_v14 = vadd.f32 %v5376_v43, %v2880_v59  ;;  %v2929_v17 = vadd.f32 %v6517_v2, %v2928_v13  ;;  %v4965_v20 = vpop.f32.mrb[89].mxu0  ;;  %v3189_v57 = vsel %vm1135_vm2, %v6702_v44, -inf }
 0x3f0   : > { %3190 = vmax.xlane.f32.xlu1 %v3189_v57  ;;  %3187 = vmax.xlane.f32.xlu0 %v3186_v1  ;;  %v2931_v10 = vpop.f32.mrb[90].mxu0  ;;  %v5378_v20 = vld [vmem:[%s7244_s2 + $0xc8] sm:$0xff] }
 0x3f1   : > { %v6718_v62 = vadd.f32 %v5377_v41, %v2929_v17  ;;  %v2932_v59 = vadd.f32 %v6522_v3, %v2931_v10  ;;  %v4966_v43 = vpop.f32.mrb[91].mxu0  ;;  %v3192_v39 = vsel %vm1135_vm2, %v6708_v14, -inf  ;;  %v5379_v10 = vld [vmem:[%s7244_s2 + $0xd0] sm:$0xff] }
 0x3f2   : > { %v2980_v13 = vpop.f32.mrb[88].mxu1 }
 0x3f3   : > { %v6724_v7 = vadd.f32 %v5378_v20, %v2932_v59  ;;  %v2981_v57 = vadd.f32 %v6517_v2, %v2980_v13  ;;  %v4971_v1 = vpop.f32.mrb[89].mxu1  ;;  %v3195_v17 = vsel %vm1135_vm2, %v6718_v62, -inf }
 0x3f4   : > { %v2983_v41 = vpop.f32.mrb[90].mxu1  ;;  %3193 = vmax.xlane.f32.xlu0 %v3192_v39  ;;  %3196 = vmax.xlane.f32.xlu1 %v3195_v17  ;;  %v5380_v1 = vld [vmem:[%s7244_s2 + $0xd8] sm:$0xff] }
 0x3f5   : > { %v6734_v43 = vadd.f32 %v5379_v10, %v2981_v57  ;;  %v2984_v59 = vadd.f32 %v6522_v3, %v2983_v41  ;;  %v4972_v20 = vpop.f32.mrb[91].mxu1  ;;  %v3198_v57 = vsel %vm1135_vm2, %v6724_v7, -inf  ;;  %v5381_v10 = vld [vmem:[%s7244_s2 + $0xe0] sm:$0xff] }
 0x3f6   : > { %v3032_v13 = vpop.f32.mrb[92].mxu0 }
 0x3f7   : > { %v6740_v36 = vadd.f32 %v5380_v1, %v2984_v59  ;;  %v3033_v38 = vadd.f32 %v6517_v2, %v3032_v13  ;;  %v4977_v39 = vpop.f32.mrb[93].mxu0  ;;  %v3201_v17 = vsel %vm1135_vm2, %v6734_v43, -inf }
 0x3f8   : > { %3202 = vmax.xlane.f32.xlu1 %v3201_v17  ;;  %3199 = vmax.xlane.f32.xlu0 %v3198_v57  ;;  %v3035_v41 = vpop.f32.mrb[94].mxu0  ;;  %v5382_v39 = vld [vmem:[%s7244_s2 + $0xe8] sm:$0xff] }
 0x3f9   : > { %v6750_v20 = vadd.f32 %v5381_v10, %v3033_v38  ;;  %v3036_v59 = vadd.f32 %v6522_v3, %v3035_v41  ;;  %v4978_v1 = vpop.f32.mrb[95].mxu0  ;;  %v3204_v61 = vsel %vm1135_vm2, %v6740_v36, -inf  ;;  %v5383_v41 = vld [vmem:[%s7244_s2 + $0xf0] sm:$0xff] }
 0x3fa   : > { %v3084_v13 = vpop.f32.mrb[92].mxu1 }
 0x3fb   : > { %v6756_v52 = vadd.f32 %v5382_v39, %v3036_v59  ;;  %v3085_v17 = vadd.f32 %v6517_v2, %v3084_v13  ;;  %v4983_v57 = vpop.f32.mrb[93].mxu1  ;;  %v3207_v38 = vsel %vm1135_vm2, %v6750_v20, -inf  ;;  %v5384_v2 = vld [vmem:[%s7244_s2 + $0xf8] sm:$0xff] }
 0x3fc   : > { %v3087_v10 = vpop.f32.mrb[94].mxu1  ;;  %3205 = vmax.xlane.f32.xlu0 %v3204_v61  ;;  %3208 = vmax.xlane.f32.xlu1 %v3207_v38 }
 0x3fd   : > { %v6766_v1 = vadd.f32 %v5383_v41, %v3085_v17  ;;  %v3088_v59 = vadd.f32 %v6522_v3, %v3087_v10  ;;  %v4984_v39 = vpop.f32.mrb[95].mxu1  ;;  %v3210_v61 = vsel %vm1135_vm2, %v6756_v52, -inf  ;;  %v6784_v3 = vpop.permute.xlu1 %3585 }
 0x3fe   : > { %v6788_v10 = vpop.permute.xlu0 %3632 }
 0x3ff   : > { %v6772_v13 = vadd.f32 %v5384_v2, %v3088_v59  ;;  %v3213_v57 = vsel %vm1135_vm2, %v6766_v1, -inf }
 0x400   : > { %3214 = vmax.xlane.f32.xlu1 %v3213_v57  ;;  %3211 = vmax.xlane.f32.xlu0 %v3210_v61 }
 0x401   : > { %v3216_v17 = vsel %vm1135_vm2, %v6772_v13, -inf  ;;  %v6786_v38 = vpop.permute.xlu1 %3679 }
 0x402   : > { %v6792_v59 = vpop.permute.xlu0 %3726 }
 0x404   : > { %3217 = vmax.xlane.f32.xlu0 %v3216_v17 }
 0x405   : > { %v6790_v41 = vpop.permute.xlu1 %3773 }
 0x406   : > { %v6796_v2 = vpop.permute.xlu0 %3820 }
 0x409   : > { %v6794_v39 = vpop.permute.xlu1 %3867 }
 0x40d   : > { %v6798_v57 = vpop.permute.xlu1 %3961 }
 0x411   : > { %4102 = vrot.lane.b32.xlu1 %v7299_v47, %s5399_s20  ;;  %v6800_v47 = vpop.permute.xlu0 %3914  ;;  %v6802_v61 = vpop.permute.xlu1 %4008 }
 0x41a   : > { %4055 = vrot.lane.b32.xlu0 %v7304_v28, %s5399_s20 }
 0x451   : > { %v3125_v28 = vpop.xlane.xlu0 %3124 }
 0x452   : > { %v3219_v17 = vsub.f32 %v6528_v26, %v3125_v28 }
 0x453   : > { %v3128_v46 = vpop.xlane.xlu1 %3127 }
 0x454   : > { %v3251_v54 = vmul.f32 1.442695, %v3219_v17  ;;  %v3220_v15 = vsub.f32 %v6534_v30, %v3128_v46 }
 0x455   : > { %v3131_v45 = vpop.xlane.xlu0 %3130 }
 0x456   : > { %5225 = vpow2.f32 %v3251_v54  ;;  %v3253_v33 = vmul.f32 1.442695, %v3220_v15  ;;  %v3221_v51 = vsub.f32 %v6542_v4, %v3131_v45 }
 0x458   : > { %5227 = vpow2.f32 %v3253_v33  ;;  %v3255_v0 = vmul.f32 1.442695, %v3221_v51 }
 0x459   : > { %v3134_v24 = vpop.xlane.xlu0 %3133  ;;  %v3137_v50 = vpop.xlane.xlu1 %3136 }
 0x45a   : > { %5229 = vpow2.f32 %v3255_v0  ;;  %v3222_v60 = vsub.f32 %v6550_v19, %v3134_v24  ;;  %v3223_v37 = vsub.f32 %v6558_v11, %v3137_v50 }
 0x45c   : > { %v3257_v31 = vmul.f32 1.442695, %v3222_v60  ;;  %v3259_v26 = vmul.f32 1.442695, %v3223_v37 }
 0x45d   : > { %v3143_v28 = vpop.xlane.xlu1 %3142  ;;  %v3140_v17 = vpop.xlane.xlu0 %3139 }
 0x45e   : > { %5231 = vpow2.f32 %v3257_v31  ;;  %v3225_v46 = vsub.f32 %v6574_v23, %v3143_v28  ;;  %v3224_v15 = vsub.f32 %v6564_v56, %v3140_v17 }
 0x45f   : > { %5233 = vpow2.f32 %v3259_v26 }
 0x460   : > { %v6811_v45 = vpop.eup %5225  ;;  %v3263_v51 = vmul.f32 1.442695, %v3225_v46  ;;  %v3261_v33 = vmul.f32 1.442695, %v3224_v15 }
 0x461   : > { %v3146_v54 = vpop.xlane.xlu0 %3145  ;;  %v3149_v0 = vpop.xlane.xlu1 %3148  ;;  %v3315_v24 = vsel %vm1135_vm2, %v6811_v45, 0.0 }
 0x462   : > { %v6815_v50 = vpop.eup %5227  ;;  %5235 = vpow2.f32 %v3263_v51  ;;  %v3226_v37 = vsub.f32 %v6580_v32, %v3146_v54  ;;  %v3227_v31 = vsub.f32 %v6590_v34, %v3149_v0  ;;  %3316 = vadd.xlane.f32.xlu1 %v3315_v24 }
 0x463   : > { %5237 = vpow2.f32 %v3261_v33  ;;  %v3318_v60 = vsel %vm1135_vm2, %v6815_v50, 0.0 }
 0x464   : > { %v6821_v30 = vpop.eup %5229  ;;  %v3265_v4 = vmul.f32 1.442695, %v3226_v37  ;;  %v3267_v19 = vmul.f32 1.442695, %v3227_v31  ;;  %3319 = vadd.xlane.f32.xlu0 %v3318_v60 }
 0x465   : > { %v3155_v11 = vpop.xlane.xlu1 %3154  ;;  %v3152_v56 = vpop.xlane.xlu0 %3151  ;;  %v3321_v23 = vsel %vm1135_vm2, %v6821_v30, 0.0 }
 0x466   : > { %5239 = vpow2.f32 %v3265_v4  ;;  %v3229_v32 = vsub.f32 %v6606_v55, %v3155_v11  ;;  %v3228_v34 = vsub.f32 %v6596_v21, %v3152_v56  ;;  %3322 = vadd.xlane.f32.xlu1 %v3321_v23 }
 0x467   : > { %5241 = vpow2.f32 %v3267_v19 }
 0x468   : > { %v6827_v26 = vpop.eup %5231  ;;  %v3271_v28 = vmul.f32 1.442695, %v3229_v32  ;;  %v3269_v17 = vmul.f32 1.442695, %v3228_v34 }
 0x469   : > { %v6829_v46 = vpop.eup %5233  ;;  %v3158_v15 = vpop.xlane.xlu0 %3157  ;;  %v3324_v33 = vsel %vm1135_vm2, %v6827_v26, 0.0 }
 0x46a   : > { %v3161_v51 = vpop.xlane.xlu1 %3160  ;;  %5243 = vpow2.f32 %v3271_v28  ;;  %v3230_v54 = vsub.f32 %v6612_v29, %v3158_v15  ;;  %v3327_v21 = vsel %vm1135_vm2, %v6829_v46, 0.0  ;;  %3325 = vadd.xlane.f32.xlu0 %v3324_v33 }
 0x46b   : > { %v3231_v55 = vsub.f32 %v6622_v58, %v3161_v51  ;;  %5245 = vpow2.f32 %v3269_v17  ;;  %3328 = vadd.xlane.f32.xlu1 %v3327_v21 }
 0x46c   : > { %v6837_v0 = vpop.eup %5235  ;;  %v3273_v24 = vmul.f32 1.442695, %v3230_v54 }
 0x46d   : > { %v3275_v37 = vmul.f32 1.442695, %v3231_v55  ;;  %v6839_v31 = vpop.eup %5237  ;;  %v3164_v4 = vpop.xlane.xlu0 %3163  ;;  %v3333_v19 = vsel %vm1135_vm2, %v6837_v0, 0.0 }
 0x46e   : > { %v3167_v60 = vpop.xlane.xlu1 %3166  ;;  %5247 = vpow2.f32 %v3273_v24  ;;  %v3232_v58 = vsub.f32 %v6628_v12, %v3164_v4  ;;  %v3330_v11 = vsel %vm1135_vm2, %v6839_v31, 0.0 }
 0x46f   : > { %v3233_v29 = vsub.f32 %v6638_v63, %v3167_v60  ;;  %5249 = vpow2.f32 %v3275_v37  ;;  %3334 = vadd.xlane.f32.xlu1 %v3333_v19  ;;  %3331 = vadd.xlane.f32.xlu0 %v3330_v11 }
 0x470   : > { %v6847_v56 = vpop.eup %5239  ;;  %v3277_v32 = vmul.f32 1.442695, %v3232_v58 }
 0x471   : > { %v3279_v23 = vmul.f32 1.442695, %v3233_v29  ;;  %v6849_v34 = vpop.eup %5241  ;;  %v3170_v28 = vpop.xlane.xlu0 %3169  ;;  %v3336_v15 = vsel %vm1135_vm2, %v6847_v56, 0.0 }
 0x472   : > { %v3173_v17 = vpop.xlane.xlu1 %3172  ;;  %v3234_v12 = vsub.f32 %v6644_v42, %v3170_v28  ;;  %v3339_v51 = vsel %vm1135_vm2, %v6849_v34, 0.0 }
 0x473   : > { %5251 = vpow2.f32 %v3279_v23  ;;  %v3235_v63 = vsub.f32 %v6654_v6, %v3173_v17  ;;  %3340 = vadd.xlane.f32.xlu1 %v3339_v51  ;;  %3337 = vadd.xlane.f32.xlu0 %v3336_v15 }
 0x474   : > { %5253 = vpow2.f32 %v3277_v32  ;;  %v6857_v33 = vpop.eup %5243  ;;  %v3281_v54 = vmul.f32 1.442695, %v3234_v12 }
 0x475   : > { %v3283_v55 = vmul.f32 1.442695, %v3235_v63  ;;  %v6859_v21 = vpop.eup %5245  ;;  %v3176_v37 = vpop.xlane.xlu0 %3175  ;;  %v3345_v60 = vsel %vm1135_vm2, %v6857_v33, 0.0 }
 0x476   : > { %v3179_v24 = vpop.xlane.xlu1 %3178  ;;  %5255 = vpow2.f32 %v3281_v54  ;;  %v3236_v6 = vsub.f32 %v6660_v9, %v3176_v37  ;;  %v3342_v4 = vsel %vm1135_vm2, %v6859_v21, 0.0 }
 0x477   : > { %v3237_v42 = vsub.f32 %v6670_v8, %v3179_v24  ;;  %5257 = vpow2.f32 %v3283_v55  ;;  %3346 = vadd.xlane.f32.xlu1 %v3345_v60  ;;  %3343 = vadd.xlane.f32.xlu0 %v3342_v4 }
 0x478   : > { %v6867_v19 = vpop.eup %5247  ;;  %v3285_v58 = vmul.f32 1.442695, %v3236_v6 }
 0x479   : > { %v3287_v29 = vmul.f32 1.442695, %v3237_v42  ;;  %v6869_v11 = vpop.eup %5249  ;;  %v3182_v23 = vpop.xlane.xlu0 %3181  ;;  %v3348_v28 = vsel %vm1135_vm2, %v6867_v19, 0.0 }
 0x47a   : > { %v3185_v32 = vpop.xlane.xlu1 %3184  ;;  %v3238_v9 = vsub.f32 %v6676_v27, %v3182_v23  ;;  %v3351_v17 = vsel %vm1135_vm2, %v6869_v11, 0.0 }
 0x47b   : > { %5259 = vpow2.f32 %v3287_v29  ;;  %v3239_v8 = vsub.f32 %v6686_v18, %v3185_v32  ;;  %3352 = vadd.xlane.f32.xlu1 %v3351_v17  ;;  %3349 = vadd.xlane.f32.xlu0 %v3348_v28 }
 0x47c   : > { %5261 = vpow2.f32 %v3285_v58  ;;  %v3289_v12 = vmul.f32 1.442695, %v3238_v9 }
 0x47d   : > { %v6877_v15 = vpop.eup %5251  ;;  %v3291_v63 = vmul.f32 1.442695, %v3239_v8  ;;  %v3188_v55 = vpop.xlane.xlu0 %3187 }
 0x47e   : > { %v6879_v51 = vpop.eup %5253  ;;  %v3191_v54 = vpop.xlane.xlu1 %3190  ;;  %v3357_v24 = vsel %vm1135_vm2, %v6877_v15, 0.0  ;;  %5263 = vpow2.f32 %v3289_v12  ;;  %v3240_v18 = vsub.f32 %v6692_v35, %v3188_v55 }
 0x47f   : > { %v3241_v27 = vsub.f32 %v6702_v44, %v3191_v54  ;;  %v3354_v37 = vsel %vm1135_vm2, %v6879_v51, 0.0  ;;  %5265 = vpow2.f32 %v3291_v63  ;;  %3358 = vadd.xlane.f32.xlu1 %v3357_v24 }
 0x480   : > { %3355 = vadd.xlane.f32.xlu0 %v3354_v37  ;;  %v6887_v60 = vpop.eup %5255  ;;  %v3293_v6 = vmul.f32 1.442695, %v3240_v18 }
 0x481   : > { %v3295_v42 = vmul.f32 1.442695, %v3241_v27  ;;  %v6889_v4 = vpop.eup %5257  ;;  %v3194_v29 = vpop.xlane.xlu0 %3193  ;;  %v3360_v23 = vsel %vm1135_vm2, %v6887_v60, 0.0 }
 0x482   : > { %v3197_v58 = vpop.xlane.xlu1 %3196  ;;  %v3242_v35 = vsub.f32 %v6708_v14, %v3194_v29  ;;  %v3363_v32 = vsel %vm1135_vm2, %v6889_v4, 0.0 }
 0x483   : > { %5267 = vpow2.f32 %v3295_v42  ;;  %v3243_v44 = vsub.f32 %v6718_v62, %v3197_v58  ;;  %3364 = vadd.xlane.f32.xlu1 %v3363_v32 }
 0x484   : > { %5269 = vpow2.f32 %v3293_v6  ;;  %3361 = vadd.xlane.f32.xlu0 %v3360_v23  ;;  %v3297_v9 = vmul.f32 1.442695, %v3242_v35 }
 0x485   : > { %v6897_v28 = vpop.eup %5259  ;;  %v3299_v8 = vmul.f32 1.442695, %v3243_v44  ;;  %v3200_v63 = vpop.xlane.xlu0 %3199 }
 0x486   : > { %v6899_v17 = vpop.eup %5261  ;;  %v3203_v12 = vpop.xlane.xlu1 %3202  ;;  %v3369_v54 = vsel %vm1135_vm2, %v6897_v28, 0.0  ;;  %5271 = vpow2.f32 %v3297_v9  ;;  %v3244_v62 = vsub.f32 %v6724_v7, %v3200_v63 }
 0x487   : > { %v3245_v14 = vsub.f32 %v6734_v43, %v3203_v12  ;;  %v3366_v55 = vsel %vm1135_vm2, %v6899_v17, 0.0  ;;  %5273 = vpow2.f32 %v3299_v8  ;;  %3370 = vadd.xlane.f32.xlu1 %v3369_v54 }
 0x488   : > { %3367 = vadd.xlane.f32.xlu0 %v3366_v55  ;;  %v6907_v24 = vpop.eup %5263  ;;  %v3301_v18 = vmul.f32 1.442695, %v3244_v62 }
 0x489   : > { %v3303_v27 = vmul.f32 1.442695, %v3245_v14  ;;  %v6909_v37 = vpop.eup %5265  ;;  %v3206_v42 = vpop.xlane.xlu0 %3205  ;;  %v3372_v29 = vsel %vm1135_vm2, %v6907_v24, 0.0 }
 0x48a   : > { %v3209_v6 = vpop.xlane.xlu1 %3208  ;;  %v3246_v7 = vsub.f32 %v6740_v36, %v3206_v42  ;;  %v3375_v58 = vsel %vm1135_vm2, %v6909_v37, 0.0 }
 0x48b   : > { %5275 = vpow2.f32 %v3303_v27  ;;  %v3247_v43 = vsub.f32 %v6750_v20, %v3209_v6  ;;  %3376 = vadd.xlane.f32.xlu1 %v3375_v58 }
 0x48c   : > { %5277 = vpow2.f32 %v3301_v18  ;;  %3373 = vadd.xlane.f32.xlu0 %v3372_v29  ;;  %v3305_v35 = vmul.f32 1.442695, %v3246_v7 }
 0x48d   : > { %v6917_v23 = vpop.eup %5267  ;;  %v3307_v44 = vmul.f32 1.442695, %v3247_v43  ;;  %v3212_v8 = vpop.xlane.xlu0 %3211 }
 0x48e   : > { %v6919_v32 = vpop.eup %5269  ;;  %v3215_v9 = vpop.xlane.xlu1 %3214  ;;  %v3381_v12 = vsel %vm1135_vm2, %v6917_v23, 0.0  ;;  %5279 = vpow2.f32 %v3305_v35  ;;  %v3248_v20 = vsub.f32 %v6756_v52, %v3212_v8 }
 0x48f   : > { %v3249_v36 = vsub.f32 %v6766_v1, %v3215_v9  ;;  %v3378_v63 = vsel %vm1135_vm2, %v6919_v32, 0.0  ;;  %5281 = vpow2.f32 %v3307_v44  ;;  %3382 = vadd.xlane.f32.xlu1 %v3381_v12 }
 0x490   : > { %3379 = vadd.xlane.f32.xlu0 %v3378_v63  ;;  %v6927_v54 = vpop.eup %5271  ;;  %v3309_v62 = vmul.f32 1.442695, %v3248_v20 }
 0x491   : > { %v3311_v14 = vmul.f32 1.442695, %v3249_v36  ;;  %v6929_v55 = vpop.eup %5273  ;;  %v3218_v27 = vpop.xlane.xlu0 %3217  ;;  %v3384_v18 = vsel %vm1135_vm2, %v6927_v54, 0.0 }
 0x492   : > { %v3250_v1 = vsub.f32 %v6772_v13, %v3218_v27  ;;  %v3387_v52 = vsel %vm1135_vm2, %v6929_v55, 0.0 }
 0x493   : > { %5283 = vpow2.f32 %v3311_v14  ;;  %3388 = vadd.xlane.f32.xlu1 %v3387_v52  ;;  %v6968_v14 = vpop.permute.xlu1 %4102 }
 0x494   : > { %5285 = vpow2.f32 %v3309_v62  ;;  %3385 = vadd.xlane.f32.xlu0 %v3384_v18  ;;  %v3313_v6 = vmul.f32 1.442695, %v3250_v1 }
 0x495   : > { %v6936_v42 = vpop.eup %5275  ;;  %v6970_v62 = vpop.permute.xlu0 %4055 }
 0x496   : > { %v6938_v29 = vpop.eup %5277  ;;  %v3393_v7 = vsel %vm1135_vm2, %v6936_v42, 0.0  ;;  %5287 = vpow2.f32 %v3313_v6 }
 0x497   : > { %v3390_v43 = vsel %vm1135_vm2, %v6938_v29, 0.0  ;;  %3394 = vadd.xlane.f32.xlu1 %v3393_v7 }
 0x498   : > { %3391 = vadd.xlane.f32.xlu0 %v3390_v43  ;;  %v6944_v13 = vpop.eup %5279 }
 0x499   : > { %v6946_v58 = vpop.eup %5281  ;;  %v3396_v35 = vsel %vm1135_vm2, %v6944_v13, 0.0 }
 0x49a   : > { %v3399_v44 = vsel %vm1135_vm2, %v6946_v58, 0.0 }
 0x49b   : > { %3400 = vadd.xlane.f32.xlu1 %v3399_v44 }
 0x49c   : > { %3397 = vadd.xlane.f32.xlu0 %v3396_v35 }
 0x49d   : > { %v6952_v9 = vpop.eup %5283 }
 0x49e   : > { %v6954_v8 = vpop.eup %5285  ;;  %v3405_v12 = vsel %vm1135_vm2, %v6952_v9, 0.0 }
 0x49f   : > { %v3402_v36 = vsel %vm1135_vm2, %v6954_v8, 0.0  ;;  %3406 = vadd.xlane.f32.xlu1 %v3405_v12 }
 0x4a0   : > { %3403 = vadd.xlane.f32.xlu0 %v3402_v36  ;;  %v6960_v20 = vpop.eup %5287 }
 0x4a1   : > { %v3408_v63 = vsel %vm1135_vm2, %v6960_v20, 0.0 }
 0x4a4   : > { %3409 = vadd.xlane.f32.xlu0 %v3408_v63 }
 0x4b0   : > { %4196 = vrot.lane.b32.xlu1 %v7303_v40, %s5399_s20 }
 0x4ba   : > { %4149 = vrot.lane.b32.xlu0 %v7307_v5, %s5399_s20  ;;  %s5400_s20 = smov 8  }
 0x4ef   : > { %v3317_v27 = vpop.xlane.xlu1 %3316 }
 0x4f0   : > { %5289 = vrcp.f32 %v3317_v27 }
 0x4f1   : > { %v3320_v18 = vpop.xlane.xlu0 %3319 }
 0x4f2   : > { %5291 = vrcp.f32 %v3320_v18 }
 0x4f3   : > { %v3323_v1 = vpop.xlane.xlu1 %3322 }
 0x4f4   : > { %5293 = vrcp.f32 %v3323_v1 }
 0x4f7   : > { %v3326_v52 = vpop.xlane.xlu0 %3325 }
 0x4f8   : > { %v3329_v6 = vpop.xlane.xlu1 %3328  ;;  %5295 = vrcp.f32 %v3326_v52 }
 0x4f9   : > { %5297 = vrcp.f32 %v3329_v6 }
 0x4fa   : > { %v5290_v7 = vpop.eup %5289 }
 0x4fb   : > { %v3443_v5 = vmul.f32 %v5290_v7, %v6811_v45 }
 0x4fc   : > { %v5292_v43 = vpop.eup %5291  ;;  %v3335_v40 = vpop.xlane.xlu1 %3334 }
 0x4fd   : > { %v3332_v35 = vpop.xlane.xlu0 %3331  ;;  %v3444_v44 = vmul.f32 %v5292_v43, %v6815_v50 }
 0x4fe   : > { %5299 = vrcp.f32 %v3332_v35  ;;  %v5294_v36 = vpop.eup %5293 }
 0x4ff   : > { %v3475_v12 = vpack.c.bf16 %v3444_v44, %v3443_v5  ;;  %5301 = vrcp.f32 %v3335_v40  ;;  %v3445_v1 = vmul.f32 %v5294_v36, %v6821_v30 }
 0x500   : > { %v3341_v63 = vpop.xlane.xlu1 %3340 }
 0x501   : > { %v3338_v27 = vpop.xlane.xlu0 %3337  ;;  %4988 = vmatmul.mubr.msk.bf16.vlgmr.msra.gmra.mrb[96].mxu0 %vm1135_vm2, %v3475_v12 }
 0x502   : > { %v5296_v18 = vpop.eup %5295  ;;  %5303 = vrcp.f32 %v3338_v27  ;;  %4998 = vmatpush3.bf16.msra.mxu0 %v6784_v3  ;;  %4999 = vmatprep.mubr.msk.bf16.mxu0 %vm5394_vm0, %v7310_v22 }
 0x503   : > { %v3446_v45 = vmul.f32 %v5296_v18, %v6827_v26  ;;  %5009 = vmatprep.subr.bf16.mxu0 %v7310_v22  ;;  %5305 = vrcp.f32 %v3341_v63  ;;  %v5298_v7 = vpop.eup %5297 }
 0x504   : > { %v3347_v50 = vpop.xlane.xlu1 %3346  ;;  %v3447_v30 = vmul.f32 %v5298_v7, %v6829_v46 }
 0x505   : > { %v3344_v52 = vpop.xlane.xlu0 %3343  ;;  %v3476_v6 = vpack.c.bf16 %v3446_v45, %v3445_v1 }
 0x506   : > { %5307 = vrcp.f32 %v3344_v52 }
 0x507   : > { %4994 = vmatmul.mubr.msk.bf16.vlgmr.msra.gmra.mrb[96].mxu1 %vm1135_vm2, %v3476_v6  ;;  %5309 = vrcp.f32 %v3347_v50 }
 0x508   : > { %v5300_v43 = vpop.eup %5299  ;;  %v3353_v3 = vpop.xlane.xlu1 %3352  ;;  %5004 = vmatpush3.bf16.msra.mxu1 %v6788_v10  ;;  %5005 = vmatprep.mubr.msk.bf16.mxu1 %vm5394_vm0, %v7310_v22 }
 0x509   : > { %v3350_v40 = vpop.xlane.xlu0 %3349  ;;  %v3448_v26 = vmul.f32 %v5300_v43, %v6839_v31  ;;  %5015 = vmatprep.subr.bf16.mxu1 %v7310_v22  ;;  %v5302_v35 = vpop.eup %5301 }
 0x50a   : > { %5311 = vrcp.f32 %v3350_v40  ;;  %v3449_v63 = vmul.f32 %v5302_v35, %v6837_v0 }
 0x50b   : > { %v3477_v5 = vpack.c.bf16 %v3448_v26, %v3447_v30  ;;  %5313 = vrcp.f32 %v3353_v3 }
 0x50c   : > { %v5304_v44 = vpop.eup %5303  ;;  %v3359_v12 = vpop.xlane.xlu1 %3358 }
 0x50d   : > { %v3356_v36 = vpop.xlane.xlu0 %3355  ;;  %v3450_v10 = vmul.f32 %v5304_v44, %v6847_v56  ;;  %5000 = vmatmul.mubr.msk.bf16.vlgmr.msra.gmra.mrb[100].mxu0 %vm1135_vm2, %v3477_v5  ;;  %v5306_v27 = vpop.eup %5305 }
 0x50e   : > { %5010 = vmatpush3.bf16.msra.mxu0 %v6786_v38  ;;  %5315 = vrcp.f32 %v3356_v36  ;;  %5011 = vmatprep.mubr.msk.bf16.mxu0 %vm5394_vm0, %v7310_v22  ;;  %v3451_v0 = vmul.f32 %v5306_v27, %v6849_v34 }
 0x50f   : > { %v3478_v46 = vpack.c.bf16 %v3450_v10, %v3449_v63  ;;  %5021 = vmatprep.subr.bf16.mxu0 %v7310_v22  ;;  %5317 = vrcp.f32 %v3359_v12 }
 0x510   : > { %v5308_v31 = vpop.eup %5307  ;;  %v3365_v18 = vpop.xlane.xlu1 %3364 }
 0x511   : > { %v3362_v1 = vpop.xlane.xlu0 %3361  ;;  %v3452_v56 = vmul.f32 %v5308_v31, %v6859_v21  ;;  %5006 = vmatmul.mubr.msk.bf16.vlgmr.msra.gmra.mrb[100].mxu1 %vm1135_vm2, %v3478_v46  ;;  %v5310_v45 = vpop.eup %5309 }
 0x512   : > { %5016 = vmatpush3.bf16.msra.mxu1 %v6792_v59  ;;  %5319 = vrcp.f32 %v3362_v1  ;;  %5017 = vmatprep.mubr.msk.bf16.mxu1 %vm5394_vm0, %v7310_v22  ;;  %v3453_v34 = vmul.f32 %v5310_v45, %v6857_v33 }
 0x513   : > { %v3479_v38 = vpack.c.bf16 %v3452_v56, %v3451_v0  ;;  %5027 = vmatprep.subr.bf16.mxu1 %v7310_v22  ;;  %5321 = vrcp.f32 %v3365_v18 }
 0x514   : > { %v5312_v50 = vpop.eup %5311  ;;  %v3371_v52 = vpop.xlane.xlu1 %3370 }
 0x515   : > { %v3368_v6 = vpop.xlane.xlu0 %3367  ;;  %v3454_v21 = vmul.f32 %v5312_v50, %v6867_v19  ;;  %5012 = vmatmul.mubr.msk.bf16.vlgmr.msra.gmra.mrb[104].mxu0 %vm1135_vm2, %v3479_v38  ;;  %v5314_v7 = vpop.eup %5313 }
 0x516   : > { %5022 = vmatpush3.bf16.msra.mxu0 %v6790_v41  ;;  %5323 = vrcp.f32 %v3368_v6  ;;  %5023 = vmatprep.mubr.msk.bf16.mxu0 %vm5394_vm0, %v7310_v22  ;;  %v3455_v33 = vmul.f32 %v5314_v7, %v6869_v11 }
 0x517   : > { %v3480_v59 = vpack.c.bf16 %v3454_v21, %v3453_v34  ;;  %5033 = vmatprep.subr.bf16.mxu0 %v7310_v22  ;;  %5325 = vrcp.f32 %v3371_v52 }
 0x518   : > { %v5316_v43 = vpop.eup %5315  ;;  %v3377_v3 = vpop.xlane.xlu1 %3376 }
 0x519   : > { %v3374_v40 = vpop.xlane.xlu0 %3373  ;;  %v3456_v19 = vmul.f32 %v5316_v43, %v6879_v51  ;;  %5018 = vmatmul.mubr.msk.bf16.vlgmr.msra.gmra.mrb[104].mxu1 %vm1135_vm2, %v3480_v59  ;;  %v5318_v30 = vpop.eup %5317 }
 0x51a   : > { %5028 = vmatpush3.bf16.msra.mxu1 %v6796_v2  ;;  %5327 = vrcp.f32 %v3374_v40  ;;  %5029 = vmatprep.mubr.msk.bf16.mxu1 %vm5394_vm0, %v7310_v22  ;;  %v3457_v11 = vmul.f32 %v5318_v30, %v6877_v15 }
 0x51b   : > { %v3481_v41 = vpack.c.bf16 %v3456_v19, %v3455_v33  ;;  %5039 = vmatprep.subr.bf16.mxu1 %v7310_v22  ;;  %5329 = vrcp.f32 %v3377_v3 }
 0x51c   : > { %v5320_v26 = vpop.eup %5319  ;;  %v3383_v35 = vpop.xlane.xlu1 %3382 }
 0x51d   : > { %v3380_v5 = vpop.xlane.xlu0 %3379  ;;  %v3458_v51 = vmul.f32 %v5320_v26, %v6887_v60  ;;  %5024 = vmatmul.mubr.msk.bf16.vlgmr.msra.gmra.mrb[108].mxu0 %vm1135_vm2, %v3481_v41  ;;  %v5322_v44 = vpop.eup %5321 }
 0x51e   : > { %5034 = vmatpush3.bf16.msra.mxu0 %v6794_v39  ;;  %5331 = vrcp.f32 %v3380_v5  ;;  %5035 = vmatprep.mubr.msk.bf16.mxu0 %vm5394_vm0, %v7310_v22  ;;  %v3459_v15 = vmul.f32 %v5322_v44, %v6889_v4 }
 0x51f   : > { %v3482_v2 = vpack.c.bf16 %v3458_v51, %v3457_v11  ;;  %5045 = vmatprep.subr.bf16.mxu0 %v7310_v22  ;;  %5333 = vrcp.f32 %v3383_v35 }
 0x520   : > { %v5324_v12 = vpop.eup %5323  ;;  %v3389_v36 = vpop.xlane.xlu1 %3388 }
 0x521   : > { %v3386_v63 = vpop.xlane.xlu0 %3385  ;;  %v3460_v60 = vmul.f32 %v5324_v12, %v6899_v17  ;;  %5030 = vmatmul.mubr.msk.bf16.vlgmr.msra.gmra.mrb[108].mxu1 %vm1135_vm2, %v3482_v2  ;;  %v5326_v10 = vpop.eup %5325 }
 0x522   : > { %5040 = vmatpush3.bf16.msra.mxu1 %v6800_v47  ;;  %5335 = vrcp.f32 %v3386_v63  ;;  %5041 = vmatprep.mubr.msk.bf16.mxu1 %vm5394_vm0, %v7310_v22  ;;  %v3461_v4 = vmul.f32 %v5326_v10, %v6897_v28 }
 0x523   : > { %v3483_v39 = vpack.c.bf16 %v3460_v60, %v3459_v15  ;;  %5051 = vmatprep.subr.bf16.mxu1 %v7310_v22  ;;  %5337 = vrcp.f32 %v3389_v36 }
 0x524   : > { %v5328_v27 = vpop.eup %5327  ;;  %v3395_v46 = vpop.xlane.xlu1 %3394 }
 0x525   : > { %v3392_v31 = vpop.xlane.xlu0 %3391  ;;  %v3462_v17 = vmul.f32 %v5328_v27, %v6907_v24  ;;  %5036 = vmatmul.mubr.msk.bf16.vlgmr.msra.gmra.mrb[112].mxu0 %vm1135_vm2, %v3483_v39  ;;  %v5330_v18 = vpop.eup %5329 }
 0x526   : > { %5046 = vmatpush3.bf16.msra.mxu0 %v6798_v57  ;;  %5339 = vrcp.f32 %v3392_v31  ;;  %5047 = vmatprep.mubr.msk.bf16.mxu0 %vm5394_vm0, %v7310_v22  ;;  %v3463_v28 = vmul.f32 %v5330_v18, %v6909_v37 }
 0x527   : > { %v3484_v47 = vpack.c.bf16 %v3462_v17, %v3461_v4  ;;  %5057 = vmatprep.subr.bf16.mxu0 %v7310_v22  ;;  %5341 = vrcp.f32 %v3395_v46 }
 0x528   : > { %v5332_v1 = vpop.eup %5331  ;;  %v3401_v0 = vpop.xlane.xlu1 %3400 }
 0x529   : > { %v3398_v56 = vpop.xlane.xlu0 %3397  ;;  %v3464_v24 = vmul.f32 %v5332_v1, %v6919_v32  ;;  %5042 = vmatmul.mubr.msk.bf16.vlgmr.msra.gmra.mrb[112].mxu1 %vm1135_vm2, %v3484_v47  ;;  %v5334_v45 = vpop.eup %5333 }
 0x52a   : > { %5052 = vmatpush3.bf16.msra.mxu1 %v6802_v61  ;;  %5343 = vrcp.f32 %v3398_v56  ;;  %5053 = vmatprep.mubr.msk.bf16.mxu1 %vm5394_vm0, %v7310_v22  ;;  %v3465_v37 = vmul.f32 %v5334_v45, %v6917_v23 }
 0x52b   : > { %v3485_v57 = vpack.c.bf16 %v3464_v24, %v3463_v28  ;;  %5063 = vmatprep.subr.bf16.mxu1 %v7310_v22  ;;  %5345 = vrcp.f32 %v3401_v0 }
 0x52c   : > { %v5336_v38 = vpop.eup %5335  ;;  %v3407_v50 = vpop.xlane.xlu1 %3406 }
 0x52d   : > { %v3404_v52 = vpop.xlane.xlu0 %3403  ;;  %v3466_v32 = vmul.f32 %v5336_v38, %v6927_v54  ;;  %5048 = vmatmul.mubr.msk.bf16.vlgmr.msra.gmra.mrb[116].mxu0 %vm1135_vm2, %v3485_v57  ;;  %v5338_v6 = vpop.eup %5337 }
 0x52e   : > { %5058 = vmatpush3.bf16.msra.mxu0 %v6970_v62  ;;  %5347 = vrcp.f32 %v3404_v52  ;;  %5059 = vmatprep.mubr.msk.bf16.mxu0 %vm5394_vm0, %v7310_v22  ;;  %v3467_v7 = vmul.f32 %v5338_v6, %v6929_v55 }
 0x52f   : > { %5349 = vrcp.f32 %v3407_v50  ;;  %v3486_v61 = vpack.c.bf16 %v3466_v32, %v3465_v37  ;;  %5069 = vmatprep.subr.bf16.mxu0 %v7310_v22 }
 0x530   : > { %v5340_v34 = vpop.eup %5339 }
 0x531   : > { %v3410_v21 = vpop.xlane.xlu0 %3409  ;;  %v3468_v23 = vmul.f32 %v5340_v34, %v6938_v29  ;;  %5054 = vmatmul.mubr.msk.bf16.vlgmr.msra.gmra.mrb[116].mxu1 %vm1135_vm2, %v3486_v61  ;;  %v5342_v54 = vpop.eup %5341 }
 0x532   : > { %5351 = vrcp.f32 %v3410_v21  ;;  %5064 = vmatpush3.bf16.msra.mxu1 %v6968_v14  ;;  %5065 = vmatprep.mubr.msk.bf16.mxu1 %vm5394_vm0, %v7310_v22  ;;  %v3469_v3 = vmul.f32 %v5342_v54, %v6936_v42  ;;  %v4197_v14 = vpop.permute.xlu1 %4196 }
 0x533   : > { %v3487_v62 = vpack.c.bf16 %v3468_v23, %v3467_v7  ;;  %5075 = vmatprep.subr.bf16.mxu1 %v7310_v22 }
 0x534   : > { %v5344_v59 = vpop.eup %5343 }
 0x535   : > { %v4150_v43 = vpop.permute.xlu0 %4149  ;;  %v3470_v55 = vmul.f32 %v5344_v59, %v6944_v13  ;;  %5060 = vmatmul.mubr.msk.bf16.vlgmr.msra.gmra.mrb[120].mxu0 %vm1135_vm2, %v3487_v62  ;;  %v5346_v29 = vpop.eup %5345 }
 0x536   : > { %5070 = vmatpush3.bf16.msra.mxu0 %v4150_v43  ;;  %5071 = vmatprep.mubr.msk.bf16.mxu0 %vm5394_vm0, %v7310_v22  ;;  %v3471_v30 = vmul.f32 %v5346_v29, %v6946_v58 }
 0x537   : > { %v3488_v40 = vpack.c.bf16 %v3470_v55, %v3469_v3 }
 0x538   : > { %v5348_v33 = vpop.eup %5347 }
 0x539   : > { %v5350_v19 = vpop.eup %5349  ;;  %v3472_v41 = vmul.f32 %v5348_v33, %v6954_v8  ;;  %5066 = vmatmul.mubr.msk.bf16.vlgmr.msra.gmra.mrb[120].mxu1 %vm1135_vm2, %v3488_v40 }
 0x53a   : > { %5076 = vmatpush3.bf16.msra.mxu1 %v4197_v14  ;;  %5077 = vmatprep.mubr.msk.bf16.mxu1 %vm5394_vm0, %v7310_v22  ;;  %v3473_v26 = vmul.f32 %v5350_v19, %v6952_v9 }
 0x53b   : > { %v3489_v13 = vpack.c.bf16 %v3472_v41, %v3471_v30 }
 0x53c   : > { %v5352_v42 = vpop.eup %5351 }
 0x53d   : > { %v3474_v35 = vmul.f32 %v5352_v42, %v6960_v20  ;;  %5072 = vmatmul.mubr.msk.bf16.vlgmr.msra.gmra.mrb[124].mxu0 %vm1135_vm2, %v3489_v13 }
 0x53f   : > { %v3490_v5 = vpack.c.bf16 %v3474_v35, %v3473_v26 }
 0x541   : > { %5078 = vmatmul.mubr.msk.bf16.vlgmr.msra.gmra.mrb[124].mxu1 %vm1135_vm2, %v3490_v5 }
 0x5d4   : > { %v3531_v58 = vpop.f32.mrb[96].mxu0 }
 0x5d5   : > { %4275 = vrot.lane.b32.xlu0 %v3531_v58, %s5400_s20  ;;  %v4989_v8 = vpop.f32.mrb[97].mxu0 }
 0x5d6   : > { %v3534_v11 = vpop.f32.mrb[98].mxu0 }
 0x5d7   : > { %4277 = vrot.lane.b32.xlu1 %v3534_v11, %s5400_s20  ;;  %v4990_v22 = vpop.f32.mrb[99].mxu0 }
 0x5da   : > { %v3578_v51 = vpop.f32.mrb[96].mxu1 }
 0x5db   : > { %v4995_v44 = vpop.f32.mrb[97].mxu1  ;;  %4279 = vrot.lane.b32.xlu0 %v3578_v51, %s5400_s20 }
 0x5dc   : > { %v3581_v9 = vpop.f32.mrb[98].mxu1 }
 0x5dd   : > { %v4996_v20 = vpop.f32.mrb[99].mxu1  ;;  %4281 = vrot.lane.b32.xlu1 %v3581_v9, %s5400_s20 }
 0x5e0   : > { %v3625_v2 = vpop.f32.mrb[100].mxu0 }
 0x5e1   : > { %4283 = vrot.lane.b32.xlu0 %v3625_v2, %s5400_s20  ;;  %v5001_v12 = vpop.f32.mrb[101].mxu0 }
 0x5e2   : > { %v3628_v36 = vpop.f32.mrb[102].mxu0 }
 0x5e3   : > { %4285 = vrot.lane.b32.xlu1 %v3628_v36, %s5400_s20  ;;  %v5002_v63 = vpop.f32.mrb[103].mxu0 }
 0x5e4   : > { %v3672_v15 = vpop.f32.mrb[100].mxu1 }
 0x5e5   : > { %v5007_v60 = vpop.f32.mrb[101].mxu1  ;;  %4287 = vrot.lane.b32.xlu0 %v3672_v15, %s5400_s20 }
 0x5e6   : > { %v3675_v10 = vpop.f32.mrb[102].mxu1 }
 0x5e7   : > { %v5008_v39 = vpop.f32.mrb[103].mxu1  ;;  %4289 = vrot.lane.b32.xlu1 %v3675_v10, %s5400_s20  ;;  %v7349_v10 = vld [vmem:[#allocation11_spill] sm:$0xff] }
 0x5e8   : > { %v3719_v27 = vpop.f32.mrb[104].mxu0 }
 0x5e9   : > { %4291 = vrot.lane.b32.xlu0 %v3719_v27, %s5400_s20  ;;  %v5013_v46 = vpop.f32.mrb[105].mxu0  ;;  %v7350_v27 = vld [vmem:[#allocation5_spill] sm:$0xff] }
 0x5ea   : > { %v3722_v31 = vpop.f32.mrb[106].mxu0 }
 0x5eb   : > { %4293 = vrot.lane.b32.xlu1 %v3722_v31, %s5400_s20  ;;  %v5014_v4 = vpop.f32.mrb[107].mxu0  ;;  %v7351_v31 = vld [vmem:[#allocation4_spill] sm:$0xff] }
 0x5ec   : > { %v3766_v17 = vpop.f32.mrb[104].mxu1 }
 0x5ed   : > { %v5019_v18 = vpop.f32.mrb[105].mxu1  ;;  %4295 = vrot.lane.b32.xlu0 %v3766_v17, %s5400_s20  ;;  %v7352_v17 = vld [vmem:[#allocation2_spill] sm:$0xff] }
 0x5ee   : > { %v3769_v47 = vpop.f32.mrb[106].mxu1 }
 0x5ef   : > { %v5020_v1 = vpop.f32.mrb[107].mxu1  ;;  %4297 = vrot.lane.b32.xlu1 %v3769_v47, %s5400_s20 }
 0x5f0   : > { %v3813_v0 = vpop.f32.mrb[108].mxu0  ;;  %v7353_v1 = vld [vmem:[#allocation13_spill] sm:$0xff] }
 0x5f1   : > { %4299 = vrot.lane.b32.xlu0 %v3813_v0, %s5400_s20  ;;  %v5025_v56 = vpop.f32.mrb[109].mxu0 }
 0x5f2   : > { %v3816_v28 = vpop.f32.mrb[110].mxu0 }
 0x5f3   : > { %4301 = vrot.lane.b32.xlu1 %v3816_v28, %s5400_s20  ;;  %v5026_v24 = vpop.f32.mrb[111].mxu0  ;;  %v7354_v28 = vld [vmem:[#allocation10_spill] sm:$0xff] }
 0x5f4   : > { %v3860_v45 = vpop.f32.mrb[108].mxu1 }
 0x5f5   : > { %v5031_v57 = vpop.f32.mrb[109].mxu1  ;;  %4303 = vrot.lane.b32.xlu0 %v3860_v45, %s5400_s20 }
 0x5f6   : > { %v3863_v38 = vpop.f32.mrb[110].mxu1  ;;  %v7355_v57 = vld [vmem:[#allocation7_spill] sm:$0xff] }
 0x5f7   : > { %v5032_v50 = vpop.f32.mrb[111].mxu1  ;;  %4305 = vrot.lane.b32.xlu1 %v3863_v38, %s5400_s20 }
 0x5f8   : > { %v3907_v52 = vpop.f32.mrb[112].mxu0 }
 0x5f9   : > { %4307 = vrot.lane.b32.xlu0 %v3907_v52, %s5400_s20  ;;  %v5037_v37 = vpop.f32.mrb[113].mxu0  ;;  %v7356_v52 = vld [vmem:[#allocation3_spill] sm:$0xff] }
 0x5fa   : > { %v3910_v32 = vpop.f32.mrb[114].mxu0 }
 0x5fb   : > { %4309 = vrot.lane.b32.xlu1 %v3910_v32, %s5400_s20  ;;  %v5038_v6 = vpop.f32.mrb[115].mxu0 }
 0x5fc   : > { %v3954_v61 = vpop.f32.mrb[112].mxu1  ;;  %v7357_v6 = vld [vmem:[#allocation15_spill] sm:$0xff] }
 0x5fd   : > { %v5043_v34 = vpop.f32.mrb[113].mxu1  ;;  %4311 = vrot.lane.b32.xlu0 %v3954_v61, %s5400_s20 }
 0x5fe   : > { %v3957_v21 = vpop.f32.mrb[114].mxu1 }
 0x5ff   : > { %v5044_v7 = vpop.f32.mrb[115].mxu1  ;;  %4313 = vrot.lane.b32.xlu1 %v3957_v21, %s5400_s20  ;;  %v7358_v21 = vld [vmem:[#allocation12_spill] sm:$0xff] }
 0x600   : > { %v4001_v23 = vpop.f32.mrb[116].mxu0 }
 0x601   : > { %4315 = vrot.lane.b32.xlu0 %v4001_v23, %s5400_s20  ;;  %v5049_v54 = vpop.f32.mrb[117].mxu0 }
 0x602   : > { %v4004_v62 = vpop.f32.mrb[118].mxu0  ;;  %v7359_v54 = vld [vmem:[#allocation9_spill] sm:$0xff] }
 0x603   : > { %4317 = vrot.lane.b32.xlu1 %v4004_v62, %s5400_s20  ;;  %v5050_v59 = vpop.f32.mrb[119].mxu0 }
 0x604   : > { %v4048_v43 = vpop.f32.mrb[116].mxu1 }
 0x605   : > { %v5055_v3 = vpop.f32.mrb[117].mxu1  ;;  %4319 = vrot.lane.b32.xlu0 %v4048_v43, %s5400_s20  ;;  %v7360_v43 = vld [vmem:[#allocation6_spill] sm:$0xff] }
 0x606   : > { %v4051_v55 = vpop.f32.mrb[118].mxu1 }
 0x607   : > { %v5056_v29 = vpop.f32.mrb[119].mxu1  ;;  %4321 = vrot.lane.b32.xlu1 %v4051_v55, %s5400_s20 }
 0x608   : > { %v4095_v14 = vpop.f32.mrb[120].mxu0  ;;  %v7361_v29 = vld [vmem:[#allocation14_spill] sm:$0xff] }
 0x609   : > { %4323 = vrot.lane.b32.xlu0 %v4095_v14, %s5400_s20  ;;  %v5061_v40 = vpop.f32.mrb[121].mxu0 }
 0x60a   : > { %v4098_v33 = vpop.f32.mrb[122].mxu0 }
 0x60b   : > { %4325 = vrot.lane.b32.xlu1 %v4098_v33, %s5400_s20  ;;  %v5062_v19 = vpop.f32.mrb[123].mxu0  ;;  %v7362_v33 = vld [vmem:[#allocation8_spill] sm:$0xff] }
 0x60c   : > { %v4142_v30 = vpop.f32.mrb[120].mxu1 }
 0x60d   : > { %v5067_v41 = vpop.f32.mrb[121].mxu1  ;;  %4327 = vrot.lane.b32.xlu0 %v4142_v30, %s5400_s20 }
 0x60e   : > { %v4145_v42 = vpop.f32.mrb[122].mxu1  ;;  %v7363_v41 = vld [vmem:[#allocation16_spill] sm:$0xff] }
 0x60f   : > { %v5068_v13 = vpop.f32.mrb[123].mxu1  ;;  %4329 = vrot.lane.b32.xlu1 %v4145_v42, %s5400_s20 }
 0x610   : > { %v4189_v26 = vpop.f32.mrb[124].mxu0 }
 0x611   : > { %4331 = vrot.lane.b32.xlu0 %v4189_v26, %s5400_s20  ;;  %v5073_v35 = vpop.f32.mrb[125].mxu0  ;;  %v7364_v26 = vld [vmem:[#allocation18_spill] sm:$0xff] }
 0x612   : > { %v4192_v5 = vpop.f32.mrb[126].mxu0 }
 0x613   : > { %4333 = vrot.lane.b32.xlu1 %v4192_v5, %s5400_s20  ;;  %v5074_v58 = vpop.f32.mrb[127].mxu0 }
 0x614   : > { %v4236_v8 = vpop.f32.mrb[124].mxu1  ;;  %v7365_v58 = vld [vmem:[#allocation17_spill] sm:$0xff] }
 0x615   : > { %v5079_v11 = vpop.f32.mrb[125].mxu1  ;;  %4335 = vrot.lane.b32.xlu0 %v4236_v8, %s5400_s20 }
 0x616   : > { %v4239_v22 = vpop.f32.mrb[126].mxu1 }
 0x617   : > { %v5080_v51 = vpop.f32.mrb[127].mxu1  ;;  %4337 = vrot.lane.b32.xlu1 %v4239_v22, %s5400_s20  ;;  %v7366_v22 = vld [vmem:[#allocation20_spill] sm:$0xff] }
 0x647   : > { %v4276_v44 = vpop.permute.xlu0 %4275 }
 0x648   : > { %v4371_v9 = vsel %vm305_vm1, %v6448_v25, %v4276_v44 }
 0x649   : > { %4403 = vst.msk [vmem:[%s7109_s22] sm:$0xff] %vm1135_vm2, %v4371_v9  ;;  %v4278_v20 = vpop.permute.xlu1 %4277  ;;  %v7367_v9 = vld [vmem:[#allocation19_spill] sm:$0xff] }
 0x64a   : > { %v4372_v2 = vsel %vm305_vm1, %v6450_v48, %v4278_v20 }
 0x64b   : > { %4404 = vst.msk [vmem:[%s7109_s22 + $0x8] sm:$0xff] %vm1135_vm2, %v4372_v2 }
 0x64d   : > { %v4280_v12 = vpop.permute.xlu0 %4279 }
 0x64e   : > { %v4373_v36 = vsel %vm305_vm1, %v6452_v53, %v4280_v12  ;;  %v7368_v12 = vld [vmem:[#allocation22_spill] sm:$0xff] }
 0x64f   : > { %4405 = vst.msk [vmem:[%s7109_s22 + $0x10] sm:$0xff] %vm1135_vm2, %v4373_v36  ;;  %v4282_v63 = vpop.permute.xlu1 %4281 }
 0x650   : > { %v4374_v25 = vsel %vm305_vm1, %v6455_v49, %v4282_v63 }
 0x651   : > { %4406 = vst.msk [vmem:[%s7109_s22 + $0x18] sm:$0xff] %vm1135_vm2, %v4374_v25  ;;  %v7369_v25 = vld [vmem:[#allocation21_spill] sm:$0xff] }
 0x653   : > { %v4284_v15 = vpop.permute.xlu0 %4283 }
 0x654   : > { %v4375_v48 = vsel %vm305_vm1, %v6457_v16, %v4284_v15 }
 0x655   : > { %4407 = vst.msk [vmem:[%s7109_s22 + $0x20] sm:$0xff] %vm1135_vm2, %v4375_v48  ;;  %v4286_v60 = vpop.permute.xlu1 %4285 }
 0x656   : > { %v4376_v53 = vsel %vm305_vm1, %v7349_v10, %v4286_v60  ;;  %v7370_v60 = vld [vmem:[#allocation24_spill] sm:$0xff] }
 0x657   : > { %4408 = vst.msk [vmem:[%s7109_s22 + $0x28] sm:$0xff] %vm1135_vm2, %v4376_v53  ;;  %v4288_v39 = vpop.permute.xlu0 %4287 }
 0x658   : > { %v4377_v49 = vsel %vm305_vm1, %v7350_v27, %v4288_v39  ;;  %v7371_v39 = vld [vmem:[#allocation23_spill] sm:$0xff] }
 0x659   : > { %4409 = vst.msk [vmem:[%s7109_s22 + $0x30] sm:$0xff] %vm1135_vm2, %v4377_v49  ;;  %v4290_v46 = vpop.permute.xlu1 %4289 }
 0x65a   : > { %v4378_v16 = vsel %vm305_vm1, %v7351_v31, %v4290_v46  ;;  %v7372_v46 = vld [vmem:[#allocation25_spill] sm:$0xff] }
 0x65b   : > { %4410 = vst.msk [vmem:[%s7109_s22 + $0x38] sm:$0xff] %vm1135_vm2, %v4378_v16  ;;  %v4292_v4 = vpop.permute.xlu0 %4291 }
 0x65c   : > { %v4379_v18 = vsel %vm305_vm1, %v7352_v17, %v4292_v4  ;;  %v7373_v4 = vld [vmem:[#allocation26_spill] sm:$0xff] }
 0x65d   : > { %4411 = vst.msk [vmem:[%s7109_s22 + $0x40] sm:$0xff] %vm1135_vm2, %v4379_v18  ;;  %v4294_v47 = vpop.permute.xlu1 %4293 }
 0x65e   : > { %v4380_v0 = vsel %vm305_vm1, %v7353_v1, %v4294_v47  ;;  %v7374_v47 = vld [vmem:[#allocation27_spill] sm:$0xff] }
 0x65f   : > { %4412 = vst.msk [vmem:[%s7109_s22 + $0x48] sm:$0xff] %vm1135_vm2, %v4380_v0  ;;  %v4296_v56 = vpop.permute.xlu0 %4295 }
 0x660   : > { %v4381_v24 = vsel %vm305_vm1, %v7354_v28, %v4296_v56  ;;  %v7375_v56 = vld [vmem:[#allocation28_spill] sm:$0xff] }
 0x661   : > { %4413 = vst.msk [vmem:[%s7109_s22 + $0x50] sm:$0xff] %vm1135_vm2, %v4381_v24  ;;  %v4298_v45 = vpop.permute.xlu1 %4297 }
 0x662   : > { %v4382_v38 = vsel %vm305_vm1, %v7355_v57, %v4298_v45 }
 0x663   : > { %4414 = vst.msk [vmem:[%s7109_s22 + $0x58] sm:$0xff] %vm1135_vm2, %v4382_v38  ;;  %v4300_v50 = vpop.permute.xlu0 %4299 }
 0x664   : > { %v4383_v37 = vsel %vm305_vm1, %v7356_v52, %v4300_v50 }
 0x665   : > { %4415 = vst.msk [vmem:[%s7109_s22 + $0x60] sm:$0xff] %vm1135_vm2, %v4383_v37  ;;  %v4302_v32 = vpop.permute.xlu1 %4301 }
 0x666   : > { %v4384_v61 = vsel %vm305_vm1, %v7357_v6, %v4302_v32 }
 0x667   : > { %4416 = vst.msk [vmem:[%s7109_s22 + $0x68] sm:$0xff] %vm1135_vm2, %v4384_v61  ;;  %v4304_v34 = vpop.permute.xlu0 %4303 }
 0x668   : > { %v4385_v7 = vsel %vm305_vm1, %v7358_v21, %v4304_v34 }
 0x669   : > { %4417 = vst.msk [vmem:[%s7109_s22 + $0x70] sm:$0xff] %vm1135_vm2, %v4385_v7  ;;  %v4306_v23 = vpop.permute.xlu1 %4305 }
 0x66a   : > { %v4386_v62 = vsel %vm305_vm1, %v7359_v54, %v4306_v23 }
 0x66b   : > { %4418 = vst.msk [vmem:[%s7109_s22 + $0x78] sm:$0xff] %vm1135_vm2, %v4386_v62  ;;  %v4308_v59 = vpop.permute.xlu0 %4307 }
 0x66c   : > { %v4387_v3 = vsel %vm305_vm1, %v7360_v43, %v4308_v59 }
 0x66d   : > { %4419 = vst.msk [vmem:[%s7109_s22 + $0x80] sm:$0xff] %vm1135_vm2, %v4387_v3  ;;  %v4310_v55 = vpop.permute.xlu1 %4309 }
 0x66e   : > { %v4388_v14 = vsel %vm305_vm1, %v7361_v29, %v4310_v55 }
 0x66f   : > { %4420 = vst.msk [vmem:[%s7109_s22 + $0x88] sm:$0xff] %vm1135_vm2, %v4388_v14  ;;  %v4312_v40 = vpop.permute.xlu0 %4311 }
 0x670   : > { %v4389_v19 = vsel %vm305_vm1, %v7362_v33, %v4312_v40 }
 0x671   : > { %4421 = vst.msk [vmem:[%s7109_s22 + $0x90] sm:$0xff] %vm1135_vm2, %v4389_v19  ;;  %v4314_v30 = vpop.permute.xlu1 %4313 }
 0x672   : > { %v4390_v42 = vsel %vm305_vm1, %v7363_v41, %v4314_v30 }
 0x673   : > { %4422 = vst.msk [vmem:[%s7109_s22 + $0x98] sm:$0xff] %vm1135_vm2, %v4390_v42  ;;  %v4316_v13 = vpop.permute.xlu0 %4315 }
 0x674   : > { %v4391_v35 = vsel %vm305_vm1, %v7364_v26, %v4316_v13 }
 0x675   : > { %4423 = vst.msk [vmem:[%s7109_s22 + $0xa0] sm:$0xff] %vm1135_vm2, %v4391_v35  ;;  %v4318_v5 = vpop.permute.xlu1 %4317 }
 0x676   : > { %v4392_v8 = vsel %vm305_vm1, %v7365_v58, %v4318_v5 }
 0x677   : > { %4424 = vst.msk [vmem:[%s7109_s22 + $0xa8] sm:$0xff] %vm1135_vm2, %v4392_v8  ;;  %v4320_v11 = vpop.permute.xlu0 %4319 }
 0x678   : > { %v4393_v51 = vsel %vm305_vm1, %v7366_v22, %v4320_v11 }
 0x679   : > { %4425 = vst.msk [vmem:[%s7109_s22 + $0xb0] sm:$0xff] %vm1135_vm2, %v4393_v51  ;;  %v4322_v44 = vpop.permute.xlu1 %4321 }
 0x67a   : > { %v4394_v20 = vsel %vm305_vm1, %v7367_v9, %v4322_v44 }
 0x67b   : > { %4426 = vst.msk [vmem:[%s7109_s22 + $0xb8] sm:$0xff] %vm1135_vm2, %v4394_v20  ;;  %v4324_v2 = vpop.permute.xlu0 %4323 }
 0x67c   : > { %v4395_v36 = vsel %vm305_vm1, %v7368_v12, %v4324_v2 }
 0x67d   : > { %4427 = vst.msk [vmem:[%s7109_s22 + $0xc0] sm:$0xff] %vm1135_vm2, %v4395_v36  ;;  %v4326_v63 = vpop.permute.xlu1 %4325 }
 0x67e   : > { %v4396_v15 = vsel %vm305_vm1, %v7369_v25, %v4326_v63 }
 0x67f   : > { %4428 = vst.msk [vmem:[%s7109_s22 + $0xc8] sm:$0xff] %vm1135_vm2, %v4396_v15  ;;  %v4328_v48 = vpop.permute.xlu0 %4327 }
 0x680   : > { %v4397_v10 = vsel %vm305_vm1, %v7370_v60, %v4328_v48 }
 0x681   : > { %4429 = vst.msk [vmem:[%s7109_s22 + $0xd0] sm:$0xff] %vm1135_vm2, %v4397_v10  ;;  %v4330_v53 = vpop.permute.xlu1 %4329 }
 0x682   : > { %v4398_v27 = vsel %vm305_vm1, %v7371_v39, %v4330_v53 }
 0x683   : > { %4430 = vst.msk [vmem:[%s7109_s22 + $0xd8] sm:$0xff] %vm1135_vm2, %v4398_v27  ;;  %v4332_v49 = vpop.permute.xlu0 %4331 }
 0x684   : > { %v4399_v31 = vsel %vm305_vm1, %v7372_v46, %v4332_v49 }
 0x685   : > { %4431 = vst.msk [vmem:[%s7109_s22 + $0xe0] sm:$0xff] %vm1135_vm2, %v4399_v31  ;;  %v4334_v16 = vpop.permute.xlu1 %4333 }
 0x686   : > { %v4400_v17 = vsel %vm305_vm1, %v7373_v4, %v4334_v16 }
 0x687   : > { %4432 = vst.msk [vmem:[%s7109_s22 + $0xe8] sm:$0xff] %vm1135_vm2, %v4400_v17  ;;  %v4336_v18 = vpop.permute.xlu0 %4335 }
 0x688   : > { %v4401_v1 = vsel %vm305_vm1, %v7374_v47, %v4336_v18 }
 0x689   : > { %4433 = vst.msk [vmem:[%s7109_s22 + $0xf0] sm:$0xff] %vm1135_vm2, %v4401_v1  ;;  %v4338_v0 = vpop.permute.xlu1 %4337 }
 0x68a   : > { %v4402_v28 = vsel %vm305_vm1, %v7375_v56, %v4338_v0 }
 0x68b   : > { %4434 = vst.msk [vmem:[%s7109_s22 + $0xf8] sm:$0xff] %vm1135_vm2, %v4402_v28 }
 0x68c PF: > { %s13_s12 = sadd.s32 1, %s5391_s12  }
 0x68d   : > { %p10_p4 = scmp.ge.s32.totalorder %s13_s12, 4  }
 0x68f   :  { %12 = sbr.rel (!%p10_p4) target bundleno = 1 (0x1), region = 63 }

// kernel: _lambda_.54
= control target key start
LH: loop header
LB: loop body
LE: loop exit
PB: predicated region body
PF: predicated region fallthrough
CT: control target
= control target key end

     0   :  { %s1128_s12 = smov 0   ;;  %s1130_s13 = smov 0   ;;  %s1382_s0 = inlined_call_operand.vmem [shape: bf16[512,16], index: 0, kind: input, shape index: {}]   ;;  %s1383_s1 = inlined_call_operand.vmem [shape: bf16[16,32], index: 1, kind: input, shape index: {}]   ;;  %s1384_s2 = inlined_call_operand.vmem [shape: f32[1,32], index: 2, kind: input, shape index: {}]   ;;  %s1385_s3 = inlined_call_operand.vmem [shape: f32[512,32], index: 3, kind: output, shape index: {}]  }
   0x1   :  { %s1132_s14 = smov 0  }
   0x2 LB: > { %s32_s15 = sadd.s32 1, %s1101_s13  ;;  %p947_p0 = scmp.ge.s32.totalorder %s1105_s14, 1  ;;  %s1105_s14 = sphi %s1132_s14, %s13_s14   ;;  %s1101_s13 = sphi %s1130_s13, %s1388_s13   ;;  %s1097_s12 = sphi %s1128_s12, %s1387_s12  }
   0x3   : > { %p34_p1 = scmp.ge.s32.totalorder %s32_s15, 2  ;;  %p188_p2 = scmp.lt.s32.totalorder %s1105_s14, 3 }
   0x5   : > { %s1390_s15 = smov (%p34_p1, %s32_s15), 0  ;;  %p189_p3 = pnand %p947_p0, %p188_p2 }
   0x6   : > { %v1066_v0 = vld [vmem:[%s1383_s1] sm:$0xff] (!%p189_p3)   ;;  %s948_s18 = sshll.u32 (!%p189_p3), %s1097_s12, 5  ;;  %vm264_vm0 = vcmask (!%p189_p3), 261120   ;;  %v1107_v1 = vmov (!%p189_p3), 0.0   ;;  %vm449_vm1 = vcmask (!%p189_p3), 130048  }
   0x7   : > { %192 = sbr.rel (%p189_p3) target bundleno = 274 (0x112), region = 32  ;;  %p1154_p4 = scmp.lt.s32.totalorder (!%p189_p3), %s948_s18, 63  ;;  %1005 = vmatprep.subr.bf16.mxu0 (!%p189_p3), %v1066_v0  ;;  %1039 = vmatprep.subr.bf16.mxu1 (!%p189_p3), %v1066_v0  ;;  %267 = vst.msk [vmem:[#allocation2 + $0x10] sm:$0xff] (!%p189_p3), %vm264_vm0, %v1107_v1  ;;  %265 = vst.msk [vmem:[#allocation2] sm:$0xff] (!%p189_p3), %vm264_vm0, %v1107_v1  ;;  %v1246_v45 = vld [vmem:[%s1384_s2] ss:$0 sm:$0xff] (!%p189_p3) }
   0x8   : > { %266 = vst.msk [vmem:[#allocation2 + $0x8] sm:$0xff] (!%p189_p3), %vm264_vm0, %v1107_v1  ;;  %268 = vst.msk [vmem:[#allocation2 + $0x18] sm:$0xff] (!%p189_p3), %vm264_vm0, %v1107_v1  ;;  %1006 = vmatpush3.bf16.msra.mxu0 (!%p189_p3), %v1066_v0  ;;  %1040 = vmatpush3.bf16.msra.mxu1 (!%p189_p3), %v1066_v0 }
   0x9   : > { %269 = vst.msk [vmem:[#allocation2 + $0x20] sm:$0xff] (!%p189_p3), %vm264_vm0, %v1107_v1  ;;  %270 = vst.msk [vmem:[#allocation2 + $0x28] sm:$0xff] (!%p189_p3), %vm264_vm0, %v1107_v1 }
   0xa   : > { %271 = vst.msk [vmem:[#allocation2 + $0x30] sm:$0xff] (!%p189_p3), %vm264_vm0, %v1107_v1  ;;  %272 = vst.msk [vmem:[#allocation2 + $0x38] sm:$0xff] (!%p189_p3), %vm264_vm0, %v1107_v1 }
   0xb   : > { %273 = vst.msk [vmem:[#allocation2 + $0x40] sm:$0xff] (!%p189_p3), %vm264_vm0, %v1107_v1  ;;  %274 = vst.msk [vmem:[#allocation2 + $0x48] sm:$0xff] (!%p189_p3), %vm264_vm0, %v1107_v1 }
   0xc   : > { %275 = vst.msk [vmem:[#allocation2 + $0x50] sm:$0xff] (!%p189_p3), %vm264_vm0, %v1107_v1  ;;  %276 = vst.msk [vmem:[#allocation2 + $0x58] sm:$0xff] (!%p189_p3), %vm264_vm0, %v1107_v1 }
   0xd   : > { %277 = vst.msk [vmem:[#allocation2 + $0x60] sm:$0xff] (!%p189_p3), %vm264_vm0, %v1107_v1  ;;  %278 = vst.msk [vmem:[#allocation2 + $0x68] sm:$0xff] (!%p189_p3), %vm264_vm0, %v1107_v1 }
   0xe   : > { %279 = vst.msk [vmem:[#allocation2 + $0x70] sm:$0xff] %vm264_vm0, %v1107_v1  ;;  %280 = vst.msk [vmem:[#allocation2 + $0x78] sm:$0xff] %vm264_vm0, %v1107_v1  ;;  %s1392_s18 = smov (!%p1154_p4, %s948_s18), 63  ;;  %v299_v18 = vld [vmem:[#allocation2 + $0x10] sm:$0xff]  ;;  %v297_v20 = vld [vmem:[#allocation2] sm:$0xff] }
   0xf   : > { %281 = vst.msk [vmem:[#allocation2 + $0x80] sm:$0xff] %vm264_vm0, %v1107_v1  ;;  %282 = vst.msk [vmem:[#allocation2 + $0x88] sm:$0xff] %vm264_vm0, %v1107_v1  ;;  %s949_s20 = sshll.u32 %s1392_s18, 2  ;;  %v300_v23 = vld [vmem:[#allocation2 + $0x18] sm:$0xff]  ;;  %v298_v28 = vld [vmem:[#allocation2 + $0x8] sm:$0xff]  ;;  %s951_s24 = sshll.u32 %s1392_s18, 3 }
  0x10   : > { %283 = vst.msk [vmem:[#allocation2 + $0x90] sm:$0xff] %vm264_vm0, %v1107_v1  ;;  %284 = vst.msk [vmem:[#allocation2 + $0x98] sm:$0xff] %vm264_vm0, %v1107_v1  ;;  %s1200_s23 = scalar_lea.vmem %s1382_s0, %s949_s20  ;;  %v301_v44 = vld [vmem:[#allocation2 + $0x20] sm:$0xff]  ;;  %v302_v53 = vld [vmem:[#allocation2 + $0x28] sm:$0xff]  ;;  %s1251_s29 = scalar_lea.vmem %s1385_s3, %s951_s24 }
  0x11   : > { %285 = vst.msk [vmem:[#allocation2 + $0xa0] sm:$0xff] %vm264_vm0, %v1107_v1  ;;  %286 = vst.msk [vmem:[#allocation2 + $0xa8] sm:$0xff] %vm264_vm0, %v1107_v1  ;;  %v1067_v2 = vld [vmem:[%s1200_s23] sm:$0xff]   ;;  %v1069_v4 = vld [vmem:[%s1200_s23 + $0x8] sm:$0xff]  }
  0x12   : > { %287 = vst.msk [vmem:[#allocation2 + $0xb0] sm:$0xff] %vm264_vm0, %v1107_v1  ;;  %288 = vst.msk [vmem:[#allocation2 + $0xb8] sm:$0xff] %vm264_vm0, %v1107_v1  ;;  %v1068_v3 = vld [vmem:[%s1200_s23 + $0x40] sm:$0xff]   ;;  %1007 = vmatprep.mubr.msk.bf16.mxu0 %vm449_vm1, %v1067_v2  ;;  %v1070_v5 = vld [vmem:[%s1200_s23 + $0x48] sm:$0xff]  }
  0x13   : > { %289 = vst.msk [vmem:[#allocation2 + $0xc0] sm:$0xff] %vm264_vm0, %v1107_v1  ;;  %290 = vst.msk [vmem:[#allocation2 + $0xc8] sm:$0xff] %vm264_vm0, %v1107_v1  ;;  %1023 = vmatprep.mubr.msk.bf16.mxu1 %vm449_vm1, %v1068_v3  ;;  %1008 = vmatmul.mubr.msk.bf16.vlgmr.msra.gmra.mrb[0].mxu0 %vm449_vm1, %v1069_v4  ;;  %v1071_v6 = vld [vmem:[%s1200_s23 + $0x10] sm:$0xff]   ;;  %v1073_v8 = vld [vmem:[%s1200_s23 + $0x18] sm:$0xff]  }
  0x14   : > { %291 = vst.msk [vmem:[#allocation2 + $0xd0] sm:$0xff] %vm264_vm0, %v1107_v1  ;;  %292 = vst.msk [vmem:[#allocation2 + $0xd8] sm:$0xff] %vm264_vm0, %v1107_v1  ;;  %1024 = vmatmul.mubr.msk.bf16.vlgmr.msra.gmra.mrb[0].mxu1 %vm449_vm1, %v1070_v5  ;;  %v1072_v7 = vld [vmem:[%s1200_s23 + $0x50] sm:$0xff]   ;;  %1011 = vmatprep.mubr.msk.bf16.mxu0 %vm449_vm1, %v1071_v6  ;;  %v1074_v9 = vld [vmem:[%s1200_s23 + $0x58] sm:$0xff]  }
  0x15   : > { %293 = vst.msk [vmem:[#allocation2 + $0xe0] sm:$0xff] %vm264_vm0, %v1107_v1  ;;  %294 = vst.msk [vmem:[#allocation2 + $0xe8] sm:$0xff] %vm264_vm0, %v1107_v1  ;;  %1027 = vmatprep.mubr.msk.bf16.mxu1 %vm449_vm1, %v1072_v7  ;;  %v1075_v10 = vld [vmem:[%s1200_s23 + $0x20] sm:$0xff]   ;;  %v1077_v12 = vld [vmem:[%s1200_s23 + $0x28] sm:$0xff]  }
  0x16   : > { %295 = vst.msk [vmem:[#allocation2 + $0xf0] sm:$0xff] %vm264_vm0, %v1107_v1  ;;  %296 = vst.msk [vmem:[#allocation2 + $0xf8] sm:$0xff] %vm264_vm0, %v1107_v1  ;;  %v1076_v11 = vld [vmem:[%s1200_s23 + $0x60] sm:$0xff]   ;;  %v1078_v13 = vld [vmem:[%s1200_s23 + $0x68] sm:$0xff]  }
  0x17   : > { %v1079_v14 = vld [vmem:[%s1200_s23 + $0x30] sm:$0xff]   ;;  %v1081_v16 = vld [vmem:[%s1200_s23 + $0x38] sm:$0xff]   ;;  %v313_v22 = vld [vmem:[#allocation2 + $0x80] sm:$0xff] }
  0x18   : > { %v1080_v15 = vld [vmem:[%s1200_s23 + $0x70] sm:$0xff]   ;;  %v1082_v17 = vld [vmem:[%s1200_s23 + $0x78] sm:$0xff]   ;;  %v314_v33 = vld [vmem:[#allocation2 + $0x88] sm:$0xff] }
  0x19   : > { %v315_v19 = vld [vmem:[#allocation2 + $0x90] sm:$0xff]  ;;  %v316_v27 = vld [vmem:[#allocation2 + $0x98] sm:$0xff]  ;;  %v317_v47 = vld [vmem:[#allocation2 + $0xa0] sm:$0xff] }
  0x1a   : > { %v303_v42 = vld [vmem:[#allocation2 + $0x30] sm:$0xff]  ;;  %v304_v48 = vld [vmem:[#allocation2 + $0x38] sm:$0xff]  ;;  %v318_v59 = vld [vmem:[#allocation2 + $0xa8] sm:$0xff] }
  0x1b   : > { %1012 = vmatmul.mubr.msk.bf16.gmra.mrb[4].mxu0 %vm449_vm1, %v1073_v8  ;;  %v319_v43 = vld [vmem:[#allocation2 + $0xb0] sm:$0xff]  ;;  %v320_v52 = vld [vmem:[#allocation2 + $0xb8] sm:$0xff] }
  0x1c   : > { %1028 = vmatmul.mubr.msk.bf16.gmra.mrb[4].mxu1 %vm449_vm1, %v1074_v9  ;;  %1015 = vmatprep.mubr.msk.bf16.mxu0 %vm449_vm1, %v1075_v10 }
  0x1d   : > { %1031 = vmatprep.mubr.msk.bf16.mxu1 %vm449_vm1, %v1076_v11 }
  0x23   : > { %1016 = vmatmul.mubr.msk.bf16.gmra.mrb[8].mxu0 %vm449_vm1, %v1077_v12 }
  0x24   : > { %1032 = vmatmul.mubr.msk.bf16.gmra.mrb[8].mxu1 %vm449_vm1, %v1078_v13  ;;  %1019 = vmatprep.mubr.msk.bf16.mxu0 %vm449_vm1, %v1079_v14 }
  0x25   : > { %1035 = vmatprep.mubr.msk.bf16.mxu1 %vm449_vm1, %v1080_v15 }
  0x2b   : > { %1020 = vmatmul.mubr.msk.bf16.gmra.mrb[12].mxu0 %vm449_vm1, %v1081_v16 }
  0x2c   : > { %1036 = vmatmul.mubr.msk.bf16.gmra.mrb[12].mxu1 %vm449_vm1, %v1082_v17 }
  0xe6   : > { %v1009_v21 = vpop.f32.mrb[0].mxu0 }
  0xe7   : > { %v661_v24 = vadd.f32 %v1009_v21, %v299_v18  ;;  %v1025_v25 = vpop.f32.mrb[0].mxu1  ;;  %v532_v26 = vpop.f32.mrb[1].mxu0  ;;  %v307_v18 = vld [vmem:[#allocation2 + $0x50] sm:$0xff]  ;;  %v305_v21 = vld [vmem:[#allocation2 + $0x40] sm:$0xff] }
  0xe8   : > { %v677_v29 = vadd.f32 %v1025_v25, %v315_v19  ;;  %v659_v30 = vadd.f32 %v532_v26, %v297_v20  ;;  %v596_v31 = vpop.f32.mrb[1].mxu1  ;;  %v1010_v32 = vpop.f32.mrb[2].mxu0  ;;  %v323_v20 = vld [vmem:[#allocation2 + $0xd0] sm:$0xff] }
  0xe9   : > { %694 = vst.msk [vmem:[#allocation2 + $0x10] sm:$0xff] %vm264_vm0, %v661_v24  ;;  %v675_v34 = vadd.f32 %v596_v31, %v313_v22  ;;  %v662_v35 = vadd.f32 %v1010_v32, %v300_v23  ;;  %v1026_v36 = vpop.f32.mrb[2].mxu1  ;;  %v535_v37 = vpop.f32.mrb[3].mxu0  ;;  %v321_v23 = vld [vmem:[#allocation2 + $0xc0] sm:$0xff]  ;;  %v308_v24 = vld [vmem:[#allocation2 + $0x58] sm:$0xff] }
  0xea   : > { %710 = vst.msk [vmem:[#allocation2 + $0x90] sm:$0xff] %vm264_vm0, %v677_v29  ;;  %692 = vst.msk [vmem:[#allocation2] sm:$0xff] %vm264_vm0, %v659_v30  ;;  %v678_v38 = vadd.f32 %v1026_v36, %v316_v27  ;;  %v660_v39 = vadd.f32 %v535_v37, %v298_v28  ;;  %v599_v40 = vpop.f32.mrb[3].mxu1  ;;  %v324_v28 = vld [vmem:[#allocation2 + $0xd8] sm:$0xff]  ;;  %v306_v29 = vld [vmem:[#allocation2 + $0x48] sm:$0xff] }
  0xeb   : > { %708 = vst.msk [vmem:[#allocation2 + $0x80] sm:$0xff] %vm264_vm0, %v675_v34  ;;  %695 = vst.msk [vmem:[#allocation2 + $0x18] sm:$0xff] %vm264_vm0, %v662_v35  ;;  %v676_v41 = vadd.f32 %v599_v40, %v314_v33  ;;  %v322_v35 = vld [vmem:[#allocation2 + $0xc8] sm:$0xff] }
  0xec   : > { %711 = vst.msk [vmem:[#allocation2 + $0x98] sm:$0xff] %vm264_vm0, %v678_v38  ;;  %693 = vst.msk [vmem:[#allocation2 + $0x8] sm:$0xff] %vm264_vm0, %v660_v39 }
  0xed   : > { %709 = vst.msk [vmem:[#allocation2 + $0x88] sm:$0xff] %vm264_vm0, %v676_v41 }
  0xee   : > { %v1013_v46 = vpop.f32.mrb[4].mxu0 }
  0xef   : > { %v665_v49 = vadd.f32 %v1013_v46, %v303_v42  ;;  %v1029_v50 = vpop.f32.mrb[4].mxu1  ;;  %v548_v51 = vpop.f32.mrb[5].mxu0 }
  0xf0   : > { %v729_v54 = vld [vmem:[#allocation2 + $0x10] sm:$0xff]  ;;  %v681_v55 = vadd.f32 %v1029_v50, %v319_v43  ;;  %v663_v56 = vadd.f32 %v548_v51, %v301_v44  ;;  %v612_v57 = vpop.f32.mrb[5].mxu1  ;;  %v1014_v58 = vpop.f32.mrb[6].mxu0 }
  0xf1   : > { %v768_v60 = vadd.f32 %v1246_v45, %v729_v54  ;;  %v745_v61 = vld [vmem:[#allocation2 + $0x90] sm:$0xff]  ;;  %v727_v62 = vld [vmem:[#allocation2] sm:$0xff]  ;;  %698 = vst.msk [vmem:[#allocation2 + $0x30] sm:$0xff] %vm264_vm0, %v665_v49  ;;  %v679_v63 = vadd.f32 %v612_v57, %v317_v47  ;;  %v666_v0 = vadd.f32 %v1014_v58, %v304_v48  ;;  %v1030_v1 = vpop.f32.mrb[6].mxu1  ;;  %v551_v2 = vpop.f32.mrb[7].mxu0 }
  0xf2   : > { %v784_v3 = vadd.f32 %v1246_v45, %v745_v61  ;;  %v766_v4 = vadd.f32 %v1246_v45, %v727_v62  ;;  %v743_v5 = vld [vmem:[#allocation2 + $0x80] sm:$0xff]  ;;  %v730_v6 = vld [vmem:[#allocation2 + $0x18] sm:$0xff]  ;;  %714 = vst.msk [vmem:[#allocation2 + $0xb0] sm:$0xff] %vm264_vm0, %v681_v55  ;;  %696 = vst.msk [vmem:[#allocation2 + $0x20] sm:$0xff] %vm264_vm0, %v663_v56  ;;  %v682_v7 = vadd.f32 %v1030_v1, %v320_v52  ;;  %v615_v9 = vpop.f32.mrb[7].mxu1 }
  0xf3   : > { %v664_v8 = vadd.f32 %v551_v2, %v302_v53  ;;  %800 = vst.msk [vmem:[%s1251_s29 + $0x10] sm:$0xff] %vm264_vm0, %v768_v60  ;;  %v782_v10 = vadd.f32 %v1246_v45, %v743_v5  ;;  %v769_v11 = vadd.f32 %v1246_v45, %v730_v6  ;;  %v746_v12 = vld [vmem:[#allocation2 + $0x98] sm:$0xff]  ;;  %v728_v13 = vld [vmem:[#allocation2 + $0x8] sm:$0xff]  ;;  %712 = vst.msk [vmem:[#allocation2 + $0xa0] sm:$0xff] %vm264_vm0, %v679_v63 }
  0xf4   : > { %699 = vst.msk [vmem:[#allocation2 + $0x38] sm:$0xff] %vm264_vm0, %v666_v0  ;;  %v680_v14 = vadd.f32 %v615_v9, %v318_v59  ;;  %816 = vst.msk [vmem:[%s1251_s29 + $0x90] sm:$0xff] %vm264_vm0, %v784_v3  ;;  %v785_v15 = vadd.f32 %v1246_v45, %v746_v12  ;;  %v767_v16 = vadd.f32 %v1246_v45, %v728_v13  ;;  %v744_v17 = vld [vmem:[#allocation2 + $0x88] sm:$0xff]  ;;  %v311_v59 = vld [vmem:[#allocation2 + $0x70] sm:$0xff] }
  0xf5   : > { %798 = vst.msk [vmem:[%s1251_s29] sm:$0xff] %vm264_vm0, %v766_v4  ;;  %715 = vst.msk [vmem:[#allocation2 + $0xb8] sm:$0xff] %vm264_vm0, %v682_v7  ;;  %v783_v19 = vadd.f32 %v1246_v45, %v744_v17  ;;  %v327_v61 = vld [vmem:[#allocation2 + $0xf0] sm:$0xff]  ;;  %v309_v62 = vld [vmem:[#allocation2 + $0x60] sm:$0xff] }
  0xf6   : > { %697 = vst.msk [vmem:[#allocation2 + $0x28] sm:$0xff] %vm264_vm0, %v664_v8  ;;  %814 = vst.msk [vmem:[%s1251_s29 + $0x80] sm:$0xff] %vm264_vm0, %v782_v10  ;;  %v1017_v22 = vpop.f32.mrb[8].mxu0  ;;  %v325_v0 = vld [vmem:[#allocation2 + $0xe0] sm:$0xff]  ;;  %v312_v1 = vld [vmem:[#allocation2 + $0x78] sm:$0xff] }
  0xf7   : > { %801 = vst.msk [vmem:[%s1251_s29 + $0x18] sm:$0xff] %vm264_vm0, %v769_v11  ;;  %713 = vst.msk [vmem:[#allocation2 + $0xa8] sm:$0xff] %vm264_vm0, %v680_v14  ;;  %v669_v25 = vadd.f32 %v1017_v22, %v307_v18  ;;  %v1033_v26 = vpop.f32.mrb[8].mxu1  ;;  %v564_v27 = vpop.f32.mrb[9].mxu0  ;;  %v328_v5 = vld [vmem:[#allocation2 + $0xf8] sm:$0xff]  ;;  %v310_v6 = vld [vmem:[#allocation2 + $0x68] sm:$0xff] }
  0xf8   : > { %817 = vst.msk [vmem:[%s1251_s29 + $0x98] sm:$0xff] %vm264_vm0, %v785_v15  ;;  %799 = vst.msk [vmem:[%s1251_s29 + $0x8] sm:$0xff] %vm264_vm0, %v767_v16  ;;  %v733_v30 = vld [vmem:[#allocation2 + $0x30] sm:$0xff]  ;;  %v685_v31 = vadd.f32 %v1033_v26, %v323_v20  ;;  %v667_v32 = vadd.f32 %v564_v27, %v305_v21  ;;  %v628_v33 = vpop.f32.mrb[9].mxu1  ;;  %v1018_v34 = vpop.f32.mrb[10].mxu0  ;;  %v326_v12 = vld [vmem:[#allocation2 + $0xe8] sm:$0xff] }
  0xf9   : > { %815 = vst.msk [vmem:[%s1251_s29 + $0x88] sm:$0xff] %vm264_vm0, %v783_v19  ;;  %v772_v36 = vadd.f32 %v1246_v45, %v733_v30  ;;  %v749_v37 = vld [vmem:[#allocation2 + $0xb0] sm:$0xff]  ;;  %v731_v38 = vld [vmem:[#allocation2 + $0x20] sm:$0xff]  ;;  %702 = vst.msk [vmem:[#allocation2 + $0x50] sm:$0xff] %vm264_vm0, %v669_v25  ;;  %v683_v39 = vadd.f32 %v628_v33, %v321_v23  ;;  %v670_v40 = vadd.f32 %v1018_v34, %v308_v24  ;;  %v1034_v41 = vpop.f32.mrb[10].mxu1  ;;  %v567_v42 = vpop.f32.mrb[11].mxu0 }
  0xfa   : > { %v788_v43 = vadd.f32 %v1246_v45, %v749_v37  ;;  %v770_v44 = vadd.f32 %v1246_v45, %v731_v38  ;;  %v747_v46 = vld [vmem:[#allocation2 + $0xa0] sm:$0xff]  ;;  %718 = vst.msk [vmem:[#allocation2 + $0xd0] sm:$0xff] %vm264_vm0, %v685_v31  ;;  %700 = vst.msk [vmem:[#allocation2 + $0x40] sm:$0xff] %vm264_vm0, %v667_v32  ;;  %v686_v48 = vadd.f32 %v1034_v41, %v324_v28  ;;  %v631_v50 = vpop.f32.mrb[11].mxu1 }
  0xfb   : > { %v734_v47 = vld [vmem:[#allocation2 + $0x38] sm:$0xff]  ;;  %v668_v49 = vadd.f32 %v567_v42, %v306_v29  ;;  %804 = vst.msk [vmem:[%s1251_s29 + $0x30] sm:$0xff] %vm264_vm0, %v772_v36  ;;  %v786_v51 = vadd.f32 %v1246_v45, %v747_v46  ;;  %716 = vst.msk [vmem:[#allocation2 + $0xc0] sm:$0xff] %vm264_vm0, %v683_v39  ;;  %v684_v55 = vadd.f32 %v631_v50, %v322_v35 }
  0xfc   : > { %v773_v52 = vadd.f32 %v1246_v45, %v734_v47  ;;  %v750_v53 = vld [vmem:[#allocation2 + $0xb8] sm:$0xff]  ;;  %703 = vst.msk [vmem:[#allocation2 + $0x58] sm:$0xff] %vm264_vm0, %v670_v40  ;;  %820 = vst.msk [vmem:[%s1251_s29 + $0xb0] sm:$0xff] %vm264_vm0, %v788_v43 }
  0xfd   : > { %v732_v54 = vld [vmem:[#allocation2 + $0x28] sm:$0xff]  ;;  %802 = vst.msk [vmem:[%s1251_s29 + $0x20] sm:$0xff] %vm264_vm0, %v770_v44  ;;  %v789_v56 = vadd.f32 %v1246_v45, %v750_v53  ;;  %719 = vst.msk [vmem:[#allocation2 + $0xd8] sm:$0xff] %vm264_vm0, %v686_v48 }
  0xfe   : > { %v771_v57 = vadd.f32 %v1246_v45, %v732_v54  ;;  %v748_v58 = vld [vmem:[#allocation2 + $0xa8] sm:$0xff]  ;;  %701 = vst.msk [vmem:[#allocation2 + $0x48] sm:$0xff] %vm264_vm0, %v668_v49  ;;  %818 = vst.msk [vmem:[%s1251_s29 + $0xa0] sm:$0xff] %vm264_vm0, %v786_v51  ;;  %v1021_v63 = vpop.f32.mrb[12].mxu0 }
  0xff   : > { %805 = vst.msk [vmem:[%s1251_s29 + $0x38] sm:$0xff] %vm264_vm0, %v773_v52  ;;  %v787_v60 = vadd.f32 %v1246_v45, %v748_v58  ;;  %717 = vst.msk [vmem:[#allocation2 + $0xc8] sm:$0xff] %vm264_vm0, %v684_v55  ;;  %v673_v2 = vadd.f32 %v1021_v63, %v311_v59  ;;  %v1037_v3 = vpop.f32.mrb[12].mxu1  ;;  %v580_v4 = vpop.f32.mrb[13].mxu0 }
 0x100   : > { %821 = vst.msk [vmem:[%s1251_s29 + $0xb8] sm:$0xff] %vm264_vm0, %v789_v56  ;;  %803 = vst.msk [vmem:[%s1251_s29 + $0x28] sm:$0xff] %vm264_vm0, %v771_v57  ;;  %v737_v7 = vld [vmem:[#allocation2 + $0x50] sm:$0xff]  ;;  %v689_v8 = vadd.f32 %v1037_v3, %v327_v61  ;;  %v671_v9 = vadd.f32 %v580_v4, %v309_v62  ;;  %v644_v10 = vpop.f32.mrb[13].mxu1  ;;  %v1022_v11 = vpop.f32.mrb[14].mxu0 }
 0x101   : > { %819 = vst.msk [vmem:[%s1251_s29 + $0xa8] sm:$0xff] %vm264_vm0, %v787_v60  ;;  %v776_v13 = vadd.f32 %v1246_v45, %v737_v7  ;;  %v753_v14 = vld [vmem:[#allocation2 + $0xd0] sm:$0xff]  ;;  %v735_v15 = vld [vmem:[#allocation2 + $0x40] sm:$0xff]  ;;  %706 = vst.msk [vmem:[#allocation2 + $0x70] sm:$0xff] %vm264_vm0, %v673_v2  ;;  %v687_v16 = vadd.f32 %v644_v10, %v325_v0  ;;  %v674_v17 = vadd.f32 %v1022_v11, %v312_v1  ;;  %v1038_v18 = vpop.f32.mrb[14].mxu1  ;;  %v583_v19 = vpop.f32.mrb[15].mxu0 }
 0x102   : > { %v792_v20 = vadd.f32 %v1246_v45, %v753_v14  ;;  %v774_v21 = vadd.f32 %v1246_v45, %v735_v15  ;;  %v751_v22 = vld [vmem:[#allocation2 + $0xc0] sm:$0xff]  ;;  %722 = vst.msk [vmem:[#allocation2 + $0xf0] sm:$0xff] %vm264_vm0, %v689_v8  ;;  %704 = vst.msk [vmem:[#allocation2 + $0x60] sm:$0xff] %vm264_vm0, %v671_v9  ;;  %v690_v24 = vadd.f32 %v1038_v18, %v328_v5  ;;  %v647_v26 = vpop.f32.mrb[15].mxu1 }
 0x103   : > { %v738_v23 = vld [vmem:[#allocation2 + $0x58] sm:$0xff]  ;;  %v672_v25 = vadd.f32 %v583_v19, %v310_v6  ;;  %808 = vst.msk [vmem:[%s1251_s29 + $0x50] sm:$0xff] %vm264_vm0, %v776_v13  ;;  %v790_v27 = vadd.f32 %v1246_v45, %v751_v22  ;;  %720 = vst.msk [vmem:[#allocation2 + $0xe0] sm:$0xff] %vm264_vm0, %v687_v16  ;;  %v688_v31 = vadd.f32 %v647_v26, %v326_v12 }
 0x104   : > { %v777_v28 = vadd.f32 %v1246_v45, %v738_v23  ;;  %v754_v29 = vld [vmem:[#allocation2 + $0xd8] sm:$0xff]  ;;  %707 = vst.msk [vmem:[#allocation2 + $0x78] sm:$0xff] %vm264_vm0, %v674_v17  ;;  %824 = vst.msk [vmem:[%s1251_s29 + $0xd0] sm:$0xff] %vm264_vm0, %v792_v20 }
 0x105   : > { %v736_v30 = vld [vmem:[#allocation2 + $0x48] sm:$0xff]  ;;  %806 = vst.msk [vmem:[%s1251_s29 + $0x40] sm:$0xff] %vm264_vm0, %v774_v21  ;;  %v793_v32 = vadd.f32 %v1246_v45, %v754_v29  ;;  %723 = vst.msk [vmem:[#allocation2 + $0xf8] sm:$0xff] %vm264_vm0, %v690_v24 }
 0x106   : > { %v775_v33 = vadd.f32 %v1246_v45, %v736_v30  ;;  %v752_v34 = vld [vmem:[#allocation2 + $0xc8] sm:$0xff]  ;;  %705 = vst.msk [vmem:[#allocation2 + $0x68] sm:$0xff] %vm264_vm0, %v672_v25  ;;  %822 = vst.msk [vmem:[%s1251_s29 + $0xc0] sm:$0xff] %vm264_vm0, %v790_v27 }
 0x107   : > { %809 = vst.msk [vmem:[%s1251_s29 + $0x58] sm:$0xff] %vm264_vm0, %v777_v28  ;;  %v791_v35 = vadd.f32 %v1246_v45, %v752_v34  ;;  %721 = vst.msk [vmem:[#allocation2 + $0xe8] sm:$0xff] %vm264_vm0, %v688_v31 }
 0x108   : > { %825 = vst.msk [vmem:[%s1251_s29 + $0xd8] sm:$0xff] %vm264_vm0, %v793_v32  ;;  %807 = vst.msk [vmem:[%s1251_s29 + $0x48] sm:$0xff] %vm264_vm0, %v775_v33  ;;  %v741_v36 = vld [vmem:[#allocation2 + $0x70] sm:$0xff] }
 0x109   : > { %823 = vst.msk [vmem:[%s1251_s29 + $0xc8] sm:$0xff] %vm264_vm0, %v791_v35  ;;  %v780_v37 = vadd.f32 %v1246_v45, %v741_v36  ;;  %v757_v38 = vld [vmem:[#allocation2 + $0xf0] sm:$0xff]  ;;  %v739_v39 = vld [vmem:[#allocation2 + $0x60] sm:$0xff] }
 0x10a   : > { %v796_v40 = vadd.f32 %v1246_v45, %v757_v38  ;;  %v778_v41 = vadd.f32 %v1246_v45, %v739_v39  ;;  %v755_v42 = vld [vmem:[#allocation2 + $0xe0] sm:$0xff] }
 0x10b   : > { %v742_v43 = vld [vmem:[#allocation2 + $0x78] sm:$0xff]  ;;  %812 = vst.msk [vmem:[%s1251_s29 + $0x70] sm:$0xff] %vm264_vm0, %v780_v37  ;;  %v794_v44 = vadd.f32 %v1246_v45, %v755_v42 }
 0x10c   : > { %v781_v46 = vadd.f32 %v1246_v45, %v742_v43  ;;  %v758_v47 = vld [vmem:[#allocation2 + $0xf8] sm:$0xff]  ;;  %828 = vst.msk [vmem:[%s1251_s29 + $0xf0] sm:$0xff] %vm264_vm0, %v796_v40  ;;  %810 = vst.msk [vmem:[%s1251_s29 + $0x60] sm:$0xff] %vm264_vm0, %v778_v41 }
 0x10d   : > { %v740_v48 = vld [vmem:[#allocation2 + $0x68] sm:$0xff]  ;;  %v797_v49 = vadd.f32 %v1246_v45, %v758_v47  ;;  %826 = vst.msk [vmem:[%s1251_s29 + $0xe0] sm:$0xff] %vm264_vm0, %v794_v44 }
 0x10e   : > { %v779_v50 = vadd.f32 %v1246_v45, %v740_v48  ;;  %v756_v51 = vld [vmem:[#allocation2 + $0xe8] sm:$0xff]  ;;  %813 = vst.msk [vmem:[%s1251_s29 + $0x78] sm:$0xff] %vm264_vm0, %v781_v46 }
 0x10f   : > { %v795_v52 = vadd.f32 %v1246_v45, %v756_v51  ;;  %829 = vst.msk [vmem:[%s1251_s29 + $0xf8] sm:$0xff] %vm264_vm0, %v797_v49 }
 0x110   : > { %811 = vst.msk [vmem:[%s1251_s29 + $0x68] sm:$0xff] %vm264_vm0, %v779_v50 }
 0x111   : > { %827 = vst.msk [vmem:[%s1251_s29 + $0xe8] sm:$0xff] %vm264_vm0, %v795_v52 }
 0x112 PF: > { %s13_s14 = sadd.s32 1, %s1105_s14   ;;  %s1387_s12 = smov %s1101_s13 }
 0x113   : > { %p10_p5 = scmp.ge.s32.totalorder %s13_s14, 4   ;;  %s1388_s13 = smov %s1390_s15 }
 0x115   :  { %12 = sbr.rel (!%p10_p5) target bundleno = 2 (0x2), region = 76 }

// kernel: _lambda_.55
= control target key start
LH: loop header
LB: loop body
LE: loop exit
PB: predicated region body
PF: predicated region fallthrough
CT: control target
= control target key end

     0   :  { %s1143_s12 = smov 0   ;;  %s1145_s13 = smov 0   ;;  %s1387_s0 = inlined_call_operand.vmem [shape: bf16[512,32], index: 0, kind: input, shape index: {}]   ;;  %s1388_s1 = inlined_call_operand.vmem [shape: bf16[32,16], index: 1, kind: input, shape index: {}]   ;;  %s1389_s2 = inlined_call_operand.vmem [shape: f32[1,16], index: 2, kind: input, shape index: {}]   ;;  %s1390_s3 = inlined_call_operand.vmem [shape: f32[512,16], index: 3, kind: output, shape index: {}]  }
   0x1   :  { %s1147_s14 = smov 0  }
   0x2 LB: > { %s32_s15 = sadd.s32 1, %s1116_s13  ;;  %p955_p0 = scmp.ge.s32.totalorder %s1120_s14, 1  ;;  %s1120_s14 = sphi %s1147_s14, %s13_s14   ;;  %s1116_s13 = sphi %s1145_s13, %s1392_s13   ;;  %s1112_s12 = sphi %s1143_s12, %s1391_s12  }
   0x3   : > { %p34_p1 = scmp.ge.s32.totalorder %s32_s15, 2  ;;  %p188_p2 = scmp.lt.s32.totalorder %s1120_s14, 3 }
   0x5   : > { %s1394_s15 = smov (%p34_p1, %s32_s15), 0  ;;  %p189_p3 = pnand %p955_p0, %p188_p2 }
   0x6   : > { %v1080_v0 = vld [vmem:[%s1388_s1] sm:$0xff] (!%p189_p3)   ;;  %s956_s18 = sshll.u32 (!%p189_p3), %s1112_s12, 5  ;;  %v1081_v1 = vld [vmem:[%s1388_s1 + $0x8] sm:$0xff] (!%p189_p3)   ;;  %vm264_vm0 = vcmask (!%p189_p3), 130048   ;;  %v1122_v2 = vmov (!%p189_p3), 0.0   ;;  %vm457_vm1 = vcmask (!%p189_p3), 261120  }
   0x7   : > { %192 = sbr.rel (%p189_p3) target bundleno = 274 (0x112), region = 32  ;;  %p230_p4 = scmp.lt.s32.totalorder (!%p189_p3), %s956_s18, 63  ;;  %1015 = vmatprep.subr.bf16.mxu0 (!%p189_p3), %v1080_v0  ;;  %1051 = vmatprep.subr.bf16.mxu1 (!%p189_p3), %v1080_v0  ;;  %267 = vst.msk [vmem:[#allocation2 + $0x10] sm:$0xff] (!%p189_p3), %vm264_vm0, %v1122_v2  ;;  %265 = vst.msk [vmem:[#allocation2] sm:$0xff] (!%p189_p3), %vm264_vm0, %v1122_v2  ;;  %v1251_v46 = vld [vmem:[%s1389_s2] ss:$0 sm:$0xff] (!%p189_p3) }
   0x8   : > { %1016 = vmatpush3.bf16.msra.mxu0 (!%p189_p3), %v1080_v0  ;;  %1053 = vmatpush3.bf16.msra.mxu1 (!%p189_p3), %v1080_v0  ;;  %266 = vst.msk [vmem:[#allocation2 + $0x8] sm:$0xff] (!%p189_p3), %vm264_vm0, %v1122_v2  ;;  %268 = vst.msk [vmem:[#allocation2 + $0x18] sm:$0xff] (!%p189_p3), %vm264_vm0, %v1122_v2 }
   0x9   : > { %269 = vst.msk [vmem:[#allocation2 + $0x20] sm:$0xff] (!%p189_p3), %vm264_vm0, %v1122_v2  ;;  %270 = vst.msk [vmem:[#allocation2 + $0x28] sm:$0xff] (!%p189_p3), %vm264_vm0, %v1122_v2  ;;  %1017 = vmatprep.subr.bf16.mxu0 (!%p189_p3), %v1081_v1  ;;  %1052 = vmatprep.subr.bf16.mxu1 (!%p189_p3), %v1081_v1 }
   0xa   : > { %271 = vst.msk [vmem:[#allocation2 + $0x30] sm:$0xff] (!%p189_p3), %vm264_vm0, %v1122_v2  ;;  %272 = vst.msk [vmem:[#allocation2 + $0x38] sm:$0xff] (!%p189_p3), %vm264_vm0, %v1122_v2 }
   0xb   : > { %273 = vst.msk [vmem:[#allocation2 + $0x40] sm:$0xff] (!%p189_p3), %vm264_vm0, %v1122_v2  ;;  %274 = vst.msk [vmem:[#allocation2 + $0x48] sm:$0xff] (!%p189_p3), %vm264_vm0, %v1122_v2 }
   0xc   : > { %275 = vst.msk [vmem:[#allocation2 + $0x50] sm:$0xff] (!%p189_p3), %vm264_vm0, %v1122_v2  ;;  %276 = vst.msk [vmem:[#allocation2 + $0x58] sm:$0xff] (!%p189_p3), %vm264_vm0, %v1122_v2  ;;  %1018 = vmatpush3.bf16.msra.mxu0 (!%p189_p3), %v1081_v1  ;;  %1054 = vmatpush3.bf16.msra.mxu1 (!%p189_p3), %v1081_v1 }
   0xd   : > { %277 = vst.msk [vmem:[#allocation2 + $0x60] sm:$0xff] (!%p189_p3), %vm264_vm0, %v1122_v2  ;;  %278 = vst.msk [vmem:[#allocation2 + $0x68] sm:$0xff] (!%p189_p3), %vm264_vm0, %v1122_v2 }
   0xe   : > { %s1396_s18 = smov (!%p230_p4, %s956_s18), 63  ;;  %279 = vst.msk [vmem:[#allocation2 + $0x70] sm:$0xff] %vm264_vm0, %v1122_v2  ;;  %280 = vst.msk [vmem:[#allocation2 + $0x78] sm:$0xff] %vm264_vm0, %v1122_v2  ;;  %v299_v19 = vld [vmem:[#allocation2 + $0x10] sm:$0xff]  ;;  %v297_v21 = vld [vmem:[#allocation2] sm:$0xff] }
   0xf   : > { %281 = vst.msk [vmem:[#allocation2 + $0x80] sm:$0xff] %vm264_vm0, %v1122_v2  ;;  %282 = vst.msk [vmem:[#allocation2 + $0x88] sm:$0xff] %vm264_vm0, %v1122_v2  ;;  %s957_s21 = sshll.u32 %s1396_s18, 2  ;;  %v300_v24 = vld [vmem:[#allocation2 + $0x18] sm:$0xff]  ;;  %v298_v29 = vld [vmem:[#allocation2 + $0x8] sm:$0xff]  ;;  %s959_s25 = sshll.u32 %s1396_s18, 3 }
  0x10   : > { %283 = vst.msk [vmem:[#allocation2 + $0x90] sm:$0xff] %vm264_vm0, %v1122_v2  ;;  %284 = vst.msk [vmem:[#allocation2 + $0x98] sm:$0xff] %vm264_vm0, %v1122_v2  ;;  %s1205_s24 = scalar_lea.vmem %s1387_s0, %s957_s21  ;;  %v301_v45 = vld [vmem:[#allocation2 + $0x20] sm:$0xff]  ;;  %v302_v54 = vld [vmem:[#allocation2 + $0x28] sm:$0xff]  ;;  %s1256_s30 = scalar_lea.vmem %s1390_s3, %s959_s25 }
  0x11   : > { %285 = vst.msk [vmem:[#allocation2 + $0xa0] sm:$0xff] %vm264_vm0, %v1122_v2  ;;  %286 = vst.msk [vmem:[#allocation2 + $0xa8] sm:$0xff] %vm264_vm0, %v1122_v2  ;;  %v1082_v3 = vld [vmem:[%s1205_s24] sm:$0xff]   ;;  %v1084_v5 = vld [vmem:[%s1205_s24 + $0x8] sm:$0xff]  }
  0x12   : > { %287 = vst.msk [vmem:[#allocation2 + $0xb0] sm:$0xff] %vm264_vm0, %v1122_v2  ;;  %288 = vst.msk [vmem:[#allocation2 + $0xb8] sm:$0xff] %vm264_vm0, %v1122_v2  ;;  %v1083_v4 = vld [vmem:[%s1205_s24 + $0x40] sm:$0xff]   ;;  %1019 = vmatprep.mubr.msk.bf16.mxu0 %vm457_vm1, %v1082_v3  ;;  %v1085_v6 = vld [vmem:[%s1205_s24 + $0x48] sm:$0xff]  }
  0x13   : > { %289 = vst.msk [vmem:[#allocation2 + $0xc0] sm:$0xff] %vm264_vm0, %v1122_v2  ;;  %290 = vst.msk [vmem:[#allocation2 + $0xc8] sm:$0xff] %vm264_vm0, %v1122_v2  ;;  %1035 = vmatprep.mubr.msk.bf16.mxu1 %vm457_vm1, %v1083_v4  ;;  %1020 = vmatmul.mubr.msk.bf16.vlgmr.msra.gmra.mrb[0].mxu0 %vm457_vm1, %v1084_v5  ;;  %v1086_v7 = vld [vmem:[%s1205_s24 + $0x10] sm:$0xff]   ;;  %v1088_v9 = vld [vmem:[%s1205_s24 + $0x18] sm:$0xff]  }
  0x14   : > { %291 = vst.msk [vmem:[#allocation2 + $0xd0] sm:$0xff] %vm264_vm0, %v1122_v2  ;;  %292 = vst.msk [vmem:[#allocation2 + $0xd8] sm:$0xff] %vm264_vm0, %v1122_v2  ;;  %1036 = vmatmul.mubr.msk.bf16.vlgmr.msra.gmra.mrb[0].mxu1 %vm457_vm1, %v1085_v6  ;;  %v1087_v8 = vld [vmem:[%s1205_s24 + $0x50] sm:$0xff]   ;;  %1023 = vmatprep.mubr.msk.bf16.mxu0 %vm457_vm1, %v1086_v7  ;;  %v1089_v10 = vld [vmem:[%s1205_s24 + $0x58] sm:$0xff]  }
  0x15   : > { %293 = vst.msk [vmem:[#allocation2 + $0xe0] sm:$0xff] %vm264_vm0, %v1122_v2  ;;  %294 = vst.msk [vmem:[#allocation2 + $0xe8] sm:$0xff] %vm264_vm0, %v1122_v2  ;;  %1039 = vmatprep.mubr.msk.bf16.mxu1 %vm457_vm1, %v1087_v8  ;;  %v1090_v11 = vld [vmem:[%s1205_s24 + $0x20] sm:$0xff]   ;;  %v1092_v13 = vld [vmem:[%s1205_s24 + $0x28] sm:$0xff]  }
  0x16   : > { %295 = vst.msk [vmem:[#allocation2 + $0xf0] sm:$0xff] %vm264_vm0, %v1122_v2  ;;  %296 = vst.msk [vmem:[#allocation2 + $0xf8] sm:$0xff] %vm264_vm0, %v1122_v2  ;;  %v1091_v12 = vld [vmem:[%s1205_s24 + $0x60] sm:$0xff]   ;;  %v1093_v14 = vld [vmem:[%s1205_s24 + $0x68] sm:$0xff]  }
  0x17   : > { %v1094_v15 = vld [vmem:[%s1205_s24 + $0x30] sm:$0xff]   ;;  %v1096_v17 = vld [vmem:[%s1205_s24 + $0x38] sm:$0xff]   ;;  %v313_v23 = vld [vmem:[#allocation2 + $0x80] sm:$0xff] }
  0x18   : > { %v1095_v16 = vld [vmem:[%s1205_s24 + $0x70] sm:$0xff]   ;;  %v1097_v18 = vld [vmem:[%s1205_s24 + $0x78] sm:$0xff]   ;;  %v314_v34 = vld [vmem:[#allocation2 + $0x88] sm:$0xff] }
  0x19   : > { %v315_v20 = vld [vmem:[#allocation2 + $0x90] sm:$0xff]  ;;  %v316_v28 = vld [vmem:[#allocation2 + $0x98] sm:$0xff]  ;;  %v317_v48 = vld [vmem:[#allocation2 + $0xa0] sm:$0xff] }
  0x1a   : > { %v303_v43 = vld [vmem:[#allocation2 + $0x30] sm:$0xff]  ;;  %v304_v49 = vld [vmem:[#allocation2 + $0x38] sm:$0xff]  ;;  %v318_v60 = vld [vmem:[#allocation2 + $0xa8] sm:$0xff] }
  0x1b   : > { %1024 = vmatmul.mubr.msk.bf16.gmra.mrb[4].mxu0 %vm457_vm1, %v1088_v9  ;;  %v319_v44 = vld [vmem:[#allocation2 + $0xb0] sm:$0xff]  ;;  %v320_v53 = vld [vmem:[#allocation2 + $0xb8] sm:$0xff] }
  0x1c   : > { %1040 = vmatmul.mubr.msk.bf16.gmra.mrb[4].mxu1 %vm457_vm1, %v1089_v10  ;;  %1027 = vmatprep.mubr.msk.bf16.mxu0 %vm457_vm1, %v1090_v11 }
  0x1d   : > { %1043 = vmatprep.mubr.msk.bf16.mxu1 %vm457_vm1, %v1091_v12 }
  0x23   : > { %1028 = vmatmul.mubr.msk.bf16.gmra.mrb[8].mxu0 %vm457_vm1, %v1092_v13 }
  0x24   : > { %1044 = vmatmul.mubr.msk.bf16.gmra.mrb[8].mxu1 %vm457_vm1, %v1093_v14  ;;  %1031 = vmatprep.mubr.msk.bf16.mxu0 %vm457_vm1, %v1094_v15 }
  0x25   : > { %1047 = vmatprep.mubr.msk.bf16.mxu1 %vm457_vm1, %v1095_v16 }
  0x2b   : > { %1032 = vmatmul.mubr.msk.bf16.gmra.mrb[12].mxu0 %vm457_vm1, %v1096_v17 }
  0x2c   : > { %1048 = vmatmul.mubr.msk.bf16.gmra.mrb[12].mxu1 %vm457_vm1, %v1097_v18 }
  0xe6   : > { %v1021_v22 = vpop.f32.mrb[0].mxu0 }
  0xe7   : > { %v669_v25 = vadd.f32 %v1021_v22, %v299_v19  ;;  %v1037_v26 = vpop.f32.mrb[0].mxu1  ;;  %v540_v27 = vpop.f32.mrb[1].mxu0  ;;  %v307_v19 = vld [vmem:[#allocation2 + $0x50] sm:$0xff]  ;;  %v305_v22 = vld [vmem:[#allocation2 + $0x40] sm:$0xff] }
  0xe8   : > { %v685_v30 = vadd.f32 %v1037_v26, %v315_v20  ;;  %v667_v31 = vadd.f32 %v540_v27, %v297_v21  ;;  %v604_v32 = vpop.f32.mrb[1].mxu1  ;;  %v1022_v33 = vpop.f32.mrb[2].mxu0  ;;  %v323_v21 = vld [vmem:[#allocation2 + $0xd0] sm:$0xff] }
  0xe9   : > { %702 = vst.msk [vmem:[#allocation2 + $0x10] sm:$0xff] %vm264_vm0, %v669_v25  ;;  %v683_v35 = vadd.f32 %v604_v32, %v313_v23  ;;  %v670_v36 = vadd.f32 %v1022_v33, %v300_v24  ;;  %v1038_v37 = vpop.f32.mrb[2].mxu1  ;;  %v543_v38 = vpop.f32.mrb[3].mxu0  ;;  %v321_v24 = vld [vmem:[#allocation2 + $0xc0] sm:$0xff]  ;;  %v308_v25 = vld [vmem:[#allocation2 + $0x58] sm:$0xff] }
  0xea   : > { %718 = vst.msk [vmem:[#allocation2 + $0x90] sm:$0xff] %vm264_vm0, %v685_v30  ;;  %700 = vst.msk [vmem:[#allocation2] sm:$0xff] %vm264_vm0, %v667_v31  ;;  %v686_v39 = vadd.f32 %v1038_v37, %v316_v28  ;;  %v668_v40 = vadd.f32 %v543_v38, %v298_v29  ;;  %v607_v41 = vpop.f32.mrb[3].mxu1  ;;  %v324_v29 = vld [vmem:[#allocation2 + $0xd8] sm:$0xff]  ;;  %v306_v30 = vld [vmem:[#allocation2 + $0x48] sm:$0xff] }
  0xeb   : > { %716 = vst.msk [vmem:[#allocation2 + $0x80] sm:$0xff] %vm264_vm0, %v683_v35  ;;  %703 = vst.msk [vmem:[#allocation2 + $0x18] sm:$0xff] %vm264_vm0, %v670_v36  ;;  %v684_v42 = vadd.f32 %v607_v41, %v314_v34  ;;  %v322_v36 = vld [vmem:[#allocation2 + $0xc8] sm:$0xff] }
  0xec   : > { %719 = vst.msk [vmem:[#allocation2 + $0x98] sm:$0xff] %vm264_vm0, %v686_v39  ;;  %701 = vst.msk [vmem:[#allocation2 + $0x8] sm:$0xff] %vm264_vm0, %v668_v40 }
  0xed   : > { %717 = vst.msk [vmem:[#allocation2 + $0x88] sm:$0xff] %vm264_vm0, %v684_v42 }
  0xee   : > { %v1025_v47 = vpop.f32.mrb[4].mxu0 }
  0xef   : > { %v673_v50 = vadd.f32 %v1025_v47, %v303_v43  ;;  %v1041_v51 = vpop.f32.mrb[4].mxu1  ;;  %v556_v52 = vpop.f32.mrb[5].mxu0 }
  0xf0   : > { %v737_v55 = vld [vmem:[#allocation2 + $0x10] sm:$0xff]  ;;  %v689_v56 = vadd.f32 %v1041_v51, %v319_v44  ;;  %v671_v57 = vadd.f32 %v556_v52, %v301_v45  ;;  %v620_v58 = vpop.f32.mrb[5].mxu1  ;;  %v1026_v59 = vpop.f32.mrb[6].mxu0 }
  0xf1   : > { %v776_v61 = vadd.f32 %v1251_v46, %v737_v55  ;;  %v753_v62 = vld [vmem:[#allocation2 + $0x90] sm:$0xff]  ;;  %v735_v63 = vld [vmem:[#allocation2] sm:$0xff]  ;;  %706 = vst.msk [vmem:[#allocation2 + $0x30] sm:$0xff] %vm264_vm0, %v673_v50  ;;  %v687_v0 = vadd.f32 %v620_v58, %v317_v48  ;;  %v674_v1 = vadd.f32 %v1026_v59, %v304_v49  ;;  %v1042_v2 = vpop.f32.mrb[6].mxu1  ;;  %v559_v3 = vpop.f32.mrb[7].mxu0 }
  0xf2   : > { %v792_v4 = vadd.f32 %v1251_v46, %v753_v62  ;;  %v774_v5 = vadd.f32 %v1251_v46, %v735_v63  ;;  %v751_v6 = vld [vmem:[#allocation2 + $0x80] sm:$0xff]  ;;  %v738_v7 = vld [vmem:[#allocation2 + $0x18] sm:$0xff]  ;;  %722 = vst.msk [vmem:[#allocation2 + $0xb0] sm:$0xff] %vm264_vm0, %v689_v56  ;;  %704 = vst.msk [vmem:[#allocation2 + $0x20] sm:$0xff] %vm264_vm0, %v671_v57  ;;  %v690_v8 = vadd.f32 %v1042_v2, %v320_v53  ;;  %v623_v10 = vpop.f32.mrb[7].mxu1 }
  0xf3   : > { %v672_v9 = vadd.f32 %v559_v3, %v302_v54  ;;  %808 = vst.msk [vmem:[%s1256_s30 + $0x10] sm:$0xff] %vm264_vm0, %v776_v61  ;;  %v790_v11 = vadd.f32 %v1251_v46, %v751_v6  ;;  %v777_v12 = vadd.f32 %v1251_v46, %v738_v7  ;;  %v754_v13 = vld [vmem:[#allocation2 + $0x98] sm:$0xff]  ;;  %v736_v14 = vld [vmem:[#allocation2 + $0x8] sm:$0xff]  ;;  %720 = vst.msk [vmem:[#allocation2 + $0xa0] sm:$0xff] %vm264_vm0, %v687_v0 }
  0xf4   : > { %707 = vst.msk [vmem:[#allocation2 + $0x38] sm:$0xff] %vm264_vm0, %v674_v1  ;;  %v688_v15 = vadd.f32 %v623_v10, %v318_v60  ;;  %824 = vst.msk [vmem:[%s1256_s30 + $0x90] sm:$0xff] %vm264_vm0, %v792_v4  ;;  %v793_v16 = vadd.f32 %v1251_v46, %v754_v13  ;;  %v775_v17 = vadd.f32 %v1251_v46, %v736_v14  ;;  %v752_v18 = vld [vmem:[#allocation2 + $0x88] sm:$0xff]  ;;  %v311_v60 = vld [vmem:[#allocation2 + $0x70] sm:$0xff] }
  0xf5   : > { %806 = vst.msk [vmem:[%s1256_s30] sm:$0xff] %vm264_vm0, %v774_v5  ;;  %723 = vst.msk [vmem:[#allocation2 + $0xb8] sm:$0xff] %vm264_vm0, %v690_v8  ;;  %v791_v20 = vadd.f32 %v1251_v46, %v752_v18  ;;  %v327_v62 = vld [vmem:[#allocation2 + $0xf0] sm:$0xff]  ;;  %v309_v63 = vld [vmem:[#allocation2 + $0x60] sm:$0xff] }
  0xf6   : > { %705 = vst.msk [vmem:[#allocation2 + $0x28] sm:$0xff] %vm264_vm0, %v672_v9  ;;  %822 = vst.msk [vmem:[%s1256_s30 + $0x80] sm:$0xff] %vm264_vm0, %v790_v11  ;;  %v1029_v23 = vpop.f32.mrb[8].mxu0  ;;  %v325_v1 = vld [vmem:[#allocation2 + $0xe0] sm:$0xff]  ;;  %v312_v2 = vld [vmem:[#allocation2 + $0x78] sm:$0xff] }
  0xf7   : > { %809 = vst.msk [vmem:[%s1256_s30 + $0x18] sm:$0xff] %vm264_vm0, %v777_v12  ;;  %721 = vst.msk [vmem:[#allocation2 + $0xa8] sm:$0xff] %vm264_vm0, %v688_v15  ;;  %v677_v26 = vadd.f32 %v1029_v23, %v307_v19  ;;  %v1045_v27 = vpop.f32.mrb[8].mxu1  ;;  %v572_v28 = vpop.f32.mrb[9].mxu0  ;;  %v328_v6 = vld [vmem:[#allocation2 + $0xf8] sm:$0xff]  ;;  %v310_v7 = vld [vmem:[#allocation2 + $0x68] sm:$0xff] }
  0xf8   : > { %825 = vst.msk [vmem:[%s1256_s30 + $0x98] sm:$0xff] %vm264_vm0, %v793_v16  ;;  %807 = vst.msk [vmem:[%s1256_s30 + $0x8] sm:$0xff] %vm264_vm0, %v775_v17  ;;  %v741_v31 = vld [vmem:[#allocation2 + $0x30] sm:$0xff]  ;;  %v693_v32 = vadd.f32 %v1045_v27, %v323_v21  ;;  %v675_v33 = vadd.f32 %v572_v28, %v305_v22  ;;  %v636_v34 = vpop.f32.mrb[9].mxu1  ;;  %v1030_v35 = vpop.f32.mrb[10].mxu0  ;;  %v326_v13 = vld [vmem:[#allocation2 + $0xe8] sm:$0xff] }
  0xf9   : > { %823 = vst.msk [vmem:[%s1256_s30 + $0x88] sm:$0xff] %vm264_vm0, %v791_v20  ;;  %v780_v37 = vadd.f32 %v1251_v46, %v741_v31  ;;  %v757_v38 = vld [vmem:[#allocation2 + $0xb0] sm:$0xff]  ;;  %v739_v39 = vld [vmem:[#allocation2 + $0x20] sm:$0xff]  ;;  %710 = vst.msk [vmem:[#allocation2 + $0x50] sm:$0xff] %vm264_vm0, %v677_v26  ;;  %v691_v40 = vadd.f32 %v636_v34, %v321_v24  ;;  %v678_v41 = vadd.f32 %v1030_v35, %v308_v25  ;;  %v1046_v42 = vpop.f32.mrb[10].mxu1  ;;  %v575_v43 = vpop.f32.mrb[11].mxu0 }
  0xfa   : > { %v796_v44 = vadd.f32 %v1251_v46, %v757_v38  ;;  %v778_v45 = vadd.f32 %v1251_v46, %v739_v39  ;;  %v755_v47 = vld [vmem:[#allocation2 + $0xa0] sm:$0xff]  ;;  %726 = vst.msk [vmem:[#allocation2 + $0xd0] sm:$0xff] %vm264_vm0, %v693_v32  ;;  %708 = vst.msk [vmem:[#allocation2 + $0x40] sm:$0xff] %vm264_vm0, %v675_v33  ;;  %v694_v49 = vadd.f32 %v1046_v42, %v324_v29  ;;  %v639_v51 = vpop.f32.mrb[11].mxu1 }
  0xfb   : > { %v742_v48 = vld [vmem:[#allocation2 + $0x38] sm:$0xff]  ;;  %v676_v50 = vadd.f32 %v575_v43, %v306_v30  ;;  %812 = vst.msk [vmem:[%s1256_s30 + $0x30] sm:$0xff] %vm264_vm0, %v780_v37  ;;  %v794_v52 = vadd.f32 %v1251_v46, %v755_v47  ;;  %724 = vst.msk [vmem:[#allocation2 + $0xc0] sm:$0xff] %vm264_vm0, %v691_v40  ;;  %v692_v56 = vadd.f32 %v639_v51, %v322_v36 }
  0xfc   : > { %v781_v53 = vadd.f32 %v1251_v46, %v742_v48  ;;  %v758_v54 = vld [vmem:[#allocation2 + $0xb8] sm:$0xff]  ;;  %711 = vst.msk [vmem:[#allocation2 + $0x58] sm:$0xff] %vm264_vm0, %v678_v41  ;;  %828 = vst.msk [vmem:[%s1256_s30 + $0xb0] sm:$0xff] %vm264_vm0, %v796_v44 }
  0xfd   : > { %v740_v55 = vld [vmem:[#allocation2 + $0x28] sm:$0xff]  ;;  %810 = vst.msk [vmem:[%s1256_s30 + $0x20] sm:$0xff] %vm264_vm0, %v778_v45  ;;  %v797_v57 = vadd.f32 %v1251_v46, %v758_v54  ;;  %727 = vst.msk [vmem:[#allocation2 + $0xd8] sm:$0xff] %vm264_vm0, %v694_v49 }
  0xfe   : > { %v779_v58 = vadd.f32 %v1251_v46, %v740_v55  ;;  %v756_v59 = vld [vmem:[#allocation2 + $0xa8] sm:$0xff]  ;;  %709 = vst.msk [vmem:[#allocation2 + $0x48] sm:$0xff] %vm264_vm0, %v676_v50  ;;  %826 = vst.msk [vmem:[%s1256_s30 + $0xa0] sm:$0xff] %vm264_vm0, %v794_v52  ;;  %v1033_v0 = vpop.f32.mrb[12].mxu0 }
  0xff   : > { %813 = vst.msk [vmem:[%s1256_s30 + $0x38] sm:$0xff] %vm264_vm0, %v781_v53  ;;  %v795_v61 = vadd.f32 %v1251_v46, %v756_v59  ;;  %725 = vst.msk [vmem:[#allocation2 + $0xc8] sm:$0xff] %vm264_vm0, %v692_v56  ;;  %v681_v3 = vadd.f32 %v1033_v0, %v311_v60  ;;  %v1049_v4 = vpop.f32.mrb[12].mxu1  ;;  %v588_v5 = vpop.f32.mrb[13].mxu0 }
 0x100   : > { %829 = vst.msk [vmem:[%s1256_s30 + $0xb8] sm:$0xff] %vm264_vm0, %v797_v57  ;;  %811 = vst.msk [vmem:[%s1256_s30 + $0x28] sm:$0xff] %vm264_vm0, %v779_v58  ;;  %v745_v8 = vld [vmem:[#allocation2 + $0x50] sm:$0xff]  ;;  %v697_v9 = vadd.f32 %v1049_v4, %v327_v62  ;;  %v679_v10 = vadd.f32 %v588_v5, %v309_v63  ;;  %v652_v11 = vpop.f32.mrb[13].mxu1  ;;  %v1034_v12 = vpop.f32.mrb[14].mxu0 }
 0x101   : > { %827 = vst.msk [vmem:[%s1256_s30 + $0xa8] sm:$0xff] %vm264_vm0, %v795_v61  ;;  %v784_v14 = vadd.f32 %v1251_v46, %v745_v8  ;;  %v761_v15 = vld [vmem:[#allocation2 + $0xd0] sm:$0xff]  ;;  %v743_v16 = vld [vmem:[#allocation2 + $0x40] sm:$0xff]  ;;  %714 = vst.msk [vmem:[#allocation2 + $0x70] sm:$0xff] %vm264_vm0, %v681_v3  ;;  %v695_v17 = vadd.f32 %v652_v11, %v325_v1  ;;  %v682_v18 = vadd.f32 %v1034_v12, %v312_v2  ;;  %v1050_v19 = vpop.f32.mrb[14].mxu1  ;;  %v591_v20 = vpop.f32.mrb[15].mxu0 }
 0x102   : > { %v800_v21 = vadd.f32 %v1251_v46, %v761_v15  ;;  %v782_v22 = vadd.f32 %v1251_v46, %v743_v16  ;;  %v759_v23 = vld [vmem:[#allocation2 + $0xc0] sm:$0xff]  ;;  %730 = vst.msk [vmem:[#allocation2 + $0xf0] sm:$0xff] %vm264_vm0, %v697_v9  ;;  %712 = vst.msk [vmem:[#allocation2 + $0x60] sm:$0xff] %vm264_vm0, %v679_v10  ;;  %v698_v25 = vadd.f32 %v1050_v19, %v328_v6  ;;  %v655_v27 = vpop.f32.mrb[15].mxu1 }
 0x103   : > { %v746_v24 = vld [vmem:[#allocation2 + $0x58] sm:$0xff]  ;;  %v680_v26 = vadd.f32 %v591_v20, %v310_v7  ;;  %816 = vst.msk [vmem:[%s1256_s30 + $0x50] sm:$0xff] %vm264_vm0, %v784_v14  ;;  %v798_v28 = vadd.f32 %v1251_v46, %v759_v23  ;;  %728 = vst.msk [vmem:[#allocation2 + $0xe0] sm:$0xff] %vm264_vm0, %v695_v17  ;;  %v696_v32 = vadd.f32 %v655_v27, %v326_v13 }
 0x104   : > { %v785_v29 = vadd.f32 %v1251_v46, %v746_v24  ;;  %v762_v30 = vld [vmem:[#allocation2 + $0xd8] sm:$0xff]  ;;  %715 = vst.msk [vmem:[#allocation2 + $0x78] sm:$0xff] %vm264_vm0, %v682_v18  ;;  %832 = vst.msk [vmem:[%s1256_s30 + $0xd0] sm:$0xff] %vm264_vm0, %v800_v21 }
 0x105   : > { %v744_v31 = vld [vmem:[#allocation2 + $0x48] sm:$0xff]  ;;  %814 = vst.msk [vmem:[%s1256_s30 + $0x40] sm:$0xff] %vm264_vm0, %v782_v22  ;;  %v801_v33 = vadd.f32 %v1251_v46, %v762_v30  ;;  %731 = vst.msk [vmem:[#allocation2 + $0xf8] sm:$0xff] %vm264_vm0, %v698_v25 }
 0x106   : > { %v783_v34 = vadd.f32 %v1251_v46, %v744_v31  ;;  %v760_v35 = vld [vmem:[#allocation2 + $0xc8] sm:$0xff]  ;;  %713 = vst.msk [vmem:[#allocation2 + $0x68] sm:$0xff] %vm264_vm0, %v680_v26  ;;  %830 = vst.msk [vmem:[%s1256_s30 + $0xc0] sm:$0xff] %vm264_vm0, %v798_v28 }
 0x107   : > { %817 = vst.msk [vmem:[%s1256_s30 + $0x58] sm:$0xff] %vm264_vm0, %v785_v29  ;;  %v799_v36 = vadd.f32 %v1251_v46, %v760_v35  ;;  %729 = vst.msk [vmem:[#allocation2 + $0xe8] sm:$0xff] %vm264_vm0, %v696_v32 }
 0x108   : > { %833 = vst.msk [vmem:[%s1256_s30 + $0xd8] sm:$0xff] %vm264_vm0, %v801_v33  ;;  %815 = vst.msk [vmem:[%s1256_s30 + $0x48] sm:$0xff] %vm264_vm0, %v783_v34  ;;  %v749_v37 = vld [vmem:[#allocation2 + $0x70] sm:$0xff] }
 0x109   : > { %831 = vst.msk [vmem:[%s1256_s30 + $0xc8] sm:$0xff] %vm264_vm0, %v799_v36  ;;  %v788_v38 = vadd.f32 %v1251_v46, %v749_v37  ;;  %v765_v39 = vld [vmem:[#allocation2 + $0xf0] sm:$0xff]  ;;  %v747_v40 = vld [vmem:[#allocation2 + $0x60] sm:$0xff] }
 0x10a   : > { %v804_v41 = vadd.f32 %v1251_v46, %v765_v39  ;;  %v786_v42 = vadd.f32 %v1251_v46, %v747_v40  ;;  %v763_v43 = vld [vmem:[#allocation2 + $0xe0] sm:$0xff] }
 0x10b   : > { %v750_v44 = vld [vmem:[#allocation2 + $0x78] sm:$0xff]  ;;  %820 = vst.msk [vmem:[%s1256_s30 + $0x70] sm:$0xff] %vm264_vm0, %v788_v38  ;;  %v802_v45 = vadd.f32 %v1251_v46, %v763_v43 }
 0x10c   : > { %v789_v47 = vadd.f32 %v1251_v46, %v750_v44  ;;  %v766_v48 = vld [vmem:[#allocation2 + $0xf8] sm:$0xff]  ;;  %836 = vst.msk [vmem:[%s1256_s30 + $0xf0] sm:$0xff] %vm264_vm0, %v804_v41  ;;  %818 = vst.msk [vmem:[%s1256_s30 + $0x60] sm:$0xff] %vm264_vm0, %v786_v42 }
 0x10d   : > { %v748_v49 = vld [vmem:[#allocation2 + $0x68] sm:$0xff]  ;;  %v805_v50 = vadd.f32 %v1251_v46, %v766_v48  ;;  %834 = vst.msk [vmem:[%s1256_s30 + $0xe0] sm:$0xff] %vm264_vm0, %v802_v45 }
 0x10e   : > { %v787_v51 = vadd.f32 %v1251_v46, %v748_v49  ;;  %v764_v52 = vld [vmem:[#allocation2 + $0xe8] sm:$0xff]  ;;  %821 = vst.msk [vmem:[%s1256_s30 + $0x78] sm:$0xff] %vm264_vm0, %v789_v47 }
 0x10f   : > { %v803_v53 = vadd.f32 %v1251_v46, %v764_v52  ;;  %837 = vst.msk [vmem:[%s1256_s30 + $0xf8] sm:$0xff] %vm264_vm0, %v805_v50 }
 0x110   : > { %819 = vst.msk [vmem:[%s1256_s30 + $0x68] sm:$0xff] %vm264_vm0, %v787_v51 }
 0x111   : > { %835 = vst.msk [vmem:[%s1256_s30 + $0xe8] sm:$0xff] %vm264_vm0, %v803_v53 }
 0x112 PF: > { %s13_s14 = sadd.s32 1, %s1120_s14   ;;  %s1391_s12 = smov %s1116_s13 }
 0x113   : > { %p10_p5 = scmp.ge.s32.totalorder %s13_s14, 4   ;;  %s1392_s13 = smov %s1394_s15 }
 0x115   :  { %12 = sbr.rel (!%p10_p5) target bundleno = 2 (0x2), region = 76 }

// kernel: _lambda_.66
= control target key start
LH: loop header
LB: loop body
LE: loop exit
PB: predicated region body
PF: predicated region fallthrough
CT: control target
= control target key end

     0   :  { %s1299_s12 = smov 0   ;;  %s1301_s13 = smov 0   ;;  %s1601_s0 = inlined_call_operand.vmem [shape: bf16[512,144], index: 0, kind: input, shape index: {}]   ;;  %s1602_s1 = inlined_call_operand.vmem [shape: bf16[144,16], index: 1, kind: input, shape index: {}]   ;;  %s1603_s2 = inlined_call_operand.vmem [shape: f32[1,16], index: 2, kind: input, shape index: {}]   ;;  %s1604_s3 = inlined_call_operand.vmem [shape: f32[512,16], index: 3, kind: output, shape index: {}]  }
   0x1   :  { %s1303_s14 = smov 0  }
   0x2 LB: > { %s32_s15 = sadd.s32 1, %s1271_s13  ;;  %p1085_p0 = scmp.ge.s32.totalorder %s1275_s14, 1  ;;  %s1275_s14 = sphi %s1303_s14, %s13_s14   ;;  %s1271_s13 = sphi %s1301_s13, %s1606_s13   ;;  %s1267_s12 = sphi %s1299_s12, %s1605_s12  }
   0x3   : > { %p34_p1 = scmp.ge.s32.totalorder %s32_s15, 2  ;;  %p191_p2 = scmp.lt.s32.totalorder %s1275_s14, 3 }
   0x5   : > { %s1608_s15 = smov (%p34_p1, %s32_s15), 0  ;;  %p192_p3 = pnand %p1085_p0, %p191_p2 }
   0x6   : > { %v1196_v0 = vld [vmem:[%s1602_s1] sm:$0xff] (!%p192_p3)   ;;  %v1277_v1 = vmov (!%p192_p3), 0   ;;  %s1086_s18 = sshll.u32 (!%p192_p3), %s1267_s12, 5  ;;  %v1197_v2 = vld [vmem:[%s1602_s1 + $0x8] sm:$0xff] (!%p192_p3)   ;;  %vm272_vm0 = vcmask (!%p192_p3), 130048   ;;  %v1198_v3 = vld [vmem:[%s1602_s1 + $0x10] sm:$0xff] (!%p192_p3)  }
   0x7   : > { %195 = sbr.rel (%p192_p3) target bundleno = 327 (0x147), region = 32  ;;  %634 = vmatprep.subr.bf16.mxu0 (!%p192_p3), %v1277_v1  ;;  %1152 = vmatprep.subr.bf16.mxu1 (!%p192_p3), %v1277_v1  ;;  %p236_p4 = scmp.lt.s32.totalorder (!%p192_p3), %s1086_s18, 63  ;;  %v1278_v4 = vmov (!%p192_p3), 0.0   ;;  %v1199_v5 = vld [vmem:[%s1602_s1 + $0x18] sm:$0xff] (!%p192_p3)   ;;  %v1200_v8 = vld [vmem:[%s1602_s1 + $0x20] sm:$0xff] (!%p192_p3)   ;;  %v1201_v9 = vld [vmem:[%s1602_s1 + $0x28] sm:$0xff] (!%p192_p3)  }
   0x8   : > { %635 = vmatpush1.bf16.msra.mxu0 (!%p192_p3), %v1196_v0  ;;  %1161 = vmatpush1.bf16.msra.mxu1 (!%p192_p3), %v1196_v0  ;;  %273 = vst.msk [vmem:[#allocation2] sm:$0xff] (!%p192_p3), %vm272_vm0, %v1278_v4  ;;  %274 = vst.msk [vmem:[#allocation2 + $0x8] sm:$0xff] (!%p192_p3), %vm272_vm0, %v1278_v4  ;;  %v1202_v10 = vld [vmem:[%s1602_s1 + $0x30] sm:$0xff] (!%p192_p3)   ;;  %v1203_v11 = vld [vmem:[%s1602_s1 + $0x38] sm:$0xff] (!%p192_p3)  }
   0x9   : > { %636 = vmatprep.subr.bf16.mxu0 (!%p192_p3), %v1277_v1  ;;  %1153 = vmatprep.subr.bf16.mxu1 (!%p192_p3), %v1277_v1  ;;  %275 = vst.msk [vmem:[#allocation2 + $0x10] sm:$0xff] (!%p192_p3), %vm272_vm0, %v1278_v4  ;;  %276 = vst.msk [vmem:[#allocation2 + $0x18] sm:$0xff] (!%p192_p3), %vm272_vm0, %v1278_v4  ;;  %v1204_v12 = vld [vmem:[%s1602_s1 + $0x40] sm:$0xff] (!%p192_p3)  }
   0xa   : > { %277 = vst.msk [vmem:[#allocation2 + $0x20] sm:$0xff] (!%p192_p3), %vm272_vm0, %v1278_v4  ;;  %278 = vst.msk [vmem:[#allocation2 + $0x28] sm:$0xff] (!%p192_p3), %vm272_vm0, %v1278_v4  ;;  %v1459_v61 = vld [vmem:[%s1603_s2] ss:$0 sm:$0xff] (!%p192_p3) }
   0xb   : > { %279 = vst.msk [vmem:[#allocation2 + $0x30] sm:$0xff] (!%p192_p3), %vm272_vm0, %v1278_v4  ;;  %280 = vst.msk [vmem:[#allocation2 + $0x38] sm:$0xff] (!%p192_p3), %vm272_vm0, %v1278_v4 }
   0xc   : > { %637 = vmatpush1.bf16.msra.mxu0 (!%p192_p3), %v1197_v2  ;;  %1162 = vmatpush1.bf16.msra.mxu1 (!%p192_p3), %v1197_v2  ;;  %281 = vst.msk [vmem:[#allocation2 + $0x40] sm:$0xff] (!%p192_p3), %vm272_vm0, %v1278_v4  ;;  %282 = vst.msk [vmem:[#allocation2 + $0x48] sm:$0xff] (!%p192_p3), %vm272_vm0, %v1278_v4 }
   0xd   : > { %283 = vst.msk [vmem:[#allocation2 + $0x50] sm:$0xff] (!%p192_p3), %vm272_vm0, %v1278_v4  ;;  %284 = vst.msk [vmem:[#allocation2 + $0x58] sm:$0xff] (!%p192_p3), %vm272_vm0, %v1278_v4  ;;  %638 = vmatprep.subr.bf16.mxu0 (!%p192_p3), %v1277_v1  ;;  %1154 = vmatprep.subr.bf16.mxu1 (!%p192_p3), %v1277_v1 }
   0xe   : > { %s1610_s18 = smov (!%p236_p4, %s1086_s18), 63  ;;  %285 = vst.msk [vmem:[#allocation2 + $0x60] sm:$0xff] %vm272_vm0, %v1278_v4  ;;  %286 = vst.msk [vmem:[#allocation2 + $0x68] sm:$0xff] %vm272_vm0, %v1278_v4 }
   0xf   : > { %s1151_s23 = sshll.u32 %s1610_s18, 3  ;;  %287 = vst.msk [vmem:[#allocation2 + $0x70] sm:$0xff] %vm272_vm0, %v1278_v4  ;;  %288 = vst.msk [vmem:[#allocation2 + $0x78] sm:$0xff] %vm272_vm0, %v1278_v4  ;;  %v305_v43 = vld [vmem:[#allocation2] sm:$0xff]  ;;  %v306_v47 = vld [vmem:[#allocation2 + $0x8] sm:$0xff] }
  0x10   : > { %289 = vst.msk [vmem:[#allocation2 + $0x80] sm:$0xff] %vm272_vm0, %v1278_v4  ;;  %290 = vst.msk [vmem:[#allocation2 + $0x88] sm:$0xff] %vm272_vm0, %v1278_v4  ;;  %s1372_s26 = scalar_lea.vmem %s1601_s0, %s1151_s23  ;;  %639 = vmatpush1.bf16.msra.mxu0 %v1198_v3  ;;  %1163 = vmatpush1.bf16.msra.mxu1 %v1198_v3  ;;  %v307_v59 = vld [vmem:[#allocation2 + $0x10] sm:$0xff]  ;;  %v308_v0 = vld [vmem:[#allocation2 + $0x18] sm:$0xff]  ;;  %s1466_s20 = scalar_lea.vmem %s1604_s3, %s1151_s23 }
  0x11   : > { %291 = vst.msk [vmem:[#allocation2 + $0x90] sm:$0xff] %vm272_vm0, %v1278_v4  ;;  %292 = vst.msk [vmem:[#allocation2 + $0x98] sm:$0xff] %vm272_vm0, %v1278_v4  ;;  %v1207_v6 = vld [vmem:[%s1372_s26 + $0x4] ss:$8 sps:$4 sm:$0xff]   ;;  %640 = vmatprep.subr.bf16.mxu0 %v1277_v1  ;;  %1155 = vmatprep.subr.bf16.mxu1 %v1277_v1  ;;  %v1205_v13 = vld [vmem:[%s1372_s26] ss:$8 sps:$4 sm:$0xff]  }
  0x12   : > { %293 = vst.msk [vmem:[#allocation2 + $0xa0] sm:$0xff] %vm272_vm0, %v1278_v4  ;;  %294 = vst.msk [vmem:[#allocation2 + $0xa8] sm:$0xff] %vm272_vm0, %v1278_v4  ;;  %v1210_v7 = vld [vmem:[%s1372_s26 + $0x84] ss:$8 sps:$4 sm:$0xff]   ;;  %1132 = vmatprep.mubr.msk.bf16.mxu0 %vm272_vm0, %v1207_v6  ;;  %v1208_v14 = vld [vmem:[%s1372_s26 + $0x80] ss:$8 sps:$4 sm:$0xff]  }
  0x13   : > { %295 = vst.msk [vmem:[#allocation2 + $0xb0] sm:$0xff] %vm272_vm0, %v1278_v4  ;;  %296 = vst.msk [vmem:[#allocation2 + $0xb8] sm:$0xff] %vm272_vm0, %v1278_v4  ;;  %1140 = vmatprep.mubr.msk.bf16.mxu1 %vm272_vm0, %v1210_v7  ;;  %v1211_v15 = vld [vmem:[%s1372_s26 + $0x14] ss:$8 sps:$4 sm:$0xff]   ;;  %v1215_v17 = vld [vmem:[%s1372_s26 + $0x10] ss:$8 sps:$4 sm:$0xff]  }
  0x14   : > { %297 = vst.msk [vmem:[#allocation2 + $0xc0] sm:$0xff] %vm272_vm0, %v1278_v4  ;;  %298 = vst.msk [vmem:[#allocation2 + $0xc8] sm:$0xff] %vm272_vm0, %v1278_v4  ;;  %641 = vmatpush1.bf16.msra.mxu0 %v1199_v5  ;;  %1164 = vmatpush1.bf16.msra.mxu1 %v1199_v5  ;;  %v1213_v16 = vld [vmem:[%s1372_s26 + $0x94] ss:$8 sps:$4 sm:$0xff]   ;;  %v1216_v18 = vld [vmem:[%s1372_s26 + $0x90] ss:$8 sps:$4 sm:$0xff]  }
  0x15   : > { %299 = vst.msk [vmem:[#allocation2 + $0xd0] sm:$0xff] %vm272_vm0, %v1278_v4  ;;  %300 = vst.msk [vmem:[#allocation2 + $0xd8] sm:$0xff] %vm272_vm0, %v1278_v4  ;;  %642 = vmatprep.subr.bf16.mxu0 %v1277_v1  ;;  %1156 = vmatprep.subr.bf16.mxu1 %v1277_v1  ;;  %v1217_v19 = vld [vmem:[%s1372_s26 + $0x24] ss:$8 sps:$4 sm:$0xff]   ;;  %v1221_v21 = vld [vmem:[%s1372_s26 + $0x20] ss:$8 sps:$4 sm:$0xff]  }
  0x16   : > { %301 = vst.msk [vmem:[#allocation2 + $0xe0] sm:$0xff] %vm272_vm0, %v1278_v4  ;;  %302 = vst.msk [vmem:[#allocation2 + $0xe8] sm:$0xff] %vm272_vm0, %v1278_v4  ;;  %v1219_v20 = vld [vmem:[%s1372_s26 + $0xa4] ss:$8 sps:$4 sm:$0xff]   ;;  %v1222_v22 = vld [vmem:[%s1372_s26 + $0xa0] ss:$8 sps:$4 sm:$0xff]  }
  0x17   : > { %303 = vst.msk [vmem:[#allocation2 + $0xf0] sm:$0xff] %vm272_vm0, %v1278_v4  ;;  %304 = vst.msk [vmem:[#allocation2 + $0xf8] sm:$0xff] %vm272_vm0, %v1278_v4  ;;  %v1223_v23 = vld [vmem:[%s1372_s26 + $0x34] ss:$8 sps:$4 sm:$0xff]   ;;  %v1227_v25 = vld [vmem:[%s1372_s26 + $0x30] ss:$8 sps:$4 sm:$0xff]  }
  0x18   : > { %643 = vmatpush1.bf16.msra.mxu0 %v1200_v8  ;;  %1165 = vmatpush1.bf16.msra.mxu1 %v1200_v8  ;;  %v1225_v24 = vld [vmem:[%s1372_s26 + $0xb4] ss:$8 sps:$4 sm:$0xff]   ;;  %v1228_v26 = vld [vmem:[%s1372_s26 + $0xb0] ss:$8 sps:$4 sm:$0xff]   ;;  %v1229_v27 = vld [vmem:[%s1372_s26 + $0x44] ss:$8 sps:$4 sm:$0xff]  }
  0x19   : > { %644 = vmatprep.subr.bf16.mxu0 %v1277_v1  ;;  %1157 = vmatprep.subr.bf16.mxu1 %v1277_v1  ;;  %v1231_v28 = vld [vmem:[%s1372_s26 + $0xc4] ss:$8 sps:$4 sm:$0xff]   ;;  %v1233_v29 = vld [vmem:[%s1372_s26 + $0x40] ss:$8 sps:$4 sm:$0xff]   ;;  %v1235_v31 = vld [vmem:[%s1372_s26 + $0x54] ss:$8 sps:$4 sm:$0xff]  }
  0x1a   : > { %v1234_v30 = vld [vmem:[%s1372_s26 + $0xc0] ss:$8 sps:$4 sm:$0xff]   ;;  %v1237_v32 = vld [vmem:[%s1372_s26 + $0xd4] ss:$8 sps:$4 sm:$0xff]   ;;  %v1239_v33 = vld [vmem:[%s1372_s26 + $0x50] ss:$8 sps:$4 sm:$0xff]  }
  0x1b   : > { %v1240_v34 = vld [vmem:[%s1372_s26 + $0xd0] ss:$8 sps:$4 sm:$0xff]   ;;  %v1241_v35 = vld [vmem:[%s1372_s26 + $0x64] ss:$8 sps:$4 sm:$0xff]   ;;  %v1245_v37 = vld [vmem:[%s1372_s26 + $0x60] ss:$8 sps:$4 sm:$0xff]  }
  0x1c   : > { %645 = vmatpush1.bf16.msra.mxu0 %v1201_v9  ;;  %1166 = vmatpush1.bf16.msra.mxu1 %v1201_v9  ;;  %v1243_v36 = vld [vmem:[%s1372_s26 + $0xe4] ss:$8 sps:$4 sm:$0xff]   ;;  %v1246_v38 = vld [vmem:[%s1372_s26 + $0xe0] ss:$8 sps:$4 sm:$0xff]   ;;  %v1247_v39 = vld [vmem:[%s1372_s26 + $0x74] ss:$8 sps:$4 sm:$0xff]  }
  0x1d   : > { %646 = vmatprep.subr.bf16.mxu0 %v1277_v1  ;;  %1158 = vmatprep.subr.bf16.mxu1 %v1277_v1  ;;  %v1249_v40 = vld [vmem:[%s1372_s26 + $0xf4] ss:$8 sps:$4 sm:$0xff]   ;;  %v1251_v41 = vld [vmem:[%s1372_s26 + $0x70] ss:$8 sps:$4 sm:$0xff]   ;;  %v321_v44 = vld [vmem:[#allocation2 + $0x80] sm:$0xff] }
  0x1e   : > { %v1252_v42 = vld [vmem:[%s1372_s26 + $0xf0] ss:$8 sps:$4 sm:$0xff]   ;;  %v322_v48 = vld [vmem:[#allocation2 + $0x88] sm:$0xff] }
  0x1f   : > { %v323_v60 = vld [vmem:[#allocation2 + $0x90] sm:$0xff] }
  0x20   : > { %647 = vmatpush1.bf16.msra.mxu0 %v1202_v10  ;;  %1167 = vmatpush1.bf16.msra.mxu1 %v1202_v10 }
  0x21   : > { %648 = vmatprep.subr.bf16.mxu0 %v1277_v1  ;;  %1159 = vmatprep.subr.bf16.mxu1 %v1277_v1 }
  0x24   : > { %649 = vmatpush1.bf16.msra.mxu0 %v1203_v11  ;;  %1168 = vmatpush1.bf16.msra.mxu1 %v1203_v11 }
  0x25   : > { %650 = vmatprep.subr.bf16.mxu0 %v1277_v1  ;;  %1160 = vmatprep.subr.bf16.mxu1 %v1277_v1  ;;  %v324_v1 = vld [vmem:[#allocation2 + $0x98] sm:$0xff] }
  0x28   : > { %651 = vmatpush1.bf16.msra.mxu0 %v1204_v12  ;;  %1169 = vmatpush1.bf16.msra.mxu1 %v1204_v12 }
  0x2b   : > { %667 = vmatmul.mubr.bf16.vlgmr.msra.gmra.mrb[0].mxu0 %v1205_v13  ;;  %731 = vmatmul.mubr.bf16.vlgmr.msra.gmra.mrb[0].mxu1 %v1208_v14 }
  0x2c   : > { %1133 = vmatprep.mubr.msk.bf16.mxu0 %vm272_vm0, %v1211_v15  ;;  %1141 = vmatprep.mubr.msk.bf16.mxu1 %vm272_vm0, %v1213_v16 }
  0x33   : > { %675 = vmatmul.mubr.bf16.gmra.mrb[4].mxu0 %v1215_v17  ;;  %739 = vmatmul.mubr.bf16.gmra.mrb[4].mxu1 %v1216_v18 }
  0x34   : > { %1134 = vmatprep.mubr.msk.bf16.mxu0 %vm272_vm0, %v1217_v19  ;;  %1142 = vmatprep.mubr.msk.bf16.mxu1 %vm272_vm0, %v1219_v20  ;;  %v309_v20 = vld [vmem:[#allocation2 + $0x20] sm:$0xff] }
  0x3b   : > { %683 = vmatmul.mubr.bf16.gmra.mrb[8].mxu0 %v1221_v21  ;;  %747 = vmatmul.mubr.bf16.gmra.mrb[8].mxu1 %v1222_v22  ;;  %v325_v21 = vld [vmem:[#allocation2 + $0xa0] sm:$0xff] }
  0x3c   : > { %1135 = vmatprep.mubr.msk.bf16.mxu0 %vm272_vm0, %v1223_v23  ;;  %1143 = vmatprep.mubr.msk.bf16.mxu1 %vm272_vm0, %v1225_v24  ;;  %v310_v24 = vld [vmem:[#allocation2 + $0x28] sm:$0xff] }
  0x43   : > { %691 = vmatmul.mubr.bf16.gmra.mrb[12].mxu0 %v1227_v25  ;;  %755 = vmatmul.mubr.bf16.gmra.mrb[12].mxu1 %v1228_v26  ;;  %v326_v25 = vld [vmem:[#allocation2 + $0xa8] sm:$0xff] }
  0x44   : > { %1136 = vmatprep.mubr.msk.bf16.mxu0 %vm272_vm0, %v1229_v27  ;;  %1144 = vmatprep.mubr.msk.bf16.mxu1 %vm272_vm0, %v1231_v28 }
  0x4b   : > { %699 = vmatmul.mubr.bf16.gmra.mrb[16].mxu0 %v1233_v29  ;;  %763 = vmatmul.mubr.bf16.gmra.mrb[16].mxu1 %v1234_v30 }
  0x4c   : > { %1137 = vmatprep.mubr.msk.bf16.mxu0 %vm272_vm0, %v1235_v31  ;;  %1145 = vmatprep.mubr.msk.bf16.mxu1 %vm272_vm0, %v1237_v32 }
  0x53   : > { %707 = vmatmul.mubr.bf16.gmra.mrb[20].mxu0 %v1239_v33  ;;  %771 = vmatmul.mubr.bf16.gmra.mrb[20].mxu1 %v1240_v34 }
  0x54   : > { %1138 = vmatprep.mubr.msk.bf16.mxu0 %vm272_vm0, %v1241_v35  ;;  %1146 = vmatprep.mubr.msk.bf16.mxu1 %vm272_vm0, %v1243_v36 }
  0x5b   : > { %715 = vmatmul.mubr.bf16.gmra.mrb[24].mxu0 %v1245_v37  ;;  %779 = vmatmul.mubr.bf16.gmra.mrb[24].mxu1 %v1246_v38 }
  0x5c   : > { %1139 = vmatprep.mubr.msk.bf16.mxu0 %vm272_vm0, %v1247_v39  ;;  %1147 = vmatprep.mubr.msk.bf16.mxu1 %vm272_vm0, %v1249_v40 }
  0x63   : > { %723 = vmatmul.mubr.bf16.gmra.mrb[28].mxu0 %v1251_v41  ;;  %787 = vmatmul.mubr.bf16.gmra.mrb[28].mxu1 %v1252_v42 }
  0xfe   : > { %v668_v45 = vpop.f32.mrb[0].mxu0  ;;  %v732_v46 = vpop.f32.mrb[0].mxu1 }
  0xff   : > { %v795_v49 = vadd.f32 %v668_v45, %v305_v43  ;;  %v811_v50 = vadd.f32 %v732_v46, %v321_v44  ;;  %v670_v51 = vpop.f32.mrb[1].mxu0  ;;  %v734_v52 = vpop.f32.mrb[1].mxu1  ;;  %v311_v44 = vld [vmem:[#allocation2 + $0x30] sm:$0xff] }
 0x100   : > { %v671_v53 = vpop.f32.mrb[2].mxu0  ;;  %v735_v54 = vpop.f32.mrb[2].mxu1  ;;  %v327_v45 = vld [vmem:[#allocation2 + $0xb0] sm:$0xff] }
 0x101   : > { %827 = vst.msk [vmem:[#allocation2] sm:$0xff] %vm272_vm0, %v795_v49  ;;  %843 = vst.msk [vmem:[#allocation2 + $0x80] sm:$0xff] %vm272_vm0, %v811_v50  ;;  %v796_v55 = vadd.f32 %v671_v53, %v306_v47  ;;  %v812_v56 = vadd.f32 %v735_v54, %v322_v48  ;;  %v673_v57 = vpop.f32.mrb[3].mxu0  ;;  %v737_v58 = vpop.f32.mrb[3].mxu1  ;;  %v312_v48 = vld [vmem:[#allocation2 + $0x38] sm:$0xff] }
 0x102   : > { %v328_v49 = vld [vmem:[#allocation2 + $0xb8] sm:$0xff] }
 0x103   : > { %828 = vst.msk [vmem:[#allocation2 + $0x8] sm:$0xff] %vm272_vm0, %v796_v55  ;;  %844 = vst.msk [vmem:[#allocation2 + $0x88] sm:$0xff] %vm272_vm0, %v812_v56 }
 0x106   : > { %v676_v62 = vpop.f32.mrb[4].mxu0  ;;  %v740_v63 = vpop.f32.mrb[4].mxu1 }
 0x107   : > { %v797_v2 = vadd.f32 %v676_v62, %v307_v59  ;;  %v813_v3 = vadd.f32 %v740_v63, %v323_v60  ;;  %v678_v4 = vpop.f32.mrb[5].mxu0  ;;  %v742_v5 = vpop.f32.mrb[5].mxu1 }
 0x108   : > { %v862_v6 = vld [vmem:[#allocation2] sm:$0xff]  ;;  %v679_v8 = vpop.f32.mrb[6].mxu0  ;;  %v743_v9 = vpop.f32.mrb[6].mxu1 }
 0x109   : > { %v878_v7 = vld [vmem:[#allocation2 + $0x80] sm:$0xff]  ;;  %v901_v10 = vadd.f32 %v1459_v61, %v862_v6  ;;  %829 = vst.msk [vmem:[#allocation2 + $0x10] sm:$0xff] %vm272_vm0, %v797_v2  ;;  %845 = vst.msk [vmem:[#allocation2 + $0x90] sm:$0xff] %vm272_vm0, %v813_v3  ;;  %v798_v12 = vadd.f32 %v679_v8, %v308_v0  ;;  %v814_v13 = vadd.f32 %v743_v9, %v324_v1  ;;  %v681_v14 = vpop.f32.mrb[7].mxu0  ;;  %v745_v15 = vpop.f32.mrb[7].mxu1  ;;  %v314_v9 = vld [vmem:[#allocation2 + $0x48] sm:$0xff] }
 0x10a   : > { %v917_v11 = vadd.f32 %v1459_v61, %v878_v7  ;;  %v863_v16 = vld [vmem:[#allocation2 + $0x8] sm:$0xff]  ;;  %v313_v5 = vld [vmem:[#allocation2 + $0x40] sm:$0xff] }
 0x10b   : > { %v879_v17 = vld [vmem:[#allocation2 + $0x88] sm:$0xff]  ;;  %933 = vst.msk [vmem:[%s1466_s20] sm:$0xff] %vm272_vm0, %v901_v10  ;;  %v902_v18 = vadd.f32 %v1459_v61, %v863_v16  ;;  %830 = vst.msk [vmem:[#allocation2 + $0x18] sm:$0xff] %vm272_vm0, %v798_v12  ;;  %v329_v6 = vld [vmem:[#allocation2 + $0xc0] sm:$0xff] }
 0x10c   : > { %949 = vst.msk [vmem:[%s1466_s20 + $0x80] sm:$0xff] %vm272_vm0, %v917_v11  ;;  %v918_v19 = vadd.f32 %v1459_v61, %v879_v17  ;;  %846 = vst.msk [vmem:[#allocation2 + $0x98] sm:$0xff] %vm272_vm0, %v814_v13  ;;  %v330_v10 = vld [vmem:[#allocation2 + $0xc8] sm:$0xff] }
 0x10d   : > { %934 = vst.msk [vmem:[%s1466_s20 + $0x8] sm:$0xff] %vm272_vm0, %v902_v18 }
 0x10e   : > { %950 = vst.msk [vmem:[%s1466_s20 + $0x88] sm:$0xff] %vm272_vm0, %v918_v19  ;;  %v684_v22 = vpop.f32.mrb[8].mxu0  ;;  %v748_v23 = vpop.f32.mrb[8].mxu1 }
 0x10f   : > { %v799_v26 = vadd.f32 %v684_v22, %v309_v20  ;;  %v815_v27 = vadd.f32 %v748_v23, %v325_v21  ;;  %v686_v28 = vpop.f32.mrb[9].mxu0  ;;  %v750_v29 = vpop.f32.mrb[9].mxu1 }
 0x110   : > { %v864_v30 = vld [vmem:[#allocation2 + $0x10] sm:$0xff]  ;;  %v687_v32 = vpop.f32.mrb[10].mxu0  ;;  %v751_v33 = vpop.f32.mrb[10].mxu1 }
 0x111   : > { %v880_v31 = vld [vmem:[#allocation2 + $0x90] sm:$0xff]  ;;  %v903_v34 = vadd.f32 %v1459_v61, %v864_v30  ;;  %831 = vst.msk [vmem:[#allocation2 + $0x20] sm:$0xff] %vm272_vm0, %v799_v26  ;;  %847 = vst.msk [vmem:[#allocation2 + $0xa0] sm:$0xff] %vm272_vm0, %v815_v27  ;;  %v800_v36 = vadd.f32 %v687_v32, %v310_v24  ;;  %v816_v37 = vadd.f32 %v751_v33, %v326_v25  ;;  %v689_v38 = vpop.f32.mrb[11].mxu0  ;;  %v753_v39 = vpop.f32.mrb[11].mxu1  ;;  %v316_v33 = vld [vmem:[#allocation2 + $0x58] sm:$0xff] }
 0x112   : > { %v919_v35 = vadd.f32 %v1459_v61, %v880_v31  ;;  %v865_v40 = vld [vmem:[#allocation2 + $0x18] sm:$0xff]  ;;  %v315_v29 = vld [vmem:[#allocation2 + $0x50] sm:$0xff] }
 0x113   : > { %v881_v41 = vld [vmem:[#allocation2 + $0x98] sm:$0xff]  ;;  %935 = vst.msk [vmem:[%s1466_s20 + $0x10] sm:$0xff] %vm272_vm0, %v903_v34  ;;  %v904_v42 = vadd.f32 %v1459_v61, %v865_v40  ;;  %832 = vst.msk [vmem:[#allocation2 + $0x28] sm:$0xff] %vm272_vm0, %v800_v36  ;;  %v331_v30 = vld [vmem:[#allocation2 + $0xd0] sm:$0xff] }
 0x114   : > { %951 = vst.msk [vmem:[%s1466_s20 + $0x90] sm:$0xff] %vm272_vm0, %v919_v35  ;;  %v920_v43 = vadd.f32 %v1459_v61, %v881_v41  ;;  %848 = vst.msk [vmem:[#allocation2 + $0xa8] sm:$0xff] %vm272_vm0, %v816_v37  ;;  %v332_v34 = vld [vmem:[#allocation2 + $0xd8] sm:$0xff] }
 0x115   : > { %936 = vst.msk [vmem:[%s1466_s20 + $0x18] sm:$0xff] %vm272_vm0, %v904_v42 }
 0x116   : > { %952 = vst.msk [vmem:[%s1466_s20 + $0x98] sm:$0xff] %vm272_vm0, %v920_v43  ;;  %v692_v46 = vpop.f32.mrb[12].mxu0  ;;  %v756_v47 = vpop.f32.mrb[12].mxu1 }
 0x117   : > { %v801_v50 = vadd.f32 %v692_v46, %v311_v44  ;;  %v817_v51 = vadd.f32 %v756_v47, %v327_v45  ;;  %v694_v52 = vpop.f32.mrb[13].mxu0  ;;  %v758_v53 = vpop.f32.mrb[13].mxu1 }
 0x118   : > { %v866_v54 = vld [vmem:[#allocation2 + $0x20] sm:$0xff]  ;;  %v695_v56 = vpop.f32.mrb[14].mxu0  ;;  %v759_v57 = vpop.f32.mrb[14].mxu1 }
 0x119   : > { %v882_v55 = vld [vmem:[#allocation2 + $0xa0] sm:$0xff]  ;;  %v905_v58 = vadd.f32 %v1459_v61, %v866_v54  ;;  %833 = vst.msk [vmem:[#allocation2 + $0x30] sm:$0xff] %vm272_vm0, %v801_v50  ;;  %849 = vst.msk [vmem:[#allocation2 + $0xb0] sm:$0xff] %vm272_vm0, %v817_v51  ;;  %v802_v60 = vadd.f32 %v695_v56, %v312_v48  ;;  %v818_v62 = vadd.f32 %v759_v57, %v328_v49  ;;  %v697_v63 = vpop.f32.mrb[15].mxu0  ;;  %v761_v0 = vpop.f32.mrb[15].mxu1  ;;  %v318_v57 = vld [vmem:[#allocation2 + $0x68] sm:$0xff] }
 0x11a   : > { %v921_v59 = vadd.f32 %v1459_v61, %v882_v55  ;;  %v867_v1 = vld [vmem:[#allocation2 + $0x28] sm:$0xff]  ;;  %v317_v53 = vld [vmem:[#allocation2 + $0x60] sm:$0xff] }
 0x11b   : > { %v883_v2 = vld [vmem:[#allocation2 + $0xa8] sm:$0xff]  ;;  %937 = vst.msk [vmem:[%s1466_s20 + $0x20] sm:$0xff] %vm272_vm0, %v905_v58  ;;  %v906_v3 = vadd.f32 %v1459_v61, %v867_v1  ;;  %834 = vst.msk [vmem:[#allocation2 + $0x38] sm:$0xff] %vm272_vm0, %v802_v60  ;;  %v333_v54 = vld [vmem:[#allocation2 + $0xe0] sm:$0xff] }
 0x11c   : > { %953 = vst.msk [vmem:[%s1466_s20 + $0xa0] sm:$0xff] %vm272_vm0, %v921_v59  ;;  %v922_v4 = vadd.f32 %v1459_v61, %v883_v2  ;;  %850 = vst.msk [vmem:[#allocation2 + $0xb8] sm:$0xff] %vm272_vm0, %v818_v62  ;;  %v334_v58 = vld [vmem:[#allocation2 + $0xe8] sm:$0xff] }
 0x11d   : > { %938 = vst.msk [vmem:[%s1466_s20 + $0x28] sm:$0xff] %vm272_vm0, %v906_v3 }
 0x11e   : > { %954 = vst.msk [vmem:[%s1466_s20 + $0xa8] sm:$0xff] %vm272_vm0, %v922_v4  ;;  %v700_v7 = vpop.f32.mrb[16].mxu0  ;;  %v764_v8 = vpop.f32.mrb[16].mxu1 }
 0x11f   : > { %v803_v11 = vadd.f32 %v700_v7, %v313_v5  ;;  %v819_v12 = vadd.f32 %v764_v8, %v329_v6  ;;  %v702_v13 = vpop.f32.mrb[17].mxu0  ;;  %v766_v14 = vpop.f32.mrb[17].mxu1 }
 0x120   : > { %v868_v15 = vld [vmem:[#allocation2 + $0x30] sm:$0xff]  ;;  %v703_v17 = vpop.f32.mrb[18].mxu0  ;;  %v767_v18 = vpop.f32.mrb[18].mxu1 }
 0x121   : > { %v884_v16 = vld [vmem:[#allocation2 + $0xb0] sm:$0xff]  ;;  %v907_v19 = vadd.f32 %v1459_v61, %v868_v15  ;;  %835 = vst.msk [vmem:[#allocation2 + $0x40] sm:$0xff] %vm272_vm0, %v803_v11  ;;  %851 = vst.msk [vmem:[#allocation2 + $0xc0] sm:$0xff] %vm272_vm0, %v819_v12  ;;  %v804_v21 = vadd.f32 %v703_v17, %v314_v9  ;;  %v820_v22 = vadd.f32 %v767_v18, %v330_v10  ;;  %v705_v23 = vpop.f32.mrb[19].mxu0  ;;  %v769_v24 = vpop.f32.mrb[19].mxu1  ;;  %v320_v18 = vld [vmem:[#allocation2 + $0x78] sm:$0xff] }
 0x122   : > { %v923_v20 = vadd.f32 %v1459_v61, %v884_v16  ;;  %v869_v25 = vld [vmem:[#allocation2 + $0x38] sm:$0xff]  ;;  %v319_v14 = vld [vmem:[#allocation2 + $0x70] sm:$0xff] }
 0x123   : > { %v885_v26 = vld [vmem:[#allocation2 + $0xb8] sm:$0xff]  ;;  %939 = vst.msk [vmem:[%s1466_s20 + $0x30] sm:$0xff] %vm272_vm0, %v907_v19  ;;  %v908_v27 = vadd.f32 %v1459_v61, %v869_v25  ;;  %836 = vst.msk [vmem:[#allocation2 + $0x48] sm:$0xff] %vm272_vm0, %v804_v21  ;;  %v335_v15 = vld [vmem:[#allocation2 + $0xf0] sm:$0xff] }
 0x124   : > { %955 = vst.msk [vmem:[%s1466_s20 + $0xb0] sm:$0xff] %vm272_vm0, %v923_v20  ;;  %v924_v28 = vadd.f32 %v1459_v61, %v885_v26  ;;  %852 = vst.msk [vmem:[#allocation2 + $0xc8] sm:$0xff] %vm272_vm0, %v820_v22  ;;  %v336_v19 = vld [vmem:[#allocation2 + $0xf8] sm:$0xff] }
 0x125   : > { %940 = vst.msk [vmem:[%s1466_s20 + $0x38] sm:$0xff] %vm272_vm0, %v908_v27 }
 0x126   : > { %956 = vst.msk [vmem:[%s1466_s20 + $0xb8] sm:$0xff] %vm272_vm0, %v924_v28  ;;  %v708_v31 = vpop.f32.mrb[20].mxu0  ;;  %v772_v32 = vpop.f32.mrb[20].mxu1 }
 0x127   : > { %v805_v35 = vadd.f32 %v708_v31, %v315_v29  ;;  %v821_v36 = vadd.f32 %v772_v32, %v331_v30  ;;  %v710_v37 = vpop.f32.mrb[21].mxu0  ;;  %v774_v38 = vpop.f32.mrb[21].mxu1 }
 0x128   : > { %v870_v39 = vld [vmem:[#allocation2 + $0x40] sm:$0xff]  ;;  %v711_v41 = vpop.f32.mrb[22].mxu0  ;;  %v775_v42 = vpop.f32.mrb[22].mxu1 }
 0x129   : > { %v886_v40 = vld [vmem:[#allocation2 + $0xc0] sm:$0xff]  ;;  %v909_v43 = vadd.f32 %v1459_v61, %v870_v39  ;;  %837 = vst.msk [vmem:[#allocation2 + $0x50] sm:$0xff] %vm272_vm0, %v805_v35  ;;  %853 = vst.msk [vmem:[#allocation2 + $0xd0] sm:$0xff] %vm272_vm0, %v821_v36  ;;  %v806_v45 = vadd.f32 %v711_v41, %v316_v33  ;;  %v822_v46 = vadd.f32 %v775_v42, %v332_v34  ;;  %v713_v47 = vpop.f32.mrb[23].mxu0  ;;  %v777_v48 = vpop.f32.mrb[23].mxu1 }
 0x12a   : > { %v925_v44 = vadd.f32 %v1459_v61, %v886_v40  ;;  %v871_v49 = vld [vmem:[#allocation2 + $0x48] sm:$0xff] }
 0x12b   : > { %v887_v50 = vld [vmem:[#allocation2 + $0xc8] sm:$0xff]  ;;  %941 = vst.msk [vmem:[%s1466_s20 + $0x40] sm:$0xff] %vm272_vm0, %v909_v43  ;;  %v910_v51 = vadd.f32 %v1459_v61, %v871_v49  ;;  %838 = vst.msk [vmem:[#allocation2 + $0x58] sm:$0xff] %vm272_vm0, %v806_v45 }
 0x12c   : > { %957 = vst.msk [vmem:[%s1466_s20 + $0xc0] sm:$0xff] %vm272_vm0, %v925_v44  ;;  %v926_v52 = vadd.f32 %v1459_v61, %v887_v50  ;;  %854 = vst.msk [vmem:[#allocation2 + $0xd8] sm:$0xff] %vm272_vm0, %v822_v46 }
 0x12d   : > { %942 = vst.msk [vmem:[%s1466_s20 + $0x48] sm:$0xff] %vm272_vm0, %v910_v51 }
 0x12e   : > { %958 = vst.msk [vmem:[%s1466_s20 + $0xc8] sm:$0xff] %vm272_vm0, %v926_v52  ;;  %v716_v55 = vpop.f32.mrb[24].mxu0  ;;  %v780_v56 = vpop.f32.mrb[24].mxu1 }
 0x12f   : > { %v807_v59 = vadd.f32 %v716_v55, %v317_v53  ;;  %v823_v60 = vadd.f32 %v780_v56, %v333_v54  ;;  %v718_v62 = vpop.f32.mrb[25].mxu0  ;;  %v782_v63 = vpop.f32.mrb[25].mxu1 }
 0x130   : > { %v872_v0 = vld [vmem:[#allocation2 + $0x50] sm:$0xff]  ;;  %v719_v2 = vpop.f32.mrb[26].mxu0  ;;  %v783_v3 = vpop.f32.mrb[26].mxu1 }
 0x131   : > { %v888_v1 = vld [vmem:[#allocation2 + $0xd0] sm:$0xff]  ;;  %v911_v4 = vadd.f32 %v1459_v61, %v872_v0  ;;  %839 = vst.msk [vmem:[#allocation2 + $0x60] sm:$0xff] %vm272_vm0, %v807_v59  ;;  %855 = vst.msk [vmem:[#allocation2 + $0xe0] sm:$0xff] %vm272_vm0, %v823_v60  ;;  %v808_v6 = vadd.f32 %v719_v2, %v318_v57  ;;  %v824_v7 = vadd.f32 %v783_v3, %v334_v58  ;;  %v721_v8 = vpop.f32.mrb[27].mxu0  ;;  %v785_v9 = vpop.f32.mrb[27].mxu1 }
 0x132   : > { %v927_v5 = vadd.f32 %v1459_v61, %v888_v1  ;;  %v873_v10 = vld [vmem:[#allocation2 + $0x58] sm:$0xff] }
 0x133   : > { %v889_v11 = vld [vmem:[#allocation2 + $0xd8] sm:$0xff]  ;;  %943 = vst.msk [vmem:[%s1466_s20 + $0x50] sm:$0xff] %vm272_vm0, %v911_v4  ;;  %v912_v12 = vadd.f32 %v1459_v61, %v873_v10  ;;  %840 = vst.msk [vmem:[#allocation2 + $0x68] sm:$0xff] %vm272_vm0, %v808_v6 }
 0x134   : > { %959 = vst.msk [vmem:[%s1466_s20 + $0xd0] sm:$0xff] %vm272_vm0, %v927_v5  ;;  %v928_v13 = vadd.f32 %v1459_v61, %v889_v11  ;;  %856 = vst.msk [vmem:[#allocation2 + $0xe8] sm:$0xff] %vm272_vm0, %v824_v7 }
 0x135   : > { %944 = vst.msk [vmem:[%s1466_s20 + $0x58] sm:$0xff] %vm272_vm0, %v912_v12 }
 0x136   : > { %960 = vst.msk [vmem:[%s1466_s20 + $0xd8] sm:$0xff] %vm272_vm0, %v928_v13  ;;  %v724_v16 = vpop.f32.mrb[28].mxu0  ;;  %v788_v17 = vpop.f32.mrb[28].mxu1 }
 0x137   : > { %v809_v20 = vadd.f32 %v724_v16, %v319_v14  ;;  %v825_v21 = vadd.f32 %v788_v17, %v335_v15  ;;  %v726_v22 = vpop.f32.mrb[29].mxu0  ;;  %v790_v23 = vpop.f32.mrb[29].mxu1 }
 0x138   : > { %v874_v24 = vld [vmem:[#allocation2 + $0x60] sm:$0xff]  ;;  %v727_v26 = vpop.f32.mrb[30].mxu0  ;;  %v791_v27 = vpop.f32.mrb[30].mxu1 }
 0x139   : > { %v890_v25 = vld [vmem:[#allocation2 + $0xe0] sm:$0xff]  ;;  %v913_v28 = vadd.f32 %v1459_v61, %v874_v24  ;;  %841 = vst.msk [vmem:[#allocation2 + $0x70] sm:$0xff] %vm272_vm0, %v809_v20  ;;  %857 = vst.msk [vmem:[#allocation2 + $0xf0] sm:$0xff] %vm272_vm0, %v825_v21  ;;  %v810_v30 = vadd.f32 %v727_v26, %v320_v18  ;;  %v826_v31 = vadd.f32 %v791_v27, %v336_v19  ;;  %v729_v32 = vpop.f32.mrb[31].mxu0  ;;  %v793_v33 = vpop.f32.mrb[31].mxu1 }
 0x13a   : > { %v929_v29 = vadd.f32 %v1459_v61, %v890_v25  ;;  %v875_v34 = vld [vmem:[#allocation2 + $0x68] sm:$0xff] }
 0x13b   : > { %v891_v35 = vld [vmem:[#allocation2 + $0xe8] sm:$0xff]  ;;  %945 = vst.msk [vmem:[%s1466_s20 + $0x60] sm:$0xff] %vm272_vm0, %v913_v28  ;;  %v914_v36 = vadd.f32 %v1459_v61, %v875_v34  ;;  %842 = vst.msk [vmem:[#allocation2 + $0x78] sm:$0xff] %vm272_vm0, %v810_v30 }
 0x13c   : > { %961 = vst.msk [vmem:[%s1466_s20 + $0xe0] sm:$0xff] %vm272_vm0, %v929_v29  ;;  %v930_v37 = vadd.f32 %v1459_v61, %v891_v35  ;;  %858 = vst.msk [vmem:[#allocation2 + $0xf8] sm:$0xff] %vm272_vm0, %v826_v31 }
 0x13d   : > { %946 = vst.msk [vmem:[%s1466_s20 + $0x68] sm:$0xff] %vm272_vm0, %v914_v36 }
 0x13e   : > { %962 = vst.msk [vmem:[%s1466_s20 + $0xe8] sm:$0xff] %vm272_vm0, %v930_v37 }
 0x140   : > { %v876_v38 = vld [vmem:[#allocation2 + $0x70] sm:$0xff] }
 0x141   : > { %v892_v39 = vld [vmem:[#allocation2 + $0xf0] sm:$0xff]  ;;  %v915_v40 = vadd.f32 %v1459_v61, %v876_v38 }
 0x142   : > { %v931_v41 = vadd.f32 %v1459_v61, %v892_v39  ;;  %v877_v42 = vld [vmem:[#allocation2 + $0x78] sm:$0xff] }
 0x143   : > { %v893_v43 = vld [vmem:[#allocation2 + $0xf8] sm:$0xff]  ;;  %947 = vst.msk [vmem:[%s1466_s20 + $0x70] sm:$0xff] %vm272_vm0, %v915_v40  ;;  %v916_v44 = vadd.f32 %v1459_v61, %v877_v42 }
 0x144   : > { %963 = vst.msk [vmem:[%s1466_s20 + $0xf0] sm:$0xff] %vm272_vm0, %v931_v41  ;;  %v932_v45 = vadd.f32 %v1459_v61, %v893_v43 }
 0x145   : > { %948 = vst.msk [vmem:[%s1466_s20 + $0x78] sm:$0xff] %vm272_vm0, %v916_v44 }
 0x146   : > { %964 = vst.msk [vmem:[%s1466_s20 + $0xf8] sm:$0xff] %vm272_vm0, %v932_v45 }
 0x147 PF: > { %s13_s14 = sadd.s32 1, %s1275_s14   ;;  %s1605_s12 = smov %s1271_s13 }
 0x148   : > { %p10_p5 = scmp.ge.s32.totalorder %s13_s14, 4   ;;  %s1606_s13 = smov %s1608_s15 }
 0x14a   :  { %12 = sbr.rel (!%p10_p5) target bundleno = 2 (0x2), region = 76 }

// kernel: _lambda_.89
= control target key start
LH: loop header
LB: loop body
LE: loop exit
PB: predicated region body
PF: predicated region fallthrough
CT: control target
= control target key end

     0   :  { %s1300_s12 = smov 0   ;;  %s1302_s13 = smov 0   ;;  %s1602_s0 = inlined_call_operand.vmem [shape: bf16[512,144], index: 0, kind: input, shape index: {}]   ;;  %s1603_s1 = inlined_call_operand.vmem [shape: bf16[144,4], index: 1, kind: input, shape index: {}]   ;;  %s1604_s2 = inlined_call_operand.vmem [shape: f32[1,4], index: 2, kind: input, shape index: {}]   ;;  %s1605_s3 = inlined_call_operand.vmem [shape: f32[512,4], index: 3, kind: output, shape index: {}]  }
   0x1   :  { %s1304_s14 = smov 0  }
   0x2 LB: > { %s32_s15 = sadd.s32 1, %s1272_s13  ;;  %p1086_p0 = scmp.ge.s32.totalorder %s1276_s14, 1  ;;  %s1276_s14 = sphi %s1304_s14, %s13_s14   ;;  %s1272_s13 = sphi %s1302_s13, %s1607_s13   ;;  %s1268_s12 = sphi %s1300_s12, %s1606_s12  }
   0x3   : > { %p34_p1 = scmp.ge.s32.totalorder %s32_s15, 2  ;;  %p191_p2 = scmp.lt.s32.totalorder %s1276_s14, 3 }
   0x5   : > { %s1609_s15 = smov (%p34_p1, %s32_s15), 0  ;;  %p192_p3 = pnand %p1086_p0, %p191_p2 }
   0x6   : > { %v1197_v0 = vld [vmem:[%s1603_s1] sm:$0xff] (!%p192_p3)   ;;  %v1278_v1 = vmov (!%p192_p3), 0   ;;  %s1087_s18 = sshll.u32 (!%p192_p3), %s1268_s12, 5  ;;  %v1198_v2 = vld [vmem:[%s1603_s1 + $0x8] sm:$0xff] (!%p192_p3)   ;;  %vm272_vm0 = vcmask (!%p192_p3), 31744   ;;  %v1199_v3 = vld [vmem:[%s1603_s1 + $0x10] sm:$0xff] (!%p192_p3)  }
   0x7   : > { %195 = sbr.rel (%p192_p3) target bundleno = 327 (0x147), region = 32  ;;  %634 = vmatprep.subr.bf16.mxu0 (!%p192_p3), %v1278_v1  ;;  %1153 = vmatprep.subr.bf16.mxu1 (!%p192_p3), %v1278_v1  ;;  %p236_p4 = scmp.lt.s32.totalorder (!%p192_p3), %s1087_s18, 63  ;;  %v1279_v4 = vmov (!%p192_p3), 0.0   ;;  %v1200_v5 = vld [vmem:[%s1603_s1 + $0x18] sm:$0xff] (!%p192_p3)   ;;  %vm585_vm1 = vcmask (!%p192_p3), 130048   ;;  %v1201_v8 = vld [vmem:[%s1603_s1 + $0x20] sm:$0xff] (!%p192_p3)  }
   0x8   : > { %635 = vmatpush1.bf16.msra.mxu0 (!%p192_p3), %v1197_v0  ;;  %1162 = vmatpush1.bf16.msra.mxu1 (!%p192_p3), %v1197_v0  ;;  %273 = vst.msk [vmem:[#allocation2] sm:$0xff] (!%p192_p3), %vm272_vm0, %v1279_v4  ;;  %274 = vst.msk [vmem:[#allocation2 + $0x8] sm:$0xff] (!%p192_p3), %vm272_vm0, %v1279_v4  ;;  %v1202_v9 = vld [vmem:[%s1603_s1 + $0x28] sm:$0xff] (!%p192_p3)   ;;  %v1203_v10 = vld [vmem:[%s1603_s1 + $0x30] sm:$0xff] (!%p192_p3)  }
   0x9   : > { %636 = vmatprep.subr.bf16.mxu0 (!%p192_p3), %v1278_v1  ;;  %1154 = vmatprep.subr.bf16.mxu1 (!%p192_p3), %v1278_v1  ;;  %275 = vst.msk [vmem:[#allocation2 + $0x10] sm:$0xff] (!%p192_p3), %vm272_vm0, %v1279_v4  ;;  %276 = vst.msk [vmem:[#allocation2 + $0x18] sm:$0xff] (!%p192_p3), %vm272_vm0, %v1279_v4  ;;  %v1204_v11 = vld [vmem:[%s1603_s1 + $0x38] sm:$0xff] (!%p192_p3)   ;;  %v1205_v12 = vld [vmem:[%s1603_s1 + $0x40] sm:$0xff] (!%p192_p3)  }
   0xa   : > { %277 = vst.msk [vmem:[#allocation2 + $0x20] sm:$0xff] (!%p192_p3), %vm272_vm0, %v1279_v4  ;;  %278 = vst.msk [vmem:[#allocation2 + $0x28] sm:$0xff] (!%p192_p3), %vm272_vm0, %v1279_v4  ;;  %v1460_v61 = vld [vmem:[%s1604_s2] ss:$0 sm:$0xff] (!%p192_p3) }
   0xb   : > { %279 = vst.msk [vmem:[#allocation2 + $0x30] sm:$0xff] (!%p192_p3), %vm272_vm0, %v1279_v4  ;;  %280 = vst.msk [vmem:[#allocation2 + $0x38] sm:$0xff] (!%p192_p3), %vm272_vm0, %v1279_v4 }
   0xc   : > { %637 = vmatpush1.bf16.msra.mxu0 (!%p192_p3), %v1198_v2  ;;  %1163 = vmatpush1.bf16.msra.mxu1 (!%p192_p3), %v1198_v2  ;;  %281 = vst.msk [vmem:[#allocation2 + $0x40] sm:$0xff] (!%p192_p3), %vm272_vm0, %v1279_v4  ;;  %282 = vst.msk [vmem:[#allocation2 + $0x48] sm:$0xff] (!%p192_p3), %vm272_vm0, %v1279_v4 }
   0xd   : > { %638 = vmatprep.subr.bf16.mxu0 (!%p192_p3), %v1278_v1  ;;  %1155 = vmatprep.subr.bf16.mxu1 (!%p192_p3), %v1278_v1  ;;  %283 = vst.msk [vmem:[#allocation2 + $0x50] sm:$0xff] (!%p192_p3), %vm272_vm0, %v1279_v4  ;;  %284 = vst.msk [vmem:[#allocation2 + $0x58] sm:$0xff] (!%p192_p3), %vm272_vm0, %v1279_v4 }
   0xe   : > { %s1611_s18 = smov (!%p236_p4, %s1087_s18), 63  ;;  %285 = vst.msk [vmem:[#allocation2 + $0x60] sm:$0xff] %vm272_vm0, %v1279_v4  ;;  %286 = vst.msk [vmem:[#allocation2 + $0x68] sm:$0xff] %vm272_vm0, %v1279_v4 }
   0xf   : > { %s1152_s23 = sshll.u32 %s1611_s18, 3  ;;  %287 = vst.msk [vmem:[#allocation2 + $0x70] sm:$0xff] %vm272_vm0, %v1279_v4  ;;  %288 = vst.msk [vmem:[#allocation2 + $0x78] sm:$0xff] %vm272_vm0, %v1279_v4  ;;  %v305_v43 = vld [vmem:[#allocation2] sm:$0xff]  ;;  %v306_v47 = vld [vmem:[#allocation2 + $0x8] sm:$0xff] }
  0x10   : > { %s1341_s26 = scalar_lea.vmem %s1602_s0, %s1152_s23  ;;  %289 = vst.msk [vmem:[#allocation2 + $0x80] sm:$0xff] %vm272_vm0, %v1279_v4  ;;  %290 = vst.msk [vmem:[#allocation2 + $0x88] sm:$0xff] %vm272_vm0, %v1279_v4  ;;  %639 = vmatpush1.bf16.msra.mxu0 %v1199_v3  ;;  %1164 = vmatpush1.bf16.msra.mxu1 %v1199_v3  ;;  %v307_v59 = vld [vmem:[#allocation2 + $0x10] sm:$0xff]  ;;  %v308_v0 = vld [vmem:[#allocation2 + $0x18] sm:$0xff]  ;;  %s1467_s20 = scalar_lea.vmem %s1605_s3, %s1152_s23 }
  0x11   : > { %291 = vst.msk [vmem:[#allocation2 + $0x90] sm:$0xff] %vm272_vm0, %v1279_v4  ;;  %292 = vst.msk [vmem:[#allocation2 + $0x98] sm:$0xff] %vm272_vm0, %v1279_v4  ;;  %v1208_v6 = vld [vmem:[%s1341_s26 + $0x4] ss:$8 sps:$4 sm:$0xff]   ;;  %640 = vmatprep.subr.bf16.mxu0 %v1278_v1  ;;  %1156 = vmatprep.subr.bf16.mxu1 %v1278_v1  ;;  %v1206_v13 = vld [vmem:[%s1341_s26] ss:$8 sps:$4 sm:$0xff]  }
  0x12   : > { %293 = vst.msk [vmem:[#allocation2 + $0xa0] sm:$0xff] %vm272_vm0, %v1279_v4  ;;  %294 = vst.msk [vmem:[#allocation2 + $0xa8] sm:$0xff] %vm272_vm0, %v1279_v4  ;;  %v1211_v7 = vld [vmem:[%s1341_s26 + $0x84] ss:$8 sps:$4 sm:$0xff]   ;;  %1133 = vmatprep.mubr.msk.bf16.mxu0 %vm585_vm1, %v1208_v6  ;;  %v1209_v14 = vld [vmem:[%s1341_s26 + $0x80] ss:$8 sps:$4 sm:$0xff]  }
  0x13   : > { %295 = vst.msk [vmem:[#allocation2 + $0xb0] sm:$0xff] %vm272_vm0, %v1279_v4  ;;  %296 = vst.msk [vmem:[#allocation2 + $0xb8] sm:$0xff] %vm272_vm0, %v1279_v4  ;;  %1141 = vmatprep.mubr.msk.bf16.mxu1 %vm585_vm1, %v1211_v7  ;;  %v1212_v15 = vld [vmem:[%s1341_s26 + $0x14] ss:$8 sps:$4 sm:$0xff]   ;;  %v1216_v17 = vld [vmem:[%s1341_s26 + $0x10] ss:$8 sps:$4 sm:$0xff]  }
  0x14   : > { %297 = vst.msk [vmem:[#allocation2 + $0xc0] sm:$0xff] %vm272_vm0, %v1279_v4  ;;  %298 = vst.msk [vmem:[#allocation2 + $0xc8] sm:$0xff] %vm272_vm0, %v1279_v4  ;;  %641 = vmatpush1.bf16.msra.mxu0 %v1200_v5  ;;  %1165 = vmatpush1.bf16.msra.mxu1 %v1200_v5  ;;  %v1214_v16 = vld [vmem:[%s1341_s26 + $0x94] ss:$8 sps:$4 sm:$0xff]   ;;  %v1217_v18 = vld [vmem:[%s1341_s26 + $0x90] ss:$8 sps:$4 sm:$0xff]  }
  0x15   : > { %299 = vst.msk [vmem:[#allocation2 + $0xd0] sm:$0xff] %vm272_vm0, %v1279_v4  ;;  %300 = vst.msk [vmem:[#allocation2 + $0xd8] sm:$0xff] %vm272_vm0, %v1279_v4  ;;  %642 = vmatprep.subr.bf16.mxu0 %v1278_v1  ;;  %1157 = vmatprep.subr.bf16.mxu1 %v1278_v1  ;;  %v1218_v19 = vld [vmem:[%s1341_s26 + $0x24] ss:$8 sps:$4 sm:$0xff]   ;;  %v1222_v21 = vld [vmem:[%s1341_s26 + $0x20] ss:$8 sps:$4 sm:$0xff]  }
  0x16   : > { %301 = vst.msk [vmem:[#allocation2 + $0xe0] sm:$0xff] %vm272_vm0, %v1279_v4  ;;  %302 = vst.msk [vmem:[#allocation2 + $0xe8] sm:$0xff] %vm272_vm0, %v1279_v4  ;;  %v1220_v20 = vld [vmem:[%s1341_s26 + $0xa4] ss:$8 sps:$4 sm:$0xff]   ;;  %v1223_v22 = vld [vmem:[%s1341_s26 + $0xa0] ss:$8 sps:$4 sm:$0xff]  }
  0x17   : > { %303 = vst.msk [vmem:[#allocation2 + $0xf0] sm:$0xff] %vm272_vm0, %v1279_v4  ;;  %304 = vst.msk [vmem:[#allocation2 + $0xf8] sm:$0xff] %vm272_vm0, %v1279_v4  ;;  %v1224_v23 = vld [vmem:[%s1341_s26 + $0x34] ss:$8 sps:$4 sm:$0xff]   ;;  %v1228_v25 = vld [vmem:[%s1341_s26 + $0x30] ss:$8 sps:$4 sm:$0xff]  }
  0x18   : > { %643 = vmatpush1.bf16.msra.mxu0 %v1201_v8  ;;  %1166 = vmatpush1.bf16.msra.mxu1 %v1201_v8  ;;  %v1226_v24 = vld [vmem:[%s1341_s26 + $0xb4] ss:$8 sps:$4 sm:$0xff]   ;;  %v1229_v26 = vld [vmem:[%s1341_s26 + $0xb0] ss:$8 sps:$4 sm:$0xff]   ;;  %v1230_v27 = vld [vmem:[%s1341_s26 + $0x44] ss:$8 sps:$4 sm:$0xff]  }
  0x19   : > { %644 = vmatprep.subr.bf16.mxu0 %v1278_v1  ;;  %1158 = vmatprep.subr.bf16.mxu1 %v1278_v1  ;;  %v1232_v28 = vld [vmem:[%s1341_s26 + $0xc4] ss:$8 sps:$4 sm:$0xff]   ;;  %v1234_v29 = vld [vmem:[%s1341_s26 + $0x40] ss:$8 sps:$4 sm:$0xff]   ;;  %v1236_v31 = vld [vmem:[%s1341_s26 + $0x54] ss:$8 sps:$4 sm:$0xff]  }
  0x1a   : > { %v1235_v30 = vld [vmem:[%s1341_s26 + $0xc0] ss:$8 sps:$4 sm:$0xff]   ;;  %v1238_v32 = vld [vmem:[%s1341_s26 + $0xd4] ss:$8 sps:$4 sm:$0xff]   ;;  %v1240_v33 = vld [vmem:[%s1341_s26 + $0x50] ss:$8 sps:$4 sm:$0xff]  }
  0x1b   : > { %v1241_v34 = vld [vmem:[%s1341_s26 + $0xd0] ss:$8 sps:$4 sm:$0xff]   ;;  %v1242_v35 = vld [vmem:[%s1341_s26 + $0x64] ss:$8 sps:$4 sm:$0xff]   ;;  %v1246_v37 = vld [vmem:[%s1341_s26 + $0x60] ss:$8 sps:$4 sm:$0xff]  }
  0x1c   : > { %645 = vmatpush1.bf16.msra.mxu0 %v1202_v9  ;;  %1167 = vmatpush1.bf16.msra.mxu1 %v1202_v9  ;;  %v1244_v36 = vld [vmem:[%s1341_s26 + $0xe4] ss:$8 sps:$4 sm:$0xff]   ;;  %v1247_v38 = vld [vmem:[%s1341_s26 + $0xe0] ss:$8 sps:$4 sm:$0xff]   ;;  %v1248_v39 = vld [vmem:[%s1341_s26 + $0x74] ss:$8 sps:$4 sm:$0xff]  }
  0x1d   : > { %646 = vmatprep.subr.bf16.mxu0 %v1278_v1  ;;  %1159 = vmatprep.subr.bf16.mxu1 %v1278_v1  ;;  %v1250_v40 = vld [vmem:[%s1341_s26 + $0xf4] ss:$8 sps:$4 sm:$0xff]   ;;  %v1252_v41 = vld [vmem:[%s1341_s26 + $0x70] ss:$8 sps:$4 sm:$0xff]   ;;  %v321_v44 = vld [vmem:[#allocation2 + $0x80] sm:$0xff] }
  0x1e   : > { %v1253_v42 = vld [vmem:[%s1341_s26 + $0xf0] ss:$8 sps:$4 sm:$0xff]   ;;  %v322_v48 = vld [vmem:[#allocation2 + $0x88] sm:$0xff] }
  0x1f   : > { %v323_v60 = vld [vmem:[#allocation2 + $0x90] sm:$0xff] }
  0x20   : > { %647 = vmatpush1.bf16.msra.mxu0 %v1203_v10  ;;  %1168 = vmatpush1.bf16.msra.mxu1 %v1203_v10 }
  0x21   : > { %648 = vmatprep.subr.bf16.mxu0 %v1278_v1  ;;  %1160 = vmatprep.subr.bf16.mxu1 %v1278_v1 }
  0x24   : > { %649 = vmatpush1.bf16.msra.mxu0 %v1204_v11  ;;  %1169 = vmatpush1.bf16.msra.mxu1 %v1204_v11 }
  0x25   : > { %650 = vmatprep.subr.bf16.mxu0 %v1278_v1  ;;  %1161 = vmatprep.subr.bf16.mxu1 %v1278_v1  ;;  %v324_v1 = vld [vmem:[#allocation2 + $0x98] sm:$0xff] }
  0x28   : > { %651 = vmatpush1.bf16.msra.mxu0 %v1205_v12  ;;  %1170 = vmatpush1.bf16.msra.mxu1 %v1205_v12 }
  0x2b   : > { %667 = vmatmul.mubr.bf16.vlgmr.msra.gmra.mrb[0].mxu0 %v1206_v13  ;;  %731 = vmatmul.mubr.bf16.vlgmr.msra.gmra.mrb[0].mxu1 %v1209_v14 }
  0x2c   : > { %1134 = vmatprep.mubr.msk.bf16.mxu0 %vm585_vm1, %v1212_v15  ;;  %1142 = vmatprep.mubr.msk.bf16.mxu1 %vm585_vm1, %v1214_v16 }
  0x33   : > { %675 = vmatmul.mubr.bf16.gmra.mrb[4].mxu0 %v1216_v17  ;;  %739 = vmatmul.mubr.bf16.gmra.mrb[4].mxu1 %v1217_v18 }
  0x34   : > { %1135 = vmatprep.mubr.msk.bf16.mxu0 %vm585_vm1, %v1218_v19  ;;  %1143 = vmatprep.mubr.msk.bf16.mxu1 %vm585_vm1, %v1220_v20  ;;  %v309_v20 = vld [vmem:[#allocation2 + $0x20] sm:$0xff] }
  0x3b   : > { %683 = vmatmul.mubr.bf16.gmra.mrb[8].mxu0 %v1222_v21  ;;  %747 = vmatmul.mubr.bf16.gmra.mrb[8].mxu1 %v1223_v22  ;;  %v325_v21 = vld [vmem:[#allocation2 + $0xa0] sm:$0xff] }
  0x3c   : > { %1136 = vmatprep.mubr.msk.bf16.mxu0 %vm585_vm1, %v1224_v23  ;;  %1144 = vmatprep.mubr.msk.bf16.mxu1 %vm585_vm1, %v1226_v24  ;;  %v310_v24 = vld [vmem:[#allocation2 + $0x28] sm:$0xff] }
  0x43   : > { %691 = vmatmul.mubr.bf16.gmra.mrb[12].mxu0 %v1228_v25  ;;  %755 = vmatmul.mubr.bf16.gmra.mrb[12].mxu1 %v1229_v26  ;;  %v326_v25 = vld [vmem:[#allocation2 + $0xa8] sm:$0xff] }
  0x44   : > { %1137 = vmatprep.mubr.msk.bf16.mxu0 %vm585_vm1, %v1230_v27  ;;  %1145 = vmatprep.mubr.msk.bf16.mxu1 %vm585_vm1, %v1232_v28 }
  0x4b   : > { %699 = vmatmul.mubr.bf16.gmra.mrb[16].mxu0 %v1234_v29  ;;  %763 = vmatmul.mubr.bf16.gmra.mrb[16].mxu1 %v1235_v30 }
  0x4c   : > { %1138 = vmatprep.mubr.msk.bf16.mxu0 %vm585_vm1, %v1236_v31  ;;  %1146 = vmatprep.mubr.msk.bf16.mxu1 %vm585_vm1, %v1238_v32 }
  0x53   : > { %707 = vmatmul.mubr.bf16.gmra.mrb[20].mxu0 %v1240_v33  ;;  %771 = vmatmul.mubr.bf16.gmra.mrb[20].mxu1 %v1241_v34 }
  0x54   : > { %1139 = vmatprep.mubr.msk.bf16.mxu0 %vm585_vm1, %v1242_v35  ;;  %1147 = vmatprep.mubr.msk.bf16.mxu1 %vm585_vm1, %v1244_v36 }
  0x5b   : > { %715 = vmatmul.mubr.bf16.gmra.mrb[24].mxu0 %v1246_v37  ;;  %779 = vmatmul.mubr.bf16.gmra.mrb[24].mxu1 %v1247_v38 }
  0x5c   : > { %1140 = vmatprep.mubr.msk.bf16.mxu0 %vm585_vm1, %v1248_v39  ;;  %1148 = vmatprep.mubr.msk.bf16.mxu1 %vm585_vm1, %v1250_v40 }
  0x63   : > { %723 = vmatmul.mubr.bf16.gmra.mrb[28].mxu0 %v1252_v41  ;;  %787 = vmatmul.mubr.bf16.gmra.mrb[28].mxu1 %v1253_v42 }
  0xfe   : > { %v668_v45 = vpop.f32.mrb[0].mxu0  ;;  %v732_v46 = vpop.f32.mrb[0].mxu1 }
  0xff   : > { %v795_v49 = vadd.f32 %v668_v45, %v305_v43  ;;  %v811_v50 = vadd.f32 %v732_v46, %v321_v44  ;;  %v670_v51 = vpop.f32.mrb[1].mxu0  ;;  %v734_v52 = vpop.f32.mrb[1].mxu1  ;;  %v311_v44 = vld [vmem:[#allocation2 + $0x30] sm:$0xff] }
 0x100   : > { %v671_v53 = vpop.f32.mrb[2].mxu0  ;;  %v735_v54 = vpop.f32.mrb[2].mxu1  ;;  %v327_v45 = vld [vmem:[#allocation2 + $0xb0] sm:$0xff] }
 0x101   : > { %828 = vst.msk [vmem:[#allocation2] sm:$0xff] %vm272_vm0, %v795_v49  ;;  %844 = vst.msk [vmem:[#allocation2 + $0x80] sm:$0xff] %vm272_vm0, %v811_v50  ;;  %v796_v55 = vadd.f32 %v671_v53, %v306_v47  ;;  %v812_v56 = vadd.f32 %v735_v54, %v322_v48  ;;  %v673_v57 = vpop.f32.mrb[3].mxu0  ;;  %v737_v58 = vpop.f32.mrb[3].mxu1  ;;  %v312_v48 = vld [vmem:[#allocation2 + $0x38] sm:$0xff] }
 0x102   : > { %v328_v49 = vld [vmem:[#allocation2 + $0xb8] sm:$0xff] }
 0x103   : > { %829 = vst.msk [vmem:[#allocation2 + $0x8] sm:$0xff] %vm272_vm0, %v796_v55  ;;  %845 = vst.msk [vmem:[#allocation2 + $0x88] sm:$0xff] %vm272_vm0, %v812_v56 }
 0x106   : > { %v676_v62 = vpop.f32.mrb[4].mxu0  ;;  %v740_v63 = vpop.f32.mrb[4].mxu1 }
 0x107   : > { %v797_v2 = vadd.f32 %v676_v62, %v307_v59  ;;  %v813_v3 = vadd.f32 %v740_v63, %v323_v60  ;;  %v678_v4 = vpop.f32.mrb[5].mxu0  ;;  %v742_v5 = vpop.f32.mrb[5].mxu1 }
 0x108   : > { %v863_v6 = vld [vmem:[#allocation2] sm:$0xff]  ;;  %v679_v8 = vpop.f32.mrb[6].mxu0  ;;  %v743_v9 = vpop.f32.mrb[6].mxu1 }
 0x109   : > { %v879_v7 = vld [vmem:[#allocation2 + $0x80] sm:$0xff]  ;;  %v902_v10 = vadd.f32 %v1460_v61, %v863_v6  ;;  %830 = vst.msk [vmem:[#allocation2 + $0x10] sm:$0xff] %vm272_vm0, %v797_v2  ;;  %846 = vst.msk [vmem:[#allocation2 + $0x90] sm:$0xff] %vm272_vm0, %v813_v3  ;;  %v798_v12 = vadd.f32 %v679_v8, %v308_v0  ;;  %v814_v13 = vadd.f32 %v743_v9, %v324_v1  ;;  %v681_v14 = vpop.f32.mrb[7].mxu0  ;;  %v745_v15 = vpop.f32.mrb[7].mxu1  ;;  %v314_v9 = vld [vmem:[#allocation2 + $0x48] sm:$0xff] }
 0x10a   : > { %v918_v11 = vadd.f32 %v1460_v61, %v879_v7  ;;  %v864_v16 = vld [vmem:[#allocation2 + $0x8] sm:$0xff]  ;;  %v313_v5 = vld [vmem:[#allocation2 + $0x40] sm:$0xff] }
 0x10b   : > { %v880_v17 = vld [vmem:[#allocation2 + $0x88] sm:$0xff]  ;;  %934 = vst.msk [vmem:[%s1467_s20] sm:$0xff] %vm272_vm0, %v902_v10  ;;  %v903_v18 = vadd.f32 %v1460_v61, %v864_v16  ;;  %831 = vst.msk [vmem:[#allocation2 + $0x18] sm:$0xff] %vm272_vm0, %v798_v12  ;;  %v329_v6 = vld [vmem:[#allocation2 + $0xc0] sm:$0xff] }
 0x10c   : > { %950 = vst.msk [vmem:[%s1467_s20 + $0x80] sm:$0xff] %vm272_vm0, %v918_v11  ;;  %v919_v19 = vadd.f32 %v1460_v61, %v880_v17  ;;  %847 = vst.msk [vmem:[#allocation2 + $0x98] sm:$0xff] %vm272_vm0, %v814_v13  ;;  %v330_v10 = vld [vmem:[#allocation2 + $0xc8] sm:$0xff] }
 0x10d   : > { %935 = vst.msk [vmem:[%s1467_s20 + $0x8] sm:$0xff] %vm272_vm0, %v903_v18 }
 0x10e   : > { %951 = vst.msk [vmem:[%s1467_s20 + $0x88] sm:$0xff] %vm272_vm0, %v919_v19  ;;  %v684_v22 = vpop.f32.mrb[8].mxu0  ;;  %v748_v23 = vpop.f32.mrb[8].mxu1 }
 0x10f   : > { %v799_v26 = vadd.f32 %v684_v22, %v309_v20  ;;  %v815_v27 = vadd.f32 %v748_v23, %v325_v21  ;;  %v686_v28 = vpop.f32.mrb[9].mxu0  ;;  %v750_v29 = vpop.f32.mrb[9].mxu1 }
 0x110   : > { %v865_v30 = vld [vmem:[#allocation2 + $0x10] sm:$0xff]  ;;  %v687_v32 = vpop.f32.mrb[10].mxu0  ;;  %v751_v33 = vpop.f32.mrb[10].mxu1 }
 0x111   : > { %v881_v31 = vld [vmem:[#allocation2 + $0x90] sm:$0xff]  ;;  %v904_v34 = vadd.f32 %v1460_v61, %v865_v30  ;;  %832 = vst.msk [vmem:[#allocation2 + $0x20] sm:$0xff] %vm272_vm0, %v799_v26  ;;  %848 = vst.msk [vmem:[#allocation2 + $0xa0] sm:$0xff] %vm272_vm0, %v815_v27  ;;  %v800_v36 = vadd.f32 %v687_v32, %v310_v24  ;;  %v816_v37 = vadd.f32 %v751_v33, %v326_v25  ;;  %v689_v38 = vpop.f32.mrb[11].mxu0  ;;  %v753_v39 = vpop.f32.mrb[11].mxu1  ;;  %v316_v33 = vld [vmem:[#allocation2 + $0x58] sm:$0xff] }
 0x112   : > { %v920_v35 = vadd.f32 %v1460_v61, %v881_v31  ;;  %v866_v40 = vld [vmem:[#allocation2 + $0x18] sm:$0xff]  ;;  %v315_v29 = vld [vmem:[#allocation2 + $0x50] sm:$0xff] }
 0x113   : > { %v882_v41 = vld [vmem:[#allocation2 + $0x98] sm:$0xff]  ;;  %936 = vst.msk [vmem:[%s1467_s20 + $0x10] sm:$0xff] %vm272_vm0, %v904_v34  ;;  %v905_v42 = vadd.f32 %v1460_v61, %v866_v40  ;;  %833 = vst.msk [vmem:[#allocation2 + $0x28] sm:$0xff] %vm272_vm0, %v800_v36  ;;  %v331_v30 = vld [vmem:[#allocation2 + $0xd0] sm:$0xff] }
 0x114   : > { %952 = vst.msk [vmem:[%s1467_s20 + $0x90] sm:$0xff] %vm272_vm0, %v920_v35  ;;  %v921_v43 = vadd.f32 %v1460_v61, %v882_v41  ;;  %849 = vst.msk [vmem:[#allocation2 + $0xa8] sm:$0xff] %vm272_vm0, %v816_v37  ;;  %v332_v34 = vld [vmem:[#allocation2 + $0xd8] sm:$0xff] }
 0x115   : > { %937 = vst.msk [vmem:[%s1467_s20 + $0x18] sm:$0xff] %vm272_vm0, %v905_v42 }
 0x116   : > { %953 = vst.msk [vmem:[%s1467_s20 + $0x98] sm:$0xff] %vm272_vm0, %v921_v43  ;;  %v692_v46 = vpop.f32.mrb[12].mxu0  ;;  %v756_v47 = vpop.f32.mrb[12].mxu1 }
 0x117   : > { %v801_v50 = vadd.f32 %v692_v46, %v311_v44  ;;  %v817_v51 = vadd.f32 %v756_v47, %v327_v45  ;;  %v694_v52 = vpop.f32.mrb[13].mxu0  ;;  %v758_v53 = vpop.f32.mrb[13].mxu1 }
 0x118   : > { %v867_v54 = vld [vmem:[#allocation2 + $0x20] sm:$0xff]  ;;  %v695_v56 = vpop.f32.mrb[14].mxu0  ;;  %v759_v57 = vpop.f32.mrb[14].mxu1 }
 0x119   : > { %v883_v55 = vld [vmem:[#allocation2 + $0xa0] sm:$0xff]  ;;  %v906_v58 = vadd.f32 %v1460_v61, %v867_v54  ;;  %834 = vst.msk [vmem:[#allocation2 + $0x30] sm:$0xff] %vm272_vm0, %v801_v50  ;;  %850 = vst.msk [vmem:[#allocation2 + $0xb0] sm:$0xff] %vm272_vm0, %v817_v51  ;;  %v802_v60 = vadd.f32 %v695_v56, %v312_v48  ;;  %v818_v62 = vadd.f32 %v759_v57, %v328_v49  ;;  %v697_v63 = vpop.f32.mrb[15].mxu0  ;;  %v761_v0 = vpop.f32.mrb[15].mxu1  ;;  %v318_v57 = vld [vmem:[#allocation2 + $0x68] sm:$0xff] }
 0x11a   : > { %v922_v59 = vadd.f32 %v1460_v61, %v883_v55  ;;  %v868_v1 = vld [vmem:[#allocation2 + $0x28] sm:$0xff]  ;;  %v317_v53 = vld [vmem:[#allocation2 + $0x60] sm:$0xff] }
 0x11b   : > { %v884_v2 = vld [vmem:[#allocation2 + $0xa8] sm:$0xff]  ;;  %938 = vst.msk [vmem:[%s1467_s20 + $0x20] sm:$0xff] %vm272_vm0, %v906_v58  ;;  %v907_v3 = vadd.f32 %v1460_v61, %v868_v1  ;;  %835 = vst.msk [vmem:[#allocation2 + $0x38] sm:$0xff] %vm272_vm0, %v802_v60  ;;  %v333_v54 = vld [vmem:[#allocation2 + $0xe0] sm:$0xff] }
 0x11c   : > { %954 = vst.msk [vmem:[%s1467_s20 + $0xa0] sm:$0xff] %vm272_vm0, %v922_v59  ;;  %v923_v4 = vadd.f32 %v1460_v61, %v884_v2  ;;  %851 = vst.msk [vmem:[#allocation2 + $0xb8] sm:$0xff] %vm272_vm0, %v818_v62  ;;  %v334_v58 = vld [vmem:[#allocation2 + $0xe8] sm:$0xff] }
 0x11d   : > { %939 = vst.msk [vmem:[%s1467_s20 + $0x28] sm:$0xff] %vm272_vm0, %v907_v3 }
 0x11e   : > { %955 = vst.msk [vmem:[%s1467_s20 + $0xa8] sm:$0xff] %vm272_vm0, %v923_v4  ;;  %v700_v7 = vpop.f32.mrb[16].mxu0  ;;  %v764_v8 = vpop.f32.mrb[16].mxu1 }
 0x11f   : > { %v803_v11 = vadd.f32 %v700_v7, %v313_v5  ;;  %v819_v12 = vadd.f32 %v764_v8, %v329_v6  ;;  %v702_v13 = vpop.f32.mrb[17].mxu0  ;;  %v766_v14 = vpop.f32.mrb[17].mxu1 }
 0x120   : > { %v869_v15 = vld [vmem:[#allocation2 + $0x30] sm:$0xff]  ;;  %v703_v17 = vpop.f32.mrb[18].mxu0  ;;  %v767_v18 = vpop.f32.mrb[18].mxu1 }
 0x121   : > { %v885_v16 = vld [vmem:[#allocation2 + $0xb0] sm:$0xff]  ;;  %v908_v19 = vadd.f32 %v1460_v61, %v869_v15  ;;  %836 = vst.msk [vmem:[#allocation2 + $0x40] sm:$0xff] %vm272_vm0, %v803_v11  ;;  %852 = vst.msk [vmem:[#allocation2 + $0xc0] sm:$0xff] %vm272_vm0, %v819_v12  ;;  %v804_v21 = vadd.f32 %v703_v17, %v314_v9  ;;  %v820_v22 = vadd.f32 %v767_v18, %v330_v10  ;;  %v705_v23 = vpop.f32.mrb[19].mxu0  ;;  %v769_v24 = vpop.f32.mrb[19].mxu1  ;;  %v320_v18 = vld [vmem:[#allocation2 + $0x78] sm:$0xff] }
 0x122   : > { %v924_v20 = vadd.f32 %v1460_v61, %v885_v16  ;;  %v870_v25 = vld [vmem:[#allocation2 + $0x38] sm:$0xff]  ;;  %v319_v14 = vld [vmem:[#allocation2 + $0x70] sm:$0xff] }
 0x123   : > { %v886_v26 = vld [vmem:[#allocation2 + $0xb8] sm:$0xff]  ;;  %940 = vst.msk [vmem:[%s1467_s20 + $0x30] sm:$0xff] %vm272_vm0, %v908_v19  ;;  %v909_v27 = vadd.f32 %v1460_v61, %v870_v25  ;;  %837 = vst.msk [vmem:[#allocation2 + $0x48] sm:$0xff] %vm272_vm0, %v804_v21  ;;  %v335_v15 = vld [vmem:[#allocation2 + $0xf0] sm:$0xff] }
 0x124   : > { %956 = vst.msk [vmem:[%s1467_s20 + $0xb0] sm:$0xff] %vm272_vm0, %v924_v20  ;;  %v925_v28 = vadd.f32 %v1460_v61, %v886_v26  ;;  %853 = vst.msk [vmem:[#allocation2 + $0xc8] sm:$0xff] %vm272_vm0, %v820_v22  ;;  %v336_v19 = vld [vmem:[#allocation2 + $0xf8] sm:$0xff] }
 0x125   : > { %941 = vst.msk [vmem:[%s1467_s20 + $0x38] sm:$0xff] %vm272_vm0, %v909_v27 }
 0x126   : > { %957 = vst.msk [vmem:[%s1467_s20 + $0xb8] sm:$0xff] %vm272_vm0, %v925_v28  ;;  %v708_v31 = vpop.f32.mrb[20].mxu0  ;;  %v772_v32 = vpop.f32.mrb[20].mxu1 }
 0x127   : > { %v805_v35 = vadd.f32 %v708_v31, %v315_v29  ;;  %v821_v36 = vadd.f32 %v772_v32, %v331_v30  ;;  %v710_v37 = vpop.f32.mrb[21].mxu0  ;;  %v774_v38 = vpop.f32.mrb[21].mxu1 }
 0x128   : > { %v871_v39 = vld [vmem:[#allocation2 + $0x40] sm:$0xff]  ;;  %v711_v41 = vpop.f32.mrb[22].mxu0  ;;  %v775_v42 = vpop.f32.mrb[22].mxu1 }
 0x129   : > { %v887_v40 = vld [vmem:[#allocation2 + $0xc0] sm:$0xff]  ;;  %v910_v43 = vadd.f32 %v1460_v61, %v871_v39  ;;  %838 = vst.msk [vmem:[#allocation2 + $0x50] sm:$0xff] %vm272_vm0, %v805_v35  ;;  %854 = vst.msk [vmem:[#allocation2 + $0xd0] sm:$0xff] %vm272_vm0, %v821_v36  ;;  %v806_v45 = vadd.f32 %v711_v41, %v316_v33  ;;  %v822_v46 = vadd.f32 %v775_v42, %v332_v34  ;;  %v713_v47 = vpop.f32.mrb[23].mxu0  ;;  %v777_v48 = vpop.f32.mrb[23].mxu1 }
 0x12a   : > { %v926_v44 = vadd.f32 %v1460_v61, %v887_v40  ;;  %v872_v49 = vld [vmem:[#allocation2 + $0x48] sm:$0xff] }
 0x12b   : > { %v888_v50 = vld [vmem:[#allocation2 + $0xc8] sm:$0xff]  ;;  %942 = vst.msk [vmem:[%s1467_s20 + $0x40] sm:$0xff] %vm272_vm0, %v910_v43  ;;  %v911_v51 = vadd.f32 %v1460_v61, %v872_v49  ;;  %839 = vst.msk [vmem:[#allocation2 + $0x58] sm:$0xff] %vm272_vm0, %v806_v45 }
 0x12c   : > { %958 = vst.msk [vmem:[%s1467_s20 + $0xc0] sm:$0xff] %vm272_vm0, %v926_v44  ;;  %v927_v52 = vadd.f32 %v1460_v61, %v888_v50  ;;  %855 = vst.msk [vmem:[#allocation2 + $0xd8] sm:$0xff] %vm272_vm0, %v822_v46 }
 0x12d   : > { %943 = vst.msk [vmem:[%s1467_s20 + $0x48] sm:$0xff] %vm272_vm0, %v911_v51 }
 0x12e   : > { %959 = vst.msk [vmem:[%s1467_s20 + $0xc8] sm:$0xff] %vm272_vm0, %v927_v52  ;;  %v716_v55 = vpop.f32.mrb[24].mxu0  ;;  %v780_v56 = vpop.f32.mrb[24].mxu1 }
 0x12f   : > { %v807_v59 = vadd.f32 %v716_v55, %v317_v53  ;;  %v823_v60 = vadd.f32 %v780_v56, %v333_v54  ;;  %v718_v62 = vpop.f32.mrb[25].mxu0  ;;  %v782_v63 = vpop.f32.mrb[25].mxu1 }
 0x130   : > { %v873_v0 = vld [vmem:[#allocation2 + $0x50] sm:$0xff]  ;;  %v719_v2 = vpop.f32.mrb[26].mxu0  ;;  %v783_v3 = vpop.f32.mrb[26].mxu1 }
 0x131   : > { %v889_v1 = vld [vmem:[#allocation2 + $0xd0] sm:$0xff]  ;;  %v912_v4 = vadd.f32 %v1460_v61, %v873_v0  ;;  %840 = vst.msk [vmem:[#allocation2 + $0x60] sm:$0xff] %vm272_vm0, %v807_v59  ;;  %856 = vst.msk [vmem:[#allocation2 + $0xe0] sm:$0xff] %vm272_vm0, %v823_v60  ;;  %v808_v6 = vadd.f32 %v719_v2, %v318_v57  ;;  %v824_v7 = vadd.f32 %v783_v3, %v334_v58  ;;  %v721_v8 = vpop.f32.mrb[27].mxu0  ;;  %v785_v9 = vpop.f32.mrb[27].mxu1 }
 0x132   : > { %v928_v5 = vadd.f32 %v1460_v61, %v889_v1  ;;  %v874_v10 = vld [vmem:[#allocation2 + $0x58] sm:$0xff] }
 0x133   : > { %v890_v11 = vld [vmem:[#allocation2 + $0xd8] sm:$0xff]  ;;  %944 = vst.msk [vmem:[%s1467_s20 + $0x50] sm:$0xff] %vm272_vm0, %v912_v4  ;;  %v913_v12 = vadd.f32 %v1460_v61, %v874_v10  ;;  %841 = vst.msk [vmem:[#allocation2 + $0x68] sm:$0xff] %vm272_vm0, %v808_v6 }
 0x134   : > { %960 = vst.msk [vmem:[%s1467_s20 + $0xd0] sm:$0xff] %vm272_vm0, %v928_v5  ;;  %v929_v13 = vadd.f32 %v1460_v61, %v890_v11  ;;  %857 = vst.msk [vmem:[#allocation2 + $0xe8] sm:$0xff] %vm272_vm0, %v824_v7 }
 0x135   : > { %945 = vst.msk [vmem:[%s1467_s20 + $0x58] sm:$0xff] %vm272_vm0, %v913_v12 }
 0x136   : > { %961 = vst.msk [vmem:[%s1467_s20 + $0xd8] sm:$0xff] %vm272_vm0, %v929_v13  ;;  %v724_v16 = vpop.f32.mrb[28].mxu0  ;;  %v788_v17 = vpop.f32.mrb[28].mxu1 }
 0x137   : > { %v809_v20 = vadd.f32 %v724_v16, %v319_v14  ;;  %v825_v21 = vadd.f32 %v788_v17, %v335_v15  ;;  %v726_v22 = vpop.f32.mrb[29].mxu0  ;;  %v790_v23 = vpop.f32.mrb[29].mxu1 }
 0x138   : > { %v875_v24 = vld [vmem:[#allocation2 + $0x60] sm:$0xff]  ;;  %v727_v26 = vpop.f32.mrb[30].mxu0  ;;  %v791_v27 = vpop.f32.mrb[30].mxu1 }
 0x139   : > { %v891_v25 = vld [vmem:[#allocation2 + $0xe0] sm:$0xff]  ;;  %v914_v28 = vadd.f32 %v1460_v61, %v875_v24  ;;  %842 = vst.msk [vmem:[#allocation2 + $0x70] sm:$0xff] %vm272_vm0, %v809_v20  ;;  %858 = vst.msk [vmem:[#allocation2 + $0xf0] sm:$0xff] %vm272_vm0, %v825_v21  ;;  %v810_v30 = vadd.f32 %v727_v26, %v320_v18  ;;  %v826_v31 = vadd.f32 %v791_v27, %v336_v19  ;;  %v729_v32 = vpop.f32.mrb[31].mxu0  ;;  %v793_v33 = vpop.f32.mrb[31].mxu1 }
 0x13a   : > { %v930_v29 = vadd.f32 %v1460_v61, %v891_v25  ;;  %v876_v34 = vld [vmem:[#allocation2 + $0x68] sm:$0xff] }
 0x13b   : > { %v892_v35 = vld [vmem:[#allocation2 + $0xe8] sm:$0xff]  ;;  %946 = vst.msk [vmem:[%s1467_s20 + $0x60] sm:$0xff] %vm272_vm0, %v914_v28  ;;  %v915_v36 = vadd.f32 %v1460_v61, %v876_v34  ;;  %843 = vst.msk [vmem:[#allocation2 + $0x78] sm:$0xff] %vm272_vm0, %v810_v30 }
 0x13c   : > { %962 = vst.msk [vmem:[%s1467_s20 + $0xe0] sm:$0xff] %vm272_vm0, %v930_v29  ;;  %v931_v37 = vadd.f32 %v1460_v61, %v892_v35  ;;  %859 = vst.msk [vmem:[#allocation2 + $0xf8] sm:$0xff] %vm272_vm0, %v826_v31 }
 0x13d   : > { %947 = vst.msk [vmem:[%s1467_s20 + $0x68] sm:$0xff] %vm272_vm0, %v915_v36 }
 0x13e   : > { %963 = vst.msk [vmem:[%s1467_s20 + $0xe8] sm:$0xff] %vm272_vm0, %v931_v37 }
 0x140   : > { %v877_v38 = vld [vmem:[#allocation2 + $0x70] sm:$0xff] }
 0x141   : > { %v893_v39 = vld [vmem:[#allocation2 + $0xf0] sm:$0xff]  ;;  %v916_v40 = vadd.f32 %v1460_v61, %v877_v38 }
 0x142   : > { %v932_v41 = vadd.f32 %v1460_v61, %v893_v39  ;;  %v878_v42 = vld [vmem:[#allocation2 + $0x78] sm:$0xff] }
 0x143   : > { %v894_v43 = vld [vmem:[#allocation2 + $0xf8] sm:$0xff]  ;;  %948 = vst.msk [vmem:[%s1467_s20 + $0x70] sm:$0xff] %vm272_vm0, %v916_v40  ;;  %v917_v44 = vadd.f32 %v1460_v61, %v878_v42 }
 0x144   : > { %964 = vst.msk [vmem:[%s1467_s20 + $0xf0] sm:$0xff] %vm272_vm0, %v932_v41  ;;  %v933_v45 = vadd.f32 %v1460_v61, %v894_v43 }
 0x145   : > { %949 = vst.msk [vmem:[%s1467_s20 + $0x78] sm:$0xff] %vm272_vm0, %v917_v44 }
 0x146   : > { %965 = vst.msk [vmem:[%s1467_s20 + $0xf8] sm:$0xff] %vm272_vm0, %v933_v45 }
 0x147 PF: > { %s13_s14 = sadd.s32 1, %s1276_s14   ;;  %s1606_s12 = smov %s1272_s13 }
 0x148   : > { %p10_p5 = scmp.ge.s32.totalorder %s13_s14, 4   ;;  %s1607_s13 = smov %s1609_s15 }
 0x14a   :  { %12 = sbr.rel (!%p10_p5) target bundleno = 2 (0x2), region = 76 }

</bundles_post_ra>
